<compile_context>
chip_gen: v7x
topology: tpu7x:2x2x1
jax: 0.10.0
libtpu: 0.0.40
codegen_flags: <defaults>
</compile_context>

<pallas_src>
import jax
import jax.numpy as jnp
from jax.experimental import pallas as pl
from jax.experimental.pallas import tpu as pltpu

# Toy shapes consistent with the module (feature_dim scaled down from 2048).
B, C, H, W = 2, 4, 16, 16
FEATURE_DIM = 128      # stand-in for 2048
HIDDEN = 256           # hardcoded in the module
OUT_DIM = 1
OUT_LANES = 128        # lane-dense output slab width
# TODO(synk): once BATCH_TILE >= 128 on real batches, switch the output to a
# (1, BATCH_TILE) lane-dense logit row instead of the 128-wide broadcast slab.


def _round_up(v, m):
    return ((v + m - 1) // m) * m


def _vmem_limit_bytes():
    """Generation-aware scoped-VMEM limit.

    ~100 MiB on 128-MiB parts (v5e/v6e, whose default scoped limit is only
    16/32 MiB), but physical-minus-headroom on v7x (64 MiB VMEM).
    """
    mib = 1024 * 1024
    try:
        cap = int(pltpu.get_tpu_info().vmem_capacity_bytes)
    except Exception:      # emulator / unknown chip -> conservative fallback
        cap = 64 * mib
    return int(max(16 * mib, min(cap - 8 * mib, 100 * mib)))


def _pack_head(w1, b1, w2, feature_dim, hidden, head_rows):
    """Pack the classifier-head params into one lane-dense bf16 slab.

    Rows 0..F-1: w1 (F, 256); row F: b1; row F+1: w2. bf16 storage for w1/b1/w2
    is a documented precision decision (MXU operands); b2 stays exact f32 and
    travels separately through SMEM.
    """
    head = jnp.zeros((head_rows, hidden), jnp.float32)
    head = head.at[:feature_dim, :].set(w1)
    head = head.at[feature_dim, :].set(b1)
    head = head.at[feature_dim + 1, :].set(w2)
    return head.astype(jnp.bfloat16)


def classifier_forward(x_nchw, params):
    """x_nchw: (B, C, H, W) float32 -> (B, 1) float32 logits."""
    wenc, w1, b1, w2, b2 = params
    bsz, ch, hh, ww = x_nchw.shape
    hw = hh * ww
    feature_dim, hidden = w1.shape

    # ----- tiling ------------------------------------------------------------
    batch_tile = min(128, _round_up(max(bsz, 16), 16))     # multiple of 16
    num_bt = pl.cdiv(bsz, batch_tile)
    hw_chunk = 128 if hw % 128 == 0 else hw                 # HW reduction chunk
    num_hw = hw // hw_chunk
    head_rows = _round_up(feature_dim + 2, 8)
    num_channels = ch
    inv_hw = 1.0 / float(hw)

    # ----- inputs (no extra HBM passes over x) -------------------------------
    # NCHW -> (B, C, HW) is a trailing-dim merge (free). x stays f32: the VPU
    # channel mix runs in f32 anyway and a separate bf16 cast pass would cost
    # more HBM traffic than it saves. No batch pad: grid uses cdiv and ragged
    # tile rows are discarded after the kernel.
    x = x_nchw.reshape(bsz, ch, hw)
    wenc_fc = jnp.transpose(wenc, (1, 0)).astype(jnp.float32)        # (F, C) tiny
    head = _pack_head(w1, b1, w2, feature_dim, hidden, head_rows)    # bf16 slab
    b2_smem = jnp.reshape(b2, (1,)).astype(jnp.float32)              # exact f32

    def kernel(x_ref, wenc_ref, head_ref, b2_ref, out_ref, acc_ref):
        # x_ref    : (BT, C, HW_CHUNK)      f32   input chunk (NCHW-native layout)
        # wenc_ref : (F, C)                 f32   synthetic 1x1-conv weights
        # head_ref : (HEAD_ROWS, HIDDEN)    bf16  packed [w1; b1; w2]
        # b2_ref   : (1,)                   f32   SMEM scalar (exact final bias)
        # out_ref  : (BT, OUT_LANES)        f32   logit broadcast across lanes
        # acc_ref  : (BT, F)                f32   pooled-sum accumulator scratch
        j = pl.program_id(1)

        @pl.when(j == 0)
        def _():
            acc_ref[...] = jnp.zeros_like(acc_ref)

        # ---- encoder stand-in: 1x1-conv channel mix + ReLU + global-avg-pool.
        # K = C = 4 would waste >97% of the MXU contraction depth, so the
        # channel mix is C VPU broadcast-FMAs with F on sublanes and spatial on
        # lanes (no in-kernel transpose of x, no MXU push).
        xc = x_ref[...]                                    # (BT, C, HWc) f32
        wfc = wenc_ref[...]                                # (F, C)       f32
        conv_t = xc[:, 0:1, :] * wfc[None, :, 0:1]         # (BT, F, HWc) f32
        for cidx in range(1, num_channels):
            conv_t = conv_t + xc[:, cidx:cidx + 1, :] * wfc[None, :, cidx:cidx + 1]
        conv_t = jnp.maximum(conv_t, 0.0)                  # ReLU
        acc_ref[...] += jnp.sum(conv_t, axis=-1)           # pooled partial sum

        # ---- classifier head, only on the last HW chunk --------------------
        @pl.when(j == pl.num_programs(1) - 1)
        def _():
            feats = (acc_ref[...] * inv_hw).astype(jnp.bfloat16)          # (BT, F)
            w1_t = head_ref[0:feature_dim, :]                             # (F, 256) bf16
            b1_r = head_ref[feature_dim:feature_dim + 1, :].astype(jnp.float32)
            w2_r = head_ref[feature_dim + 1:feature_dim + 2, :].astype(jnp.float32)
            # Linear(F, 256) + ReLU  (bf16 MXU operands, f32 accumulation).
            hdn = jnp.dot(feats, w1_t, preferred_element_type=jnp.float32) + b1_r
            hdn = jnp.maximum(hdn, 0.0)
            # Dropout(0.3): identity at inference time.
            # Linear(256, 1): VPU multiply + lane reduce (N=1 would be a
            # lane-sparse MXU matmul); exact f32 b2 added after the reduction.
            logit = jnp.sum(hdn * w2_r, axis=-1, keepdims=True) + b2_ref[0]
            out_ref[...] = jnp.broadcast_to(logit, out_ref.shape).astype(out_ref.dtype)

    out = pl.pallas_call(
        kernel,
        out_shape=jax.ShapeDtypeStruct((num_bt * batch_tile, OUT_LANES), jnp.float32),
        grid_spec=pltpu.PrefetchScalarGridSpec(
            num_scalar_prefetch=0,
            grid=(num_bt, num_hw),                 # reduction (HW) axis last
            in_specs=[
                pl.BlockSpec((batch_tile, num_channels, hw_chunk),
                             lambda i, j: (i, 0, j)),
                pl.BlockSpec((feature_dim, num_channels), lambda i, j: (0, 0)),
                pl.BlockSpec((head_rows, hidden), lambda i, j: (0, 0)),
                pl.BlockSpec(memory_space=pltpu.MemorySpace.SMEM),   # b2 scalar
            ],
            out_specs=pl.BlockSpec((batch_tile, OUT_LANES), lambda i, j: (i, 0)),
            scratch_shapes=[pltpu.VMEM((batch_tile, feature_dim), jnp.float32)],
        ),
        compiler_params=pltpu.CompilerParams(
            # Batch tiles are independent -> shard across TensorCores (v7x);
            # HW chunks accumulate into the scratch -> arbitrary.
            dimension_semantics=("parallel", "arbitrary"),
            vmem_limit_bytes=_vmem_limit_bytes(),
        ),
    )(x, wenc_fc, head, b2_smem)

    # Ragged batch-tile rows (>= bsz) are garbage-in/garbage-out; slice off.
    return out[:bsz, :OUT_DIM]


def init_params(key):
    k_enc, k_w1, k_b1, k_w2, k_b2 = jax.random.split(key, 5)
    # Synthetic 1x1-conv encoder weight in (C, F) layout.
    wenc = jax.random.normal(k_enc, (C, FEATURE_DIM), jnp.float32) * 0.5
    # PyTorch Linear stores weight as (out, in); we hold the transpose so the
    # kernel computes x @ W.T + b with a plain row-major matmul.
    w1 = jax.random.normal(k_w1, (FEATURE_DIM, HIDDEN), jnp.float32) * 0.1
    b1 = jax.random.normal(k_b1, (HIDDEN,), jnp.float32) * 0.1
    w2 = jax.random.normal(k_w2, (HIDDEN,), jnp.float32) * 0.1
    b2 = jax.random.normal(k_b2, (), jnp.float32) * 0.1
    return wenc, w1, b1, w2, b2


def reference_forward(x_nchw, params):
    """Pure-JAX reference of the same forward pass (head quantized like the kernel)."""
    wenc, w1, b1, w2, b2 = params
    q = lambda a: a.astype(jnp.bfloat16).astype(jnp.float32)
    bsz, ch, hh, ww = x_nchw.shape
    x = x_nchw.reshape(bsz, ch, hh * ww)                            # (B, C, HW) f32
    conv = jnp.maximum(jnp.einsum('bcs,cf->bsf', x, wenc), 0.0)     # f32 encoder
    feats = q(jnp.mean(conv, axis=1))                               # bf16-quantized feats
    hdn = jnp.maximum(feats @ q(w1) + q(b1), 0.0)
    return (hdn * q(w2)[None, :]).sum(axis=-1, keepdims=True) + b2  # exact f32 b2


if __name__ == "__main__":
    key = jax.random.PRNGKey(0)
    k_x, k_p = jax.random.split(key)
    x = jax.random.normal(k_x, (B, C, H, W), jnp.float32)
    params = init_params(k_p)

    fwd = jax.jit(classifier_forward)
    out = jax.block_until_ready(fwd(x, params))

    ref = reference_forward(x, params)
    assert out.shape == (B, OUT_DIM), out.shape
    assert jnp.allclose(out, ref, atol=2e-2, rtol=2e-2), (out, ref)

    print("KERNEL_OK")
</pallas_src>

<mosaic_0001>
module attributes {stable_mosaic.version = 11 : i64} {
  func.func @kernel(%arg0: i32, %arg1: i32, %arg2: memref<16x4x128xf32, #tpu.memory_space<vmem>>, %arg3: memref<128x4xf32, #tpu.memory_space<vmem>>, %arg4: memref<136x256xbf16, #tpu.memory_space<vmem>>, %arg5: memref<1xf32, #tpu.memory_space<smem>>, %arg6: memref<16x128xf32, #tpu.memory_space<vmem>>, %arg7: memref<16x128xf32, #tpu.memory_space<vmem>>) attributes {dimension_semantics = [#tpu.dimension_semantics<parallel>, #tpu.dimension_semantics<arbitrary>], iteration_bounds = array<i64: 1, 2>, scalar_prefetch = 0 : i64, scratch_operands = 1 : i64, tpu.core_type = #tpu.core_type<tc>, window_params = [{transform_indices = @transform_0, window_bounds = array<i64: 16, 4, 128>}, {pipeline_mode = #tpu.pipeline_mode<synchronous>, transform_indices = @transform_1, window_bounds = array<i64: 128, 4>}, {pipeline_mode = #tpu.pipeline_mode<synchronous>, transform_indices = @transform_2, window_bounds = array<i64: 136, 256>}, {transform_indices = @transform_3, window_bounds = array<i64: 1>}, {transform_indices = @transform_4, window_bounds = array<i64: 16, 128>}]} {
    %c0_i32 = arith.constant 0 : i32
    %0 = arith.cmpi eq, %arg1, %c0_i32 : i32
    %1 = arith.extui %0 : i1 to i32
    %c0_i32_0 = arith.constant 0 : i32
    %2 = arith.cmpi ne, %1, %c0_i32_0 : i32
    scf.if %2 {
      %cst_11 = arith.constant 0.000000e+00 : f32
      %41 = vector.broadcast %cst_11 : f32 to vector<16x128xf32>
      %c0_12 = arith.constant 0 : index
      %c0_13 = arith.constant 0 : index
      %42 = vector.load %arg7[%c0_12, %c0_13] : memref<16x128xf32, #tpu.memory_space<vmem>>, vector<16x128xf32>
      tpu.vector_store %arg7[%c0_12, %c0_13], %41 {strides = array<i32>} : memref<16x128xf32, #tpu.memory_space<vmem>>, vector<16x128xf32>,
    } else {
    }
    %c0 = arith.constant 0 : index
    %c0_1 = arith.constant 0 : index
    %c0_2 = arith.constant 0 : index
    %3 = vector.load %arg2[%c0, %c0_1, %c0_2] : memref<16x4x128xf32, #tpu.memory_space<vmem>>, vector<16x4x128xf32>
    %c0_3 = arith.constant 0 : index
    %c0_4 = arith.constant 0 : index
    %4 = vector.load %arg3[%c0_3, %c0_4] : memref<128x4xf32, #tpu.memory_space<vmem>>, vector<128x4xf32>
    %5 = vector.extract_strided_slice %3 {offsets = [0, 0, 0], sizes = [16, 1, 128], strides = [1, 1, 1]} : vector<16x4x128xf32> to vector<16x1x128xf32>
    %6 = vector.extract_strided_slice %4 {offsets = [0, 0], sizes = [128, 1], strides = [1, 1]} : vector<128x4xf32> to vector<128x1xf32>
    %7 = vector.shape_cast %6 : vector<128x1xf32> to vector<1x128x1xf32>
    %8 = vector.broadcast %5 : vector<16x1x128xf32> to vector<16x128x128xf32>
    %9 = vector.broadcast %7 : vector<1x128x1xf32> to vector<16x128x128xf32>
    %10 = arith.mulf %8, %9 : vector<16x128x128xf32>
    %11 = vector.extract_strided_slice %3 {offsets = [0, 1, 0], sizes = [16, 1, 128], strides = [1, 1, 1]} : vector<16x4x128xf32> to vector<16x1x128xf32>
    %12 = vector.extract_strided_slice %4 {offsets = [0, 1], sizes = [128, 1], strides = [1, 1]} : vector<128x4xf32> to vector<128x1xf32>
    %13 = vector.shape_cast %12 : vector<128x1xf32> to vector<1x128x1xf32>
    %14 = vector.broadcast %11 : vector<16x1x128xf32> to vector<16x128x128xf32>
    %15 = vector.broadcast %13 : vector<1x128x1xf32> to vector<16x128x128xf32>
    %16 = arith.mulf %14, %15 : vector<16x128x128xf32>
    %17 = arith.addf %10, %16 : vector<16x128x128xf32>
    %18 = vector.extract_strided_slice %3 {offsets = [0, 2, 0], sizes = [16, 1, 128], strides = [1, 1, 1]} : vector<16x4x128xf32> to vector<16x1x128xf32>
    %19 = vector.extract_strided_slice %4 {offsets = [0, 2], sizes = [128, 1], strides = [1, 1]} : vector<128x4xf32> to vector<128x1xf32>
    %20 = vector.shape_cast %19 : vector<128x1xf32> to vector<1x128x1xf32>
    %21 = vector.broadcast %18 : vector<16x1x128xf32> to vector<16x128x128xf32>
    %22 = vector.broadcast %20 : vector<1x128x1xf32> to vector<16x128x128xf32>
    %23 = arith.mulf %21, %22 : vector<16x128x128xf32>
    %24 = arith.addf %17, %23 : vector<16x128x128xf32>
    %25 = vector.extract_strided_slice %3 {offsets = [0, 3, 0], sizes = [16, 1, 128], strides = [1, 1, 1]} : vector<16x4x128xf32> to vector<16x1x128xf32>
    %26 = vector.extract_strided_slice %4 {offsets = [0, 3], sizes = [128, 1], strides = [1, 1]} : vector<128x4xf32> to vector<128x1xf32>
    %27 = vector.shape_cast %26 : vector<128x1xf32> to vector<1x128x1xf32>
    %28 = vector.broadcast %25 : vector<16x1x128xf32> to vector<16x128x128xf32>
    %29 = vector.broadcast %27 : vector<1x128x1xf32> to vector<16x128x128xf32>
    %30 = arith.mulf %28, %29 : vector<16x128x128xf32>
    %31 = arith.addf %24, %30 : vector<16x128x128xf32>
    %cst = arith.constant 0.000000e+00 : f32
    %32 = vector.broadcast %cst : f32 to vector<16x128x128xf32>
    %33 = arith.maximumf %31, %32 : vector<16x128x128xf32>
    %c0_5 = arith.constant 0 : index
    %c0_6 = arith.constant 0 : index
    %34 = vector.load %arg7[%c0_5, %c0_6] : memref<16x128xf32, #tpu.memory_space<vmem>>, vector<16x128xf32>
    %cst_7 = arith.constant dense<0.000000e+00> : vector<16x128xf32>
    %35 = vector.multi_reduction <add>, %33, %cst_7 [2] : vector<16x128x128xf32> to vector<16x128xf32>
    %36 = arith.addf %34, %35 : vector<16x128xf32>
    %c0_8 = arith.constant 0 : index
    %c0_9 = arith.constant 0 : index
    %37 = vector.load %arg7[%c0_8, %c0_9] : memref<16x128xf32, #tpu.memory_space<vmem>>, vector<16x128xf32>
    tpu.vector_store %arg7[%c0_8, %c0_9], %36 {strides = array<i32>} : memref<16x128xf32, #tpu.memory_space<vmem>>, vector<16x128xf32>,
    %c1_i32 = arith.constant 1 : i32
    %38 = arith.cmpi eq, %arg1, %c1_i32 : i32
    %39 = arith.extui %38 : i1 to i32
    %c0_i32_10 = arith.constant 0 : i32
    %40 = arith.cmpi ne, %39, %c0_i32_10 : i32
    scf.if %40 {
      %c0_11 = arith.constant 0 : index
      %c0_12 = arith.constant 0 : index
      %41 = vector.load %arg7[%c0_11, %c0_12] : memref<16x128xf32, #tpu.memory_space<vmem>>, vector<16x128xf32>
      %cst_13 = arith.constant 3.906250e-03 : f32
      %42 = vector.broadcast %cst_13 : f32 to vector<16x128xf32>
      %43 = arith.mulf %41, %42 : vector<16x128xf32>
      %44 = arith.truncf %43 : vector<16x128xf32> to vector<16x128xbf16>
      %c0_14 = arith.constant 0 : index
      %c0_15 = arith.constant 0 : index
      %45 = vector.load %arg4[%c0_14, %c0_15] : memref<136x256xbf16, #tpu.memory_space<vmem>>, vector<128x256xbf16>
      %c128 = arith.constant 128 : index
      %c0_16 = arith.constant 0 : index
      %46 = vector.load %arg4[%c128, %c0_16] : memref<136x256xbf16, #tpu.memory_space<vmem>>, vector<1x256xbf16>
      %47 = arith.extf %46 : vector<1x256xbf16> to vector<1x256xf32>
      %c129 = arith.constant 129 : index
      %c0_17 = arith.constant 0 : index
      %48 = vector.load %arg4[%c129, %c0_17] : memref<136x256xbf16, #tpu.memory_space<vmem>>, vector<1x256xbf16>
      %49 = arith.extf %48 : vector<1x256xbf16> to vector<1x256xf32>
      %cst_18 = arith.constant dense<0.000000e+00> : vector<16x256xf32>
      %50 = tpu.matmul %44, %45, %cst_18 {dimension_numbers = #tpu.dot_dimension_numbers<[1], [0], [0], [1], [0, 0, 1, 1], [], []>} : vector<16x128xbf16>, vector<128x256xbf16>, vector<16x256xf32> -> vector<16x256xf32>
      %51 = vector.broadcast %47 : vector<1x256xf32> to vector<16x256xf32>
      %52 = arith.addf %50, %51 : vector<16x256xf32>
      %cst_19 = arith.constant 0.000000e+00 : f32
      %53 = vector.broadcast %cst_19 : f32 to vector<16x256xf32>
      %54 = arith.maximumf %52, %53 : vector<16x256xf32>
      %55 = vector.broadcast %49 : vector<1x256xf32> to vector<16x256xf32>
      %56 = arith.mulf %54, %55 : vector<16x256xf32>
      %cst_20 = arith.constant dense<0.000000e+00> : vector<16xf32>
      %57 = vector.multi_reduction <add>, %56, %cst_20 [1] : vector<16x256xf32> to vector<16xf32>
      %58 = vector.shape_cast %57 : vector<16xf32> to vector<16x1xf32>
      %c0_21 = arith.constant 0 : index
      %59 = memref.load %arg5[%c0_21] : memref<1xf32, #tpu.memory_space<smem>>
      %60 = vector.broadcast %59 : f32 to vector<16x1xf32>
      %61 = arith.addf %58, %60 : vector<16x1xf32>
      %62 = vector.shape_cast %61 : vector<16x1xf32> to vector<16x1xf32>
      %63 = vector.broadcast %62 : vector<16x1xf32> to vector<16x128xf32>
      %c0_22 = arith.constant 0 : index
      %c0_23 = arith.constant 0 : index
      %64 = vector.load %arg6[%c0_22, %c0_23] : memref<16x128xf32, #tpu.memory_space<vmem>>, vector<16x128xf32>
      tpu.vector_store %arg6[%c0_22, %c0_23], %63 {strides = array<i32>} : memref<16x128xf32, #tpu.memory_space<vmem>>, vector<16x128xf32>,
    } else {
    }
    return
  }
  func.func @transform_0(%arg0: i32, %arg1: i32) -> (i32, i32, i32) {
    %c0_i32 = arith.constant 0 : i32
    %c0_i32_0 = arith.constant 0 : i32
    return %arg0, %c0_i32, %arg1 : i32, i32, i32
  }
  func.func @transform_1(%arg0: i32, %arg1: i32) -> (i32, i32) {
    %c0_i32 = arith.constant 0 : i32
    %c0_i32_0 = arith.constant 0 : i32
    %c0_i32_1 = arith.constant 0 : i32
    return %c0_i32, %c0_i32_0 : i32, i32
  }
  func.func @transform_2(%arg0: i32, %arg1: i32) -> (i32, i32) {
    %c0_i32 = arith.constant 0 : i32
    %c0_i32_0 = arith.constant 0 : i32
    %c0_i32_1 = arith.constant 0 : i32
    return %c0_i32, %c0_i32_0 : i32, i32
  }
  func.func @transform_3(%arg0: i32, %arg1: i32) -> i32 {
    %c0_i32 = arith.constant 0 : i32
    %c0_i32_0 = arith.constant 0 : i32
    return %c0_i32 : i32
  }
  func.func @transform_4(%arg0: i32, %arg1: i32) -> (i32, i32) {
    %c0_i32 = arith.constant 0 : i32
    %c0_i32_0 = arith.constant 0 : i32
    return %arg0, %c0_i32 : i32, i32
  }
}

</mosaic_0001>

<bundles_post_ra>
// kernel: classifier_forward.1
= control target key start
LH: loop header
LB: loop body
LE: loop exit
PB: predicated region body
PF: predicated region fallthrough
CT: control target
= control target key end

     0   :  { %s10516_s0 = inlined_call_operand.vmem [shape: f32[2,4,256], index: 0, kind: input, shape index: {}]   ;;  %s10517_s1 = inlined_call_operand.vmem [shape: f32[128,4], index: 1, kind: input, shape index: {}]   ;;  %s10518_s2 = inlined_call_operand.vmem [shape: bf16[136,256], index: 2, kind: input, shape index: {}]   ;;  %s10519_s3 = inlined_call_operand.<no memory space> [shape: f32[1], index: 3, kind: input, shape index: {}]   ;;  %s10520_s4 = inlined_call_operand.vmem [shape: f32[16,128], index: 4, kind: output, shape index: {}]  }
   0x1   :  { %9 = sst [smem:[#allocation3]] %s10519_s3 }
   0x2   :  { %s5584_s17 = smov 0   ;;  %s5586_s18 = smov 0  }
   0x3   :  { %s5588_s19 = smov 0   ;;  %s5590_s20 = smov 0  }
   0x4   :  { %s5592_s21 = smov 0  }
   0x5 LB: > { %s24_s3 = sadd.s32 1, %s5540_s20  ;;  %p43_p1 = scmp.ne.s32.totalorder %s5532_s18, %s5528_s17  ;;  %s5544_s21 = sphi %s5592_s21, %s15_s21   ;;  %s5540_s20 = sphi %s5590_s20, %s12138_s20   ;;  %s5536_s19 = sphi %s5588_s19, %s12137_s19   ;;  %s5532_s18 = sphi %s5586_s18, %s12136_s18   ;;  %s5528_s17 = sphi %s5584_s17, %s12135_s17  }
   0x6   : > { %p25_p0 = scmp.ge.s32.totalorder %s24_s3, 2  ;;  %p44_p2 = scmp.eq.s32.totalorder %s5544_s21, 0 }
   0x7   : > { %s36_s23 = sadd.s32 1, %s5532_s18  ;;  %p5344_p5 = scmp.ge.s32.totalorder %s5544_s21, 2 }
   0x8   : > { %s12140_s3 = smov (%p25_p0, %s24_s3), 0  ;;  %p45_p3 = por %p44_p2, %p43_p1 }
   0x9   : > { %s32_s22 = ssub.s32 %s5540_s20, %s12140_s3  ;;  %167 = sbr.rel (%p5344_p5) target bundleno = 33 (0x21), region = 28 }
   0xa   : > { %p34_p4 = scmp.eq.s32.totalorder %s32_s22, 0 }
   0xc   : > { %s5619_s24 = scalar_select %p34_p4, %s5532_s18, %s36_s23  }
  0x10   : > { %170 = sbr.rel (!%p45_p3) target bundleno = 33 (0x21), region = 32  ;;  %s172_s25 = sand.u32 (%p45_p3), 1, %s5532_s18  }
  0x11   : > { %s5346_s26 = sshll.u32 (%p45_p3), %s5540_s20, 2  ;;  %s5345_s27 = sshll.u32 (%p45_p3), %s172_s25, 6 }
  0x12   : > { %s182_s30 = scalar_lea.vmem (%p45_p3), %s10516_s0, %s5346_s26   ;;  %s174_s5 = scalar_lea.vmem (%p45_p3), [#allocation4], %s5345_s27  }
  0x13   : > { %s5546_s6 = smov (%p45_p3), 0  }
  0x17 LB: >> { %v201_v0 = vld [vmem:[%s182_s30] sm:$0xf]  ;;  %v203_v1 = vld [vmem:[%s182_s30 + $0x8] sm:$0xf]  ;;  %s195_s6 = sadd.s32 1, %s5548_s6   ;;  %s5548_s6 = sphi %s5546_s6, %s195_s6  }
  0x18   : >> { %202 = vst [vmem:[%s174_s5] sm:$0xf] %v201_v0  ;;  %204 = vst [vmem:[%s174_s5 + $0x4] sm:$0xf] %v203_v1  ;;  %p194_p6 = scmp.ge.s32.totalorder %s195_s6, 1 }
  0x1a   : > { %197 = sbr.rel (!%p194_p6) target bundleno = 23 (0x17), region = 135 }
  0x21 PF: > { %p5355_p7 = scmp.ge.s32.totalorder %s5544_s21, 1  ;;  %p288_p8 = scmp.lt.s32.totalorder %s5544_s21, 3 }
  0x23   : > { %p289_p9 = pnand %p5355_p7, %p288_p8 }
  0x25   : > { %292 = sbr.rel (%p289_p9) target bundleno = 1388 (0x56c), region = 80 }
  0x2c   : > { %s295_s7 = sand.u32 1, %s5528_s17   ;;  %p5357_p10 = scmp.ne.s32.totalorder %s5536_s19, 0 }
  0x2d   : > { %s5356_s8 = sshll.u32 %s295_s7, 6  ;;  %v5550_v2 = vmov (!%p5357_p10), 0.0  }
  0x2e   : > { %s5630_s9 = scalar_lea.vmem [#allocation4], %s5356_s8  ;;  %333 = sbr.rel (%p5357_p10) target bundleno = 53 (0x35), region = 88  ;;  %334 = vst [vmem:[#allocation2] sm:$0xff] (!%p5357_p10), %v5550_v2  ;;  %335 = vst [vmem:[#allocation2 + $0x8] sm:$0xff] (!%p5357_p10), %v5550_v2 }
  0x35 PF: > { %v5636_v3 = vld [vmem:[%s10517_s1 + $0x10] sm:$0xff]  ;;  %v5641_v4 = vld [vmem:[%s10517_s1] sm:$0xff]  ;;  %v5551_v5 = vmov 0   ;;  %v5648_v6 = vld [vmem:[%s10517_s1 + $0x18] sm:$0xff]  ;;  %v5552_v20 = vmov 1   ;;  %v5553_v21 = vmov 2   ;;  %v10521_v29 = vlaneseq }
  0x36   : > { %5458 = vset.pattern.permute.xlu1 %v5551_v5  ;;  %5457 = vset.pattern.permute.xlu0 %v5551_v5  ;;  %v5653_v7 = vld [vmem:[%s10517_s1 + $0x8] sm:$0xff]  ;;  %v5665_v9 = vld [vmem:[%s10517_s1 + $0x20] sm:$0xff]  ;;  %v5672_v10 = vld [vmem:[%s10517_s1 + $0x38] sm:$0xff]  ;;  %v5554_v22 = vmov 3   ;;  %vm3725_vm0 = vcmask 130112   ;;  %vm3732_vm1 = vcmask 195712  }
  0x37   : > { %444 = vperm.xlu1 %5458, %v5636_v3   ;;  %434 = vperm.xlu0 %5457, %v5641_v4   ;;  %v5660_v8 = vld [vmem:[%s10517_s1 + $0x28] sm:$0xff]  ;;  %v5677_v11 = vld [vmem:[%s10517_s1 + $0x30] sm:$0xff]  ;;  %v5689_v13 = vld [vmem:[%s10517_s1 + $0x40] sm:$0xff]  ;;  %v5764_v32 = vshrl.u32 %v10521_v29, 7  ;;  %vm3739_vm2 = vcmask 261312   ;;  %vm3746_vm3 = vcmask 326912  }
  0x38   : > { %v5684_v12 = vld [vmem:[%s10517_s1 + $0x48] sm:$0xff]  ;;  %v363_v14 = vld [vmem:[%s10517_s1 + $0x58] sm:$0xff]  ;;  %v5699_v15 = vld [vmem:[%s10517_s1 + $0x50] sm:$0xff]  ;;  %vm10882_vm4 = vcmask 392512   ;;  %vm10883_vm5 = vcmask 458112   ;;  %vm3767_vm6 = vcmask 523712  }
  0x39   : > { %v365_v16 = vld [vmem:[%s10517_s1 + $0x68] sm:$0xff]  ;;  %v364_v17 = vld [vmem:[%s10517_s1 + $0x60] sm:$0xff]  ;;  %v367_v18 = vld [vmem:[%s10517_s1 + $0x78] sm:$0xff]  ;;  %10895 = vst [vmem:[#allocation13_spill] sm:$0xff] %v5764_v32  ;;  %v5771_v35 = vsub.s32 0, %v5764_v32  ;;  %v5775_v37 = vsub.s32 1, %v5764_v32 }
  0x3a   : > { %v366_v19 = vld [vmem:[%s10517_s1 + $0x70] sm:$0xff]  ;;  %v338_v41 = vld [vmem:[%s5630_s9 + $0x8] sm:$0xf]  ;;  %v339_v42 = vld [vmem:[%s5630_s9 + $0xc] sm:$0xf]  ;;  %v5785_v43 = vsub.s32 2, %v5764_v32 }
  0x3b   : > { %449 = vperm.xlu1 %5458, %v5648_v6   ;;  %439 = vperm.xlu0 %5457, %v5653_v7   ;;  %10898 = vst [vmem:[#allocation16_spill] sm:$0xff] %v5771_v35  ;;  %v336_v36 = vld [vmem:[%s5630_s9] sm:$0xf]  ;;  %10899 = vst [vmem:[#allocation17_spill] sm:$0xff] %v5775_v37  ;;  %v337_v40 = vld [vmem:[%s5630_s9 + $0x4] sm:$0xf]  ;;  %v5801_v49 = vrot.slane %v338_v41, %v5771_v35  ;;  %v5804_v50 = vrot.slane %v339_v42, %v5771_v35 }
  0x3c   : > { %10902 = vst [vmem:[#allocation20_spill] sm:$0xff] %v5785_v43  ;;  %v340_v44 = vld [vmem:[%s5630_s9 + $0x10] sm:$0xf]  ;;  %v5789_v45 = vrot.slane %v336_v36, %v5771_v35  ;;  %v5792_v46 = vsub.s32 3, %v5764_v32  ;;  %v5795_v47 = vrot.slane %v336_v36, %v5775_v37  ;;  %v5798_v48 = vrot.slane %v337_v40, %v5771_v35  ;;  %v5823_v57 = vld [vmem:[%s5630_s9 + $0x14] sm:$0xf] }
  0x3d   : > { %v5811_v53 = vrot.slane %v337_v40, %v5775_v37  ;;  %v5814_v54 = vrot.slane %v338_v41, %v5775_v37  ;;  %v5817_v55 = vrot.slane %v339_v42, %v5775_v37  ;;  %v5820_v56 = vrot.slane %v340_v44, %v5771_v35  ;;  %p5358_p11 = scmp.ne.s32.totalorder %s5536_s19, 1 }
  0x3e   : > { %10903 = vst [vmem:[#allocation21_spill] sm:$0xff] %v5792_v46  ;;  %v5826_v58 = vrot.slane %v336_v36, %v5785_v43  ;;  %v5829_v59 = vrot.slane %v337_v40, %v5785_v43  ;;  %v5832_v60 = vrot.slane %v338_v41, %v5785_v43  ;;  %v5835_v61 = vrot.slane %v340_v44, %v5775_v37  ;;  %s5218_s12 = sld [smem:[#allocation3]] (!%p5358_p11) }
  0x3f   : > { %459 = vperm.xlu1 %5458, %v5660_v8   ;;  %454 = vperm.xlu0 %5457, %v5665_v9   ;;  %10906 = vst [vmem:[#allocation24_spill] sm:$0xff] %v5820_v56  ;;  %v5838_v62 = vrot.slane %v336_v36, %v5792_v46  ;;  %v5841_v63 = vrot.slane %v337_v40, %v5792_v46  ;;  %vm3774_vm7 = vcmask 589312   ;;  %vm3781_vm8 = vcmask 654912  }
  0x40   : > { %10907 = vst [vmem:[#allocation25_spill] sm:$0xff] %v5826_v58  ;;  %10908 = vst [vmem:[#allocation26_spill] sm:$0xff] %v5829_v59  ;;  %v5844_v0 = vrot.slane %v338_v41, %v5792_v46  ;;  %v5847_v1 = vrot.slane %v339_v42, %v5785_v43  ;;  %v5850_v2 = vrot.slane %v339_v42, %v5792_v46  ;;  %vm3788_vm9 = vcmask 720512  }
  0x41   : > { %10909 = vst [vmem:[#allocation27_spill] sm:$0xff] %v5832_v60  ;;  %10910 = vst [vmem:[#allocation28_spill] sm:$0xff] %v5835_v61  ;;  %v5860_v5 = vrot.slane %v5823_v57, %v5771_v35  ;;  %vm3795_vm10 = vcmask 786112   ;;  %vm3802_vm11 = vcmask 851712   ;;  %vm3809_vm12 = vcmask 917312  }
  0x42   : > { %10911 = vst [vmem:[#allocation29_spill] sm:$0xff] %v5838_v62  ;;  %10912 = vst [vmem:[#allocation30_spill] sm:$0xff] %v5841_v63  ;;  %vm3816_vm13 = vcmask 982912   ;;  %vm3823_vm14 = vcmask 1048512   ;;  %vm10816_vm15 = vcmask 1041409  }
  0x43   : > { %469 = vperm.xlu1 %5458, %v5672_v10   ;;  %464 = vperm.xlu0 %5457, %v5677_v11   ;;  %10913 = vst [vmem:[#allocation31_spill] sm:$0xff] %v5844_v0  ;;  %10914 = vst [vmem:[#allocation32_spill] sm:$0xff] %v5847_v1 }
  0x44   : > { %10915 = vst [vmem:[#allocation33_spill] sm:$0xff] %v5850_v2  ;;  %10918 = vst [vmem:[#allocation36_spill] sm:$0xff] %v5860_v5 }
  0x47   : > { %479 = vperm.xlu1 %5458, %v5684_v12   ;;  %474 = vperm.xlu0 %5457, %v5689_v13  }
  0x4b   : > { %489 = vperm.xlu1 %5458, %v363_v14   ;;  %484 = vperm.xlu0 %5457, %v5699_v15  }
  0x4f   : > { %499 = vperm.xlu1 %5458, %v365_v16   ;;  %494 = vperm.xlu0 %5457, %v364_v17  }
  0x53   : > { %509 = vperm.xlu1 %5458, %v367_v18   ;;  %504 = vperm.xlu0 %5457, %v366_v19  }
  0x57   : > { %5460 = vset.pattern.permute.xlu1 %v5552_v20  ;;  %5459 = vset.pattern.permute.xlu0 %v5552_v20 }
  0x58   : > { %837 = vperm.xlu1 %5460, %v5653_v7   ;;  %833 = vperm.xlu0 %5459, %v5641_v4  }
  0x5c   : > { %841 = vperm.xlu1 %5460, %v5636_v3   ;;  %845 = vperm.xlu0 %5459, %v5648_v6  }
  0x60   : > { %849 = vperm.xlu1 %5460, %v5665_v9   ;;  %853 = vperm.xlu0 %5459, %v5660_v8  }
  0x64   : > { %857 = vperm.xlu1 %5460, %v5677_v11   ;;  %861 = vperm.xlu0 %5459, %v5672_v10  }
  0x68   : > { %865 = vperm.xlu1 %5460, %v5689_v13   ;;  %869 = vperm.xlu0 %5459, %v5684_v12  }
  0x6c   : > { %873 = vperm.xlu1 %5460, %v5699_v15   ;;  %877 = vperm.xlu0 %5459, %v363_v14  }
  0x70   : > { %881 = vperm.xlu1 %5460, %v364_v17   ;;  %885 = vperm.xlu0 %5459, %v365_v16  }
  0x74   : > { %889 = vperm.xlu1 %5460, %v366_v19   ;;  %893 = vperm.xlu0 %5459, %v367_v18  }
  0x78   : > { %5461 = vset.pattern.permute.xlu1 %v5553_v21  ;;  %5462 = vset.pattern.permute.xlu0 %v5553_v21 }
  0x79   : > { %1473 = vperm.xlu1 %5461, %v5641_v4   ;;  %1477 = vperm.xlu0 %5462, %v5653_v7  }
  0x7d   : > { %1481 = vperm.xlu1 %5461, %v5636_v3   ;;  %1489 = vperm.xlu0 %5462, %v5665_v9  }
  0x81   : > { %1485 = vperm.xlu1 %5461, %v5648_v6   ;;  %1497 = vperm.xlu0 %5462, %v5677_v11  }
  0x85   : > { %1493 = vperm.xlu1 %5461, %v5660_v8   ;;  %1505 = vperm.xlu0 %5462, %v5689_v13  }
  0x89   : > { %1501 = vperm.xlu1 %5461, %v5672_v10   ;;  %1513 = vperm.xlu0 %5462, %v5699_v15  }
  0x8d   : > { %1509 = vperm.xlu1 %5461, %v5684_v12   ;;  %1521 = vperm.xlu0 %5462, %v364_v17  }
  0x91   : > { %1517 = vperm.xlu1 %5461, %v363_v14   ;;  %1529 = vperm.xlu0 %5462, %v366_v19  }
  0x95   : > { %1525 = vperm.xlu1 %5461, %v365_v16   ;;  %5463 = vset.pattern.permute.xlu0 %v5554_v22 }
  0x96   : > { %2113 = vperm.xlu0 %5463, %v5641_v4   ;;  %v5856_v4 = vrot.slane %v340_v44, %v5792_v46 }
  0x98   : > { %10917 = vst [vmem:[#allocation35_spill] sm:$0xff] %v5856_v4 }
  0x99   : > { %1533 = vperm.xlu1 %5461, %v367_v18  }
  0x9a   : > { %2125 = vperm.xlu0 %5463, %v5648_v6  }
  0x9d   : > { %5464 = vset.pattern.permute.xlu1 %v5554_v22 }
  0x9e   : > { %2117 = vperm.xlu1 %5464, %v5653_v7   ;;  %2133 = vperm.xlu0 %5463, %v5660_v8  }
  0xa2   : > { %2121 = vperm.xlu1 %5464, %v5636_v3   ;;  %2141 = vperm.xlu0 %5463, %v5672_v10   ;;  %v5853_v3 = vrot.slane %v340_v44, %v5785_v43 }
  0xa4   : > { %10916 = vst [vmem:[#allocation34_spill] sm:$0xff] %v5853_v3 }
  0xa6   : > { %2129 = vperm.xlu1 %5464, %v5665_v9   ;;  %2149 = vperm.xlu0 %5463, %v5684_v12  }
  0xaa   : > { %2137 = vperm.xlu1 %5464, %v5677_v11   ;;  %2157 = vperm.xlu0 %5463, %v363_v14  }
  0xae   : > { %2145 = vperm.xlu1 %5464, %v5689_v13   ;;  %2165 = vperm.xlu0 %5463, %v365_v16  }
  0xb2   : > { %2153 = vperm.xlu1 %5464, %v5699_v15   ;;  %2173 = vperm.xlu0 %5463, %v367_v18  }
  0xb6   : > { %v5747_v23 = vpop.permute.xlu1 %444  ;;  %2161 = vperm.xlu1 %5464, %v364_v17   ;;  %v5749_v24 = vpop.permute.xlu0 %434 }
  0xb7   : > { %10887 = vst [vmem:[#allocation5_spill] sm:$0xff] %v5747_v23  ;;  %10888 = vst [vmem:[#allocation6_spill] sm:$0xff] %v5749_v24  ;;  %v5868_v8 = vmul.f32 %v5749_v24, %v5789_v45  ;;  %v5872_v9 = vmul.f32 %v5747_v23, %v5789_v45  ;;  %v5876_v10 = vmul.f32 %v5749_v24, %v5798_v48 }
  0xb8   : > { %v5880_v11 = vmul.f32 %v5747_v23, %v5798_v48  ;;  %v5884_v12 = vmul.f32 %v5749_v24, %v5801_v49  ;;  %v5888_v13 = vmul.f32 %v5747_v23, %v5801_v49  ;;  %v5892_v14 = vmul.f32 %v5749_v24, %v5804_v50 }
  0xb9   : > { %v5896_v15 = vmul.f32 %v5747_v23, %v5804_v50  ;;  %v5908_v18 = vmul.f32 %v5749_v24, %v5820_v56 }
  0xba   : > { %v5751_v25 = vpop.permute.xlu1 %449  ;;  %2169 = vperm.xlu1 %5464, %v366_v19   ;;  %v5753_v26 = vpop.permute.xlu0 %439  ;;  %v5912_v19 = vmul.f32 %v5747_v23, %v5820_v56 }
  0xbb   : > { %10889 = vst [vmem:[#allocation7_spill] sm:$0xff] %v5751_v25  ;;  %10890 = vst [vmem:[#allocation8_spill] sm:$0xff] %v5753_v26  ;;  %v5900_v16 = vmul.f32 %v5751_v25, %v5789_v45  ;;  %v5904_v17 = vmul.f32 %v5753_v26, %v5789_v45  ;;  %v5916_v20 = vmul.f32 %v5753_v26, %v5798_v48 }
  0xbc   : > { %10921 = vst [vmem:[#allocation39_spill] sm:$0xff] %v5908_v18  ;;  %10922 = vst [vmem:[#allocation40_spill] sm:$0xff] %v5912_v19  ;;  %v5920_v21 = vmul.f32 %v5751_v25, %v5798_v48  ;;  %v5924_v22 = vmul.f32 %v5753_v26, %v5801_v49  ;;  %v5928_v36 = vmul.f32 %v5751_v25, %v5801_v49 }
  0xbd   : > { %v5932_v40 = vmul.f32 %v5753_v26, %v5804_v50  ;;  %v5936_v41 = vmul.f32 %v5751_v25, %v5804_v50  ;;  %v5940_v42 = vmul.f32 %v5753_v26, %v5820_v56  ;;  %v5944_v44 = vmul.f32 %v5751_v25, %v5820_v56 }
  0xbe   : > { %v5755_v27 = vpop.permute.xlu1 %459  ;;  %v5757_v28 = vpop.permute.xlu0 %454  ;;  %v5964_v19 = vmul.f32 %v5753_v26, %v5860_v5 }
  0xbf   : > { %10891 = vst [vmem:[#allocation9_spill] sm:$0xff] %v5755_v27  ;;  %10892 = vst [vmem:[#allocation10_spill] sm:$0xff] %v5757_v28  ;;  %v5952_v46 = vmul.f32 %v5755_v27, %v5789_v45  ;;  %v5956_v43 = vmul.f32 %v5757_v28, %v5789_v45  ;;  %v5960_v32 = vmul.f32 %v5755_v27, %v5798_v48 }
  0xc0   : > { %10923 = vst [vmem:[#allocation41_spill] sm:$0xff] %v5940_v42  ;;  %10924 = vst [vmem:[#allocation42_spill] sm:$0xff] %v5944_v44  ;;  %v5968_v18 = vmul.f32 %v5757_v28, %v5798_v48  ;;  %v5972_v44 = vmul.f32 %v5755_v27, %v5801_v49  ;;  %v5976_v4 = vmul.f32 %v5757_v28, %v5801_v49 }
  0xc1   : > { %10927 = vst [vmem:[#allocation45_spill] sm:$0xff] %v5964_v19  ;;  %v5980_v2 = vmul.f32 %v5755_v27, %v5804_v50  ;;  %v5988_v19 = vmul.f32 %v5757_v28, %v5804_v50  ;;  %v5992_v0 = vmul.f32 %v5755_v27, %v5820_v56  ;;  %v5996_v63 = vmul.f32 %v5757_v28, %v5820_v56 }
  0xc2   : > { %v5759_v30 = vpop.permute.xlu1 %469  ;;  %v5761_v31 = vpop.permute.xlu0 %464 }
  0xc3   : > { %10893 = vst [vmem:[#allocation11_spill] sm:$0xff] %v5759_v30  ;;  %10894 = vst [vmem:[#allocation12_spill] sm:$0xff] %v5761_v31  ;;  %v5984_v26 = vmul.f32 %v5759_v30, %v5789_v45  ;;  %v6000_v3 = vmul.f32 %v5761_v31, %v5789_v45  ;;  %v6004_v62 = vmul.f32 %v5759_v30, %v5798_v48 }
  0xc4   : > { %10928 = vst [vmem:[#allocation46_spill] sm:$0xff] %v5992_v0  ;;  %10929 = vst [vmem:[#allocation47_spill] sm:$0xff] %v5996_v63  ;;  %v6008_v42 = vmul.f32 %v5761_v31, %v5798_v48  ;;  %v6012_v1 = vmul.f32 %v5759_v30, %v5801_v49  ;;  %v6020_v63 = vmul.f32 %v5761_v31, %v5801_v49 }
  0xc5   : > { %v6024_v60 = vmul.f32 %v5759_v30, %v5804_v50  ;;  %v6028_v59 = vmul.f32 %v5761_v31, %v5804_v50  ;;  %v6032_v58 = vmul.f32 %v5759_v30, %v5820_v56 }
  0xc6   : > { %v5766_v33 = vpop.permute.xlu1 %479  ;;  %v5768_v34 = vpop.permute.xlu0 %474  ;;  %10930 = vst [vmem:[#allocation48_spill] sm:$0xff] %v6012_v1  ;;  %10933 = vst [vmem:[#allocation51_spill] sm:$0xff] %v6020_v63 }
  0xc7   : > { %10896 = vst [vmem:[#allocation14_spill] sm:$0xff] %v5766_v33  ;;  %10897 = vst [vmem:[#allocation15_spill] sm:$0xff] %v5768_v34  ;;  %v6036_v61 = vmul.f32 %v5766_v33, %v5789_v45  ;;  %v6040_v1 = vmul.f32 %v5768_v34, %v5789_v45  ;;  %v6044_v63 = vmul.f32 %v5766_v33, %v5798_v48 }
  0xc8   : > { %10934 = vst [vmem:[#allocation52_spill] sm:$0xff] %v6024_v60  ;;  %10935 = vst [vmem:[#allocation53_spill] sm:$0xff] %v6032_v58  ;;  %v6048_v60 = vmul.f32 %v5761_v31, %v5820_v56  ;;  %v6052_v30 = vmul.f32 %v5768_v34, %v5798_v48  ;;  %v6056_v58 = vmul.f32 %v5766_v33, %v5801_v49 }
  0xc9   : > { %10936 = vst [vmem:[#allocation54_spill] sm:$0xff] %v6036_v61  ;;  %10937 = vst [vmem:[#allocation55_spill] sm:$0xff] %v6040_v1  ;;  %v6060_v61 = vmul.f32 %v5768_v34, %v5801_v49  ;;  %v6064_v1 = vmul.f32 %v5766_v33, %v5804_v50  ;;  %v6068_v31 = vmul.f32 %v5768_v34, %v5804_v50 }
  0xca   : > { %v5777_v38 = vpop.permute.xlu1 %489  ;;  %v5779_v39 = vpop.permute.xlu0 %484  ;;  %10938 = vst [vmem:[#allocation56_spill] sm:$0xff] %v6044_v63  ;;  %10939 = vst [vmem:[#allocation57_spill] sm:$0xff] %v6048_v60  ;;  %v6072_v60 = vmul.f32 %v5766_v33, %v5820_v56 }
  0xcb   : > { %10900 = vst [vmem:[#allocation18_spill] sm:$0xff] %v5777_v38  ;;  %10901 = vst [vmem:[#allocation19_spill] sm:$0xff] %v5779_v39  ;;  %v6092_v33 = vmul.f32 %v5779_v39, %v5789_v45 }
  0xcc   : > { %10940 = vst [vmem:[#allocation58_spill] sm:$0xff] %v6052_v30  ;;  %10941 = vst [vmem:[#allocation59_spill] sm:$0xff] %v6056_v58  ;;  %v6076_v30 = vmul.f32 %v5768_v34, %v5820_v56  ;;  %v6080_v58 = vrot.slane %v5823_v57, %v5775_v37  ;;  %v6096_v34 = vmul.f32 %v5777_v38, %v5798_v48 }
  0xcd   : > { %10942 = vst [vmem:[#allocation60_spill] sm:$0xff] %v6060_v61  ;;  %10943 = vst [vmem:[#allocation61_spill] sm:$0xff] %v6064_v1  ;;  %v6088_v1 = vmul.f32 %v5777_v38, %v5789_v45  ;;  %v6100_v57 = vmul.f32 %v5779_v39, %v5798_v48  ;;  %v6104_v37 = vmul.f32 %v5777_v38, %v5801_v49 }
  0xce   : > { %v5806_v51 = vpop.permute.xlu1 %499  ;;  %v5808_v52 = vpop.permute.xlu0 %494  ;;  %10944 = vst [vmem:[#allocation62_spill] sm:$0xff] %v6068_v31  ;;  %10945 = vst [vmem:[#allocation63_spill] sm:$0xff] %v6072_v60  ;;  %v6116_v60 = vmul.f32 %v5779_v39, %v5804_v50 }
  0xcf   : > { %10904 = vst [vmem:[#allocation22_spill] sm:$0xff] %v5806_v51  ;;  %10905 = vst [vmem:[#allocation23_spill] sm:$0xff] %v5808_v52  ;;  %v6120_v31 = vmul.f32 %v5806_v51, %v5789_v45 }
  0xd0   : > { %10946 = vst [vmem:[#allocation64_spill] sm:$0xff] %v6076_v30  ;;  %10947 = vst [vmem:[#allocation65_spill] sm:$0xff] %v6080_v58  ;;  %v6108_v58 = vmul.f32 %v5779_v39, %v5801_v49  ;;  %v6112_v30 = vmul.f32 %v5777_v38, %v5804_v50 }
  0xd1   : > { %10950 = vst [vmem:[#allocation68_spill] sm:$0xff] %v6096_v34  ;;  %10951 = vst [vmem:[#allocation69_spill] sm:$0xff] %v6100_v57  ;;  %v6124_v57 = vmul.f32 %v5777_v38, %v5820_v56  ;;  %v6144_v38 = vmul.f32 %v5808_v52, %v5798_v48 }
  0xd2   : > { %v5862_v6 = vpop.permute.xlu1 %509  ;;  %v5864_v7 = vpop.permute.xlu0 %504  ;;  %10952 = vst [vmem:[#allocation70_spill] sm:$0xff] %v6104_v37  ;;  %10953 = vst [vmem:[#allocation71_spill] sm:$0xff] %v6108_v58  ;;  %v6128_v37 = vmul.f32 %v5779_v39, %v5820_v56  ;;  %v6132_v58 = vmul.f32 %v5747_v23, %v5860_v5  ;;  %v6148_v39 = vmul.f32 %v5806_v51, %v5801_v49 }
  0xd3   : > { %10919 = vst [vmem:[#allocation37_spill] sm:$0xff] %v5862_v6  ;;  %10920 = vst [vmem:[#allocation38_spill] sm:$0xff] %v5864_v7 }
  0xd4   : > { %10954 = vst [vmem:[#allocation72_spill] sm:$0xff] %v6112_v30  ;;  %10955 = vst [vmem:[#allocation73_spill] sm:$0xff] %v6116_v60  ;;  %v6136_v30 = vmul.f32 %v5808_v52, %v5789_v45  ;;  %v6140_v60 = vmul.f32 %v5806_v51, %v5798_v48 }
  0xd5   : > { %10956 = vst [vmem:[#allocation74_spill] sm:$0xff] %v6120_v31  ;;  %10957 = vst [vmem:[#allocation75_spill] sm:$0xff] %v6124_v57  ;;  %v6160_v57 = vmul.f32 %v5806_v51, %v5804_v50 }
  0xd6   : > { %10958 = vst [vmem:[#allocation76_spill] sm:$0xff] %v6128_v37  ;;  %10959 = vst [vmem:[#allocation77_spill] sm:$0xff] %v6132_v58  ;;  %v6156_v58 = vmul.f32 %v5808_v52, %v5801_v49 }
  0xd7   : > { %v5946_v29 = vpop.permute.xlu1 %837  ;;  %v5948_v35 = vpop.permute.xlu0 %833  ;;  %10960 = vst [vmem:[#allocation78_spill] sm:$0xff] %v6136_v30  ;;  %10961 = vst [vmem:[#allocation79_spill] sm:$0xff] %v6140_v60  ;;  %v6164_v60 = vmul.f32 %v5808_v52, %v5804_v50  ;;  %v6176_v30 = vmul.f32 %v5864_v7, %v5789_v45 }
  0xd8   : > { %10925 = vst [vmem:[#allocation43_spill] sm:$0xff] %v5946_v29  ;;  %10926 = vst [vmem:[#allocation44_spill] sm:$0xff] %v5948_v35 }
  0xd9   : > { %10962 = vst [vmem:[#allocation80_spill] sm:$0xff] %v6144_v38  ;;  %10963 = vst [vmem:[#allocation81_spill] sm:$0xff] %v6148_v39  ;;  %v6168_v38 = vmul.f32 %v5806_v51, %v5820_v56  ;;  %v6172_v39 = vmul.f32 %v5862_v6, %v5789_v45  ;;  %v6188_v51 = vmul.f32 %v5862_v6, %v5798_v48 }
  0xda   : > { %10966 = vst [vmem:[#allocation84_spill] sm:$0xff] %v6156_v58  ;;  %10967 = vst [vmem:[#allocation85_spill] sm:$0xff] %v6160_v57  ;;  %v6180_v58 = vmul.f32 %v5808_v52, %v5820_v56  ;;  %v6184_v57 = vmul.f32 %v5751_v25, %v5860_v5  ;;  %v6196_v45 = vmul.f32 %v5862_v6, %v5801_v49 }
  0xdb   : > { %v6014_v0 = vpop.permute.xlu1 %841  ;;  %v6016_v28 = vpop.permute.xlu0 %845  ;;  %10968 = vst [vmem:[#allocation86_spill] sm:$0xff] %v6164_v60  ;;  %10969 = vst [vmem:[#allocation87_spill] sm:$0xff] %v6168_v38  ;;  %v6192_v38 = vmul.f32 %v5864_v7, %v5798_v48  ;;  %v6200_v52 = vmul.f32 %v5864_v7, %v5801_v49  ;;  %v896_v25 = vmul.f32 %v5948_v35, %v5795_v47 }
  0xdc   : > { %10931 = vst [vmem:[#allocation49_spill] sm:$0xff] %v6014_v0  ;;  %10932 = vst [vmem:[#allocation50_spill] sm:$0xff] %v6016_v28  ;;  %v6214_v48 = vmul.f32 %v5862_v6, %v5820_v56  ;;  %v897_v49 = vmul.f32 %v5946_v29, %v5795_v47  ;;  %v945_v56 = vmul.f32 %v5946_v29, %v5817_v55 }
  0xdd   : > { %10970 = vst [vmem:[#allocation88_spill] sm:$0xff] %v6172_v39  ;;  %10971 = vst [vmem:[#allocation89_spill] sm:$0xff] %v6176_v30  ;;  %v944_v60 = vmul.f32 %v5948_v35, %v5817_v55  ;;  %v914_v30 = vmul.f32 %v6014_v0, %v5811_v53 }
  0xde   : > { %10972 = vst [vmem:[#allocation90_spill] sm:$0xff] %v6180_v58  ;;  %10973 = vst [vmem:[#allocation91_spill] sm:$0xff] %v6184_v57  ;;  %v6206_v57 = vmul.f32 %v5862_v6, %v5804_v50  ;;  %v6210_v58 = vmul.f32 %v5864_v7, %v5804_v50  ;;  %v6228_v50 = vmul.f32 %v5755_v27, %v5860_v5 }
  0xdf   : > { %v6082_v61 = vpop.permute.xlu1 %849  ;;  %v6084_v63 = vpop.permute.xlu0 %853  ;;  %10974 = vst [vmem:[#allocation92_spill] sm:$0xff] %v6188_v51  ;;  %10975 = vst [vmem:[#allocation93_spill] sm:$0xff] %v6192_v38  ;;  %v929_v6 = vmul.f32 %v5946_v29, %v5814_v54  ;;  %v928_v7 = vmul.f32 %v5948_v35, %v5814_v54  ;;  %v898_v27 = vmul.f32 %v6014_v0, %v5795_v47 }
  0xe0   : > { %10948 = vst [vmem:[#allocation66_spill] sm:$0xff] %v6082_v61  ;;  %10949 = vst [vmem:[#allocation67_spill] sm:$0xff] %v6084_v63  ;;  %v6249_v51 = vadd.f32 %v896_v25, %v5868_v8  ;;  %v947_v8 = vmul.f32 %v6016_v28, %v5817_v55  ;;  %v6279_v34 = vadd.f32 %v945_v56, %v5932_v40 }
  0xe1   : > { %10976 = vst [vmem:[#allocation94_spill] sm:$0xff] %v6196_v45  ;;  %10977 = vst [vmem:[#allocation95_spill] sm:$0xff] %v6200_v52  ;;  %v913_v52 = vmul.f32 %v5946_v29, %v5811_v53  ;;  %v6262_v29 = vadd.f32 %v897_v49, %v5904_v17  ;;  %v6276_v31 = vadd.f32 %v928_v7, %v5884_v12 }
  0xe2   : > { %10978 = vst [vmem:[#allocation96_spill] sm:$0xff] %v6206_v57  ;;  %10979 = vst [vmem:[#allocation97_spill] sm:$0xff] %v6210_v58  ;;  %v912_v57 = vmul.f32 %v5948_v35, %v5811_v53  ;;  %v899_v58 = vmul.f32 %v6016_v28, %v5795_v47  ;;  %v946_v17 = vmul.f32 %v6014_v0, %v5817_v55 }
  0xe3   : > { %v6150_v37 = vpop.permute.xlu1 %857  ;;  %v6152_v23 = vpop.permute.xlu0 %861  ;;  %10980 = vst [vmem:[#allocation98_spill] sm:$0xff] %v6214_v48  ;;  %10983 = vst [vmem:[#allocation101_spill] sm:$0xff] %v6228_v50  ;;  %v6238_v48 = vmul.f32 %v5749_v24, %v5860_v5  ;;  %v915_v50 = vmul.f32 %v6016_v28, %v5811_v53  ;;  %v931_v24 = vmul.f32 %v6016_v28, %v5814_v54 }
  0xe4   : > { %10964 = vst [vmem:[#allocation82_spill] sm:$0xff] %v6150_v37  ;;  %10965 = vst [vmem:[#allocation83_spill] sm:$0xff] %v6152_v23  ;;  %v930_v5 = vmul.f32 %v6014_v0, %v5814_v54  ;;  %v6265_v35 = vadd.f32 %v913_v52, %v5916_v20  ;;  %v6268_v25 = vadd.f32 %v912_v57, %v5876_v10 }
  0xe5   : > { %10984 = vst [vmem:[#allocation102_spill] sm:$0xff] %v6238_v48  ;;  %10985 = vst [vmem:[#allocation103_spill] sm:$0xff] %v6249_v51  ;;  %v6273_v51 = vadd.f32 %v929_v6, %v5924_v22  ;;  %v6284_v52 = vadd.f32 %v899_v58, %v5900_v16  ;;  %v6287_v10 = vadd.f32 %v898_v27, %v5872_v9 }
  0xe6   : > { %v6290_v20 = vadd.f32 %v915_v50, %v5920_v21  ;;  %v6293_v6 = vadd.f32 %v944_v60, %v5892_v14  ;;  %v901_v7 = vmul.f32 %v6084_v63, %v5795_v47  ;;  %v6298_v56 = vadd.f32 %v914_v30, %v5880_v11 }
  0xe7   : > { %v6216_v45 = vpop.permute.xlu1 %865  ;;  %v6218_v38 = vpop.permute.xlu0 %869  ;;  %v6301_v12 = vadd.f32 %v931_v24, %v5928_v36  ;;  %v6304_v58 = vadd.f32 %v930_v5, %v5888_v13  ;;  %v900_v60 = vmul.f32 %v6082_v61, %v5795_v47  ;;  %v917_v14 = vmul.f32 %v6084_v63, %v5811_v53 }
  0xe8   : > { %10981 = vst [vmem:[#allocation99_spill] sm:$0xff] %v6216_v45  ;;  %10982 = vst [vmem:[#allocation100_spill] sm:$0xff] %v6218_v38  ;;  %v916_v30 = vmul.f32 %v6082_v61, %v5811_v53  ;;  %v6317_v11 = vadd.f32 %v947_v8, %v5936_v41  ;;  %v933_v24 = vmul.f32 %v6084_v63, %v5814_v54 }
  0xe9   : > { %v932_v5 = vmul.f32 %v6082_v61, %v5814_v54  ;;  %v949_v13 = vmul.f32 %v6084_v63, %v5817_v55  ;;  %v6326_v16 = vadd.f32 %v946_v17, %v5896_v15  ;;  %v903_v21 = vmul.f32 %v6152_v23, %v5795_v47 }
  0xea   : > { %10990 = vst [vmem:[#allocation108_spill] sm:$0xff] %v6317_v11  ;;  %v902_v22 = vmul.f32 %v6150_v37, %v5795_v47  ;;  %v919_v36 = vmul.f32 %v6152_v23, %v5811_v53  ;;  %v948_v40 = vmul.f32 %v6082_v61, %v5817_v55  ;;  %v6337_v41 = vadd.f32 %v901_v7, %v5952_v46 }
  0xeb   : > { %v6257_v48 = vpop.permute.xlu1 %873  ;;  %v6259_v39 = vpop.permute.xlu0 %877  ;;  %v918_v57 = vmul.f32 %v6150_v37, %v5811_v53  ;;  %v935_v15 = vmul.f32 %v6152_v23, %v5814_v54  ;;  %v934_v49 = vmul.f32 %v6150_v37, %v5814_v54  ;;  %v6350_v17 = vadd.f32 %v900_v60, %v5956_v43 }
  0xec   : > { %10986 = vst [vmem:[#allocation104_spill] sm:$0xff] %v6257_v48  ;;  %10987 = vst [vmem:[#allocation105_spill] sm:$0xff] %v6259_v39  ;;  %v6353_v61 = vadd.f32 %v917_v14, %v5960_v32  ;;  %v6356_v46 = vadd.f32 %v916_v30, %v5968_v18  ;;  %v951_v7 = vmul.f32 %v6152_v23, %v5817_v55  ;;  %v10999_v14 = vld [vmem:[#allocation48_spill] sm:$0xff] }
  0xed   : > { %10991 = vst [vmem:[#allocation109_spill] sm:$0xff] %v6337_v41  ;;  %v6361_v0 = vadd.f32 %v933_v24, %v5972_v44  ;;  %v6364_v41 = vadd.f32 %v932_v5, %v5976_v4  ;;  %v6367_v11 = vadd.f32 %v949_v13, %v5980_v2  ;;  %v950_v43 = vmul.f32 %v6150_v37, %v5817_v55  ;;  %v11002_v5 = vld [vmem:[#allocation52_spill] sm:$0xff] }
  0xee   : > { %10994 = vst [vmem:[#allocation112_spill] sm:$0xff] %v6353_v61  ;;  %v6372_v32 = vadd.f32 %v903_v21, %v5984_v26  ;;  %v6375_v18 = vadd.f32 %v902_v22, %v6000_v3  ;;  %v6378_v60 = vadd.f32 %v919_v36, %v6004_v62  ;;  %v6381_v44 = vadd.f32 %v948_v40, %v5988_v19  ;;  %v11001_v26 = vld [vmem:[#allocation51_spill] sm:$0xff] }
  0xef   : > { %v6306_v27 = vpop.permute.xlu1 %881  ;;  %v6308_v9 = vpop.permute.xlu0 %885  ;;  %10995 = vst [vmem:[#allocation113_spill] sm:$0xff] %v6361_v0  ;;  %10996 = vst [vmem:[#allocation114_spill] sm:$0xff] %v6367_v11  ;;  %v905_v4 = vmul.f32 %v6218_v38, %v5795_v47  ;;  %v6386_v2 = vadd.f32 %v918_v57, %v6008_v42  ;;  %v6389_v30 = vadd.f32 %v935_v15, %v10999_v14  ;;  %v11016_v0 = vld [vmem:[#allocation60_spill] sm:$0xff] }
  0xf0   : > { %10988 = vst [vmem:[#allocation106_spill] sm:$0xff] %v6306_v27  ;;  %10989 = vst [vmem:[#allocation107_spill] sm:$0xff] %v6308_v9  ;;  %v6392_v24 = vadd.f32 %v934_v49, %v11001_v26  ;;  %v904_v3 = vmul.f32 %v6216_v45, %v5795_v47  ;;  %v921_v62 = vmul.f32 %v6218_v38, %v5811_v53  ;;  %v11006_v26 = vld [vmem:[#allocation54_spill] sm:$0xff] }
  0xf1   : > { %10997 = vst [vmem:[#allocation115_spill] sm:$0xff] %v6372_v32  ;;  %10998 = vst [vmem:[#allocation116_spill] sm:$0xff] %v6378_v60  ;;  %v920_v19 = vmul.f32 %v6216_v45, %v5811_v53  ;;  %v6401_v13 = vadd.f32 %v951_v7, %v11002_v5  ;;  %v937_v22 = vmul.f32 %v6218_v38, %v5814_v54  ;;  %v11011_v60 = vld [vmem:[#allocation58_spill] sm:$0xff]  ;;  %v11014_v32 = vld [vmem:[#allocation59_spill] sm:$0xff] }
  0xf2   : > { %11000 = vst [vmem:[#allocation48_spill] sm:$0xff] %v6389_v30  ;;  %v936_v36 = vmul.f32 %v6216_v45, %v5814_v54  ;;  %v953_v40 = vmul.f32 %v6218_v38, %v5817_v55  ;;  %v6414_v57 = vadd.f32 %v950_v43, %v6028_v59  ;;  %v907_v15 = vmul.f32 %v6259_v39, %v5795_v47  ;;  %v11008_v38 = vld [vmem:[#allocation55_spill] sm:$0xff] }
  0xf3   : > { %v6345_v50 = vpop.permute.xlu1 %889  ;;  %v6347_v8 = vpop.permute.xlu0 %893  ;;  %11003 = vst [vmem:[#allocation51_spill] sm:$0xff] %v6401_v13  ;;  %v906_v49 = vmul.f32 %v6257_v48, %v5795_v47  ;;  %v923_v7 = vmul.f32 %v6259_v39, %v5811_v53  ;;  %v952_v14 = vmul.f32 %v6216_v45, %v5817_v55  ;;  %v6425_v5 = vadd.f32 %v905_v4, %v11006_v26  ;;  %v11009_v13 = vld [vmem:[#allocation56_spill] sm:$0xff] }
  0xf4   : > { %10992 = vst [vmem:[#allocation110_spill] sm:$0xff] %v6345_v50  ;;  %10993 = vst [vmem:[#allocation111_spill] sm:$0xff] %v6347_v8  ;;  %v922_v37 = vmul.f32 %v6257_v48, %v5811_v53  ;;  %v939_v59 = vmul.f32 %v6259_v39, %v5814_v54  ;;  %v938_v43 = vmul.f32 %v6257_v48, %v5814_v54 }
  0xf5   : > { %11007 = vst [vmem:[#allocation54_spill] sm:$0xff] %v6425_v5  ;;  %v6434_v23 = vadd.f32 %v904_v3, %v11008_v38  ;;  %v6437_v30 = vadd.f32 %v921_v62, %v11009_v13  ;;  %v6440_v45 = vadd.f32 %v920_v19, %v11011_v60  ;;  %v955_v4 = vmul.f32 %v6259_v39, %v5817_v55  ;;  %v11017_v38 = vld [vmem:[#allocation61_spill] sm:$0xff]  ;;  %v11021_v13 = vld [vmem:[#allocation68_spill] sm:$0xff] }
  0xf6   : > { %v6449_v11 = vadd.f32 %v937_v22, %v11014_v32  ;;  %v6452_v61 = vadd.f32 %v936_v36, %v11016_v0  ;;  %v6455_v3 = vadd.f32 %v953_v40, %v11017_v38  ;;  %v954_v60 = vmul.f32 %v6257_v48, %v5817_v55  ;;  %v11023_v32 = vld [vmem:[#allocation62_spill] sm:$0xff]  ;;  %v11024_v36 = vld [vmem:[#allocation69_spill] sm:$0xff] }
  0xf7   : > { %11010 = vst [vmem:[#allocation55_spill] sm:$0xff] %v6437_v30  ;;  %v6460_v62 = vadd.f32 %v907_v15, %v6088_v1  ;;  %v6463_v19 = vadd.f32 %v906_v49, %v6092_v33  ;;  %v6466_v39 = vadd.f32 %v923_v7, %v11021_v13  ;;  %v6469_v22 = vadd.f32 %v952_v14, %v11023_v32  ;;  %v11026_v38 = vld [vmem:[#allocation70_spill] sm:$0xff]  ;;  %v11028_v1 = vld [vmem:[#allocation71_spill] sm:$0xff]  ;;  %v11030_v14 = vld [vmem:[#allocation72_spill] sm:$0xff] }
  0xf8   : > { %v6403_v42 = vpop.permute.xlu1 %1473  ;;  %v6405_v21 = vpop.permute.xlu0 %1477  ;;  %11015 = vst [vmem:[#allocation59_spill] sm:$0xff] %v6449_v11  ;;  %11018 = vst [vmem:[#allocation60_spill] sm:$0xff] %v6455_v3  ;;  %v909_v0 = vmul.f32 %v6308_v9, %v5795_v47  ;;  %v6474_v40 = vadd.f32 %v922_v37, %v11024_v36  ;;  %v6477_v48 = vadd.f32 %v939_v59, %v11026_v38  ;;  %v11034_v38 = vld [vmem:[#allocation73_spill] sm:$0xff]  ;;  %v11038_v3 = vld [vmem:[#allocation78_spill] sm:$0xff] }
  0xf9   : > { %11004 = vst [vmem:[#allocation52_spill] sm:$0xff] %v6403_v42  ;;  %11005 = vst [vmem:[#allocation117_spill] sm:$0xff] %v6405_v21  ;;  %v6480_v15 = vadd.f32 %v938_v43, %v11028_v1  ;;  %v908_v33 = vmul.f32 %v6306_v27, %v5795_v47  ;;  %v925_v49 = vmul.f32 %v6308_v9, %v5811_v53  ;;  %v11040_v11 = vld [vmem:[#allocation79_spill] sm:$0xff] }
  0xfa   : > { %11019 = vst [vmem:[#allocation61_spill] sm:$0xff] %v6460_v62  ;;  %11020 = vst [vmem:[#allocation118_spill] sm:$0xff] %v6463_v19  ;;  %v924_v7 = vmul.f32 %v6306_v27, %v5811_v53  ;;  %v6489_v13 = vadd.f32 %v955_v4, %v11030_v14  ;;  %v941_v59 = vmul.f32 %v6308_v9, %v5814_v54 }
  0xfb   : > { %11022 = vst [vmem:[#allocation68_spill] sm:$0xff] %v6466_v39  ;;  %11025 = vst [vmem:[#allocation62_spill] sm:$0xff] %v6474_v40  ;;  %v940_v43 = vmul.f32 %v6306_v27, %v5814_v54  ;;  %v957_v36 = vmul.f32 %v6308_v9, %v5817_v55  ;;  %v6502_v1 = vadd.f32 %v954_v60, %v11034_v38  ;;  %v11036_v39 = vld [vmem:[#allocation74_spill] sm:$0xff] }
  0xfc   : > { %v6444_v26 = vpop.permute.xlu1 %1481  ;;  %v6446_v5 = vpop.permute.xlu0 %1489  ;;  %11027 = vst [vmem:[#allocation69_spill] sm:$0xff] %v6477_v48  ;;  %11029 = vst [vmem:[#allocation70_spill] sm:$0xff] %v6480_v15  ;;  %v911_v4 = vmul.f32 %v6347_v8, %v5795_v47  ;;  %v910_v14 = vmul.f32 %v6345_v50, %v5795_v47  ;;  %v956_v48 = vmul.f32 %v6306_v27, %v5817_v55 }
  0xfd   : > { %11012 = vst [vmem:[#allocation56_spill] sm:$0xff] %v6444_v26  ;;  %11013 = vst [vmem:[#allocation58_spill] sm:$0xff] %v6446_v5  ;;  %v6513_v62 = vadd.f32 %v909_v0, %v11036_v39  ;;  %v926_v9 = vmul.f32 %v6345_v50, %v5811_v53  ;;  %v943_v60 = vmul.f32 %v6347_v8, %v5814_v54 }
  0xfe   : > { %11031 = vst [vmem:[#allocation71_spill] sm:$0xff] %v6489_v13  ;;  %11035 = vst [vmem:[#allocation73_spill] sm:$0xff] %v6502_v1  ;;  %v927_v13 = vmul.f32 %v6347_v8, %v5811_v53  ;;  %v942_v38 = vmul.f32 %v6345_v50, %v5814_v54  ;;  %v6522_v47 = vadd.f32 %v908_v33, %v11038_v3  ;;  %v11042_v1 = vld [vmem:[#allocation80_spill] sm:$0xff]  ;;  %v11049_v3 = vld [vmem:[#allocation85_spill] sm:$0xff] }
  0xff   : > { %11037 = vst [vmem:[#allocation74_spill] sm:$0xff] %v6513_v62  ;;  %v6525_v30 = vadd.f32 %v925_v49, %v11040_v11  ;;  %v6528_v27 = vadd.f32 %v924_v7, %v11042_v1  ;;  %v959_v39 = vmul.f32 %v6347_v8, %v5817_v55  ;;  %v11046_v62 = vld [vmem:[#allocation81_spill] sm:$0xff]  ;;  %v11048_v54 = vld [vmem:[#allocation84_spill] sm:$0xff]  ;;  %v6543_v33 = vadd.f32 %v957_v36, %v11049_v3  ;;  %v11052_v49 = vld [vmem:[#allocation43_spill] sm:$0xff] }
 0x100   : > { %v6491_v37 = vpop.permute.xlu1 %1485  ;;  %v6493_v32 = vpop.permute.xlu0 %1497  ;;  %11039 = vst [vmem:[#allocation78_spill] sm:$0xff] %v6522_v47  ;;  %v6537_v15 = vadd.f32 %v941_v59, %v11046_v62  ;;  %v6540_v40 = vadd.f32 %v940_v43, %v11048_v54  ;;  %v11051_v11 = vld [vmem:[#allocation28_spill] sm:$0xff]  ;;  %v11055_v8 = vld [vmem:[#allocation89_spill] sm:$0xff]  ;;  %v11058_v62 = vld [vmem:[#allocation86_spill] sm:$0xff] }
 0x101   : > { %11032 = vst [vmem:[#allocation72_spill] sm:$0xff] %v6491_v37  ;;  %11033 = vst [vmem:[#allocation119_spill] sm:$0xff] %v6493_v32  ;;  %v961_v7 = vmul.f32 %v11052_v49, %v11051_v11  ;;  %v11053_v1 = vld [vmem:[#allocation88_spill] sm:$0xff]  ;;  %v6557_v59 = vadd.f32 %v956_v48, %v11058_v62  ;;  %v11059_v43 = vld [vmem:[#allocation25_spill] sm:$0xff] }
 0x102   : > { %11041 = vst [vmem:[#allocation79_spill] sm:$0xff] %v6525_v30  ;;  %11043 = vst [vmem:[#allocation80_spill] sm:$0xff] %v6528_v27  ;;  %v6548_v30 = vadd.f32 %v911_v4, %v11053_v1  ;;  %v6551_v27 = vadd.f32 %v910_v14, %v11055_v8  ;;  %v11056_v47 = vld [vmem:[#allocation92_spill] sm:$0xff]  ;;  %v1536_v54 = vmul.f32 %v6403_v42, %v11059_v43  ;;  %v11060_v36 = vld [vmem:[#allocation93_spill] sm:$0xff] }
 0x103   : > { %11047 = vst [vmem:[#allocation81_spill] sm:$0xff] %v6537_v15  ;;  %11050 = vst [vmem:[#allocation84_spill] sm:$0xff] %v6543_v33  ;;  %v6554_v19 = vadd.f32 %v927_v13, %v11056_v47  ;;  %v6562_v3 = vadd.f32 %v926_v9, %v11060_v36  ;;  %v11062_v33 = vld [vmem:[#allocation94_spill] sm:$0xff]  ;;  %v11064_v4 = vld [vmem:[#allocation95_spill] sm:$0xff]  ;;  %v1537_v8 = vmul.f32 %v6405_v21, %v11059_v43 }
 0x104   : > { %v6532_v0 = vpop.permute.xlu1 %1493  ;;  %v6534_v53 = vpop.permute.xlu0 %1505  ;;  %11054 = vst [vmem:[#allocation85_spill] sm:$0xff] %v6548_v30  ;;  %v6565_v49 = vadd.f32 %v943_v60, %v11062_v33  ;;  %v6568_v1 = vadd.f32 %v942_v38, %v11064_v4  ;;  %v11066_v13 = vld [vmem:[#allocation26_spill] sm:$0xff]  ;;  %v11067_v47 = vld [vmem:[#allocation96_spill] sm:$0xff]  ;;  %v11071_v60 = vld [vmem:[#allocation27_spill] sm:$0xff] }
 0x105   : > { %11044 = vst [vmem:[#allocation120_spill] sm:$0xff] %v6532_v0  ;;  %11045 = vst [vmem:[#allocation121_spill] sm:$0xff] %v6534_v53  ;;  %v1553_v14 = vmul.f32 %v6405_v21, %v11066_v13  ;;  %v1552_v48 = vmul.f32 %v6403_v42, %v11066_v13  ;;  %v6577_v62 = vadd.f32 %v959_v39, %v11067_v47  ;;  %v11072_v4 = vld [vmem:[#allocation32_spill] sm:$0xff] }
 0x106   : > { %11057 = vst [vmem:[#allocation88_spill] sm:$0xff] %v6554_v19  ;;  %11061 = vst [vmem:[#allocation89_spill] sm:$0xff] %v6562_v3  ;;  %v1569_v38 = vmul.f32 %v6405_v21, %v11071_v60  ;;  %v1568_v33 = vmul.f32 %v6403_v42, %v11071_v60  ;;  %v11073_v19 = vld [vmem:[#allocation41_spill] sm:$0xff]  ;;  %v6594_v39 = vmul.f32 %v6345_v50, %v5817_v55  ;;  %v11078_v3 = vld [vmem:[#allocation103_spill] sm:$0xff] }
 0x107   : > { %11063 = vst [vmem:[#allocation92_spill] sm:$0xff] %v6565_v49  ;;  %11065 = vst [vmem:[#allocation86_spill] sm:$0xff] %v6568_v1  ;;  %v1585_v49 = vmul.f32 %v6405_v21, %v11072_v4  ;;  %v6590_v30 = vadd.f32 %v961_v7, %v11073_v19  ;;  %v6598_v47 = vmul.f32 %v6016_v28, %v11051_v11 }
 0x108   : > { %11068 = vst [vmem:[#allocation25_spill] sm:$0xff] %v6577_v62  ;;  %v6579_v9 = vpop.permute.xlu1 %1501  ;;  %v6581_v36 = vpop.permute.xlu0 %1513  ;;  %v11075_v62 = vld [vmem:[#allocation44_spill] sm:$0xff]  ;;  %v6606_v1 = vmul.f32 %v6084_v63, %v11051_v11  ;;  %v6609_v21 = vadd.f32 %v1536_v54, %v11078_v3  ;;  %v1538_v19 = vmul.f32 %v6444_v26, %v11059_v43  ;;  %v1540_v55 = vmul.f32 %v6446_v5, %v11059_v43 }
 0x109   : > { %11069 = vst [vmem:[#allocation93_spill] sm:$0xff] %v6579_v9  ;;  %11070 = vst [vmem:[#allocation94_spill] sm:$0xff] %v6581_v36  ;;  %v6602_v15 = vmul.f32 %v11075_v62, %v11051_v11  ;;  %v1584_v7 = vmul.f32 %v6403_v42, %v11072_v4  ;;  %v6618_v28 = vadd.f32 %v1537_v8, %v6262_v29 }
 0x10a   : > { %11074 = vst [vmem:[#allocation95_spill] sm:$0xff] %v6598_v47  ;;  %11077 = vst [vmem:[#allocation96_spill] sm:$0xff] %v6606_v1  ;;  %v6621_v62 = vadd.f32 %v1553_v14, %v6265_v35  ;;  %v6624_v63 = vadd.f32 %v1552_v48, %v6268_v25  ;;  %v1554_v54 = vmul.f32 %v6444_v26, %v11066_v13 }
 0x10b   : > { %11076 = vst [vmem:[#allocation26_spill] sm:$0xff] %v6602_v15  ;;  %v1556_v1 = vmul.f32 %v6446_v5, %v11066_v13  ;;  %v6635_v11 = vadd.f32 %v1569_v38, %v6273_v51  ;;  %v6638_v29 = vadd.f32 %v1568_v33, %v6276_v31  ;;  %v6641_v35 = vadd.f32 %v1585_v49, %v6279_v34 }
 0x10c   : > { %v6628_v3 = vpop.permute.xlu1 %1509  ;;  %v6630_v50 = vpop.permute.xlu0 %1521  ;;  %v1570_v25 = vmul.f32 %v6444_v26, %v11071_v60  ;;  %v1572_v8 = vmul.f32 %v6446_v5, %v11071_v60  ;;  %v1586_v14 = vmul.f32 %v6444_v26, %v11072_v4  ;;  %v1588_v48 = vmul.f32 %v6446_v5, %v11072_v4 }
 0x10d   : > { %11079 = vst [vmem:[#allocation27_spill] sm:$0xff] %v6628_v3  ;;  %11080 = vst [vmem:[#allocation32_spill] sm:$0xff] %v6630_v50  ;;  %v1539_v51 = vmul.f32 %v6491_v37, %v11059_v43  ;;  %v6654_v31 = vadd.f32 %v1538_v19, %v6287_v10  ;;  %v6657_v34 = vadd.f32 %v1540_v55, %v6350_v17 }
 0x10e   : > { %11081 = vst [vmem:[#allocation41_spill] sm:$0xff] %v6641_v35  ;;  %v6660_v49 = vadd.f32 %v1584_v7, %v6293_v6  ;;  %v1542_v38 = vmul.f32 %v6493_v32, %v11059_v43  ;;  %v1555_v33 = vmul.f32 %v6491_v37, %v11066_v13  ;;  %v6667_v5 = vadd.f32 %v1554_v54, %v6298_v56 }
 0x10f   : > { %v1558_v26 = vmul.f32 %v6493_v32, %v11066_v13  ;;  %v6676_v17 = vadd.f32 %v1556_v1, %v6356_v46  ;;  %v1571_v6 = vmul.f32 %v6491_v37, %v11071_v60  ;;  %v1574_v55 = vmul.f32 %v6493_v32, %v11071_v60 }
 0x110   : > { %v6671_v10 = vpop.permute.xlu1 %1517  ;;  %v6673_v19 = vpop.permute.xlu0 %1529  ;;  %v1587_v56 = vmul.f32 %v6491_v37, %v11072_v4  ;;  %v6685_v7 = vadd.f32 %v1570_v25, %v6304_v58  ;;  %v6688_v54 = vadd.f32 %v1572_v8, %v6364_v41  ;;  %v6691_v15 = vadd.f32 %v1586_v14, %v6326_v16  ;;  %v11096_v37 = vld [vmem:[#allocation112_spill] sm:$0xff] }
 0x111   : > { %11082 = vst [vmem:[#allocation103_spill] sm:$0xff] %v6671_v10  ;;  %11083 = vst [vmem:[#allocation122_spill] sm:$0xff] %v6673_v19  ;;  %v6694_v46 = vadd.f32 %v1588_v48, %v6381_v44  ;;  %v1795_v1 = vadd.f32 %v1539_v51, %v6284_v52  ;;  %v1541_v42 = vmul.f32 %v6532_v0, %v11059_v43  ;;  %v11091_v48 = vld [vmem:[#allocation108_spill] sm:$0xff] }
 0x112   : > { %11084 = vst [vmem:[#allocation123_spill] sm:$0xff] %v6685_v7  ;;  %11085 = vst [vmem:[#allocation124_spill] sm:$0xff] %v6688_v54  ;;  %v1544_v47 = vmul.f32 %v6534_v53, %v11059_v43  ;;  %v1590_v58 = vmul.f32 %v6493_v32, %v11072_v4  ;;  %v6704_v41 = vadd.f32 %v1542_v38, %v6375_v18 }
 0x113   : > { %11086 = vst [vmem:[#allocation125_spill] sm:$0xff] %v6691_v15  ;;  %11087 = vst [vmem:[#allocation126_spill] sm:$0xff] %v6694_v46  ;;  %v6707_v16 = vadd.f32 %v1555_v33, %v6290_v20  ;;  %v1557_v44 = vmul.f32 %v6532_v0, %v11066_v13  ;;  %v6712_v52 = vadd.f32 %v1558_v26, %v6386_v2  ;;  %v11093_v33 = vld [vmem:[#allocation29_spill] sm:$0xff] }
 0x114   : > { %v6714_v25 = vpop.permute.xlu1 %1525  ;;  %v1560_v8 = vmul.f32 %v6534_v53, %v11066_v13  ;;  %v6719_v14 = vadd.f32 %v1571_v6, %v6301_v12  ;;  %v6722_v18 = vadd.f32 %v1574_v55, %v6392_v24  ;;  %v6725_v20 = vadd.f32 %v1587_v56, %v11091_v48  ;;  %v11094_v6 = vld [vmem:[#allocation109_spill] sm:$0xff] }
 0x115   : > { %11088 = vst [vmem:[#allocation127_spill] sm:$0xff] %v6712_v52  ;;  %11089 = vst [vmem:[#allocation128_spill] sm:$0xff] %v6714_v25  ;;  %v6727_v51 = vpop.permute.xlu0 %2113  ;;  %v1573_v2 = vmul.f32 %v6532_v0, %v11071_v60  ;;  %v1576_v26 = vmul.f32 %v6534_v53, %v11071_v60  ;;  %v1589_v38 = vmul.f32 %v6532_v0, %v11072_v4  ;;  %v11120_v52 = vld [vmem:[#allocation54_spill] sm:$0xff] }
 0x116   : > { %11090 = vst [vmem:[#allocation129_spill] sm:$0xff] %v6722_v18  ;;  %11092 = vst [vmem:[#allocation108_spill] sm:$0xff] %v6727_v51  ;;  %v1592_v12 = vmul.f32 %v6534_v53, %v11072_v4  ;;  %v2176_v24 = vmul.f32 %v6727_v51, %v11093_v33  ;;  %v1797_v55 = vadd.f32 %v1541_v42, %v11094_v6 }
 0x117   : > { %v6741_v56 = vadd.f32 %v1544_v47, %v6434_v23  ;;  %v6744_v48 = vadd.f32 %v1590_v58, %v6414_v57  ;;  %v1543_v32 = vmul.f32 %v6579_v9, %v11059_v43  ;;  %v1546_v0 = vmul.f32 %v6581_v36, %v11059_v43 }
 0x118   : > { %v6751_v46 = vadd.f32 %v1557_v44, %v11096_v37  ;;  %v1559_v53 = vmul.f32 %v6579_v9, %v11066_v13  ;;  %v6755_v15 = vpop.permute.xlu1 %1533  ;;  %v2432_v23 = vadd.f32 %v2176_v24, %v6609_v21  ;;  %v6759_v42 = vadd.f32 %v1560_v8, %v6440_v45  ;;  %v11100_v37 = vld [vmem:[#allocation113_spill] sm:$0xff] }
 0x119   : > { %11095 = vst [vmem:[#allocation29_spill] sm:$0xff] %v6744_v48  ;;  %11097 = vst [vmem:[#allocation109_spill] sm:$0xff] %v6755_v15  ;;  %v1562_v57 = vmul.f32 %v6581_v36, %v11066_v13  ;;  %v1575_v47 = vmul.f32 %v6579_v9, %v11071_v60  ;;  %v6765_v58 = vpop.permute.xlu0 %2125  ;;  %v6768_v44 = vadd.f32 %v1573_v2, %v11100_v37  ;;  %v11102_v48 = vld [vmem:[#allocation114_spill] sm:$0xff]  ;;  %v11105_v37 = vld [vmem:[#allocation115_spill] sm:$0xff] }
 0x11a   : > { %11098 = vst [vmem:[#allocation112_spill] sm:$0xff] %v6759_v42  ;;  %11099 = vst [vmem:[#allocation130_spill] sm:$0xff] %v6765_v58  ;;  %v6771_v6 = vadd.f32 %v1576_v26, %v6452_v61  ;;  %v6774_v35 = vadd.f32 %v1589_v38, %v11102_v48  ;;  %v6777_v45 = vadd.f32 %v1592_v12, %v6469_v22  ;;  %v2688_v21 = vmax.f32 %v2432_v23, 0.0  ;;  %v11106_v61 = vld [vmem:[#allocation118_spill] sm:$0xff]  ;;  %v11107_v38 = vld [vmem:[#allocation116_spill] sm:$0xff] }
 0x11b   : > { %v2179_v8 = vmul.f32 %v6765_v58, %v11093_v33  ;;  %v1578_v24 = vmul.f32 %v6581_v36, %v11071_v60  ;;  %v1591_v2 = vmul.f32 %v6579_v9, %v11072_v4  ;;  %v1799_v18 = vadd.f32 %v1543_v32, %v11105_v37  ;;  %v11110_v9 = vld [vmem:[#allocation48_spill] sm:$0xff]  ;;  %v11118_v42 = vld [vmem:[#allocation73_spill] sm:$0xff] }
 0x11c   : > { %11101 = vst [vmem:[#allocation113_spill] sm:$0xff] %v6771_v6  ;;  %11103 = vst [vmem:[#allocation114_spill] sm:$0xff] %v6774_v35  ;;  %v6787_v26 = vadd.f32 %v1546_v0, %v11106_v61  ;;  %v6790_v48 = vadd.f32 %v1559_v53, %v11107_v38  ;;  %v1594_v22 = vmul.f32 %v6581_v36, %v11072_v4  ;;  %2946 = vadd.xlane.f32.xlu1 %v2688_v21  ;;  %v11116_v38 = vld [vmem:[#allocation51_spill] sm:$0xff] }
 0x11d   : > { %11104 = vst [vmem:[#allocation131_spill] sm:$0xff] %v6777_v45  ;;  %v2435_v12 = vadd.f32 %v2179_v8, %v1795_v1  ;;  %v1545_v23 = vmul.f32 %v6628_v3, %v11059_v43  ;;  %v11108_v45 = vld [vmem:[#allocation62_spill] sm:$0xff]  ;;  %v6800_v6 = vadd.f32 %v1575_v47, %v11110_v9  ;;  %v6802_v32 = vpop.permute.xlu1 %2117  ;;  %v6804_v0 = vpop.permute.xlu0 %2133  ;;  %v1548_v53 = vmul.f32 %v6630_v50, %v11059_v43 }
 0x11e   : > { %v6797_v35 = vadd.f32 %v1562_v57, %v11108_v45  ;;  %11112 = vst [vmem:[#allocation116_spill] sm:$0xff] %v6802_v32  ;;  %11113 = vst [vmem:[#allocation62_spill] sm:$0xff] %v6804_v0  ;;  %v1561_v21 = vmul.f32 %v6628_v3, %v11066_v13  ;;  %v1564_v1 = vmul.f32 %v6630_v50, %v11066_v13  ;;  %v11114_v8 = vld [vmem:[#allocation70_spill] sm:$0xff] }
 0x11f   : > { %11111 = vst [vmem:[#allocation118_spill] sm:$0xff] %v6800_v6  ;;  %v1577_v57 = vmul.f32 %v6628_v3, %v11071_v60  ;;  %v2691_v45 = vmax.f32 %v2435_v12, 0.0  ;;  %v2177_v9 = vmul.f32 %v6802_v32, %v11093_v33  ;;  %v2181_v47 = vmul.f32 %v6804_v0, %v11093_v33 }
 0x120   : > { %11109 = vst [vmem:[#allocation115_spill] sm:$0xff] %v6797_v35  ;;  %v6819_v37 = vadd.f32 %v1578_v24, %v11114_v8  ;;  %v1580_v61 = vmul.f32 %v6630_v50, %v11071_v60  ;;  %v6824_v36 = vadd.f32 %v1591_v2, %v11116_v38  ;;  %v1593_v35 = vmul.f32 %v6628_v3, %v11072_v4  ;;  %v11123_v2 = vld [vmem:[#allocation78_spill] sm:$0xff]  ;;  %v11124_v3 = vld [vmem:[#allocation55_spill] sm:$0xff] }
 0x121   : > { %v6829_v12 = vadd.f32 %v1594_v22, %v11118_v42  ;;  %2952 = vadd.xlane.f32.xlu1 %v2691_v45  ;;  %v2433_v54 = vadd.f32 %v2177_v9, %v6618_v28  ;;  %v2437_v6 = vadd.f32 %v2181_v47, %v1797_v55  ;;  %v1801_v7 = vadd.f32 %v1545_v23, %v11120_v52  ;;  %v6835_v8 = vpop.permute.xlu1 %2121  ;;  %v11125_v42 = vld [vmem:[#allocation80_spill] sm:$0xff]  ;;  %v11127_v28 = vld [vmem:[#allocation59_spill] sm:$0xff] }
 0x122   : > { %11115 = vst [vmem:[#allocation48_spill] sm:$0xff] %v6819_v37  ;;  %11117 = vst [vmem:[#allocation70_spill] sm:$0xff] %v6824_v36  ;;  %v1596_v24 = vmul.f32 %v6630_v50, %v11072_v4  ;;  %v6837_v37 = vpop.permute.xlu0 %2141  ;;  %v6840_v38 = vadd.f32 %v1548_v53, %v11123_v2  ;;  %v6843_v36 = vadd.f32 %v1561_v21, %v11124_v3 }
 0x123   : > { %11119 = vst [vmem:[#allocation51_spill] sm:$0xff] %v6829_v12  ;;  %11121 = vst [vmem:[#allocation73_spill] sm:$0xff] %v6835_v8  ;;  %v6846_v22 = vadd.f32 %v1564_v1, %v11125_v42  ;;  %v6849_v55 = vadd.f32 %v1577_v57, %v11127_v28  ;;  %v2689_v52 = vmax.f32 %v2433_v54, 0.0  ;;  %v2693_v23 = vmax.f32 %v2437_v6, 0.0  ;;  %v11129_v1 = vld [vmem:[#allocation60_spill] sm:$0xff]  ;;  %v11135_v12 = vld [vmem:[#allocation34_spill] sm:$0xff] }
 0x124   : > { %11122 = vst [vmem:[#allocation54_spill] sm:$0xff] %v6837_v37  ;;  %v2178_v45 = vmul.f32 %v6835_v8, %v11093_v33  ;;  %v2183_v9 = vmul.f32 %v6837_v37, %v11093_v33  ;;  %v1547_v53 = vmul.f32 %v6671_v10, %v11059_v43  ;;  %v1550_v3 = vmul.f32 %v6673_v19, %v11059_v43 }
 0x125   : > { %11126 = vst [vmem:[#allocation78_spill] sm:$0xff] %v6846_v22  ;;  %v6860_v21 = vadd.f32 %v1580_v61, %v6540_v40  ;;  %v6863_v57 = vadd.f32 %v1593_v35, %v11129_v1  ;;  %2948 = vadd.xlane.f32.xlu0 %v2689_v52  ;;  %2956 = vadd.xlane.f32.xlu1 %v2693_v23  ;;  %v6868_v2 = vpop.permute.xlu1 %2129  ;;  %v11151_v22 = vld [vmem:[#allocation31_spill] sm:$0xff] }
 0x126   : > { %v2434_v54 = vadd.f32 %v2178_v45, %v6654_v31  ;;  %v2439_v6 = vadd.f32 %v2183_v9, %v1799_v18  ;;  %v1563_v47 = vmul.f32 %v6671_v10, %v11066_v13  ;;  %11131 = vst [vmem:[#allocation59_spill] sm:$0xff] %v6868_v2  ;;  %v6870_v42 = vpop.permute.xlu0 %2149  ;;  %v1566_v28 = vmul.f32 %v6673_v19, %v11066_v13  ;;  %v11134_v45 = vld [vmem:[#allocation61_spill] sm:$0xff] }
 0x127   : > { %11128 = vst [vmem:[#allocation55_spill] sm:$0xff] %v6860_v21  ;;  %11130 = vst [vmem:[#allocation80_spill] sm:$0xff] %v6863_v57  ;;  %v1579_v40 = vmul.f32 %v6671_v10, %v11071_v60  ;;  %v1582_v35 = vmul.f32 %v6673_v19, %v11071_v60  ;;  %v6879_v61 = vadd.f32 %v1596_v24, %v6557_v59  ;;  %v11136_v19 = vld [vmem:[#allocation117_spill] sm:$0xff] }
 0x128   : > { %11132 = vst [vmem:[#allocation60_spill] sm:$0xff] %v6870_v42  ;;  %v2690_v31 = vmax.f32 %v2434_v54, 0.0  ;;  %v2695_v18 = vmax.f32 %v2439_v6, 0.0  ;;  %v2180_v52 = vmul.f32 %v6868_v2, %v11093_v33  ;;  %v2185_v23 = vmul.f32 %v6870_v42, %v11093_v33  ;;  %v11137_v6 = vld [vmem:[#allocation68_spill] sm:$0xff] }
 0x129   : > { %11133 = vst [vmem:[#allocation132_spill] sm:$0xff] %v6879_v61  ;;  %v1803_v9 = vadd.f32 %v1547_v53, %v11134_v45  ;;  %v6887_v1 = vadd.f32 %v1550_v3, %v6551_v27  ;;  %v1595_v50 = vmul.f32 %v6671_v10, %v11072_v4  ;;  %v1601_v59 = vmul.f32 %v11136_v19, %v11135_v12  ;;  %v6897_v57 = vpop.permute.xlu1 %2137  ;;  %v11140_v3 = vld [vmem:[#allocation89_spill] sm:$0xff] }
 0x12a   : > { %2950 = vadd.xlane.f32.xlu0 %v2690_v31  ;;  %2960 = vadd.xlane.f32.xlu1 %v2695_v18  ;;  %v2436_v24 = vadd.f32 %v2180_v52, %v6657_v34  ;;  %v2441_v54 = vadd.f32 %v2185_v23, %v1801_v7  ;;  %v6895_v61 = vadd.f32 %v1563_v47, %v11137_v6  ;;  %v6899_v53 = vpop.permute.xlu0 %2157  ;;  %v11142_v10 = vld [vmem:[#allocation69_spill] sm:$0xff]  ;;  %v11143_v31 = vld [vmem:[#allocation86_spill] sm:$0xff] }
 0x12b   : > { %11138 = vst [vmem:[#allocation61_spill] sm:$0xff] %v6897_v57  ;;  %11139 = vst [vmem:[#allocation68_spill] sm:$0xff] %v6899_v53  ;;  %v1549_v27 = vmul.f32 %v6714_v25, %v11059_v43  ;;  %v6904_v45 = vadd.f32 %v1566_v28, %v11140_v3  ;;  %v6907_v19 = vadd.f32 %v1579_v40, %v11142_v10  ;;  %v11145_v23 = vld [vmem:[#allocation30_spill] sm:$0xff]  ;;  %v11146_v40 = vld [vmem:[#allocation71_spill] sm:$0xff] }
 0x12c   : > { %v6910_v18 = vadd.f32 %v1582_v35, %v11143_v31  ;;  %v2692_v34 = vmax.f32 %v2436_v24, 0.0  ;;  %v2697_v7 = vmax.f32 %v2441_v54, 0.0  ;;  %v2182_v47 = vmul.f32 %v6897_v57, %v11093_v33 }
 0x12d   : > { %11141 = vst [vmem:[#allocation89_spill] sm:$0xff] %v6904_v45  ;;  %v2187_v52 = vmul.f32 %v6899_v53, %v11093_v33  ;;  %v2192_v6 = vmul.f32 %v6727_v51, %v11145_v23  ;;  %v1565_v28 = vmul.f32 %v6714_v25, %v11066_v13  ;;  %v1581_v10 = vmul.f32 %v6714_v25, %v11071_v60  ;;  %v6929_v31 = vpop.permute.xlu1 %2145 }
 0x12e   : > { %11144 = vst [vmem:[#allocation69_spill] sm:$0xff] %v6910_v18  ;;  %v6923_v35 = vadd.f32 %v1595_v50, %v11146_v40  ;;  %2954 = vadd.xlane.f32.xlu0 %v2692_v34  ;;  %2964 = vadd.xlane.f32.xlu1 %v2697_v7  ;;  %v2438_v24 = vadd.f32 %v2182_v47, %v6704_v41  ;;  %11148 = vst [vmem:[#allocation30_spill] sm:$0xff] %v6929_v31  ;;  %v6931_v12 = vpop.permute.xlu0 %2165  ;;  %v11150_v18 = vld [vmem:[#allocation74_spill] sm:$0xff] }
 0x12f   : > { %v2443_v54 = vadd.f32 %v2187_v52, %v1803_v9  ;;  %v6927_v3 = vadd.f32 %v1601_v59, %v6590_v30  ;;  %11149 = vst [vmem:[#allocation71_spill] sm:$0xff] %v6931_v12  ;;  %v1805_v21 = vadd.f32 %v1549_v27, %v11150_v18  ;;  %v1551_v45 = vmul.f32 %v6755_v15, %v11059_v43  ;;  %v11152_v27 = vld [vmem:[#allocation79_spill] sm:$0xff]  ;;  %v11153_v43 = vld [vmem:[#allocation81_spill] sm:$0xff] }
 0x130   : > { %v2208_v50 = vmul.f32 %v6727_v51, %v11151_v22  ;;  %v1597_v34 = vmul.f32 %v6714_v25, %v11072_v4  ;;  %v2694_v41 = vmax.f32 %v2438_v24, 0.0  ;;  %v2184_v30 = vmul.f32 %v6929_v31, %v11093_v33  ;;  %v11154_v52 = vld [vmem:[#allocation33_spill] sm:$0xff] }
 0x131   : > { %11147 = vst [vmem:[#allocation86_spill] sm:$0xff] %v6927_v3  ;;  %v2699_v9 = vmax.f32 %v2443_v54, 0.0  ;;  %v2189_v59 = vmul.f32 %v6931_v12, %v11093_v33  ;;  %v6945_v7 = vadd.f32 %v2192_v6, %v6624_v63  ;;  %v6948_v18 = vadd.f32 %v1565_v28, %v11152_v27  ;;  %v6958_v3 = vpop.permute.xlu1 %2153  ;;  %v11157_v6 = vld [vmem:[#allocation85_spill] sm:$0xff] }
 0x132   : > { %v6951_v47 = vadd.f32 %v1581_v10, %v11153_v43  ;;  %v2224_v40 = vmul.f32 %v6727_v51, %v11154_v52  ;;  %2958 = vadd.xlane.f32.xlu0 %v2694_v41  ;;  %v2440_v24 = vadd.f32 %v2184_v30, %v6741_v56  ;;  %v1567_v25 = vmul.f32 %v6755_v15, %v11066_v13  ;;  %v6960_v63 = vpop.permute.xlu0 %2173 }
 0x133   : > { %2968 = vadd.xlane.f32.xlu1 %v2699_v9  ;;  %v2445_v54 = vadd.f32 %v2189_v59, %v1805_v21  ;;  %11155 = vst [vmem:[#allocation74_spill] sm:$0xff] %v6958_v3  ;;  %11156 = vst [vmem:[#allocation31_spill] sm:$0xff] %v6960_v63  ;;  %v1807_v28 = vadd.f32 %v1551_v45, %v11157_v6  ;;  %v2193_v10 = vmul.f32 %v6802_v32, %v11145_v23  ;;  %v11159_v59 = vld [vmem:[#allocation84_spill] sm:$0xff] }
 0x134   : > { %v2195_v27 = vmul.f32 %v6765_v58, %v11145_v23  ;;  %v1583_v41 = vmul.f32 %v6755_v15, %v11071_v60  ;;  %v2696_v56 = vmax.f32 %v2440_v24, 0.0  ;;  %v2186_v13 = vmul.f32 %v6958_v3, %v11093_v33 }
 0x135   : > { %v2701_v21 = vmax.f32 %v2445_v54, 0.0  ;;  %v2191_v9 = vmul.f32 %v6960_v63, %v11093_v33  ;;  %v6974_v30 = vadd.f32 %v2208_v50, %v6638_v29  ;;  %v6977_v45 = vadd.f32 %v2224_v40, %v6660_v49  ;;  %v6988_v50 = vpop.permute.xlu1 %2161  ;;  %v11161_v40 = vld [vmem:[#allocation88_spill] sm:$0xff] }
 0x136   : > { %v6980_v43 = vadd.f32 %v1597_v34, %v11159_v59  ;;  %v1599_v60 = vmul.f32 %v6755_v15, %v11072_v4  ;;  %2962 = vadd.xlane.f32.xlu0 %v2696_v56  ;;  %v2442_v24 = vadd.f32 %v2186_v13, %v6787_v26  ;;  %v2211_v29 = vmul.f32 %v6765_v58, %v11151_v22  ;;  %v11162_v56 = vld [vmem:[#allocation92_spill] sm:$0xff]  ;;  %v11164_v15 = vld [vmem:[#allocation25_spill] sm:$0xff] }
 0x137   : > { %11158 = vst [vmem:[#allocation79_spill] sm:$0xff] %v6977_v45  ;;  %2972 = vadd.xlane.f32.xlu1 %v2701_v21  ;;  %v2447_v54 = vadd.f32 %v2191_v9, %v1807_v28  ;;  %11160 = vst [vmem:[#allocation81_spill] sm:$0xff] %v6988_v50  ;;  %v2451_v49 = vadd.f32 %v2195_v27, %v6707_v16  ;;  %v2197_v34 = vmul.f32 %v6804_v0, %v11145_v23 }
 0x138   : > { %v6994_v59 = vadd.f32 %v1567_v25, %v11161_v40  ;;  %v6997_v21 = vadd.f32 %v1583_v41, %v11162_v56  ;;  %v2698_v26 = vmax.f32 %v2442_v24, 0.0  ;;  %v2188_v13 = vmul.f32 %v6988_v50, %v11093_v33  ;;  %v11171_v56 = vld [vmem:[#allocation124_spill] sm:$0xff] }
 0x139   : > { %v2703_v28 = vmax.f32 %v2447_v54, 0.0  ;;  %v2449_v9 = vadd.f32 %v2193_v10, %v6621_v62  ;;  %v2194_v6 = vmul.f32 %v6835_v8, %v11145_v23  ;;  %v2209_v16 = vmul.f32 %v6802_v32, %v11151_v22  ;;  %v7017_v54 = vpop.permute.xlu1 %2169 }
 0x13a   : > { %v2213_v25 = vmul.f32 %v6804_v0, %v11151_v22  ;;  %v2227_v27 = vmul.f32 %v6765_v58, %v11154_v52  ;;  %2966 = vadd.xlane.f32.xlu0 %v2698_v26  ;;  %v2444_v41 = vadd.f32 %v2188_v13, %v6840_v38  ;;  %v2199_v24 = vmul.f32 %v6837_v37, %v11145_v23  ;;  %v11165_v26 = vld [vmem:[#allocation97_spill] sm:$0xff] }
 0x13b   : > { %2976 = vadd.xlane.f32.xlu1 %v2703_v28  ;;  %v7014_v62 = vadd.f32 %v2211_v29, %v6719_v14  ;;  %11163 = vst [vmem:[#allocation33_spill] sm:$0xff] %v7017_v54  ;;  %v2453_v40 = vadd.f32 %v2197_v34, %v6751_v46  ;;  %v7022_v51 = vadd.f32 %v1599_v60, %v11164_v15  ;;  %v2705_v13 = vmax.f32 %v2449_v9, 0.0 }
 0x13c   : > { %v7026_v38 = vadd.f32 %v6594_v39, %v11165_v26  ;;  %v2700_v28 = vmax.f32 %v2444_v41, 0.0  ;;  %v2190_v14 = vmul.f32 %v7017_v54, %v11093_v33  ;;  %v2196_v29 = vmul.f32 %v6868_v2, %v11145_v23 }
 0x13d   : > { %v2450_v10 = vadd.f32 %v2194_v6, %v6667_v5  ;;  %v2201_v46 = vmul.f32 %v6870_v42, %v11145_v23  ;;  %v7036_v15 = vadd.f32 %v2209_v16, %v6635_v11  ;;  %v7039_v60 = vadd.f32 %v2213_v25, %v6768_v44 }
 0x13e   : > { %2970 = vadd.xlane.f32.xlu0 %v2700_v28  ;;  %v2446_v39 = vadd.f32 %v2190_v14, %v6887_v1  ;;  %v2707_v34 = vmax.f32 %v2451_v49, 0.0  ;;  %v2455_v33 = vadd.f32 %v2199_v24, %v6790_v48  ;;  %v2210_v9 = vmul.f32 %v6835_v8, %v11151_v22  ;;  %v11167_v14 = vld [vmem:[#allocation123_spill] sm:$0xff] }
 0x13f   : > { %2980 = vadd.xlane.f32.xlu1 %v2705_v13  ;;  %v2198_v5 = vmul.f32 %v6897_v57, %v11145_v23  ;;  %v2215_v11 = vmul.f32 %v6837_v37, %v11151_v22  ;;  %v7052_v44 = vmul.f32 %v6802_v32, %v11154_v52  ;;  %v2709_v1 = vmax.f32 %v2453_v40, 0.0 }
 0x140   : > { %v2702_v16 = vmax.f32 %v2446_v39, 0.0  ;;  %v2452_v49 = vadd.f32 %v2196_v29, %v6676_v17  ;;  %v7056_v48 = vadd.f32 %v2227_v27, %v6725_v20  ;;  %v2706_v25 = vmax.f32 %v2450_v10, 0.0  ;;  %v11168_v20 = vld [vmem:[#allocation127_spill] sm:$0xff]  ;;  %v11169_v29 = vld [vmem:[#allocation118_spill] sm:$0xff] }
 0x141   : > { %v2457_v41 = vadd.f32 %v2201_v46, %v6843_v36  ;;  %v2203_v24 = vmul.f32 %v6899_v53, %v11145_v23  ;;  %v2711_v28 = vmax.f32 %v2455_v33, 0.0  ;;  %v7064_v40 = vadd.f32 %v2210_v9, %v11167_v14 }
 0x142   : > { %11166 = vst [vmem:[#allocation85_spill] sm:$0xff] %v7056_v48  ;;  %2974 = vadd.xlane.f32.xlu0 %v2702_v16  ;;  %v2212_v17 = vmul.f32 %v6868_v2, %v11151_v22  ;;  %v7069_v27 = vadd.f32 %v2198_v5, %v11168_v20  ;;  %v2200_v36 = vmul.f32 %v6929_v31, %v11145_v23  ;;  %v2708_v39 = vmax.f32 %v2452_v49, 0.0 }
 0x143   : > { %2984 = vadd.xlane.f32.xlu1 %v2707_v34  ;;  %v2205_v10 = vmul.f32 %v6931_v12, %v11145_v23  ;;  %v7076_v46 = vadd.f32 %v2215_v11, %v11169_v29  ;;  %v2202_v34 = vmul.f32 %v6958_v3, %v11145_v23  ;;  %v2207_v33 = vmul.f32 %v6960_v63, %v11145_v23 }
 0x144   : > { %v2217_v9 = vmul.f32 %v6870_v42, %v11151_v22  ;;  %v2713_v5 = vmax.f32 %v2457_v41, 0.0  ;;  %v2459_v16 = vadd.f32 %v2203_v24, %v6895_v61  ;;  %v2214_v14 = vmul.f32 %v6897_v57, %v11151_v22  ;;  %v11172_v24 = vld [vmem:[#allocation112_spill] sm:$0xff] }
 0x145   : > { %v2219_v11 = vmul.f32 %v6899_v53, %v11151_v22  ;;  %v11170_v49 = vmax.f32 %v6945_v7, 0.0  ;;  %v2204_v20 = vmul.f32 %v6988_v50, %v11145_v23  ;;  %v7095_v13 = vadd.f32 %v2212_v17, %v11171_v56 }
 0x146   : > { %v2216_v61 = vmul.f32 %v6929_v31, %v11151_v22  ;;  %v2710_v41 = vmax.f32 %v7069_v27, 0.0  ;;  %v7101_v6 = vadd.f32 %v2200_v36, %v11172_v24  ;;  %v7104_v7 = vadd.f32 %v2205_v10, %v6948_v18  ;;  %v11174_v36 = vld [vmem:[#allocation129_spill] sm:$0xff] }
 0x147   : > { %2978 = vadd.xlane.f32.xlu0 %v11170_v49  ;;  %2988 = vadd.xlane.f32.xlu1 %v2709_v1  ;;  %v11173_v49 = vld [vmem:[#allocation115_spill] sm:$0xff]  ;;  %v7111_v29 = vadd.f32 %v2207_v33, %v6994_v59  ;;  %v7114_v56 = vadd.f32 %v2217_v9, %v6849_v55  ;;  %v2221_v17 = vmul.f32 %v6931_v12, %v11151_v22  ;;  %v2715_v27 = vmax.f32 %v2459_v16, 0.0  ;;  %v11175_v59 = vld [vmem:[#allocation78_spill] sm:$0xff]  ;;  %v11176_v33 = vld [vmem:[#allocation113_spill] sm:$0xff] }
 0x148   : > { %v7108_v26 = vadd.f32 %v2202_v34, %v11173_v49  ;;  %v7119_v24 = vadd.f32 %v2214_v14, %v11174_v36  ;;  %v7122_v18 = vadd.f32 %v2219_v11, %v6907_v19  ;;  %v2218_v10 = vmul.f32 %v6958_v3, %v11151_v22  ;;  %v11195_v55 = vld [vmem:[#allocation80_spill] sm:$0xff] }
 0x149   : > { %v7127_v34 = vadd.f32 %v2204_v20, %v11175_v59  ;;  %v7131_v9 = vadd.f32 %v2216_v61, %v11176_v33  ;;  %v2223_v16 = vmul.f32 %v6960_v63, %v11151_v22  ;;  %v2712_v14 = vmax.f32 %v7101_v6, 0.0  ;;  %v11180_v6 = vld [vmem:[#allocation55_spill] sm:$0xff]  ;;  %v11193_v61 = vld [vmem:[#allocation126_spill] sm:$0xff] }
 0x14a   : > { %v2717_v19 = vmax.f32 %v7104_v7, 0.0  ;;  %v2206_v11 = vmul.f32 %v7017_v54, %v11145_v23  ;;  %v2719_v20 = vmax.f32 %v7111_v29, 0.0  ;;  %v7145_v49 = vadd.f32 %v2221_v17, %v6951_v47  ;;  %v11177_v7 = vld [vmem:[#allocation48_spill] sm:$0xff]  ;;  %v11179_v17 = vld [vmem:[#allocation89_spill] sm:$0xff] }
 0x14b   : > { %2982 = vadd.xlane.f32.xlu0 %v2706_v25  ;;  %2992 = vadd.xlane.f32.xlu1 %v2711_v28  ;;  %v2220_v25 = vmul.f32 %v6988_v50, %v11151_v22  ;;  %v2714_v28 = vmax.f32 %v7108_v26, 0.0  ;;  %v7150_v59 = vadd.f32 %v2218_v10, %v11177_v7  ;;  %v7156_v33 = vadd.f32 %v2223_v16, %v6997_v21  ;;  %v11182_v7 = vld [vmem:[#allocation41_spill] sm:$0xff]  ;;  %v11191_v26 = vld [vmem:[#allocation70_spill] sm:$0xff] }
 0x14c   : > { %v2222_v47 = vmul.f32 %v7017_v54, %v11151_v22  ;;  %v7161_v36 = vadd.f32 %v2206_v11, %v11179_v17  ;;  %v2229_v21 = vmul.f32 %v6804_v0, %v11154_v52  ;;  %v2226_v22 = vmul.f32 %v6835_v8, %v11154_v52 }
 0x14d   : > { %11178 = vst [vmem:[#allocation84_spill] sm:$0xff] %v7156_v33  ;;  %v7164_v10 = vadd.f32 %v2220_v25, %v11180_v6  ;;  %v2231_v16 = vmul.f32 %v6837_v37, %v11154_v52  ;;  %v2233_v25 = vmul.f32 %v6870_v42, %v11154_v52  ;;  %v2230_v6 = vmul.f32 %v6897_v57, %v11154_v52 }
 0x14e   : > { %v2235_v29 = vmul.f32 %v6899_v53, %v11154_v52  ;;  %v2232_v11 = vmul.f32 %v6929_v31, %v11154_v52  ;;  %v2234_v48 = vmul.f32 %v6958_v3, %v11154_v52 }
 0x14f   : > { %2986 = vadd.xlane.f32.xlu0 %v2708_v39  ;;  %2996 = vadd.xlane.f32.xlu1 %v2713_v5  ;;  %11181 = vst [vmem:[#allocation88_spill] sm:$0xff] %v7164_v10  ;;  %v7168_v39 = vadd.f32 %v7052_v44, %v11182_v7  ;;  %v11184_v5 = vlaneseq  ;;  %v2228_v44 = vmul.f32 %v6868_v2, %v11154_v52  ;;  %v11185_v7 = vld [vmem:[#allocation69_spill] sm:$0xff] }
 0x150   : > { %v7207_v45 = vadd.f32 %v2231_v16, %v11191_v26  ;;  %v7215_v1 = vadd.f32 %v2233_v25, %v11195_v55  ;;  %v11200_v16 = vld [vmem:[#allocation131_spill] sm:$0xff]  ;;  %v2239_v55 = vmul.f32 %v6960_v63, %v11154_v52  ;;  %v2238_v26 = vmul.f32 %v7017_v54, %v11154_v52 }
 0x151   : > { %11183 = vst [vmem:[#allocation92_spill] sm:$0xff] %v7168_v39  ;;  %v7171_v23 = vand.u32 127, %v11184_v5  ;;  %v7189_v5 = vadd.f32 %v2222_v47, %v11185_v7  ;;  %v11189_v47 = vld [vmem:[#allocation125_spill] sm:$0xff]  ;;  %v7212_v33 = vadd.f32 %v2228_v44, %v11193_v61  ;;  %v11203_v44 = vld [vmem:[#allocation35_spill] sm:$0xff] }
 0x152   : > { %v7204_v7 = vadd.f32 %v2226_v22, %v11189_v47  ;;  %11192 = vst [vmem:[#allocation127_spill] sm:$0xff] %v7207_v45  ;;  %11196 = vst [vmem:[#allocation124_spill] sm:$0xff] %v7215_v1  ;;  %v11197_v39 = vld [vmem:[#allocation29_spill] sm:$0xff]  ;;  %v7225_v22 = vadd.f32 %v2235_v29, %v6923_v35  ;;  %v11215_v29 = vld [vmem:[#allocation95_spill] sm:$0xff] }
 0x153   : > { %2990 = vadd.xlane.f32.xlu0 %v2710_v41  ;;  %3000 = vadd.xlane.f32.xlu1 %v2715_v27  ;;  %11186 = vst [vmem:[#allocation25_spill] sm:$0xff] %v7189_v5  ;;  %v2237_v41 = vmul.f32 %v6931_v12, %v11154_v52  ;;  %v11187_v27 = vld [vmem:[#allocation114_spill] sm:$0xff]  ;;  %11194 = vst [vmem:[#allocation118_spill] sm:$0xff] %v7212_v33  ;;  %v7218_v10 = vadd.f32 %v2230_v6, %v11197_v39  ;;  %v11205_v6 = vld [vmem:[#allocation51_spill] sm:$0xff] }
 0x154   : > { %v7201_v17 = vadd.f32 %v2229_v21, %v11187_v27  ;;  %11190 = vst [vmem:[#allocation123_spill] sm:$0xff] %v7204_v7  ;;  %v7221_v21 = vadd.s32 4294967272, %v7171_v23  ;;  %11199 = vst [vmem:[#allocation115_spill] sm:$0xff] %v7225_v22  ;;  %v7228_v27 = vadd.f32 %v2232_v11, %v11200_v16  ;;  %v2236_v39 = vmul.f32 %v6988_v50, %v11154_v52  ;;  %v11212_v16 = vld [vmem:[#allocation86_spill] sm:$0xff]  ;;  %v11228_v45 = vld [vmem:[#allocation96_spill] sm:$0xff] }
 0x155   : > { %11198 = vst [vmem:[#allocation112_spill] sm:$0xff] %v7218_v10  ;;  %v7233_v61 = vadd.f32 %v2237_v41, %v6980_v43  ;;  %v7245_v47 = vadd.f32 %v2234_v48, %v11205_v6  ;;  %v7255_v11 = vadd.f32 %v2239_v55, %v7022_v51  ;;  %v11208_v48 = vld [vmem:[#allocation34_spill] sm:$0xff]  ;;  %v11209_v6 = vld [vmem:[#allocation72_spill] sm:$0xff]  ;;  %v2243_v51 = vmul.f32 %v6765_v58, %v11203_v44 }
 0x156   : > { %11188 = vst [vmem:[#allocation97_spill] sm:$0xff] %v7201_v17  ;;  %11201 = vst [vmem:[#allocation129_spill] sm:$0xff] %v7228_v27  ;;  %v1603_v35 = vmul.f32 %v11209_v6, %v11208_v48  ;;  %v11210_v41 = vld [vmem:[#allocation132_spill] sm:$0xff]  ;;  %v11227_v33 = vld [vmem:[#allocation46_spill] sm:$0xff]  ;;  %v2245_v17 = vmul.f32 %v6804_v0, %v11203_v44 }
 0x157   : > { %2994 = vadd.xlane.f32.xlu0 %v2712_v14  ;;  %3004 = vadd.xlane.f32.xlu1 %v2717_v19  ;;  %11202 = vst [vmem:[#allocation78_spill] sm:$0xff] %v7233_v61  ;;  %v2241_v14 = vmul.f32 %v6802_v32, %v11203_v44  ;;  %v11204_v19 = vld [vmem:[#allocation122_spill] sm:$0xff]  ;;  %11206 = vst [vmem:[#allocation113_spill] sm:$0xff] %v7245_v47  ;;  %v7261_v1 = vadd.f32 %v2236_v39, %v11210_v41  ;;  %v11216_v55 = vld [vmem:[#allocation52_spill] sm:$0xff]  ;;  %v11223_v47 = vmax.f32 %v7127_v34, 0.0 }
 0x158   : > { %v1598_v25 = vmul.f32 %v11204_v19, %v11072_v4  ;;  %11207 = vst [vmem:[#allocation48_spill] sm:$0xff] %v7255_v11  ;;  %v1600_v27 = vmul.f32 %v11216_v55, %v11208_v48  ;;  %v11218_v39 = vld [vmem:[#allocation39_spill] sm:$0xff]  ;;  %v11219_v41 = vld [vmem:[#allocation26_spill] sm:$0xff]  ;;  %v1221_v7 = vadd.f32 %v11228_v45, %v11227_v33  ;;  %v11229_v34 = vld [vmem:[#allocation56_spill] sm:$0xff] }
 0x159   : > { %11211 = vst [vmem:[#allocation89_spill] sm:$0xff] %v7261_v1  ;;  %v7264_v10 = vadd.f32 %v2241_v14, %v11212_v16  ;;  %v1216_v61 = vadd.f32 %v11219_v41, %v11218_v39  ;;  %v11220_v14 = vld [vmem:[#allocation120_spill] sm:$0xff]  ;;  %v11226_v39 = vld [vmem:[#allocation83_spill] sm:$0xff]  ;;  %v11232_v11 = vld [vmem:[#allocation93_spill] sm:$0xff]  ;;  %v2253_v1 = vmul.f32 %v6931_v12, %v11203_v44 }
 0x15a   : > { %v1854_v52 = vadd.f32 %v1598_v25, %v7026_v38  ;;  %v1605_v16 = vmul.f32 %v11220_v14, %v11208_v48  ;;  %v11221_v38 = vld [vmem:[#allocation28_spill] sm:$0xff]  ;;  %v11222_v25 = vld [vmem:[#allocation49_spill] sm:$0xff]  ;;  %v11234_v0 = vld [vmem:[#allocation58_spill] sm:$0xff] }
 0x15b   : > { %2998 = vadd.xlane.f32.xlu0 %v2714_v28  ;;  %3008 = vadd.xlane.f32.xlu1 %v2719_v20  ;;  %11213 = vst [vmem:[#allocation55_spill] sm:$0xff] %v7264_v10  ;;  %v11214_v20 = vld [vmem:[#allocation42_spill] sm:$0xff]  ;;  %v962_v28 = vmul.f32 %v11222_v25, %v11221_v38  ;;  %v967_v41 = vmul.f32 %v11226_v39, %v11221_v38  ;;  %v11233_v45 = vld [vmem:[#allocation40_spill] sm:$0xff] }
 0x15c   : > { %v1219_v4 = vadd.f32 %v11215_v29, %v11214_v20  ;;  %v7274_v43 = vadd.f32 %v2238_v26, %v1854_v52  ;;  %v11224_v29 = vmax.f32 %v7036_v15, 0.0  ;;  %v11225_v26 = vld [vmem:[#allocation108_spill] sm:$0xff]  ;;  %v11230_v15 = vld [vmem:[#allocation66_spill] sm:$0xff]  ;;  %v1607_v39 = vmul.f32 %v11232_v11, %v11208_v48 }
 0x15d   : > { %v2240_v52 = vmul.f32 %v11225_v26, %v11203_v44  ;;  %v1861_v5 = vadd.f32 %v1605_v16, %v1221_v7  ;;  %v1218_v33 = vadd.f32 %v962_v28, %v11233_v45  ;;  %v1604_v14 = vmul.f32 %v11234_v0, %v11208_v48  ;;  %v11241_v0 = vld [vmem:[#allocation47_spill] sm:$0xff] }
 0x15e   : > { %11217 = vst [vmem:[#allocation41_spill] sm:$0xff] %v7274_v43  ;;  %v1859_v22 = vadd.f32 %v1603_v35, %v1219_v4  ;;  %v1856_v35 = vadd.f32 %v1600_v27, %v1216_v61  ;;  %v2242_v4 = vmul.f32 %v6835_v8, %v11203_v44  ;;  %v2247_v28 = vmul.f32 %v6837_v37, %v11203_v44  ;;  %v11268_v43 = vld [vmem:[#allocation104_spill] sm:$0xff] }
 0x15f   : > { %3002 = vadd.xlane.f32.xlu0 %v11223_v47  ;;  %3012 = vadd.xlane.f32.xlu1 %v11224_v29  ;;  %v1602_v47 = vmul.f32 %v11229_v34, %v11208_v48  ;;  %v964_v29 = vmul.f32 %v11230_v15, %v11221_v38  ;;  %v11235_v34 = vld [vmem:[#allocation100_spill] sm:$0xff]  ;;  %v11236_v15 = vmax.f32 %v7161_v36, 0.0  ;;  %v7320_v16 = vadd.f32 %v2245_v17, %v1861_v5  ;;  %v11244_v5 = vld [vmem:[#allocation63_spill] sm:$0xff] }
 0x160   : > { %v7299_v20 = vadd.f32 %v2243_v51, %v1859_v22  ;;  %v969_v26 = vmul.f32 %v11235_v34, %v11221_v38  ;;  %v11237_v22 = vmax.f32 %v7014_v62, 0.0  ;;  %v7315_v61 = vadd.f32 %v2240_v52, %v1856_v35  ;;  %v11239_v51 = vld [vmem:[#allocation53_spill] sm:$0xff]  ;;  %v11263_v62 = vld [vmem:[#allocation75_spill] sm:$0xff] }
 0x161   : > { %v1223_v7 = vadd.f32 %v967_v41, %v11239_v51  ;;  %11240 = vst [vmem:[#allocation125_spill] sm:$0xff] %v7320_v16  ;;  %v1858_v45 = vadd.f32 %v1602_v47, %v1218_v33  ;;  %v1220_v34 = vadd.f32 %v964_v29, %v11241_v0  ;;  %v2244_v36 = vmul.f32 %v6868_v2, %v11203_v44  ;;  %v11248_v41 = vld [vmem:[#allocation82_spill] sm:$0xff] }
 0x162   : > { %11231 = vst [vmem:[#allocation69_spill] sm:$0xff] %v7299_v20  ;;  %11238 = vst [vmem:[#allocation114_spill] sm:$0xff] %v7315_v61  ;;  %v3720_v35 = vadd.s32 4294967288, %v7171_v23  ;;  %v1225_v47 = vadd.f32 %v969_v26, %v11244_v5  ;;  %v11245_v0 = vmax.f32 %v6974_v30, 0.0  ;;  %v11246_v29 = vmax.f32 %v7039_v60, 0.0  ;;  %v11253_v5 = vld [vmem:[#allocation105_spill] sm:$0xff] }
 0x163   : > { %3006 = vadd.xlane.f32.xlu0 %v11236_v15  ;;  %3016 = vadd.xlane.f32.xlu1 %v11237_v22  ;;  %v1863_v15 = vadd.f32 %v1607_v39, %v1223_v7  ;;  %v11242_v22 = vld [vmem:[#allocation27_spill] sm:$0xff]  ;;  %v7330_v51 = vadd.f32 %v2242_v4, %v1858_v45  ;;  %v1860_v17 = vadd.f32 %v1604_v14, %v1220_v34  ;;  %v11249_v34 = vld [vmem:[#allocation13_spill] sm:$0xff] }
 0x164   : > { %v1609_v52 = vmul.f32 %v11242_v22, %v11208_v48  ;;  %v2249_v7 = vmul.f32 %v6870_v42, %v11203_v44  ;;  %v966_v4 = vmul.f32 %v11248_v41, %v11221_v38  ;;  %v7348_v30 = vsub.s32 %v7171_v23, %v11249_v34  ;;  %v11259_v39 = vld [vmem:[#allocation57_spill] sm:$0xff] }
 0x165   : > { %11243 = vst [vmem:[#allocation70_spill] sm:$0xff] %v7330_v51  ;;  %v7338_v33 = vadd.f32 %v2247_v28, %v1863_v15  ;;  %v7350_v60 = vadd.f32 %v2244_v36, %v1860_v17  ;;  %v11252_v28 = vld [vmem:[#allocation119_spill] sm:$0xff]  ;;  %v7360_v26 = vsub.s32 %v7221_v21, %v11249_v34  ;;  %v2246_v14 = vmul.f32 %v6897_v57, %v11203_v44 }
 0x166   : > { %11250 = vst [vmem:[#allocation80_spill] sm:$0xff] %v7348_v30  ;;  %v1865_v45 = vadd.f32 %v1609_v52, %v1225_v47  ;;  %v1606_v15 = vmul.f32 %v11252_v28, %v11208_v48  ;;  %v11255_v36 = vld [vmem:[#allocation99_spill] sm:$0xff]  ;;  %v11256_v17 = vmax.f32 %v7064_v40, 0.0  ;;  %v11257_v47 = vmax.f32 %v7076_v46, 0.0  ;;  %v11261_v40 = vld [vmem:[#allocation121_spill] sm:$0xff] }
 0x167   : > { %3010 = vadd.xlane.f32.xlu0 %v11245_v0  ;;  %3020 = vadd.xlane.f32.xlu1 %v11246_v29  ;;  %11247 = vst [vmem:[#allocation126_spill] sm:$0xff] %v7338_v33  ;;  %11251 = vst [vmem:[#allocation29_spill] sm:$0xff] %v7350_v60  ;;  %v971_v0 = vmul.f32 %v11253_v5, %v11221_v38  ;;  %v3748_v29 = vadd.s32 4294967256, %v7171_v23  ;;  %v968_v52 = vmul.f32 %v11255_v36, %v11221_v38  ;;  %v11260_v21 = vld [vmem:[#allocation103_spill] sm:$0xff]  ;;  %v11267_v33 = vld [vmem:[#allocation128_spill] sm:$0xff] }
 0x168   : > { %11254 = vst [vmem:[#allocation131_spill] sm:$0xff] %v7360_v26  ;;  %v7371_v27 = vadd.f32 %v2249_v7, %v1865_v45  ;;  %v1222_v30 = vadd.f32 %v966_v4, %v11259_v39  ;;  %v1611_v26 = vmul.f32 %v11260_v21, %v11208_v48  ;;  %v2251_v16 = vmul.f32 %v6899_v53, %v11203_v44  ;;  %v11262_v46 = vld [vmem:[#allocation107_spill] sm:$0xff]  ;;  %v11266_v4 = vld [vmem:[#allocation64_spill] sm:$0xff] }
 0x169   : > { %v1227_v7 = vadd.f32 %v971_v0, %v11263_v62  ;;  %v7385_v45 = vsub.s32 %v3720_v35, %v11249_v34  ;;  %v7388_v39 = vsub.s32 %v3748_v29, %v11249_v34  ;;  %v1224_v51 = vadd.f32 %v968_v52, %v11266_v4  ;;  %v11272_v29 = vld [vmem:[#allocation111_spill] sm:$0xff]  ;;  %v11281_v35 = vld [vmem:[#allocation98_spill] sm:$0xff] }
 0x16a   : > { %11258 = vst [vmem:[#allocation35_spill] sm:$0xff] %v7371_v27  ;;  %v1862_v61 = vadd.f32 %v1606_v15, %v1222_v30  ;;  %v2248_v60 = vmul.f32 %v6929_v31, %v11203_v44  ;;  %v1613_v20 = vmul.f32 %v11267_v33, %v11208_v48  ;;  %v970_v10 = vmul.f32 %v11268_v43, %v11221_v38 }
 0x16b   : > { %3014 = vadd.xlane.f32.xlu0 %v11256_v17  ;;  %3024 = vadd.xlane.f32.xlu1 %v11257_v47  ;;  %v1608_v17 = vmul.f32 %v11261_v40, %v11208_v48  ;;  %v973_v47 = vmul.f32 %v11262_v46, %v11221_v38  ;;  %11264 = vst [vmem:[#allocation51_spill] sm:$0xff] %v7385_v45  ;;  %11265 = vst [vmem:[#allocation34_spill] sm:$0xff] %v7388_v39  ;;  %v11269_v30 = vmax.f32 %v7095_v13, 0.0  ;;  %v11273_v39 = vld [vmem:[#allocation87_spill] sm:$0xff]  ;;  %v11274_v13 = vld [vmem:[#allocation94_spill] sm:$0xff] }
 0x16c   : > { %v11270_v62 = vmax.f32 %v7114_v56, 0.0  ;;  %v7402_v15 = vadd.f32 %v2246_v14, %v1862_v61  ;;  %v1867_v0 = vadd.f32 %v1611_v26, %v1227_v7  ;;  %v975_v52 = vmul.f32 %v11272_v29, %v11221_v38  ;;  %v11276_v14 = vld [vmem:[#allocation109_spill] sm:$0xff] }
 0x16d   : > { %v1864_v4 = vadd.f32 %v1608_v17, %v1224_v51  ;;  %v1229_v45 = vadd.f32 %v973_v47, %v11273_v39  ;;  %v3727_v56 = vadd.s32 4294967280, %v7171_v23  ;;  %v3762_v61 = vadd.s32 4294967240, %v7171_v23  ;;  %v11278_v17 = vld [vmem:[#allocation76_spill] sm:$0xff] }
 0x16e   : > { %11271 = vst [vmem:[#allocation132_spill] sm:$0xff] %v7402_v15  ;;  %v7411_v33 = vadd.f32 %v2251_v16, %v1867_v0  ;;  %v1615_v26 = vmul.f32 %v11276_v14, %v11208_v48  ;;  %v1226_v47 = vadd.f32 %v970_v10, %v11278_v17  ;;  %v2250_v39 = vmul.f32 %v6958_v3, %v11203_v44  ;;  %v11286_v0 = vld [vmem:[#allocation20_spill] sm:$0xff] }
 0x16f   : > { %3018 = vadd.xlane.f32.xlu0 %v11269_v30  ;;  %3028 = vadd.xlane.f32.xlu1 %v11270_v62  ;;  %v1610_v30 = vmul.f32 %v11274_v13, %v11208_v48  ;;  %v7417_v7 = vadd.f32 %v2248_v60, %v1864_v4  ;;  %v1869_v51 = vadd.f32 %v1613_v20, %v1229_v45  ;;  %v11279_v62 = vmax.f32 %v7119_v24, 0.0  ;;  %v11282_v20 = vld [vmem:[#allocation106_spill] sm:$0xff] }
 0x170   : > { %11275 = vst [vmem:[#allocation86_spill] sm:$0xff] %v7411_v33  ;;  %v11280_v16 = vmax.f32 %v7122_v18, 0.0  ;;  %v1231_v27 = vadd.f32 %v975_v52, %v11281_v35  ;;  %v2255_v60 = vmul.f32 %v6960_v63, %v11203_v44  ;;  %v972_v45 = vmul.f32 %v11282_v20, %v11221_v38  ;;  %v5465_v52 = vld [vmem:[%s5630_s9 + $0x14] sm:$0xf] }
 0x171   : > { %11277 = vst [vmem:[#allocation42_spill] sm:$0xff] %v7417_v7  ;;  %v7432_v10 = vadd.f32 %v2253_v1, %v1869_v51  ;;  %v1866_v4 = vadd.f32 %v1610_v30, %v1226_v47  ;;  %v3741_v17 = vadd.s32 4294967264, %v7171_v23  ;;  %v3776_v24 = vadd.s32 4294967224, %v7171_v23  ;;  %v11289_v51 = vld [vmem:[#allocation65_spill] sm:$0xff]  ;;  %v11290_v47 = vld [vmem:[#allocation43_spill] sm:$0xff] }
 0x172   : > { %v7437_v18 = vsub.s32 %v3727_v56, %v11249_v34  ;;  %v7443_v15 = vrot.slane %v5465_v52, %v11286_v0  ;;  %v7447_v1 = vsub.s32 %v3762_v61, %v11249_v34  ;;  %v977_v20 = vmul.f32 %v11290_v47, %v11289_v51 }
 0x173   : > { %3022 = vadd.xlane.f32.xlu0 %v11279_v62  ;;  %3032 = vadd.xlane.f32.xlu1 %v11280_v16  ;;  %11283 = vst [vmem:[#allocation95_spill] sm:$0xff] %v7432_v10  ;;  %v1871_v62 = vadd.f32 %v1615_v26, %v1231_v27  ;;  %v11285_v16 = vld [vmem:[#allocation32_spill] sm:$0xff]  ;;  %v7449_v30 = vadd.f32 %v2250_v39, %v1866_v4  ;;  %v11291_v56 = vmax.f32 %v7131_v9, 0.0  ;;  %v11292_v27 = vmax.f32 %v7145_v49, 0.0  ;;  %v11299_v39 = vld [vmem:[#allocation45_spill] sm:$0xff]  ;;  %v11300_v4 = vld [vmem:[#allocation110_spill] sm:$0xff] }
 0x174   : > { %11284 = vst [vmem:[#allocation39_spill] sm:$0xff] %v7437_v18  ;;  %v1612_v35 = vmul.f32 %v11285_v16, %v11208_v48  ;;  %11287 = vst [vmem:[#allocation26_spill] sm:$0xff] %v7447_v1  ;;  %v11294_v18 = vld [vmem:[#allocation90_spill] sm:$0xff]  ;;  %v2252_v63 = vmul.f32 %v6988_v50, %v11203_v44  ;;  %v3755_v61 = vadd.s32 4294967248, %v7171_v23  ;;  %v7466_v1 = vsub.s32 %v3741_v17, %v11249_v34 }
 0x175   : > { %11288 = vst [vmem:[#allocation28_spill] sm:$0xff] %v7449_v30  ;;  %v7457_v26 = vadd.f32 %v2255_v60, %v1871_v62  ;;  %v1228_v16 = vadd.f32 %v972_v45, %v11294_v18  ;;  %v7469_v9 = vsub.s32 %v3776_v24, %v11249_v34  ;;  %v11297_v60 = vld [vmem:[#allocation117_spill] sm:$0xff]  ;;  %v1233_v7 = vadd.f32 %v977_v20, %v11299_v39  ;;  %v11308_v39 = vld [vmem:[#allocation38_spill] sm:$0xff] }
 0x176   : > { %11295 = vst [vmem:[#allocation96_spill] sm:$0xff] %v7466_v1  ;;  %v1617_v62 = vmul.f32 %v11297_v60, %v7443_v15  ;;  %v11298_v45 = vld [vmem:[#allocation21_spill] sm:$0xff]  ;;  %v974_v17 = vmul.f32 %v11300_v4, %v11221_v38  ;;  %v11301_v1 = vld [vmem:[#allocation50_spill] sm:$0xff]  ;;  %v7493_v20 = vsub.s32 %v3755_v61, %v11249_v34  ;;  %v11307_v38 = vld [vmem:[#allocation24_spill] sm:$0xff] }
 0x177   : > { %3026 = vadd.xlane.f32.xlu0 %v11291_v56  ;;  %3036 = vadd.xlane.f32.xlu1 %v11292_v27  ;;  %11293 = vst [vmem:[#allocation46_spill] sm:$0xff] %v7457_v26  ;;  %11296 = vst [vmem:[#allocation40_spill] sm:$0xff] %v7469_v9  ;;  %v1868_v49 = vadd.f32 %v1612_v35, %v1228_v16  ;;  %v7474_v18 = vrot.slane %v5465_v52, %v11298_v45  ;;  %v3790_v56 = vadd.s32 4294967208, %v7171_v23  ;;  %v11303_v35 = vld [vmem:[#allocation84_spill] sm:$0xff]  ;;  %v11311_v26 = vld [vmem:[#allocation91_spill] sm:$0xff] }
 0x178   : > { %v979_v24 = vmul.f32 %v11301_v1, %v11289_v51  ;;  %v11302_v16 = vmax.f32 %v7150_v59, 0.0  ;;  %v11304_v9 = vmax.f32 %v11303_v35, 0.0  ;;  %11306 = vst [vmem:[#allocation47_spill] sm:$0xff] %v7493_v20  ;;  %v590_v30 = vmul.f32 %v11308_v39, %v11307_v38  ;;  %v11310_v61 = vld [vmem:[#allocation44_spill] sm:$0xff] }
 0x179   : > { %v7488_v10 = vadd.f32 %v2252_v63, %v1868_v49  ;;  %v2257_v27 = vmul.f32 %v6802_v32, %v7474_v18  ;;  %v1614_v59 = vmul.f32 %v11204_v19, %v11208_v48  ;;  %v1873_v35 = vadd.f32 %v1617_v62, %v1233_v7  ;;  %v11314_v7 = vld [vmem:[#allocation92_spill] sm:$0xff] }
 0x17a   : > { %v7503_v63 = vsub.s32 %v3790_v56, %v11249_v34  ;;  %v3804_v49 = vadd.s32 4294967192, %v7171_v23  ;;  %v976_v52 = vmul.f32 %v11310_v61, %v11289_v51  ;;  %v1230_v20 = vadd.f32 %v974_v17, %v590_v30  ;;  %v11322_v56 = vld [vmem:[#allocation120_spill] sm:$0xff] }
 0x17b   : > { %3030 = vadd.xlane.f32.xlu0 %v11302_v16  ;;  %3040 = vadd.xlane.f32.xlu1 %v11304_v9  ;;  %11305 = vst [vmem:[#allocation53_spill] sm:$0xff] %v7488_v10  ;;  %v1619_v16 = vmul.f32 %v11209_v6, %v7443_v15  ;;  %v3769_v9 = vadd.s32 4294967232, %v7171_v23  ;;  %v2254_v38 = vmul.f32 %v7017_v54, %v11203_v44  ;;  %v11312_v6 = vld [vmem:[#allocation88_spill] sm:$0xff]  ;;  %v11315_v62 = vmax.f32 %v11314_v7, 0.0  ;;  %v11317_v44 = vld [vmem:[#allocation67_spill] sm:$0xff]  ;;  %v11320_v7 = vld [vmem:[#allocation102_spill] sm:$0xff] }
 0x17c   : > { %11309 = vst [vmem:[#allocation63_spill] sm:$0xff] %v7503_v63  ;;  %v1235_v48 = vadd.f32 %v979_v24, %v11311_v26  ;;  %v2259_v33 = vmul.f32 %v6765_v58, %v7474_v18  ;;  %v11313_v19 = vmax.f32 %v11312_v6, 0.0  ;;  %v7518_v63 = vadd.f32 %v2257_v27, %v1873_v35  ;;  %v11321_v35 = vld [vmem:[#allocation108_spill] sm:$0xff] }
 0x17d   : > { %v1616_v30 = vmul.f32 %v11216_v55, %v7443_v15  ;;  %v981_v17 = vmul.f32 %v11317_v44, %v11289_v51  ;;  %v1870_v26 = vadd.f32 %v1614_v59, %v1230_v20  ;;  %v7525_v58 = vsub.s32 %v3769_v9, %v11249_v34  ;;  %v11325_v59 = vld [vmem:[#allocation62_spill] sm:$0xff]  ;;  %v11326_v9 = vld [vmem:[#allocation56_spill] sm:$0xff] }
 0x17e   : > { %11316 = vst [vmem:[#allocation13_spill] sm:$0xff] %v7518_v63  ;;  %v1875_v24 = vadd.f32 %v1619_v16, %v1235_v48  ;;  %v7530_v6 = vsub.s32 %v3804_v49, %v11249_v34  ;;  %v1232_v27 = vadd.f32 %v976_v52, %v11320_v7  ;;  %v1621_v10 = vmul.f32 %v11322_v56, %v7443_v15  ;;  %v11327_v49 = vld [vmem:[#allocation25_spill] sm:$0xff] }
 0x17f   : > { %3034 = vadd.xlane.f32.xlu0 %v11313_v19  ;;  %3044 = vadd.xlane.f32.xlu1 %v11315_v62  ;;  %11318 = vst [vmem:[#allocation57_spill] sm:$0xff] %v7525_v58  ;;  %v978_v19 = vmul.f32 %v11222_v25, %v11289_v51  ;;  %v2256_v62 = vmul.f32 %v11321_v35, %v7474_v18  ;;  %v11329_v52 = vld [vmem:[#allocation85_spill] sm:$0xff]  ;;  %v11336_v58 = vld [vmem:[#allocation11_spill] sm:$0xff]  ;;  %v3797_v63 = vadd.s32 4294967200, %v7171_v23 }
 0x180   : > { %11319 = vst [vmem:[#allocation75_spill] sm:$0xff] %v7530_v6  ;;  %v7537_v44 = vadd.f32 %v2254_v38, %v1870_v26  ;;  %v7539_v20 = vadd.f32 %v2259_v33, %v1875_v24  ;;  %v2261_v16 = vmul.f32 %v11325_v59, %v7474_v18  ;;  %v1618_v48 = vmul.f32 %v11326_v9, %v7443_v15  ;;  %v11331_v56 = vld [vmem:[#allocation101_spill] sm:$0xff]  ;;  %v11332_v33 = vld [vmem:[#allocation83_spill] sm:$0xff] }
 0x181   : > { %v11328_v6 = vmax.f32 %v11327_v49, 0.0  ;;  %v11330_v7 = vmax.f32 %v11329_v52, 0.0  ;;  %v1872_v25 = vadd.f32 %v1616_v30, %v1232_v27  ;;  %v1237_v38 = vadd.f32 %v981_v17, %v11331_v56  ;;  %v11333_v35 = vld [vmem:[#allocation77_spill] sm:$0xff] }
 0x182   : > { %11323 = vst [vmem:[#allocation64_spill] sm:$0xff] %v7537_v44  ;;  %11324 = vst [vmem:[#allocation87_spill] sm:$0xff] %v7539_v20  ;;  %v983_v26 = vmul.f32 %v11332_v33, %v11289_v51  ;;  %v3783_v24 = vadd.s32 4294967216, %v7171_v23  ;;  %v3818_v59 = vadd.s32 4294967176, %v7171_v23  ;;  %v1234_v9 = vadd.f32 %v978_v19, %v11333_v35  ;;  %v11337_v33 = vld [vmem:[#allocation66_spill] sm:$0xff]  ;;  %v11338_v35 = vld [vmem:[#allocation79_spill] sm:$0xff] }
 0x183   : > { %3038 = vadd.xlane.f32.xlu0 %v11328_v6  ;;  %3048 = vadd.xlane.f32.xlu1 %v11330_v7  ;;  %v2258_v6 = vmul.f32 %v6835_v8, %v7474_v18  ;;  %v7558_v49 = vadd.f32 %v2256_v62, %v1872_v25  ;;  %v1877_v52 = vadd.f32 %v1621_v10, %v1237_v38  ;;  %v11335_v7 = vld [vmem:[#allocation36_spill] sm:$0xff]  ;;  %v11339_v55 = vmax.f32 %v11338_v35, 0.0  ;;  %v11340_v25 = vld [vmem:[#allocation97_spill] sm:$0xff]  ;;  %v11345_v44 = vld [vmem:[#allocation10_spill] sm:$0xff] }
 0x184   : > { %v599_v30 = vmul.f32 %v11336_v58, %v11335_v7  ;;  %v1623_v56 = vmul.f32 %v11232_v11, %v7443_v15  ;;  %v1874_v27 = vadd.f32 %v1618_v48, %v1234_v9  ;;  %v980_v19 = vmul.f32 %v11337_v33, %v11289_v51  ;;  %v11350_v10 = vld [vmem:[#allocation14_spill] sm:$0xff]  ;;  %v11351_v20 = vld [vmem:[#allocation123_spill] sm:$0xff] }
 0x185   : > { %11334 = vst [vmem:[#allocation76_spill] sm:$0xff] %v7558_v49  ;;  %v11341_v62 = vmax.f32 %v11340_v25, 0.0  ;;  %v7573_v38 = vadd.f32 %v2261_v16, %v1877_v52  ;;  %v2263_v17 = vmul.f32 %v6837_v37, %v7474_v18  ;;  %v7578_v9 = vsub.s32 %v3783_v24, %v11249_v34  ;;  %v11348_v52 = vld [vmem:[#allocation100_spill] sm:$0xff] }
 0x186   : > { %v1239_v58 = vadd.f32 %v983_v26, %v599_v30  ;;  %v7580_v48 = vadd.f32 %v2258_v6, %v1874_v27  ;;  %v596_v35 = vmul.f32 %v11345_v44, %v11335_v7  ;;  %v7588_v16 = vsub.s32 %v3818_v59, %v11249_v34 }
 0x187   : > { %3042 = vadd.xlane.f32.xlu0 %v11339_v55  ;;  %3052 = vadd.xlane.f32.xlu1 %v11341_v62  ;;  %11342 = vst [vmem:[#allocation98_spill] sm:$0xff] %v7573_v38  ;;  %11343 = vst [vmem:[#allocation65_spill] sm:$0xff] %v7578_v9  ;;  %v11346_v55 = vld [vmem:[#allocation58_spill] sm:$0xff]  ;;  %v985_v30 = vmul.f32 %v11348_v52, %v11289_v51  ;;  %v7593_v24 = vsub.s32 %v3797_v63, %v11249_v34  ;;  %v11353_v62 = vld [vmem:[#allocation127_spill] sm:$0xff] }
 0x188   : > { %11344 = vst [vmem:[#allocation90_spill] sm:$0xff] %v7580_v48  ;;  %v1620_v25 = vmul.f32 %v11346_v55, %v7443_v15  ;;  %11347 = vst [vmem:[#allocation45_spill] sm:$0xff] %v7588_v16  ;;  %v1879_v26 = vadd.f32 %v1623_v56, %v1239_v58  ;;  %v1236_v6 = vadd.f32 %v980_v19, %v596_v35  ;;  %v11352_v55 = vmax.f32 %v11351_v20, 0.0  ;;  %v11358_v35 = vld [vmem:[#allocation18_spill] sm:$0xff] }
 0x189   : > { %11349 = vst [vmem:[#allocation84_spill] sm:$0xff] %v7593_v24  ;;  %v2260_v27 = vmul.f32 %v6868_v2, %v7474_v18  ;;  %v601_v9 = vmul.f32 %v11350_v10, %v11335_v7  ;;  %v11354_v59 = vmax.f32 %v11353_v62, 0.0  ;;  %v1625_v63 = vmul.f32 %v11242_v22, %v7443_v15 }
 0x18a   : > { %v7604_v56 = vadd.f32 %v2263_v17, %v1879_v26  ;;  %v982_v19 = vmul.f32 %v11248_v41, %v11289_v51  ;;  %v1876_v16 = vadd.f32 %v1620_v25, %v1236_v6  ;;  %v2265_v20 = vmul.f32 %v6870_v42, %v7474_v18  ;;  %v11356_v17 = vld [vmem:[#allocation12_spill] sm:$0xff] }
 0x18b   : > { %3046 = vadd.xlane.f32.xlu0 %v11352_v55  ;;  %3056 = vadd.xlane.f32.xlu1 %v11354_v59  ;;  %v987_v55 = vmul.f32 %v11253_v5, %v11289_v51  ;;  %v1241_v62 = vadd.f32 %v985_v30, %v601_v9  ;;  %v3811_v59 = vadd.s32 4294967184, %v7171_v23  ;;  %v598_v26 = vmul.f32 %v11356_v17, %v11335_v7  ;;  %v11359_v9 = vld [vmem:[#allocation118_spill] sm:$0xff]  ;;  %v11361_v23 = vld [vmem:[#allocation124_spill] sm:$0xff] }
 0x18c   : > { %11355 = vst [vmem:[#allocation24_spill] sm:$0xff] %v7604_v56  ;;  %v1622_v58 = vmul.f32 %v11252_v28, %v7443_v15  ;;  %v7620_v24 = vadd.f32 %v2260_v27, %v1876_v16  ;;  %v603_v25 = vmul.f32 %v11358_v35, %v11335_v7  ;;  %v1627_v6 = vmul.f32 %v11260_v21, %v7443_v15  ;;  %v11363_v28 = vld [vmem:[#allocation15_spill] sm:$0xff] }
 0x18d   : > { %v984_v48 = vmul.f32 %v11255_v36, %v11289_v51  ;;  %v11360_v30 = vmax.f32 %v11359_v9, 0.0  ;;  %v11362_v38 = vmax.f32 %v11361_v23, 0.0  ;;  %v1881_v5 = vadd.f32 %v1625_v63, %v1241_v62  ;;  %v11366_v23 = vld [vmem:[#allocation112_spill] sm:$0xff] }
 0x18e   : > { %11357 = vst [vmem:[#allocation91_spill] sm:$0xff] %v7620_v24  ;;  %v1238_v16 = vadd.f32 %v982_v19, %v598_v26  ;;  %v2262_v27 = vmul.f32 %v6897_v57, %v7474_v18  ;;  %v1243_v35 = vadd.f32 %v987_v55, %v603_v25  ;;  %v2267_v21 = vmul.f32 %v6899_v53, %v7474_v18 }
 0x18f   : > { %3050 = vadd.xlane.f32.xlu0 %v11360_v30  ;;  %3060 = vadd.xlane.f32.xlu1 %v11362_v38  ;;  %v600_v36 = vmul.f32 %v11363_v28, %v11335_v7  ;;  %v1624_v9 = vmul.f32 %v11261_v40, %v7443_v15  ;;  %v7641_v30 = vadd.f32 %v2265_v20, %v1881_v5  ;;  %v11367_v49 = vmax.f32 %v11366_v23, 0.0  ;;  %v11368_v5 = vld [vmem:[#allocation115_spill] sm:$0xff] }
 0x190   : > { %v7644_v38 = vsub.s32 %v3811_v59, %v11249_v34  ;;  %v1878_v63 = vadd.f32 %v1622_v58, %v1238_v16  ;;  %v989_v19 = vmul.f32 %v11262_v46, %v11289_v51  ;;  %v1883_v55 = vadd.f32 %v1627_v6, %v1243_v35  ;;  %v11371_v59 = vld [vmem:[#allocation22_spill] sm:$0xff]  ;;  %v11375_v34 = vld [vmem:[#allocation17_spill] sm:$0xff] }
 0x191   : > { %11364 = vst [vmem:[#allocation88_spill] sm:$0xff] %v7641_v30  ;;  %v1240_v62 = vadd.f32 %v984_v48, %v600_v36  ;;  %v2264_v26 = vmul.f32 %v6929_v31, %v7474_v18  ;;  %v986_v25 = vmul.f32 %v11268_v43, %v11289_v51  ;;  %v11369_v20 = vmax.f32 %v11368_v5, 0.0  ;;  %v11372_v36 = vld [vmem:[#allocation128_spill] sm:$0xff] }
 0x192   : > { %11365 = vst [vmem:[#allocation92_spill] sm:$0xff] %v7644_v38  ;;  %v7657_v58 = vadd.f32 %v2262_v27, %v1878_v63  ;;  %v605_v35 = vmul.f32 %v11371_v59, %v11335_v7  ;;  %v1629_v48 = vmul.f32 %v11372_v36, %v7443_v15  ;;  %v7663_v6 = vadd.f32 %v2267_v21, %v1883_v55  ;;  %v11374_v38 = vld [vmem:[#allocation19_spill] sm:$0xff]  ;;  %v342_v5 = vld [vmem:[%s5630_s9 + $0x18] sm:$0xf] }
 0x193   : > { %3054 = vadd.xlane.f32.xlu0 %v11367_v49  ;;  %3064 = vadd.xlane.f32.xlu1 %v11369_v20  ;;  %v1880_v16 = vadd.f32 %v1624_v9, %v1240_v62  ;;  %v602_v23 = vmul.f32 %v11374_v38, %v11335_v7  ;;  %v1626_v49 = vmul.f32 %v11274_v13, %v7443_v15  ;;  %v11377_v62 = vld [vmem:[#allocation129_spill] sm:$0xff]  ;;  %v11379_v20 = vld [vmem:[#allocation78_spill] sm:$0xff] }
 0x194   : > { %11370 = vst [vmem:[#allocation102_spill] sm:$0xff] %v7657_v58  ;;  %11373 = vst [vmem:[#allocation25_spill] sm:$0xff] %v7663_v6  ;;  %v1245_v27 = vadd.f32 %v989_v19, %v605_v35  ;;  %v2269_v63 = vmul.f32 %v6931_v12, %v7474_v18  ;;  %v7674_v24 = vrot.slane %v342_v5, %v11375_v34  ;;  %v11378_v13 = vmax.f32 %v11377_v62, 0.0  ;;  %v11381_v34 = vld [vmem:[#allocation37_spill] sm:$0xff]  ;;  %v11388_v6 = vld [vmem:[#allocation32_spill] sm:$0xff] }
 0x195   : > { %v7676_v56 = vadd.f32 %v2264_v26, %v1880_v16  ;;  %v1242_v21 = vadd.f32 %v986_v25, %v602_v23  ;;  %v2266_v9 = vmul.f32 %v6958_v3, %v7474_v18  ;;  %v991_v55 = vmul.f32 %v11272_v29, %v11289_v51 }
 0x196   : > { %v11380_v19 = vmax.f32 %v11379_v20, 0.0  ;;  %v1885_v30 = vadd.f32 %v1629_v48, %v1245_v27  ;;  %v607_v26 = vmul.f32 %v11381_v34, %v11335_v7  ;;  %v7690_v25 = vrot.slane %v342_v5, %v11286_v0  ;;  %v11385_v27 = vld [vmem:[#allocation16_spill] sm:$0xff] }
 0x197   : > { %11376 = vst [vmem:[#allocation85_spill] sm:$0xff] %v7676_v56  ;;  %3058 = vadd.xlane.f32.xlu0 %v11378_v13  ;;  %v1882_v23 = vadd.f32 %v1626_v49, %v1242_v21  ;;  %v1631_v29 = vmul.f32 %v11276_v14, %v7443_v15  ;;  %v11382_v13 = vld [vmem:[#allocation106_spill] sm:$0xff]  ;;  %v7702_v35 = vrot.slane %v342_v5, %v11385_v27  ;;  %v11387_v21 = vld [vmem:[#allocation23_spill] sm:$0xff]  ;;  %v11391_v14 = vld [vmem:[#allocation48_spill] sm:$0xff] }
 0x198   : > { %3068 = vadd.xlane.f32.xlu1 %v11380_v19  ;;  %v988_v62 = vmul.f32 %v11382_v13, %v11289_v51  ;;  %v7697_v20 = vadd.f32 %v2269_v63, %v1885_v30  ;;  %v11384_v19 = vld [vmem:[#allocation31_spill] sm:$0xff]  ;;  %v993_v58 = vmul.f32 %v11290_v47, %v7674_v24  ;;  %v1247_v49 = vadd.f32 %v991_v55, %v607_v26  ;;  %v11389_v30 = vld [vmem:[#allocation113_spill] sm:$0xff]  ;;  %v11393_v34 = vld [vmem:[#allocation8_spill] sm:$0xff] }
 0x199   : > { %v2271_v48 = vmul.f32 %v11384_v19, %v7474_v18  ;;  %v7706_v0 = vadd.f32 %v2266_v9, %v1882_v23  ;;  %v604_v16 = vmul.f32 %v11387_v21, %v11335_v7  ;;  %v1628_v13 = vmul.f32 %v11388_v6, %v7443_v15 }
 0x19a   : > { %11383 = vst [vmem:[#allocation101_spill] sm:$0xff] %v7697_v20  ;;  %v11390_v63 = vmax.f32 %v11389_v30, 0.0  ;;  %v11392_v19 = vmax.f32 %v11391_v14, 0.0  ;;  %v609_v47 = vmul.f32 %v11393_v34, %v7702_v35  ;;  %v1633_v9 = vmul.f32 %v11297_v60, %v7690_v25 }
 0x19b   : > { %11386 = vst [vmem:[#allocation77_spill] sm:$0xff] %v7706_v0  ;;  %v7722_v55 = vrot.slane %v342_v5, %v11298_v45  ;;  %v1887_v26 = vadd.f32 %v1631_v29, %v1247_v49  ;;  %v1244_v23 = vadd.f32 %v988_v62, %v604_v16  ;;  %v2268_v30 = vmul.f32 %v6988_v50, %v7474_v18  ;;  %v11395_v16 = vld [vmem:[#allocation122_spill] sm:$0xff]  ;;  %v11396_v49 = vld [vmem:[#allocation89_spill] sm:$0xff] }
 0x19c   : > { %3062 = vadd.xlane.f32.xlu0 %v11390_v63  ;;  %3072 = vadd.xlane.f32.xlu1 %v11392_v19  ;;  %v990_v14 = vmul.f32 %v11300_v4, %v11289_v51  ;;  %v1249_v63 = vadd.f32 %v993_v58, %v609_v47  ;;  %v995_v56 = vmul.f32 %v11301_v1, %v7674_v24  ;;  %v11397_v51 = vmax.f32 %v11396_v49, 0.0  ;;  %v11398_v19 = vld [vmem:[#allocation55_spill] sm:$0xff] }
 0x19d   : > { %v2273_v27 = vmul.f32 %v6802_v32, %v7722_v55  ;;  %v7733_v60 = vadd.f32 %v2271_v48, %v1887_v26  ;;  %v1884_v5 = vadd.f32 %v1628_v13, %v1244_v23  ;;  %v606_v29 = vmul.f32 %v11308_v39, %v11335_v7  ;;  %v11400_v1 = vld [vmem:[#allocation7_spill] sm:$0xff]  ;;  %v11401_v13 = vld [vmem:[#allocation72_spill] sm:$0xff] }
 0x19e   : > { %v1630_v62 = vmul.f32 %v11395_v16, %v7443_v15  ;;  %v11399_v47 = vmax.f32 %v11398_v19, 0.0  ;;  %v1889_v20 = vadd.f32 %v1633_v9, %v1249_v63  ;;  %v611_v48 = vmul.f32 %v11400_v1, %v7702_v35  ;;  %v11404_v9 = vld [vmem:[#allocation130_spill] sm:$0xff] }
 0x19f   : > { %11394 = vst [vmem:[#allocation36_spill] sm:$0xff] %v7733_v60  ;;  %v1635_v26 = vmul.f32 %v11401_v13, %v7690_v25  ;;  %v7748_v23 = vadd.f32 %v2268_v30, %v1884_v5  ;;  %v1246_v7 = vadd.f32 %v990_v14, %v606_v29  ;;  %v2270_v15 = vmul.f32 %v7017_v54, %v7474_v18  ;;  %v11406_v30 = vld [vmem:[#allocation52_spill] sm:$0xff]  ;;  %v11408_v18 = vld [vmem:[#allocation67_spill] sm:$0xff] }
 0x1a0   : > { %3066 = vadd.xlane.f32.xlu0 %v11397_v51  ;;  %3076 = vadd.xlane.f32.xlu1 %v11399_v47  ;;  %v992_v49 = vmul.f32 %v11310_v61, %v7674_v24  ;;  %v7754_v19 = vadd.f32 %v2273_v27, %v1889_v20  ;;  %v1251_v51 = vadd.f32 %v995_v56, %v611_v48  ;;  %v11405_v47 = vld [vmem:[#allocation6_spill] sm:$0xff]  ;;  %v11407_v14 = vld [vmem:[#allocation108_spill] sm:$0xff]  ;;  %v11409_v61 = vld [vmem:[#allocation41_spill] sm:$0xff] }
 0x1a1   : > { %11402 = vst [vmem:[#allocation79_spill] sm:$0xff] %v7748_v23  ;;  %v2275_v63 = vmul.f32 %v11404_v9, %v7722_v55  ;;  %v608_v58 = vmul.f32 %v11405_v47, %v7702_v35  ;;  %v1886_v0 = vadd.f32 %v1630_v62, %v1246_v7  ;;  %v1632_v5 = vmul.f32 %v11406_v30, %v7690_v25  ;;  %v11411_v56 = vld [vmem:[#allocation69_spill] sm:$0xff]  ;;  %v11421_v60 = vld [vmem:[#allocation83_spill] sm:$0xff] }
 0x1a2   : > { %11403 = vst [vmem:[#allocation97_spill] sm:$0xff] %v7754_v19  ;;  %v2272_v29 = vmul.f32 %v11407_v14, %v7722_v55  ;;  %v997_v13 = vmul.f32 %v11408_v18, %v7674_v24  ;;  %v11410_v20 = vmax.f32 %v11409_v61, 0.0  ;;  %v11412_v27 = vmax.f32 %v11411_v56, 0.0  ;;  %v11413_v62 = vld [vmem:[#allocation9_spill] sm:$0xff]  ;;  %v11416_v18 = vld [vmem:[#allocation120_spill] sm:$0xff]  ;;  %v11417_v61 = vld [vmem:[#allocation62_spill] sm:$0xff] }
 0x1a3   : > { %v1891_v9 = vadd.f32 %v1635_v26, %v1251_v51  ;;  %v613_v7 = vmul.f32 %v11413_v62, %v7702_v35  ;;  %v11414_v30 = vld [vmem:[#allocation49_spill] sm:$0xff]  ;;  %v7775_v1 = vadd.f32 %v2270_v15, %v1886_v0  ;;  %v1248_v14 = vadd.f32 %v992_v49, %v608_v58  ;;  %v11420_v51 = vld [vmem:[#allocation56_spill] sm:$0xff]  ;;  %v11426_v62 = vld [vmem:[#allocation11_spill] sm:$0xff] }
 0x1a4   : > { %3070 = vadd.xlane.f32.xlu0 %v11410_v20  ;;  %3080 = vadd.xlane.f32.xlu1 %v11412_v27  ;;  %v994_v47 = vmul.f32 %v11414_v30, %v7674_v24  ;;  %v1637_v54 = vmul.f32 %v11416_v18, %v7690_v25  ;;  %v2277_v20 = vmul.f32 %v11417_v61, %v7722_v55  ;;  %v11419_v27 = vld [vmem:[#allocation5_spill] sm:$0xff]  ;;  %v11422_v61 = vld [vmem:[#allocation114_spill] sm:$0xff] }
 0x1a5   : > { %11415 = vst [vmem:[#allocation123_spill] sm:$0xff] %v7775_v1  ;;  %v7781_v56 = vadd.f32 %v2275_v63, %v1891_v9  ;;  %v610_v26 = vmul.f32 %v11419_v27, %v7702_v35  ;;  %v1634_v48 = vmul.f32 %v11420_v51, %v7690_v25  ;;  %v999_v30 = vmul.f32 %v11421_v60, %v7674_v24  ;;  %v11424_v63 = vld [vmem:[#allocation125_spill] sm:$0xff] }
 0x1a6   : > { %v1888_v0 = vadd.f32 %v1632_v5, %v1248_v14  ;;  %v1253_v15 = vadd.f32 %v997_v13, %v613_v7  ;;  %v2274_v58 = vmul.f32 %v6835_v8, %v7722_v55  ;;  %v996_v49 = vmul.f32 %v11337_v33, %v7674_v24 }
 0x1a7   : > { %11418 = vst [vmem:[#allocation127_spill] sm:$0xff] %v7781_v56  ;;  %v11423_v9 = vmax.f32 %v11422_v61, 0.0  ;;  %v11425_v18 = vmax.f32 %v11424_v63, 0.0  ;;  %v1250_v51 = vadd.f32 %v994_v47, %v610_v26  ;;  %v615_v60 = vmul.f32 %v11426_v62, %v7702_v35  ;;  %v11428_v26 = vld [vmem:[#allocation58_spill] sm:$0xff] }
 0x1a8   : > { %v1639_v13 = vmul.f32 %v11232_v11, %v7690_v25  ;;  %v7802_v5 = vadd.f32 %v2272_v29, %v1888_v0  ;;  %v1893_v14 = vadd.f32 %v1637_v54, %v1253_v15  ;;  %v612_v7 = vmul.f32 %v11345_v44, %v7702_v35  ;;  %v11430_v0 = vld [vmem:[#allocation70_spill] sm:$0xff] }
 0x1a9   : > { %3074 = vadd.xlane.f32.xlu0 %v11423_v9  ;;  %3084 = vadd.xlane.f32.xlu1 %v11425_v18  ;;  %v1001_v61 = vmul.f32 %v11348_v52, %v7674_v24  ;;  %v1890_v9 = vadd.f32 %v1634_v48, %v1250_v51  ;;  %v1255_v18 = vadd.f32 %v999_v30, %v615_v60  ;;  %v11431_v15 = vmax.f32 %v11430_v0, 0.0  ;;  %v11432_v48 = vld [vmem:[#allocation126_spill] sm:$0xff] }
 0x1aa   : > { %11427 = vst [vmem:[#allocation118_spill] sm:$0xff] %v7802_v5  ;;  %v2279_v47 = vmul.f32 %v6837_v37, %v7722_v55  ;;  %v1636_v63 = vmul.f32 %v11428_v26, %v7690_v25  ;;  %v7812_v27 = vadd.f32 %v2277_v20, %v1893_v14  ;;  %v1252_v23 = vadd.f32 %v996_v49, %v612_v7  ;;  %v2947_v14 = vpop.xlane.xlu1 %2946 }
 0x1ab   : > { %v617_v54 = vmul.f32 %v11350_v10, %v7702_v35  ;;  %v1641_v29 = vmul.f32 %v11242_v22, %v7690_v25  ;;  %v11433_v60 = vmax.f32 %v11432_v48, 0.0  ;;  %v1895_v51 = vadd.f32 %v1639_v13, %v1255_v18  ;;  %v11436_v18 = vld [vmem:[#allocation119_spill] sm:$0xff] }
 0x1ac   : > { %11429 = vst [vmem:[#allocation124_spill] sm:$0xff] %v7812_v27  ;;  %v2276_v20 = vmul.f32 %v6868_v2, %v7722_v55  ;;  %v998_v49 = vmul.f32 %v11248_v41, %v7674_v24  ;;  %v7828_v22 = vadd.f32 %v2274_v58, %v1890_v9  ;;  %v614_v13 = vmul.f32 %v11356_v17, %v7702_v35  ;;  %v11437_v58 = vld [vmem:[#allocation105_spill] sm:$0xff] }
 0x1ad   : > { %3078 = vadd.xlane.f32.xlu0 %v11431_v15  ;;  %3088 = vadd.xlane.f32.xlu1 %v11433_v60  ;;  %v1257_v0 = vadd.f32 %v1001_v61, %v617_v54  ;;  %v2281_v15 = vmul.f32 %v6870_v42, %v7722_v55  ;;  %v7832_v48 = vadd.f32 %v2279_v47, %v1895_v51  ;;  %v11438_v9 = vld [vmem:[#allocation29_spill] sm:$0xff]  ;;  %v11440_v47 = vld [vmem:[#allocation35_spill] sm:$0xff] }
 0x1ae   : > { %11434 = vst [vmem:[#allocation112_spill] sm:$0xff] %v7828_v22  ;;  %v1892_v60 = vadd.f32 %v1636_v63, %v1252_v23  ;;  %v1638_v30 = vmul.f32 %v11436_v18, %v7690_v25  ;;  %v1003_v61 = vmul.f32 %v11437_v58, %v7674_v24  ;;  %v11439_v54 = vmax.f32 %v11438_v9, 0.0  ;;  %v7851_v56 = vpop.xlane.xlu1 %2952  ;;  %v11444_v9 = vld [vmem:[#allocation18_spill] sm:$0xff]  ;;  %v11447_v22 = vld [vmem:[#allocation132_spill] sm:$0xff] }
 0x1af   : > { %11435 = vst [vmem:[#allocation115_spill] sm:$0xff] %v7832_v48  ;;  %v1897_v7 = vadd.f32 %v1641_v29, %v1257_v0  ;;  %v11441_v51 = vmax.f32 %v11440_v47, 0.0  ;;  %v1254_v1 = vadd.f32 %v998_v49, %v614_v13  ;;  %v2278_v19 = vmul.f32 %v6897_v57, %v7722_v55  ;;  %v11445_v47 = vld [vmem:[#allocation99_spill] sm:$0xff] }
 0x1b0   : > { %v7847_v63 = vadd.f32 %v2276_v20, %v1892_v60  ;;  %v11446_v60 = vld [vmem:[#allocation103_spill] sm:$0xff]  ;;  %v2283_v23 = vmul.f32 %v6899_v53, %v7722_v55  ;;  %v1005_v29 = vmul.f32 %v11262_v46, %v7674_v24  ;;  %v11448_v27 = vmax.f32 %v11447_v22, 0.0 }
 0x1b1   : > { %3082 = vadd.xlane.f32.xlu0 %v11439_v54  ;;  %3092 = vadd.xlane.f32.xlu1 %v11441_v51  ;;  %v7854_v0 = vadd.f32 %v2281_v15, %v1897_v7  ;;  %v619_v54 = vmul.f32 %v11444_v9, %v7702_v35  ;;  %v1000_v51 = vmul.f32 %v11445_v47, %v7674_v24  ;;  %v11453_v20 = vld [vmem:[#allocation51_spill] sm:$0xff] }
 0x1b2   : > { %11442 = vst [vmem:[#allocation129_spill] sm:$0xff] %v7847_v63  ;;  %v1894_v49 = vadd.f32 %v1638_v30, %v1254_v1  ;;  %v1643_v13 = vmul.f32 %v11446_v60, %v7690_v25  ;;  %v616_v7 = vmul.f32 %v11363_v28, %v7702_v35  ;;  %v1640_v15 = vmul.f32 %v11261_v40, %v7690_v25  ;;  %v11449_v1 = vld [vmem:[#allocation86_spill] sm:$0xff]  ;;  %v2949_v5 = vpop.xlane.xlu0 %2948  ;;  %v7882_v40 = vpop.xlane.xlu1 %2956 }
 0x1b3   : > { %11443 = vst [vmem:[#allocation78_spill] sm:$0xff] %v7854_v0  ;;  %v1259_v41 = vadd.f32 %v1003_v61, %v619_v54  ;;  %v11450_v30 = vmax.f32 %v11449_v1, 0.0  ;;  %v2280_v61 = vmul.f32 %v6929_v31, %v7722_v55  ;;  %v621_v54 = vmul.f32 %v11371_v59, %v7702_v35 }
 0x1b4   : > { %v7876_v48 = vadd.f32 %v2278_v19, %v1894_v49  ;;  %v1645_v1 = vmul.f32 %v11372_v36, %v7690_v25  ;;  %v1002_v19 = vmul.f32 %v11268_v43, %v7674_v24  ;;  %v11452_v49 = vld [vmem:[#allocation80_spill] sm:$0xff]  ;;  %v3724_v63 = vrot.slane %v2949_v5, %v11453_v20  ;;  %v11455_v36 = vld [vmem:[#allocation42_spill] sm:$0xff] }
 0x1b5   : > { %3086 = vadd.xlane.f32.xlu0 %v11448_v27  ;;  %3096 = vadd.xlane.f32.xlu1 %v11450_v30  ;;  %v1256_v27 = vadd.f32 %v1000_v51, %v616_v7  ;;  %v3719_v30 = vrot.slane %v2947_v14, %v11452_v49  ;;  %v1899_v46 = vadd.f32 %v1643_v13, %v1259_v41  ;;  %v11454_v7 = vld [vmem:[#allocation94_spill] sm:$0xff]  ;;  %v11456_v43 = vmax.f32 %v11455_v36, 0.0  ;;  %v11457_v14 = vld [vmem:[#allocation95_spill] sm:$0xff]  ;;  %v11464_v41 = vld [vmem:[#allocation109_spill] sm:$0xff] }
 0x1b6   : > { %11451 = vst [vmem:[#allocation113_spill] sm:$0xff] %v7876_v48  ;;  %v2285_v59 = vmul.f32 %v6931_v12, %v7722_v55  ;;  %v1261_v28 = vadd.f32 %v1005_v29, %v621_v54  ;;  %v618_v51 = vmul.f32 %v11374_v38, %v7702_v35  ;;  %v1642_v22 = vmul.f32 %v11454_v7, %v7690_v25  ;;  %v343_v7 = vld [vmem:[%s5630_s9 + $0x1c] sm:$0xf]  ;;  %v11471_v38 = vld [vmem:[#allocation46_spill] sm:$0xff] }
 0x1b7   : > { %v1896_v31 = vadd.f32 %v1640_v15, %v1256_v27  ;;  %v3726_v0 = vsel %vm3725_vm0, %v3724_v63, %v3719_v30  ;;  %v11458_v5 = vmax.f32 %v11457_v14, 0.0  ;;  %v7903_v13 = vadd.f32 %v2283_v23, %v1899_v46  ;;  %v2951_v15 = vpop.xlane.xlu0 %2950  ;;  %v7907_v54 = vpop.xlane.xlu1 %2960  ;;  %v11462_v14 = vld [vmem:[#allocation39_spill] sm:$0xff]  ;;  %v11463_v46 = vld [vmem:[#allocation37_spill] sm:$0xff] }
 0x1b8   : > { %v2282_v29 = vmul.f32 %v6958_v3, %v7722_v55  ;;  %v1901_v63 = vadd.f32 %v1645_v1, %v1261_v28  ;;  %v1258_v36 = vadd.f32 %v1002_v19, %v618_v51  ;;  %v623_v23 = vmul.f32 %v11463_v46, %v7702_v35  ;;  %v11465_v3 = vld [vmem:[#allocation31_spill] sm:$0xff]  ;;  %v11468_v19 = vld [vmem:[#allocation17_spill] sm:$0xff] }
 0x1b9   : > { %3090 = vadd.xlane.f32.xlu0 %v11456_v43  ;;  %3100 = vadd.xlane.f32.xlu1 %v11458_v5  ;;  %11459 = vst [vmem:[#allocation48_spill] sm:$0xff] %v7903_v13  ;;  %v7909_v27 = vadd.f32 %v2280_v61, %v1896_v31  ;;  %v11461_v43 = vld [vmem:[#allocation111_spill] sm:$0xff]  ;;  %v3731_v5 = vrot.slane %v2951_v15, %v11462_v14 }
 0x1ba   : > { %v1007_v30 = vmul.f32 %v11461_v43, %v7674_v24  ;;  %v1647_v48 = vmul.f32 %v11464_v41, %v7690_v25  ;;  %v2287_v12 = vmul.f32 %v11465_v3, %v7722_v55  ;;  %v11466_v31 = vld [vmem:[#allocation131_spill] sm:$0xff]  ;;  %v7923_v61 = vadd.f32 %v2285_v59, %v1901_v63  ;;  %v11469_v43 = vld [vmem:[#allocation28_spill] sm:$0xff]  ;;  %v11473_v59 = vld [vmem:[#allocation106_spill] sm:$0xff] }
 0x1bb   : > { %11460 = vst [vmem:[#allocation89_spill] sm:$0xff] %v7909_v27  ;;  %v3738_v28 = vrot.slane %v7851_v56, %v11466_v31  ;;  %v1898_v1 = vadd.f32 %v1642_v22, %v1258_v36  ;;  %v7926_v51 = vrot.slane %v343_v7, %v11468_v19  ;;  %v3733_v15 = vsel %vm3732_vm1, %v3731_v5, %v3726_v0  ;;  %v2955_v22 = vpop.xlane.xlu0 %2954  ;;  %v7939_v36 = vpop.xlane.xlu1 %2964  ;;  %v11474_v5 = vld [vmem:[#allocation20_spill] sm:$0xff] }
 0x1bc   : > { %11467 = vst [vmem:[#allocation55_spill] sm:$0xff] %v7923_v61  ;;  %v11470_v46 = vmax.f32 %v11469_v43, 0.0  ;;  %v11472_v41 = vmax.f32 %v11471_v38, 0.0  ;;  %v620_v53 = vmul.f32 %v11387_v21, %v7702_v35  ;;  %v1004_v56 = vmul.f32 %v11473_v59, %v7674_v24  ;;  %v11478_v0 = vld [vmem:[#allocation16_spill] sm:$0xff] }
 0x1bd   : > { %v3740_v63 = vsel %vm3739_vm2, %v3738_v28, %v3733_v15  ;;  %v1263_v43 = vadd.f32 %v1007_v30, %v623_v23  ;;  %v7943_v38 = vrot.slane %v343_v7, %v11474_v5  ;;  %v7946_v3 = vadd.f32 %v2282_v29, %v1898_v1  ;;  %v11477_v15 = vld [vmem:[#allocation34_spill] sm:$0xff]  ;;  %v11479_v23 = vld [vmem:[#allocation43_spill] sm:$0xff]  ;;  %v11480_v29 = vld [vmem:[#allocation53_spill] sm:$0xff] }
 0x1be   : > { %3094 = vadd.xlane.f32.xlu0 %v11470_v46  ;;  %3104 = vadd.xlane.f32.xlu1 %v11472_v41  ;;  %v11475_v41 = vld [vmem:[#allocation96_spill] sm:$0xff]  ;;  %v1644_v13 = vmul.f32 %v11388_v6, %v7690_v25  ;;  %v2284_v28 = vmul.f32 %v6988_v50, %v7722_v55  ;;  %v3752_v21 = vrot.slane %v7882_v40, %v11477_v15  ;;  %v11481_v1 = vmax.f32 %v11480_v29, 0.0  ;;  %v11482_v5 = vld [vmem:[#allocation13_spill] sm:$0xff] }
 0x1bf   : > { %v3745_v46 = vrot.slane %v2955_v22, %v11475_v41  ;;  %11476 = vst [vmem:[#allocation41_spill] sm:$0xff] %v7946_v3  ;;  %v1903_v59 = vadd.f32 %v1647_v48, %v1263_v43  ;;  %v7955_v30 = vrot.slane %v343_v7, %v11478_v0  ;;  %v1009_v27 = vmul.f32 %v11479_v23, %v7926_v51  ;;  %v2959_v48 = vpop.xlane.xlu0 %2958  ;;  %v11498_v3 = vld [vmem:[#allocation44_spill] sm:$0xff] }
 0x1c0   : > { %v11483_v6 = vmax.f32 %v11482_v5, 0.0  ;;  %v1260_v19 = vadd.f32 %v1004_v56, %v620_v53  ;;  %v7966_v40 = vrot.slane %v343_v7, %v11298_v45  ;;  %v7969_v0 = vpop.xlane.xlu1 %2968  ;;  %v11485_v5 = vld [vmem:[#allocation47_spill] sm:$0xff]  ;;  %v1646_v45 = vmul.f32 %v11395_v16, %v7690_v25 }
 0x1c1   : > { %v3747_v22 = vsel %vm3746_vm3, %v3745_v46, %v3740_v63  ;;  %v625_v63 = vmul.f32 %v11393_v34, %v7955_v30  ;;  %v11484_v46 = vld [vmem:[#allocation117_spill] sm:$0xff]  ;;  %v3759_v53 = vrot.slane %v2959_v48, %v11485_v5  ;;  %v7978_v7 = vadd.f32 %v2287_v12, %v1903_v59  ;;  %v11488_v48 = vld [vmem:[#allocation64_spill] sm:$0xff]  ;;  %v11490_v12 = vld [vmem:[#allocation87_spill] sm:$0xff] }
 0x1c2   : > { %3098 = vadd.xlane.f32.xlu0 %v11481_v1  ;;  %3108 = vadd.xlane.f32.xlu1 %v11483_v6  ;;  %v3754_v43 = vsel %vm10882_vm4, %v3752_v21, %v3747_v22  ;;  %v1649_v29 = vmul.f32 %v11484_v46, %v7943_v38  ;;  %v1006_v6 = vmul.f32 %v11300_v4, %v7674_v24  ;;  %v11487_v22 = vld [vmem:[#allocation26_spill] sm:$0xff]  ;;  %v11489_v4 = vmax.f32 %v11488_v48, 0.0  ;;  %v11495_v48 = vld [vmem:[#allocation57_spill] sm:$0xff] }
 0x1c3   : > { %11486 = vst [vmem:[#allocation69_spill] sm:$0xff] %v7978_v7  ;;  %v1900_v56 = vadd.f32 %v1644_v13, %v1260_v19  ;;  %v622_v21 = vmul.f32 %v11308_v39, %v7702_v35  ;;  %v3766_v1 = vrot.slane %v7907_v54, %v11487_v22  ;;  %v1265_v50 = vadd.f32 %v1009_v27, %v625_v63  ;;  %v11493_v54 = vld [vmem:[#allocation50_spill] sm:$0xff]  ;;  %v2963_v59 = vpop.xlane.xlu0 %2962  ;;  %v11511_v7 = vld [vmem:[#allocation63_spill] sm:$0xff] }
 0x1c4   : > { %v2289_v61 = vmul.f32 %v6802_v32, %v7966_v40  ;;  %v3761_v24 = vsel %vm10883_vm5, %v3759_v53, %v3754_v43  ;;  %v11491_v13 = vmax.f32 %v11490_v12, 0.0  ;;  %v1011_v27 = vmul.f32 %v11493_v54, %v7926_v51  ;;  %v7999_v39 = vpop.xlane.xlu1 %2972  ;;  %v11506_v32 = vld [vmem:[#allocation6_spill] sm:$0xff] }
 0x1c5   : > { %v7994_v19 = vadd.f32 %v2284_v28, %v1900_v56  ;;  %v3768_v63 = vsel %vm3767_vm6, %v3766_v1, %v3761_v24  ;;  %v1905_v25 = vadd.f32 %v1649_v29, %v1265_v50  ;;  %v1262_v43 = vadd.f32 %v1006_v6, %v622_v21  ;;  %v11496_v28 = vld [vmem:[#allocation7_spill] sm:$0xff]  ;;  %v11499_v24 = vld [vmem:[#allocation40_spill] sm:$0xff] }
 0x1c6   : > { %3102 = vadd.xlane.f32.xlu0 %v11489_v4  ;;  %3112 = vadd.xlane.f32.xlu1 %v11491_v13  ;;  %v11494_v4 = vld [vmem:[#allocation33_spill] sm:$0xff]  ;;  %v3773_v12 = vrot.slane %v2963_v59, %v11495_v48  ;;  %v627_v56 = vmul.f32 %v11496_v28, %v7955_v30  ;;  %v11497_v13 = vld [vmem:[#allocation72_spill] sm:$0xff]  ;;  %v1008_v1 = vmul.f32 %v11498_v3, %v7926_v51  ;;  %v11504_v28 = vld [vmem:[#allocation98_spill] sm:$0xff] }
 0x1c7   : > { %11492 = vst [vmem:[#allocation114_spill] sm:$0xff] %v7994_v19  ;;  %v2286_v53 = vmul.f32 %v11494_v4, %v7722_v55  ;;  %v1651_v35 = vmul.f32 %v11497_v13, %v7943_v38  ;;  %v3780_v54 = vrot.slane %v7939_v36, %v11499_v24  ;;  %v8012_v50 = vadd.f32 %v2289_v61, %v1905_v25  ;;  %v11501_v55 = vld [vmem:[#allocation130_spill] sm:$0xff]  ;;  %v11502_v59 = vld [vmem:[#allocation76_spill] sm:$0xff]  ;;  %v2967_v61 = vpop.xlane.xlu0 %2966 }
 0x1c8   : > { %v1902_v29 = vadd.f32 %v1646_v45, %v1262_v43  ;;  %v2291_v6 = vmul.f32 %v11501_v55, %v7966_v40  ;;  %v3775_v21 = vsel %vm3774_vm7, %v3773_v12, %v3768_v63  ;;  %v11503_v4 = vmax.f32 %v11502_v59, 0.0  ;;  %v2977_v25 = vpop.xlane.xlu1 %2976  ;;  %v11507_v63 = vld [vmem:[#allocation52_spill] sm:$0xff]  ;;  %v11513_v43 = vld [vmem:[#allocation9_spill] sm:$0xff] }
 0x1c9   : > { %11500 = vst [vmem:[#allocation125_spill] sm:$0xff] %v8012_v50  ;;  %v11505_v16 = vmax.f32 %v11504_v28, 0.0  ;;  %v1267_v3 = vadd.f32 %v1011_v27, %v627_v56  ;;  %v624_v36 = vmul.f32 %v11506_v32, %v7955_v30  ;;  %v3782_v45 = vsel %vm3781_vm8, %v3780_v54, %v3775_v21  ;;  %v11512_v21 = vld [vmem:[#allocation108_spill] sm:$0xff]  ;;  %v11525_v50 = vld [vmem:[#allocation75_spill] sm:$0xff] }
 0x1ca   : > { %3106 = vadd.xlane.f32.xlu0 %v11503_v4  ;;  %v1648_v12 = vmul.f32 %v11507_v63, %v7943_v38  ;;  %v11508_v4 = vld [vmem:[#allocation67_spill] sm:$0xff]  ;;  %v8031_v27 = vadd.f32 %v2286_v53, %v1902_v29  ;;  %v3794_v54 = vrot.slane %v7969_v0, %v11511_v7  ;;  %v2288_v32 = vmul.f32 %v11512_v21, %v7966_v40  ;;  %v11514_v63 = vld [vmem:[#allocation120_spill] sm:$0xff] }
 0x1cb   : > { %3116 = vadd.xlane.f32.xlu1 %v11505_v16  ;;  %v1013_v28 = vmul.f32 %v11508_v4, %v7926_v51  ;;  %v11509_v16 = vld [vmem:[#allocation65_spill] sm:$0xff]  ;;  %v1907_v56 = vadd.f32 %v1651_v35, %v1267_v3  ;;  %v1264_v13 = vadd.f32 %v1008_v1, %v624_v36  ;;  %v629_v19 = vmul.f32 %v11513_v43, %v7955_v30  ;;  %v11517_v53 = vld [vmem:[#allocation24_spill] sm:$0xff]  ;;  %v2971_v36 = vpop.xlane.xlu0 %2970 }
 0x1cc   : > { %v3787_v59 = vrot.slane %v2967_v61, %v11509_v16  ;;  %11510 = vst [vmem:[#allocation70_spill] sm:$0xff] %v8031_v27  ;;  %v1653_v55 = vmul.f32 %v11514_v63, %v7943_v38  ;;  %v11515_v61 = vld [vmem:[#allocation90_spill] sm:$0xff]  ;;  %v11518_v3 = vmax.f32 %v11517_v53, 0.0  ;;  %v11520_v1 = vld [vmem:[#allocation49_spill] sm:$0xff]  ;;  %v2981_v21 = vpop.xlane.xlu1 %2980 }
 0x1cd   : > { %v11516_v46 = vmax.f32 %v11515_v61, 0.0  ;;  %v8047_v0 = vadd.f32 %v2291_v6, %v1907_v56  ;;  %v1010_v29 = vmul.f32 %v11520_v1, %v7926_v51  ;;  %v1904_v63 = vadd.f32 %v1648_v12, %v1264_v13  ;;  %v11524_v56 = vld [vmem:[#allocation56_spill] sm:$0xff]  ;;  %v11537_v27 = vld [vmem:[#allocation25_spill] sm:$0xff] }
 0x1ce   : > { %v3789_v4 = vsel %vm3788_vm9, %v3787_v59, %v3782_v45  ;;  %v1269_v34 = vadd.f32 %v1013_v28, %v629_v19  ;;  %v11521_v45 = vld [vmem:[#allocation62_spill] sm:$0xff]  ;;  %v1650_v35 = vmul.f32 %v11524_v56, %v7943_v38  ;;  %v3808_v1 = vrot.slane %v7999_v39, %v11525_v50  ;;  %v11527_v28 = vld [vmem:[#allocation91_spill] sm:$0xff] }
 0x1cf   : > { %3110 = vadd.xlane.f32.xlu0 %v11516_v46  ;;  %3120 = vadd.xlane.f32.xlu1 %v11518_v3  ;;  %11519 = vst [vmem:[#allocation126_spill] sm:$0xff] %v8047_v0  ;;  %v3796_v43 = vsel %vm3795_vm10, %v3794_v54, %v3789_v4  ;;  %v2293_v59 = vmul.f32 %v11521_v45, %v7966_v40  ;;  %v11522_v46 = vld [vmem:[#allocation84_spill] sm:$0xff]  ;;  %v11523_v3 = vld [vmem:[#allocation5_spill] sm:$0xff]  ;;  %v11528_v54 = vmax.f32 %v11527_v28, 0.0  ;;  %v11538_v0 = vmax.f32 %v11537_v27, 0.0 }
 0x1d0   : > { %v3801_v61 = vrot.slane %v2971_v36, %v11522_v46  ;;  %v626_v6 = vmul.f32 %v11523_v3, %v7955_v30  ;;  %v8062_v4 = vadd.f32 %v2288_v32, %v1904_v63  ;;  %v1909_v13 = vadd.f32 %v1653_v55, %v1269_v34  ;;  %v11529_v36 = vld [vmem:[#allocation88_spill] sm:$0xff]  ;;  %v11531_v3 = vld [vmem:[#allocation83_spill] sm:$0xff]  ;;  %v2975_v32 = vpop.xlane.xlu0 %2974  ;;  %v2985_v55 = vpop.xlane.xlu1 %2984 }
 0x1d1   : > { %v2290_v19 = vmul.f32 %v6835_v8, %v7966_v40  ;;  %v11530_v53 = vmax.f32 %v11529_v36, 0.0  ;;  %v1015_v39 = vmul.f32 %v11531_v3, %v7926_v51  ;;  %v11533_v28 = vld [vmem:[#allocation92_spill] sm:$0xff]  ;;  %v11534_v36 = vld [vmem:[#allocation45_spill] sm:$0xff]  ;;  %v3832_v27 = vrot.slane %v2981_v21, %v11453_v20 }
 0x1d2   : > { %11526 = vst [vmem:[#allocation29_spill] sm:$0xff] %v8062_v4  ;;  %v3803_v12 = vsel %vm3802_vm11, %v3801_v61, %v3796_v43  ;;  %v1266_v56 = vadd.f32 %v1010_v29, %v626_v6  ;;  %v8075_v63 = vadd.f32 %v2293_v59, %v1909_v13  ;;  %v631_v43 = vmul.f32 %v11426_v62, %v7955_v30  ;;  %v11542_v4 = vld [vmem:[#allocation85_spill] sm:$0xff] }
 0x1d3   : > { %3114 = vadd.xlane.f32.xlu0 %v11528_v54  ;;  %3124 = vadd.xlane.f32.xlu1 %v11530_v53  ;;  %v3810_v34 = vsel %vm3809_vm12, %v3808_v1, %v3803_v12  ;;  %v1012_v61 = vmul.f32 %v11337_v33, %v7926_v51  ;;  %v3815_v53 = vrot.slane %v2975_v32, %v11533_v28 }
 0x1d4   : > { %11532 = vst [vmem:[#allocation35_spill] sm:$0xff] %v8075_v63  ;;  %v1906_v54 = vadd.f32 %v1650_v35, %v1266_v56  ;;  %v1655_v29 = vmul.f32 %v11232_v11, %v7943_v38  ;;  %v2295_v6 = vmul.f32 %v6837_v37, %v7966_v40  ;;  %v3822_v1 = vrot.slane %v2977_v25, %v11534_v36  ;;  %v11535_v35 = vld [vmem:[#allocation102_spill] sm:$0xff]  ;;  %v2989_v11 = vpop.xlane.xlu1 %2988 }
 0x1d5   : > { %v628_v59 = vmul.f32 %v11345_v44, %v7955_v30  ;;  %v1652_v13 = vmul.f32 %v11428_v26, %v7943_v38  ;;  %v1017_v12 = vmul.f32 %v11348_v52, %v7926_v51  ;;  %v3817_v32 = vsel %vm3816_vm13, %v3815_v53, %v3810_v34  ;;  %v2979_v26 = vpop.xlane.xlu0 %2978  ;;  %v11539_v53 = vld [vmem:[#allocation27_spill] sm:$0xff] }
 0x1d6   : > { %v11536_v56 = vmax.f32 %v11535_v35, 0.0  ;;  %v1271_v25 = vadd.f32 %v1015_v39, %v631_v43  ;;  %v2292_v44 = vmul.f32 %v6868_v2, %v7966_v40  ;;  %v8102_v33 = vsel %vm3823_vm14, %v3822_v1, %v3817_v32  ;;  %v11541_v43 = vld [vmem:[#allocation82_spill] sm:$0xff] }
 0x1d7   : > { %3128 = vadd.xlane.f32.xlu1 %v11538_v0  ;;  %v1268_v52 = vadd.f32 %v1012_v61, %v628_v59  ;;  %v633_v34 = vmul.f32 %v11350_v10, %v7955_v30  ;;  %v1657_v35 = vmul.f32 %v11539_v53, %v7943_v38  ;;  %v3828_v0 = vrot.slane %v2979_v26, %v11452_v49  ;;  %v11544_v53 = vld [vmem:[#allocation101_spill] sm:$0xff] }
 0x1d8   : > { %3118 = vadd.xlane.f32.xlu0 %v11536_v56  ;;  %v8110_v39 = vadd.f32 %v2290_v19, %v1906_v54  ;;  %v1014_v56 = vmul.f32 %v11541_v43, %v7926_v51  ;;  %v1911_v1 = vadd.f32 %v1655_v29, %v1271_v25  ;;  %v2297_v61 = vmul.f32 %v6870_v42, %v7966_v40  ;;  %v2993_v29 = vpop.xlane.xlu1 %2992 }
 0x1d9   : > { %v1908_v32 = vadd.f32 %v1652_v13, %v1268_v52  ;;  %v1273_v37 = vadd.f32 %v1017_v12, %v633_v34  ;;  %v3833_v59 = vsel %vm3725_vm0, %v3832_v27, %v3828_v0  ;;  %v11543_v10 = vmax.f32 %v11542_v4, 0.0  ;;  %v2983_v54 = vpop.xlane.xlu0 %2982 }
 0x1da   : > { %11540 = vst [vmem:[#allocation132_spill] sm:$0xff] %v8110_v39  ;;  %v11545_v21 = vmax.f32 %v11544_v53, 0.0  ;;  %v630_v19 = vmul.f32 %v11356_v17, %v7955_v30  ;;  %v1654_v52 = vmul.f32 %v11436_v18, %v7943_v38  ;;  %v8126_v13 = vadd.f32 %v2295_v6, %v1911_v1  ;;  %v11551_v1 = vld [vmem:[#allocation36_spill] sm:$0xff]  ;;  %v11558_v39 = vld [vmem:[#allocation79_spill] sm:$0xff] }
 0x1db   : > { %v8128_v12 = vadd.f32 %v2292_v44, %v1908_v32  ;;  %v1913_v25 = vadd.f32 %v1657_v35, %v1273_v37  ;;  %v3837_v4 = vrot.slane %v2983_v54, %v11462_v14  ;;  %v2294_v53 = vmul.f32 %v6897_v57, %v7966_v40  ;;  %v11549_v35 = vld [vmem:[#allocation77_spill] sm:$0xff] }
 0x1dc   : > { %3122 = vadd.xlane.f32.xlu0 %v11543_v10  ;;  %3132 = vadd.xlane.f32.xlu1 %v11545_v21  ;;  %11546 = vst [vmem:[#allocation86_spill] sm:$0xff] %v8126_v13  ;;  %v1019_v10 = vmul.f32 %v11437_v58, %v7926_v51  ;;  %v1270_v34 = vadd.f32 %v1014_v56, %v630_v19  ;;  %v11550_v56 = vmax.f32 %v11549_v35, 0.0  ;;  %v11552_v32 = vmax.f32 %v11551_v1, 0.0 }
 0x1dd   : > { %11547 = vst [vmem:[#allocation42_spill] sm:$0xff] %v8128_v12  ;;  %v635_v27 = vmul.f32 %v11444_v9, %v7955_v30  ;;  %v3842_v0 = vrot.slane %v2985_v55, %v11466_v31  ;;  %v8138_v21 = vadd.f32 %v2297_v61, %v1913_v25  ;;  %v1659_v44 = vmul.f32 %v11446_v60, %v7943_v38  ;;  %v11553_v55 = vld [vmem:[#allocation68_spill] sm:$0xff]  ;;  %v2987_v25 = vpop.xlane.xlu0 %2986  ;;  %v2997_v60 = vpop.xlane.xlu1 %2996  ;;  %v11567_v12 = vld [vmem:[#allocation94_spill] sm:$0xff] }
 0x1de   : > { %v1016_v37 = vmul.f32 %v11445_v47, %v7926_v51  ;;  %v3838_v6 = vsel %vm3732_vm1, %v3837_v4, %v3833_v59  ;;  %v1910_v54 = vadd.f32 %v1654_v52, %v1270_v34  ;;  %v2299_v61 = vmul.f32 %v11553_v55, %v7966_v40  ;;  %v11554_v47 = vld [vmem:[#allocation15_spill] sm:$0xff]  ;;  %v11555_v4 = vld [vmem:[#allocation121_spill] sm:$0xff] }
 0x1df   : > { %11548 = vst [vmem:[#allocation95_spill] sm:$0xff] %v8138_v21  ;;  %v3843_v26 = vsel %vm3739_vm2, %v3842_v0, %v3838_v6  ;;  %v1275_v63 = vadd.f32 %v1019_v10, %v635_v27  ;;  %v632_v59 = vmul.f32 %v11554_v47, %v7955_v30  ;;  %v1656_v35 = vmul.f32 %v11555_v4, %v7943_v38  ;;  %v11557_v10 = vld [vmem:[#allocation30_spill] sm:$0xff]  ;;  %v11560_v4 = vld [vmem:[#allocation97_spill] sm:$0xff]  ;;  %v11566_v52 = vld [vmem:[#allocation19_spill] sm:$0xff] }
 0x1e0   : > { %3126 = vadd.xlane.f32.xlu0 %v11550_v56  ;;  %3136 = vadd.xlane.f32.xlu1 %v11552_v32  ;;  %v3847_v56 = vrot.slane %v2987_v25, %v11475_v41  ;;  %v8160_v34 = vadd.f32 %v2294_v53, %v1910_v54  ;;  %v3852_v32 = vrot.slane %v2989_v11, %v11477_v15  ;;  %v11559_v47 = vmax.f32 %v11558_v39, 0.0  ;;  %v11562_v53 = vld [vmem:[#allocation107_spill] sm:$0xff]  ;;  %v11563_v11 = vld [vmem:[#allocation104_spill] sm:$0xff] }
 0x1e1   : > { %v1915_v19 = vadd.f32 %v1659_v44, %v1275_v63  ;;  %v1272_v0 = vadd.f32 %v1016_v37, %v632_v59  ;;  %v2296_v27 = vmul.f32 %v11557_v10, %v7966_v40  ;;  %v11561_v25 = vmax.f32 %v11560_v4, 0.0  ;;  %v2991_v44 = vpop.xlane.xlu0 %2990  ;;  %v8176_v59 = vpop.xlane.xlu1 %3000 }
 0x1e2   : > { %11556 = vst [vmem:[#allocation28_spill] sm:$0xff] %v8160_v34  ;;  %v3848_v6 = vsel %vm3746_vm3, %v3847_v56, %v3843_v26  ;;  %v1021_v54 = vmul.f32 %v11562_v53, %v7926_v51  ;;  %v1018_v63 = vmul.f32 %v11563_v11, %v7926_v51  ;;  %v3857_v56 = vrot.slane %v2991_v44, %v11485_v5 }
 0x1e3   : > { %v3853_v37 = vsel %vm10882_vm4, %v3852_v32, %v3848_v6  ;;  %v8178_v26 = vadd.f32 %v2299_v61, %v1915_v19  ;;  %v1912_v39 = vadd.f32 %v1656_v35, %v1272_v0  ;;  %v634_v21 = vmul.f32 %v11566_v52, %v7955_v30  ;;  %v11569_v61 = vld [vmem:[#allocation71_spill] sm:$0xff] }
 0x1e4   : > { %3130 = vadd.xlane.f32.xlu0 %v11559_v47  ;;  %3140 = vadd.xlane.f32.xlu1 %v11561_v25  ;;  %v11564_v47 = vld [vmem:[#allocation22_spill] sm:$0xff]  ;;  %v11565_v25 = vld [vmem:[#allocation128_spill] sm:$0xff]  ;;  %v1658_v11 = vmul.f32 %v11567_v12, %v7943_v38  ;;  %v3862_v32 = vrot.slane %v2993_v29, %v11487_v22  ;;  %v2301_v35 = vmul.f32 %v11569_v61, %v7966_v40  ;;  %v11570_v0 = vld [vmem:[#allocation111_spill] sm:$0xff] }
 0x1e5   : > { %v637_v4 = vmul.f32 %v11564_v47, %v7955_v30  ;;  %v1661_v1 = vmul.f32 %v11565_v25, %v7943_v38  ;;  %v8190_v19 = vadd.f32 %v2296_v27, %v1912_v39  ;;  %v1023_v6 = vmul.f32 %v11570_v0, %v7926_v51  ;;  %v11571_v25 = vld [vmem:[#allocation123_spill] sm:$0xff]  ;;  %v2995_v27 = vpop.xlane.xlu0 %2994  ;;  %v8203_v53 = vpop.xlane.xlu1 %3004  ;;  %v11575_v61 = vld [vmem:[#allocation74_spill] sm:$0xff] }
 0x1e6   : > { %v3858_v44 = vsel %vm10883_vm5, %v3857_v56, %v3853_v37  ;;  %v11572_v13 = vmax.f32 %v11571_v25, 0.0  ;;  %v11573_v52 = vld [vmem:[#allocation127_spill] sm:$0xff]  ;;  %v1274_v10 = vadd.f32 %v1018_v63, %v634_v21  ;;  %v2298_v0 = vmul.f32 %v11575_v61, %v7966_v40  ;;  %v11576_v37 = vld [vmem:[#allocation37_spill] sm:$0xff]  ;;  %v11580_v61 = vld [vmem:[#allocation106_spill] sm:$0xff] }
 0x1e7   : > { %11568 = vst [vmem:[#allocation46_spill] sm:$0xff] %v8190_v19  ;;  %v11574_v47 = vmax.f32 %v11573_v52, 0.0  ;;  %v1277_v29 = vadd.f32 %v1021_v54, %v637_v4  ;;  %v3863_v39 = vsel %vm3767_vm6, %v3862_v32, %v3858_v44  ;;  %v639_v56 = vmul.f32 %v11576_v37, %v7955_v30  ;;  %v344_v52 = vld [vmem:[%s5630_s9 + $0x20] sm:$0xf]  ;;  %v11579_v44 = vld [vmem:[#allocation31_spill] sm:$0xff] }
 0x1e8   : > { %3134 = vadd.xlane.f32.xlu0 %v11572_v13  ;;  %v11577_v13 = vld [vmem:[#allocation109_spill] sm:$0xff]  ;;  %v1914_v54 = vadd.f32 %v1658_v11, %v1274_v10  ;;  %v3872_v4 = vrot.slane %v2997_v60, %v11499_v24  ;;  %v2303_v34 = vmul.f32 %v11579_v44, %v7966_v40  ;;  %v1020_v37 = vmul.f32 %v11580_v61, %v7926_v51  ;;  %v11586_v60 = vld [vmem:[#allocation20_spill] sm:$0xff] }
 0x1e9   : > { %3144 = vadd.xlane.f32.xlu1 %v11574_v47  ;;  %v1663_v25 = vmul.f32 %v11577_v13, %v7943_v38  ;;  %v3867_v47 = vrot.slane %v2995_v27, %v11495_v48  ;;  %v1917_v12 = vadd.f32 %v1661_v1, %v1277_v29  ;;  %v11578_v21 = vld [vmem:[#allocation17_spill] sm:$0xff]  ;;  %v1279_v32 = vadd.f32 %v1023_v6, %v639_v56  ;;  %v11581_v13 = vld [vmem:[#allocation118_spill] sm:$0xff]  ;;  %v11583_v27 = vld [vmem:[#allocation124_spill] sm:$0xff]  ;;  %v2999_v29 = vpop.xlane.xlu0 %2998  ;;  %v3009_v44 = vpop.xlane.xlu1 %3008 }
 0x1ea   : > { %v8214_v63 = vrot.slane %v344_v52, %v11578_v21  ;;  %v11582_v9 = vmax.f32 %v11581_v13, 0.0  ;;  %v11584_v1 = vmax.f32 %v11583_v27, 0.0  ;;  %v8230_v6 = vrot.slane %v344_v52, %v11586_v60  ;;  %v11588_v13 = vld [vmem:[#allocation23_spill] sm:$0xff]  ;;  %v11589_v27 = vld [vmem:[#allocation32_spill] sm:$0xff] }
 0x1eb   : > { %v3868_v55 = vsel %vm3774_vm7, %v3867_v47, %v3863_v39  ;;  %v8227_v11 = vadd.f32 %v2301_v35, %v1917_v12  ;;  %v8233_v61 = vadd.f32 %v2298_v0, %v1914_v54  ;;  %v1919_v39 = vadd.f32 %v1663_v25, %v1279_v32  ;;  %v11590_v12 = vld [vmem:[#allocation16_spill] sm:$0xff]  ;;  %v11592_v54 = vld [vmem:[#allocation81_spill] sm:$0xff] }
 0x1ec   : > { %3138 = vadd.xlane.f32.xlu0 %v11582_v9  ;;  %v3873_v56 = vsel %vm3781_vm8, %v3872_v4, %v3868_v55  ;;  %v636_v9 = vmul.f32 %v11588_v13, %v7955_v30  ;;  %v3877_v47 = vrot.slane %v2999_v29, %v11509_v16  ;;  %v8241_v35 = vrot.slane %v344_v52, %v11590_v12  ;;  %v11593_v29 = vld [vmem:[#allocation112_spill] sm:$0xff]  ;;  %v11595_v12 = vld [vmem:[#allocation115_spill] sm:$0xff] }
 0x1ed   : > { %3148 = vadd.xlane.f32.xlu1 %v11584_v1  ;;  %11585 = vst [vmem:[#allocation53_spill] sm:$0xff] %v8227_v11  ;;  %11587 = vst [vmem:[#allocation13_spill] sm:$0xff] %v8233_v61  ;;  %v1660_v1 = vmul.f32 %v11589_v27, %v7943_v38  ;;  %v1025_v10 = vmul.f32 %v11479_v23, %v8214_v63  ;;  %v3882_v55 = vrot.slane %v8176_v59, %v11511_v7  ;;  %v11597_v13 = vld [vmem:[#allocation8_spill] sm:$0xff]  ;;  %v11606_v23 = vld [vmem:[#allocation78_spill] sm:$0xff] }
 0x1ee   : > { %v8247_v0 = vadd.f32 %v2303_v34, %v1919_v39  ;;  %v1276_v25 = vadd.f32 %v1020_v37, %v636_v9  ;;  %v2300_v4 = vmul.f32 %v11592_v54, %v7966_v40  ;;  %v3878_v32 = vsel %vm3788_vm9, %v3877_v47, %v3873_v56  ;;  %v11598_v34 = vld [vmem:[#allocation117_spill] sm:$0xff]  ;;  %v3003_v37 = vpop.xlane.xlu0 %3002  ;;  %v3013_v54 = vpop.xlane.xlu1 %3012  ;;  %v11602_v56 = vld [vmem:[#allocation38_spill] sm:$0xff] }
 0x1ef   : > { %v11594_v27 = vmax.f32 %v11593_v29, 0.0  ;;  %v11596_v60 = vmax.f32 %v11595_v12, 0.0  ;;  %v641_v59 = vmul.f32 %v11597_v13, %v8241_v35  ;;  %v1665_v39 = vmul.f32 %v11598_v34, %v8230_v6  ;;  %v11599_v47 = vld [vmem:[#allocation21_spill] sm:$0xff] }
 0x1f0   : > { %11591 = vst [vmem:[#allocation64_spill] sm:$0xff] %v8247_v0  ;;  %v3883_v9 = vsel %vm3795_vm10, %v3882_v55, %v3878_v32  ;;  %v8264_v29 = vrot.slane %v344_v52, %v11599_v47  ;;  %v3887_v12 = vrot.slane %v3003_v37, %v11522_v46  ;;  %v1916_v13 = vadd.f32 %v1660_v1, %v1276_v25  ;;  %v11601_v55 = vld [vmem:[#allocation116_spill] sm:$0xff]  ;;  %v11603_v52 = vld [vmem:[#allocation122_spill] sm:$0xff] }
 0x1f1   : > { %3142 = vadd.xlane.f32.xlu0 %v11594_v27  ;;  %3152 = vadd.xlane.f32.xlu1 %v11596_v60  ;;  %v11600_v27 = vld [vmem:[#allocation110_spill] sm:$0xff]  ;;  %v1281_v19 = vadd.f32 %v1025_v10, %v641_v59  ;;  %v3892_v34 = vrot.slane %v8203_v53, %v11525_v50  ;;  %v638_v11 = vmul.f32 %v11602_v56, %v7955_v30  ;;  %v11607_v1 = vmax.f32 %v11606_v23, 0.0  ;;  %v11611_v23 = vld [vmem:[#allocation7_spill] sm:$0xff] }
 0x1f2   : > { %v1022_v60 = vmul.f32 %v11600_v27, %v7926_v51  ;;  %v2305_v32 = vmul.f32 %v11601_v55, %v8264_v29  ;;  %v1662_v47 = vmul.f32 %v11603_v52, %v7943_v38  ;;  %v3888_v51 = vsel %vm3802_vm11, %v3887_v12, %v3883_v9  ;;  %v11604_v27 = vld [vmem:[#allocation129_spill] sm:$0xff]  ;;  %v3007_v59 = vpop.xlane.xlu0 %3006  ;;  %v3017_v30 = vpop.xlane.xlu1 %3016  ;;  %v11610_v9 = vld [vmem:[#allocation50_spill] sm:$0xff] }
 0x1f3   : > { %v11605_v37 = vmax.f32 %v11604_v27, 0.0  ;;  %v8284_v53 = vadd.f32 %v2300_v4, %v1916_v13  ;;  %v1921_v25 = vadd.f32 %v1665_v39, %v1281_v19  ;;  %v3893_v61 = vsel %vm3809_vm12, %v3892_v34, %v3888_v51  ;;  %v11609_v38 = vld [vmem:[#allocation33_spill] sm:$0xff]  ;;  %v11612_v13 = vld [vmem:[#allocation72_spill] sm:$0xff] }
 0x1f4   : > { %v1278_v56 = vadd.f32 %v1022_v60, %v638_v11  ;;  %v2302_v52 = vmul.f32 %v11609_v38, %v7966_v40  ;;  %v1027_v27 = vmul.f32 %v11610_v9, %v8214_v63  ;;  %v3897_v12 = vrot.slane %v3007_v59, %v11533_v28  ;;  %v11613_v19 = vld [vmem:[#allocation44_spill] sm:$0xff]  ;;  %v11614_v40 = vld [vmem:[#allocation130_spill] sm:$0xff]  ;;  %v11615_v59 = vld [vmem:[#allocation113_spill] sm:$0xff] }
 0x1f5   : > { %3146 = vadd.xlane.f32.xlu0 %v11605_v37  ;;  %3156 = vadd.xlane.f32.xlu1 %v11607_v1  ;;  %11608 = vst [vmem:[#allocation87_spill] sm:$0xff] %v8284_v53  ;;  %v643_v37 = vmul.f32 %v11611_v23, %v8241_v35  ;;  %v1667_v4 = vmul.f32 %v11612_v13, %v8230_v6  ;;  %v11616_v10 = vmax.f32 %v11615_v59, 0.0  ;;  %v11617_v23 = vld [vmem:[#allocation48_spill] sm:$0xff]  ;;  %v11626_v53 = vld [vmem:[#allocation89_spill] sm:$0xff] }
 0x1f6   : > { %v1024_v39 = vmul.f32 %v11613_v19, %v8214_v63  ;;  %v3902_v34 = vrot.slane %v3009_v44, %v11534_v36  ;;  %v8299_v11 = vadd.f32 %v2305_v32, %v1921_v25  ;;  %v1918_v60 = vadd.f32 %v1662_v47, %v1278_v56  ;;  %v11619_v19 = vld [vmem:[#allocation6_spill] sm:$0xff]  ;;  %v11620_v44 = vld [vmem:[#allocation52_spill] sm:$0xff]  ;;  %v3011_v47 = vpop.xlane.xlu0 %3010  ;;  %v3021_v25 = vpop.xlane.xlu1 %3020 }
 0x1f7   : > { %v2307_v51 = vmul.f32 %v11614_v40, %v8264_v29  ;;  %v3898_v1 = vsel %vm3816_vm13, %v3897_v12, %v3893_v61  ;;  %v11618_v38 = vmax.f32 %v11617_v23, 0.0  ;;  %v640_v0 = vmul.f32 %v11619_v19, %v8241_v35  ;;  %v11621_v61 = vld [vmem:[#allocation108_spill] sm:$0xff] }
 0x1f8   : > { %v1664_v32 = vmul.f32 %v11620_v44, %v8230_v6  ;;  %v3903_v56 = vsel %vm3823_vm14, %v3902_v34, %v3898_v1  ;;  %v1283_v40 = vadd.f32 %v1027_v27, %v643_v37  ;;  %v2304_v12 = vmul.f32 %v11621_v61, %v8264_v29  ;;  %v11623_v34 = vld [vmem:[#allocation9_spill] sm:$0xff]  ;;  %v11624_v37 = vld [vmem:[#allocation120_spill] sm:$0xff] }
 0x1f9   : > { %3150 = vadd.xlane.f32.xlu0 %v11616_v10  ;;  %3160 = vadd.xlane.f32.xlu1 %v11618_v38  ;;  %v11622_v10 = vld [vmem:[#allocation67_spill] sm:$0xff]  ;;  %v3911_v38 = vrot.slane %v3013_v54, %v11453_v20  ;;  %v8321_v59 = vsel %vm10816_vm15, %v3903_v56, %v8102_v33  ;;  %v3907_v13 = vrot.slane %v3011_v47, %v11452_v49  ;;  %v11625_v61 = vld [vmem:[#allocation49_spill] sm:$0xff]  ;;  %v11627_v9 = vmax.f32 %v11626_v53, 0.0 }
 0x1fa   : > { %v1029_v23 = vmul.f32 %v11622_v10, %v8214_v63  ;;  %v1280_v44 = vadd.f32 %v1024_v39, %v640_v0  ;;  %v8324_v19 = vadd.f32 %v2302_v52, %v1918_v60  ;;  %v645_v27 = vmul.f32 %v11623_v34, %v8241_v35  ;;  %v11628_v33 = vld [vmem:[#allocation55_spill] sm:$0xff]  ;;  %v3015_v60 = vpop.xlane.xlu0 %3014  ;;  %v3025_v47 = vpop.xlane.xlu1 %3024 }
 0x1fb   : > { %v1669_v1 = vmul.f32 %v11624_v37, %v8230_v6  ;;  %v1026_v10 = vmul.f32 %v11625_v61, %v8214_v63  ;;  %v3912_v54 = vsel %vm3725_vm0, %v3911_v38, %v3907_v13  ;;  %v11629_v56 = vmax.f32 %v11628_v33, 0.0  ;;  %v11630_v61 = vld [vmem:[#allocation5_spill] sm:$0xff]  ;;  %v11631_v13 = vld [vmem:[#allocation56_spill] sm:$0xff] }
 0x1fc   : > { %v1923_v52 = vadd.f32 %v1667_v4, %v1283_v40  ;;  %v1920_v39 = vadd.f32 %v1664_v32, %v1280_v44  ;;  %v1285_v34 = vadd.f32 %v1029_v23, %v645_v27  ;;  %v2309_v37 = vmul.f32 %v11521_v45, %v8264_v29 }
 0x1fd   : > { %3154 = vadd.xlane.f32.xlu0 %v11627_v9  ;;  %3164 = vadd.xlane.f32.xlu1 %v11629_v56  ;;  %v642_v55 = vmul.f32 %v11630_v61, %v8241_v35  ;;  %v1666_v53 = vmul.f32 %v11631_v13, %v8230_v6  ;;  %v3916_v9 = vrot.slane %v3015_v60, %v11462_v14  ;;  %v11632_v56 = vld [vmem:[#allocation41_spill] sm:$0xff]  ;;  %vm10828_vm15 = vcmask 1042434  }
 0x1fe   : > { %v8345_v38 = vadd.f32 %v2307_v51, %v1923_v52  ;;  %v8347_v33 = vadd.f32 %v2304_v12, %v1920_v39  ;;  %v1031_v4 = vmul.f32 %v11531_v3, %v8214_v63  ;;  %v3921_v40 = vrot.slane %v3017_v30, %v11466_v31  ;;  %v11634_v60 = vld [vmem:[#allocation69_spill] sm:$0xff] }
 0x1ff   : > { %v1925_v44 = vadd.f32 %v1669_v1, %v1285_v34  ;;  %v1282_v32 = vadd.f32 %v1026_v10, %v642_v55  ;;  %v2306_v23 = vmul.f32 %v6835_v8, %v8264_v29  ;;  %v3917_v27 = vsel %vm3732_vm1, %v3916_v9, %v3912_v54  ;;  %v11636_v30 = vld [vmem:[#allocation93_spill] sm:$0xff]  ;;  %v3019_v55 = vpop.xlane.xlu0 %3018  ;;  %v3029_v1 = vpop.xlane.xlu1 %3028 }
 0x200   : > { %v11633_v0 = vmax.f32 %v11632_v56, 0.0  ;;  %v11635_v51 = vmax.f32 %v11634_v60, 0.0  ;;  %v647_v52 = vmul.f32 %v11426_v62, %v8241_v35  ;;  %v1671_v34 = vmul.f32 %v11636_v30, %v8230_v6  ;;  %v11639_v62 = vld [vmem:[#allocation10_spill] sm:$0xff] }
 0x201   : > { %v3922_v10 = vsel %vm3739_vm2, %v3921_v40, %v3917_v27  ;;  %v8365_v39 = vadd.f32 %v2309_v37, %v1925_v44  ;;  %v1922_v54 = vadd.f32 %v1666_v53, %v1282_v32  ;;  %v3926_v56 = vrot.slane %v3019_v55, %v11475_v41  ;;  %v11640_v37 = vld [vmem:[#allocation58_spill] sm:$0xff]  ;;  %v11641_v53 = vld [vmem:[#allocation100_spill] sm:$0xff] }
 0x202   : > { %3158 = vadd.xlane.f32.xlu0 %v11633_v0  ;;  %3168 = vadd.xlane.f32.xlu1 %v11635_v51  ;;  %v11637_v0 = vld [vmem:[#allocation66_spill] sm:$0xff]  ;;  %v1287_v60 = vadd.f32 %v1031_v4, %v647_v52  ;;  %v644_v8 = vmul.f32 %v11639_v62, %v8241_v35  ;;  %v3931_v30 = vrot.slane %v3021_v25, %v11477_v15  ;;  %v11644_v52 = vld [vmem:[#allocation125_spill] sm:$0xff] }
 0x203   : > { %v1028_v9 = vmul.f32 %v11637_v0, %v8214_v63  ;;  %v11638_v51 = vld [vmem:[#allocation54_spill] sm:$0xff]  ;;  %v8375_v3 = vadd.f32 %v2306_v23, %v1922_v54  ;;  %v1668_v40 = vmul.f32 %v11640_v37, %v8230_v6  ;;  %v1033_v44 = vmul.f32 %v11641_v53, %v8214_v63  ;;  %v3023_v23 = vpop.xlane.xlu0 %3022  ;;  %v3033_v37 = vpop.xlane.xlu1 %3032 }
 0x204   : > { %v2311_v12 = vmul.f32 %v11638_v51, %v8264_v29  ;;  %v3927_v32 = vsel %vm3746_vm3, %v3926_v56, %v3922_v10  ;;  %v11642_v27 = vld [vmem:[#allocation114_spill] sm:$0xff]  ;;  %v11645_v55 = vmax.f32 %v11644_v52, 0.0  ;;  %v1927_v51 = vadd.f32 %v1671_v34, %v1287_v60  ;;  %v11647_v56 = vld [vmem:[#allocation27_spill] sm:$0xff] }
 0x205   : > { %v11643_v4 = vmax.f32 %v11642_v27, 0.0  ;;  %v2308_v25 = vmul.f32 %v6868_v2, %v8264_v29  ;;  %v3932_v54 = vsel %vm10882_vm4, %v3931_v30, %v3927_v32  ;;  %v1284_v0 = vadd.f32 %v1028_v9, %v644_v8  ;;  %v11646_v53 = vld [vmem:[#allocation14_spill] sm:$0xff] }
 0x206   : > { %3172 = vadd.xlane.f32.xlu1 %v11645_v55  ;;  %v649_v10 = vmul.f32 %v11646_v53, %v8241_v35  ;;  %v1673_v27 = vmul.f32 %v11647_v56, %v8230_v6  ;;  %v8396_v55 = vadd.f32 %v2311_v12, %v1927_v51  ;;  %v1030_v34 = vmul.f32 %v11541_v43, %v8214_v63  ;;  %v11648_v62 = vld [vmem:[#allocation70_spill] sm:$0xff] }
 0x207   : > { %3162 = vadd.xlane.f32.xlu0 %v11643_v4  ;;  %v3936_v4 = vrot.slane %v3023_v23, %v11485_v5  ;;  %v3941_v60 = vrot.slane %v3025_v47, %v11487_v22  ;;  %v1924_v30 = vadd.f32 %v1668_v40, %v1284_v0  ;;  %v2313_v8 = vmul.f32 %v6870_v42, %v8264_v29  ;;  %v11650_v23 = vld [vmem:[#allocation126_spill] sm:$0xff]  ;;  %v3027_v0 = vpop.xlane.xlu0 %3026  ;;  %v11666_v42 = vld [vmem:[#allocation132_spill] sm:$0xff] }
 0x208   : > { %v1289_v32 = vadd.f32 %v1033_v44, %v649_v10  ;;  %v11649_v56 = vmax.f32 %v11648_v62, 0.0  ;;  %v11651_v53 = vmax.f32 %v11650_v23, 0.0  ;;  %v646_v51 = vmul.f32 %v11356_v17, %v8241_v35  ;;  %v3037_v44 = vpop.xlane.xlu1 %3036 }
 0x209   : > { %v3937_v9 = vsel %vm10883_vm5, %v3936_v4, %v3932_v54  ;;  %v1670_v47 = vmul.f32 %v11436_v18, %v8230_v6  ;;  %v8415_v10 = vadd.f32 %v2308_v25, %v1924_v30  ;;  %v2310_v4 = vmul.f32 %v6897_v57, %v8264_v29  ;;  %v11654_v25 = vld [vmem:[#allocation99_spill] sm:$0xff] }
 0x20a   : > { %3176 = vadd.xlane.f32.xlu1 %v11651_v53  ;;  %v3942_v40 = vsel %vm3767_vm6, %v3941_v60, %v3937_v9  ;;  %v1929_v62 = vadd.f32 %v1673_v27, %v1289_v32  ;;  %v1286_v53 = vadd.f32 %v1030_v34, %v646_v51  ;;  %v1035_v23 = vmul.f32 %v11437_v58, %v8214_v63  ;;  %v11653_v60 = vld [vmem:[#allocation18_spill] sm:$0xff]  ;;  %v11655_v32 = vld [vmem:[#allocation29_spill] sm:$0xff]  ;;  %v11657_v51 = vld [vmem:[#allocation35_spill] sm:$0xff] }
 0x20b   : > { %3166 = vadd.xlane.f32.xlu0 %v11649_v56  ;;  %11652 = vst [vmem:[#allocation76_spill] sm:$0xff] %v8415_v10  ;;  %v3946_v56 = vrot.slane %v3027_v0, %v11495_v48  ;;  %v3951_v12 = vrot.slane %v3029_v1, %v11499_v24  ;;  %v651_v9 = vmul.f32 %v11653_v60, %v8241_v35  ;;  %v11656_v34 = vmax.f32 %v11655_v32, 0.0  ;;  %v11659_v1 = vld [vmem:[#allocation103_spill] sm:$0xff] }
 0x20c   : > { %v8423_v52 = vadd.f32 %v2313_v8, %v1929_v62  ;;  %v1032_v30 = vmul.f32 %v11654_v25, %v8214_v63  ;;  %v11658_v0 = vmax.f32 %v11657_v51, 0.0  ;;  %v1926_v57 = vadd.f32 %v1670_v47, %v1286_v53  ;;  %v3031_v62 = vpop.xlane.xlu0 %3030  ;;  %v8438_v18 = vpop.xlane.xlu1 %3040  ;;  %v11660_v25 = vld [vmem:[#allocation68_spill] sm:$0xff]  ;;  %v11663_v54 = vld [vmem:[#allocation107_spill] sm:$0xff] }
 0x20d   : > { %v3947_v27 = vsel %vm3774_vm7, %v3946_v56, %v3942_v40  ;;  %v1675_v8 = vmul.f32 %v11659_v1, %v8230_v6  ;;  %v2315_v40 = vmul.f32 %v11660_v25, %v8264_v29  ;;  %v11661_v56 = vld [vmem:[#allocation15_spill] sm:$0xff]  ;;  %v3956_v47 = vrot.slane %v3031_v62, %v11509_v16  ;;  %v11664_v25 = vld [vmem:[#allocation30_spill] sm:$0xff] }
 0x20e   : > { %3180 = vadd.xlane.f32.xlu1 %v11658_v0  ;;  %v3952_v60 = vsel %vm3781_vm8, %v3951_v12, %v3947_v27  ;;  %v648_v32 = vmul.f32 %v11661_v56, %v8241_v35  ;;  %v3961_v0 = vrot.slane %v3033_v37, %v11511_v7  ;;  %v1291_v53 = vadd.f32 %v1035_v23, %v651_v9  ;;  %v11665_v56 = vld [vmem:[#allocation22_spill] sm:$0xff]  ;;  %v11673_v10 = vld [vmem:[#allocation19_spill] sm:$0xff] }
 0x20f   : > { %3170 = vadd.xlane.f32.xlu0 %v11656_v34  ;;  %v11662_v34 = vld [vmem:[#allocation121_spill] sm:$0xff]  ;;  %v1037_v1 = vmul.f32 %v11663_v54, %v8214_v63  ;;  %v8450_v12 = vadd.f32 %v2310_v4, %v1926_v57  ;;  %v2312_v17 = vmul.f32 %v11664_v25, %v8264_v29  ;;  %v653_v58 = vmul.f32 %v11665_v56, %v8241_v35  ;;  %v11668_v62 = vld [vmem:[#allocation86_spill] sm:$0xff]  ;;  %v11670_v57 = vld [vmem:[#allocation128_spill] sm:$0xff] }
 0x210   : > { %v1672_v51 = vmul.f32 %v11662_v34, %v8230_v6  ;;  %v1288_v27 = vadd.f32 %v1032_v30, %v648_v32  ;;  %v3957_v34 = vsel %vm3788_vm9, %v3956_v47, %v3952_v60  ;;  %v11667_v37 = vmax.f32 %v11666_v42, 0.0  ;;  %v11671_v30 = vld [vmem:[#allocation104_spill] sm:$0xff]  ;;  %v3035_v25 = vpop.xlane.xlu0 %3034  ;;  %v3045_v56 = vpop.xlane.xlu1 %3044 }
 0x211   : > { %v11669_v23 = vmax.f32 %v11668_v62, 0.0  ;;  %v1677_v4 = vmul.f32 %v11670_v57, %v8230_v6  ;;  %v1034_v32 = vmul.f32 %v11671_v30, %v8214_v63  ;;  %v3962_v54 = vsel %vm3795_vm10, %v3961_v0, %v3957_v34  ;;  %v11676_v0 = vld [vmem:[#allocation94_spill] sm:$0xff] }
 0x212   : > { %v1931_v47 = vadd.f32 %v1675_v8, %v1291_v53  ;;  %v1928_v42 = vadd.f32 %v1672_v51, %v1288_v27  ;;  %v1293_v62 = vadd.f32 %v1037_v1, %v653_v58  ;;  %v650_v57 = vmul.f32 %v11673_v10, %v8241_v35  ;;  %v11679_v1 = vld [vmem:[#allocation95_spill] sm:$0xff] }
 0x213   : > { %3174 = vadd.xlane.f32.xlu0 %v11667_v37  ;;  %3184 = vadd.xlane.f32.xlu1 %v11669_v23  ;;  %v3966_v37 = vrot.slane %v3035_v25, %v11522_v46  ;;  %v11672_v23 = vld [vmem:[#allocation71_spill] sm:$0xff]  ;;  %v3971_v43 = vrot.slane %v3037_v44, %v11525_v50  ;;  %v1674_v8 = vmul.f32 %v11676_v0, %v8230_v6  ;;  %v11677_v25 = vld [vmem:[#allocation42_spill] sm:$0xff]  ;;  %v11680_v53 = vmax.f32 %v11679_v1, 0.0  ;;  %v11682_v0 = vld [vmem:[#allocation37_spill] sm:$0xff] }
 0x214   : > { %v2317_v9 = vmul.f32 %v11672_v23, %v8264_v29  ;;  %v8474_v30 = vadd.f32 %v2315_v40, %v1931_v47  ;;  %v8476_v34 = vadd.f32 %v2312_v17, %v1928_v42  ;;  %v11678_v58 = vmax.f32 %v11677_v25, 0.0  ;;  %v3039_v10 = vpop.xlane.xlu0 %3038  ;;  %v3049_v17 = vpop.xlane.xlu1 %3048  ;;  %v11681_v47 = vld [vmem:[#allocation74_spill] sm:$0xff] }
 0x215   : > { %v3967_v51 = vsel %vm3802_vm11, %v3966_v37, %v3962_v54  ;;  %v1933_v60 = vadd.f32 %v1677_v4, %v1293_v62  ;;  %v1290_v44 = vadd.f32 %v1034_v32, %v650_v57  ;;  %v2314_v42 = vmul.f32 %v11681_v47, %v8264_v29  ;;  %v11683_v37 = vld [vmem:[#allocation111_spill] sm:$0xff]  ;;  %v11684_v62 = vld [vmem:[#allocation109_spill] sm:$0xff] }
 0x216   : > { %11674 = vst [vmem:[#allocation98_spill] sm:$0xff] %v8474_v30  ;;  %11675 = vst [vmem:[#allocation90_spill] sm:$0xff] %v8476_v34  ;;  %v3972_v40 = vsel %vm3809_vm12, %v3971_v43, %v3967_v51  ;;  %v655_v54 = vmul.f32 %v11682_v0, %v8241_v35  ;;  %v1039_v25 = vmul.f32 %v11683_v37, %v8214_v63  ;;  %v11686_v0 = vld [vmem:[#allocation106_spill] sm:$0xff] }
 0x217   : > { %3178 = vadd.xlane.f32.xlu0 %v11678_v58  ;;  %3188 = vadd.xlane.f32.xlu1 %v11680_v53  ;;  %v345_v58 = vld [vmem:[%s5630_s9 + $0x24] sm:$0xf]  ;;  %v3981_v1 = vrot.slane %v8438_v18, %v11534_v36  ;;  %v3976_v4 = vrot.slane %v3039_v10, %v11533_v28  ;;  %v8497_v57 = vadd.f32 %v2317_v9, %v1933_v60  ;;  %v11685_v53 = vld [vmem:[#allocation31_spill] sm:$0xff]  ;;  %v11687_v18 = vld [vmem:[#allocation28_spill] sm:$0xff]  ;;  %v11689_v10 = vmax.f32 %v8178_v26, 0.0 }
 0x218   : > { %v8500_v43 = vrot.slane %v345_v58, %v11578_v21  ;;  %v1930_v32 = vadd.f32 %v1674_v8, %v1290_v44  ;;  %v1679_v51 = vmul.f32 %v11684_v62, %v8230_v6  ;;  %v2319_v27 = vmul.f32 %v11685_v53, %v8264_v29  ;;  %v11690_v60 = vld [vmem:[#allocation23_spill] sm:$0xff]  ;;  %v11691_v44 = vld [vmem:[#allocation20_spill] sm:$0xff]  ;;  %v3043_v62 = vpop.xlane.xlu0 %3042  ;;  %v11696_v30 = vld [vmem:[#allocation46_spill] sm:$0xff] }
 0x219   : > { %v1036_v47 = vmul.f32 %v11686_v0, %v8214_v63  ;;  %v3977_v37 = vsel %vm3816_vm13, %v3976_v4, %v3972_v40  ;;  %v11688_v23 = vmax.f32 %v11687_v18, 0.0  ;;  %v652_v8 = vmul.f32 %v11690_v60, %v8241_v35  ;;  %v3053_v40 = vpop.xlane.xlu1 %3052  ;;  %v11693_v9 = vld [vmem:[#allocation16_spill] sm:$0xff]  ;;  %v11705_v34 = vld [vmem:[#allocation38_spill] sm:$0xff] }
 0x21a   : > { %v8517_v21 = vrot.slane %v345_v58, %v11691_v44  ;;  %v3990_v53 = vrot.slane %v3045_v56, %v11453_v20  ;;  %v3982_v0 = vsel %vm3823_vm14, %v3981_v1, %v3977_v37  ;;  %v1295_v4 = vadd.f32 %v1039_v25, %v655_v54  ;;  %v11694_v44 = vld [vmem:[#allocation43_spill] sm:$0xff]  ;;  %v11695_v54 = vld [vmem:[#allocation81_spill] sm:$0xff] }
 0x21b   : > { %3182 = vadd.xlane.f32.xlu0 %v11688_v23  ;;  %3192 = vadd.xlane.f32.xlu1 %v11689_v10  ;;  %v11692_v23 = vld [vmem:[#allocation32_spill] sm:$0xff]  ;;  %v8525_v26 = vsel %vm10828_vm15, %v3982_v0, %v8321_v59  ;;  %v3986_v10 = vrot.slane %v3043_v62, %v11452_v49  ;;  %v8529_v60 = vrot.slane %v345_v58, %v11693_v9  ;;  %v11697_v59 = vmax.f32 %v11696_v30, 0.0  ;;  %v11698_v0 = vld [vmem:[#allocation53_spill] sm:$0xff]  ;;  %v11703_v30 = vld [vmem:[#allocation110_spill] sm:$0xff] }
 0x21c   : > { %v1676_v18 = vmul.f32 %v11692_v23, %v8230_v6  ;;  %v1041_v56 = vmul.f32 %v11694_v44, %v8500_v43  ;;  %v8533_v20 = vadd.f32 %v2314_v42, %v1930_v32  ;;  %v1935_v37 = vadd.f32 %v1679_v51, %v1295_v4  ;;  %v11700_v49 = vld [vmem:[#allocation8_spill] sm:$0xff]  ;;  %v11701_v42 = vld [vmem:[#allocation117_spill] sm:$0xff] }
 0x21d   : > { %v1292_v1 = vadd.f32 %v1036_v47, %v652_v8  ;;  %v2316_v25 = vmul.f32 %v11695_v54, %v8264_v29  ;;  %v3991_v23 = vsel %vm3725_vm0, %v3990_v53, %v3986_v10  ;;  %v11699_v62 = vmax.f32 %v11698_v0, 0.0  ;;  %v3047_v47 = vpop.xlane.xlu0 %3046  ;;  %v3057_v51 = vpop.xlane.xlu1 %3056  ;;  %v11702_v53 = vld [vmem:[#allocation21_spill] sm:$0xff] }
 0x21e   : > { %v657_v44 = vmul.f32 %v11700_v49, %v8529_v60  ;;  %v1681_v32 = vmul.f32 %v11701_v42, %v8517_v21  ;;  %v8549_v10 = vrot.slane %v345_v58, %v11702_v53  ;;  %v4000_v0 = vrot.slane %v3049_v17, %v11466_v31  ;;  %v11704_v42 = vld [vmem:[#allocation116_spill] sm:$0xff]  ;;  %v11708_v17 = vld [vmem:[#allocation13_spill] sm:$0xff] }
 0x21f   : > { %3186 = vadd.xlane.f32.xlu0 %v11697_v59  ;;  %3196 = vadd.xlane.f32.xlu1 %v11699_v62  ;;  %v1932_v4 = vadd.f32 %v1676_v18, %v1292_v1  ;;  %v1038_v59 = vmul.f32 %v11703_v30, %v8214_v63  ;;  %v3995_v62 = vrot.slane %v3047_v47, %v11462_v14  ;;  %v11706_v18 = vld [vmem:[#allocation122_spill] sm:$0xff]  ;;  %v11709_v30 = vmax.f32 %v11708_v17, 0.0 }
 0x220   : > { %v8555_v9 = vadd.f32 %v2319_v27, %v1935_v37  ;;  %v1297_v49 = vadd.f32 %v1041_v56, %v657_v44  ;;  %v2321_v54 = vmul.f32 %v11704_v42, %v8549_v10  ;;  %v654_v8 = vmul.f32 %v11705_v34, %v8241_v35  ;;  %v11707_v1 = vld [vmem:[#allocation50_spill] sm:$0xff]  ;;  %v11710_v27 = vld [vmem:[#allocation64_spill] sm:$0xff] }
 0x221   : > { %v1678_v58 = vmul.f32 %v11706_v18, %v8230_v6  ;;  %v1043_v53 = vmul.f32 %v11707_v1, %v8500_v43  ;;  %v3996_v63 = vsel %vm3732_vm1, %v3995_v62, %v3991_v23  ;;  %v11711_v37 = vmax.f32 %v11710_v27, 0.0  ;;  %v3051_v35 = vpop.xlane.xlu0 %3050  ;;  %v3061_v6 = vpop.xlane.xlu1 %3060  ;;  %v11712_v1 = vld [vmem:[#allocation33_spill] sm:$0xff]  ;;  %v11713_v23 = vld [vmem:[#allocation7_spill] sm:$0xff]  ;;  %v11714_v27 = vld [vmem:[#allocation72_spill] sm:$0xff] }
 0x222   : > { %v8571_v56 = vadd.f32 %v2316_v25, %v1932_v4  ;;  %v1937_v47 = vadd.f32 %v1681_v32, %v1297_v49  ;;  %v4001_v34 = vsel %vm3739_vm2, %v4000_v0, %v3996_v63  ;;  %v1294_v18 = vadd.f32 %v1038_v59, %v654_v8  ;;  %v11715_v49 = vld [vmem:[#allocation44_spill] sm:$0xff]  ;;  %v11716_v59 = vld [vmem:[#allocation130_spill] sm:$0xff] }
 0x223   : > { %3190 = vadd.xlane.f32.xlu0 %v11709_v30  ;;  %3200 = vadd.xlane.f32.xlu1 %v11711_v37  ;;  %v2318_v42 = vmul.f32 %v11712_v1, %v8264_v29  ;;  %v659_v62 = vmul.f32 %v11713_v23, %v8529_v60  ;;  %v4010_v30 = vrot.slane %v3053_v40, %v11477_v15  ;;  %v11717_v37 = vld [vmem:[#allocation87_spill] sm:$0xff]  ;;  %v11719_v40 = vmax.f32 %v8299_v11, 0.0 }
 0x224   : > { %v4005_v17 = vrot.slane %v3051_v35, %v11475_v41  ;;  %v1683_v25 = vmul.f32 %v11714_v27, %v8517_v21  ;;  %v1040_v32 = vmul.f32 %v11715_v49, %v8500_v43  ;;  %v8584_v4 = vadd.f32 %v2321_v54, %v1937_v47  ;;  %v11720_v27 = vld [vmem:[#allocation6_spill] sm:$0xff]  ;;  %v11721_v54 = vld [vmem:[#allocation52_spill] sm:$0xff] }
 0x225   : > { %v1934_v0 = vadd.f32 %v1678_v58, %v1294_v18  ;;  %v1299_v8 = vadd.f32 %v1043_v53, %v659_v62  ;;  %v2323_v29 = vmul.f32 %v11716_v59, %v8549_v10  ;;  %v11718_v44 = vmax.f32 %v11717_v37, 0.0  ;;  %v3055_v58 = vpop.xlane.xlu0 %3054  ;;  %v11726_v62 = vld [vmem:[#allocation49_spill] sm:$0xff] }
 0x226   : > { %v4006_v63 = vsel %vm3746_vm3, %v4005_v17, %v4001_v34  ;;  %v656_v49 = vmul.f32 %v11720_v27, %v8529_v60  ;;  %v1680_v18 = vmul.f32 %v11721_v54, %v8517_v21  ;;  %v4020_v53 = vrot.slane %v3057_v51, %v11487_v22  ;;  %v3065_v34 = vpop.xlane.xlu1 %3064  ;;  %v11723_v27 = vld [vmem:[#allocation108_spill] sm:$0xff]  ;;  %v11724_v51 = vld [vmem:[#allocation9_spill] sm:$0xff] }
 0x227   : > { %3194 = vadd.xlane.f32.xlu0 %v11718_v44  ;;  %3204 = vadd.xlane.f32.xlu1 %v11719_v40  ;;  %v4011_v47 = vsel %vm10882_vm4, %v4010_v30, %v4006_v63  ;;  %v11722_v44 = vld [vmem:[#allocation67_spill] sm:$0xff]  ;;  %v4015_v17 = vrot.slane %v3055_v58, %v11485_v5  ;;  %v8604_v37 = vadd.f32 %v2318_v42, %v1934_v0  ;;  %v11725_v30 = vld [vmem:[#allocation120_spill] sm:$0xff]  ;;  %v11727_v58 = vmax.f32 %v8324_v19, 0.0 }
 0x228   : > { %v1045_v11 = vmul.f32 %v11722_v44, %v8500_v43  ;;  %v1939_v40 = vadd.f32 %v1683_v25, %v1299_v8  ;;  %v1296_v35 = vadd.f32 %v1040_v32, %v656_v49  ;;  %v2320_v54 = vmul.f32 %v11723_v27, %v8549_v10 }
 0x229   : > { %v661_v59 = vmul.f32 %v11724_v51, %v8529_v60  ;;  %v1685_v63 = vmul.f32 %v11725_v30, %v8517_v21  ;;  %v1042_v23 = vmul.f32 %v11726_v62, %v8500_v43  ;;  %v4016_v44 = vsel %vm10883_vm5, %v4015_v17, %v4011_v47  ;;  %v3059_v0 = vpop.xlane.xlu0 %3058 }
 0x22a   : > { %v11728_v42 = vmax.f32 %v8345_v38, 0.0  ;;  %v8620_v49 = vadd.f32 %v2323_v29, %v1939_v40  ;;  %v1936_v32 = vadd.f32 %v1680_v18, %v1296_v35  ;;  %v4021_v8 = vsel %vm3767_vm6, %v4020_v53, %v4016_v44  ;;  %v3069_v30 = vpop.xlane.xlu1 %3068  ;;  %v11729_v35 = vld [vmem:[#allocation83_spill] sm:$0xff]  ;;  %v11730_v44 = vld [vmem:[#allocation73_spill] sm:$0xff] }
 0x22b   : > { %3198 = vadd.xlane.f32.xlu0 %v11727_v58  ;;  %v1301_v51 = vadd.f32 %v1045_v11, %v661_v59  ;;  %v658_v62 = vmul.f32 %v11630_v61, %v8529_v60  ;;  %v1682_v19 = vmul.f32 %v11631_v13, %v8517_v21  ;;  %v4030_v47 = vrot.slane %v3061_v6, %v11499_v24 }
 0x22c   : > { %3208 = vadd.xlane.f32.xlu1 %v11728_v42  ;;  %v4025_v38 = vrot.slane %v3059_v0, %v11495_v48  ;;  %v2325_v29 = vmul.f32 %v11521_v45, %v8549_v10  ;;  %v1047_v18 = vmul.f32 %v11729_v35, %v8500_v43  ;;  %v8633_v17 = vadd.f32 %v2320_v54, %v1936_v32  ;;  %v11733_v0 = vld [vmem:[#allocation11_spill] sm:$0xff]  ;;  %v11734_v54 = vld [vmem:[#allocation93_spill] sm:$0xff]  ;;  %v11736_v42 = vld [vmem:[#allocation54_spill] sm:$0xff] }
 0x22d   : > { %v1941_v53 = vadd.f32 %v1685_v63, %v1301_v51  ;;  %v1298_v59 = vadd.f32 %v1042_v23, %v658_v62  ;;  %v2322_v11 = vmul.f32 %v11730_v44, %v8549_v10  ;;  %v11731_v58 = vmax.f32 %v8347_v33, 0.0  ;;  %v3063_v62 = vpop.xlane.xlu0 %3062  ;;  %v11735_v33 = vld [vmem:[#allocation66_spill] sm:$0xff] }
 0x22e   : > { %v4026_v40 = vsel %vm3774_vm7, %v4025_v38, %v4021_v8  ;;  %v11732_v6 = vmax.f32 %v8365_v39, 0.0  ;;  %v663_v25 = vmul.f32 %v11733_v0, %v8529_v60  ;;  %v1687_v51 = vmul.f32 %v11734_v54, %v8517_v21  ;;  %v3073_v32 = vpop.xlane.xlu1 %3072 }
 0x22f   : > { %3202 = vadd.xlane.f32.xlu0 %v11731_v58  ;;  %v4040_v23 = vrot.slane %v3065_v34, %v11511_v7  ;;  %v4031_v63 = vsel %vm3781_vm8, %v4030_v47, %v4026_v40  ;;  %v1938_v8 = vadd.f32 %v1682_v19, %v1298_v59  ;;  %v1044_v38 = vmul.f32 %v11735_v33, %v8500_v43  ;;  %v11737_v34 = vld [vmem:[#allocation10_spill] sm:$0xff]  ;;  %v11739_v59 = vld [vmem:[#allocation100_spill] sm:$0xff] }
 0x230   : > { %3212 = vadd.xlane.f32.xlu1 %v11732_v6  ;;  %v4035_v39 = vrot.slane %v3063_v62, %v11509_v16  ;;  %v8652_v58 = vadd.f32 %v2325_v29, %v1941_v53  ;;  %v1303_v6 = vadd.f32 %v1047_v18, %v663_v25  ;;  %v2327_v0 = vmul.f32 %v11736_v42, %v8549_v10  ;;  %v11738_v47 = vld [vmem:[#allocation58_spill] sm:$0xff] }
 0x231   : > { %vm10833_vm15 = vcmask 1043459   ;;  %v8656_v54 = vadd.f32 %v2322_v11, %v1938_v8  ;;  %v660_v44 = vmul.f32 %v11737_v34, %v8529_v60  ;;  %v1684_v19 = vmul.f32 %v11738_v47, %v8517_v21  ;;  %v3067_v8 = vpop.xlane.xlu0 %3066 }
 0x232   : > { %v1049_v40 = vmul.f32 %v11739_v59, %v8500_v43  ;;  %v4036_v62 = vsel %vm3788_vm9, %v4035_v39, %v4031_v63  ;;  %v11740_v29 = vmax.f32 %v8375_v3, 0.0  ;;  %v11741_v25 = vmax.f32 %v8396_v55, 0.0  ;;  %v3077_v34 = vpop.xlane.xlu1 %3076  ;;  %v11742_v59 = vld [vmem:[#allocation14_spill] sm:$0xff]  ;;  %v11743_v3 = vld [vmem:[#allocation27_spill] sm:$0xff] }
 0x233   : > { %v1943_v53 = vadd.f32 %v1687_v51, %v1303_v6  ;;  %v2324_v11 = vmul.f32 %v6868_v2, %v8549_v10  ;;  %v4041_v47 = vsel %vm3795_vm10, %v4040_v23, %v4036_v62  ;;  %v1300_v42 = vadd.f32 %v1044_v38, %v660_v44  ;;  %v11744_v51 = vld [vmem:[#allocation82_spill] sm:$0xff]  ;;  %v11745_v23 = vld [vmem:[#allocation60_spill] sm:$0xff]  ;;  %v11746_v38 = vld [vmem:[#allocation105_spill] sm:$0xff] }
 0x234   : > { %3206 = vadd.xlane.f32.xlu0 %v11740_v29  ;;  %3216 = vadd.xlane.f32.xlu1 %v11741_v25  ;;  %v665_v63 = vmul.f32 %v11742_v59, %v8529_v60  ;;  %v1689_v39 = vmul.f32 %v11743_v3, %v8517_v21  ;;  %v4050_v55 = vrot.slane %v3069_v30, %v11525_v50  ;;  %v11747_v3 = vld [vmem:[#allocation76_spill] sm:$0xff]  ;;  %v11749_v30 = vmax.f32 %v8423_v52, 0.0 }
 0x235   : > { %v4045_v29 = vrot.slane %v3067_v8, %v11522_v46  ;;  %v8679_v25 = vadd.f32 %v2327_v0, %v1943_v53  ;;  %v1046_v6 = vmul.f32 %v11744_v51, %v8500_v43  ;;  %v1940_v18 = vadd.f32 %v1684_v19, %v1300_v42  ;;  %v11750_v53 = vld [vmem:[#allocation12_spill] sm:$0xff]  ;;  %v11751_v19 = vld [vmem:[#allocation119_spill] sm:$0xff]  ;;  %v3071_v8 = vpop.xlane.xlu0 %3070 }
 0x236   : > { %v1305_v2 = vadd.f32 %v1049_v40, %v665_v63  ;;  %v2329_v44 = vmul.f32 %v11745_v23, %v8549_v10  ;;  %v1051_v62 = vmul.f32 %v11746_v38, %v8500_v43  ;;  %v11748_v33 = vmax.f32 %v11747_v3, 0.0  ;;  %v3081_v38 = vpop.xlane.xlu1 %3080 }
 0x237   : > { %v4046_v59 = vsel %vm3802_vm11, %v4045_v29, %v4041_v47  ;;  %v662_v42 = vmul.f32 %v11750_v53, %v8529_v60  ;;  %v1686_v40 = vmul.f32 %v11751_v19, %v8517_v21  ;;  %v11752_v47 = vld [vmem:[#allocation18_spill] sm:$0xff]  ;;  %v4060_v29 = vrot.slane %v3073_v32, %v11534_v36  ;;  %v11754_v53 = vld [vmem:[#allocation61_spill] sm:$0xff] }
 0x238   : > { %3210 = vadd.xlane.f32.xlu0 %v11748_v33  ;;  %3220 = vadd.xlane.f32.xlu1 %v11749_v30  ;;  %v4051_v63 = vsel %vm3809_vm12, %v4050_v55, %v4046_v59  ;;  %v1945_v51 = vadd.f32 %v1689_v39, %v1305_v2  ;;  %v667_v3 = vmul.f32 %v11752_v47, %v8529_v60  ;;  %v11753_v33 = vld [vmem:[#allocation103_spill] sm:$0xff]  ;;  %v11757_v32 = vld [vmem:[#allocation98_spill] sm:$0xff] }
 0x239   : > { %v1691_v52 = vmul.f32 %v11753_v33, %v8517_v21  ;;  %v4055_v30 = vrot.slane %v3071_v8, %v11533_v28  ;;  %v1302_v0 = vadd.f32 %v1046_v6, %v662_v42  ;;  %v2326_v23 = vmul.f32 %v11754_v53, %v8549_v10  ;;  %v11755_v2 = vld [vmem:[#allocation99_spill] sm:$0xff]  ;;  %v3075_v8 = vpop.xlane.xlu0 %3074  ;;  %v11774_v53 = vld [vmem:[#allocation94_spill] sm:$0xff] }
 0x23a   : > { %v8706_v19 = vadd.f32 %v2324_v11, %v1940_v18  ;;  %v8708_v35 = vadd.f32 %v2329_v44, %v1945_v51  ;;  %v1307_v59 = vadd.f32 %v1051_v62, %v667_v3  ;;  %v1048_v39 = vmul.f32 %v11755_v2, %v8500_v43  ;;  %v11759_v18 = vld [vmem:[#allocation68_spill] sm:$0xff]  ;;  %v11760_v51 = vld [vmem:[#allocation51_spill] sm:$0xff]  ;;  %v3085_v3 = vpop.xlane.xlu1 %3084 }
 0x23b   : > { %v4056_v55 = vsel %vm3816_vm13, %v4055_v30, %v4051_v63  ;;  %v11756_v33 = vmax.f32 %v8450_v12, 0.0  ;;  %v11758_v47 = vmax.f32 %v11757_v32, 0.0  ;;  %v1942_v42 = vadd.f32 %v1686_v40, %v1302_v0  ;;  %v11761_v63 = vld [vmem:[#allocation15_spill] sm:$0xff]  ;;  %v11763_v40 = vld [vmem:[#allocation121_spill] sm:$0xff] }
 0x23c   : > { %v2331_v11 = vmul.f32 %v11759_v18, %v8549_v10  ;;  %v4069_v44 = vrot.slane %v3077_v34, %v11760_v51  ;;  %v4061_v62 = vsel %vm3823_vm14, %v4060_v29, %v4056_v55  ;;  %v1947_v2 = vadd.f32 %v1691_v52, %v1307_v59  ;;  %v11764_v52 = vld [vmem:[#allocation107_spill] sm:$0xff] }
 0x23d   : > { %3214 = vadd.xlane.f32.xlu0 %v11756_v33  ;;  %3224 = vadd.xlane.f32.xlu1 %v11758_v47  ;;  %v664_v12 = vmul.f32 %v11761_v63, %v8529_v60  ;;  %v8726_v33 = vsel %vm10833_vm15, %v4061_v62, %v8525_v26  ;;  %v11762_v47 = vld [vmem:[#allocation80_spill] sm:$0xff]  ;;  %v8729_v0 = vadd.f32 %v2326_v23, %v1942_v42  ;;  %v11765_v63 = vld [vmem:[#allocation90_spill] sm:$0xff]  ;;  %v11767_v62 = vmax.f32 %v8497_v57, 0.0  ;;  %v3079_v29 = vpop.xlane.xlu0 %3078  ;;  %v11773_v18 = vld [vmem:[#allocation19_spill] sm:$0xff] }
 0x23e   : > { %v4065_v30 = vrot.slane %v3075_v8, %v11762_v47  ;;  %v1688_v32 = vmul.f32 %v11763_v40, %v8517_v21  ;;  %v1053_v59 = vmul.f32 %v11764_v52, %v8500_v43  ;;  %v11766_v26 = vmax.f32 %v11765_v63, 0.0  ;;  %v11768_v8 = vld [vmem:[#allocation30_spill] sm:$0xff]  ;;  %v11770_v63 = vld [vmem:[#allocation128_spill] sm:$0xff]  ;;  %v11772_v40 = vld [vmem:[#allocation71_spill] sm:$0xff] }
 0x23f   : > { %v1304_v55 = vadd.f32 %v1048_v39, %v664_v12  ;;  %v8743_v42 = vadd.f32 %v2331_v11, %v1947_v2  ;;  %v2328_v34 = vmul.f32 %v11768_v8, %v8549_v10  ;;  %v8747_v39 = vpop.xlane.xlu1 %3088  ;;  %v11771_v57 = vld [vmem:[#allocation104_spill] sm:$0xff]  ;;  %v4079_v2 = vrot.slane %v3081_v38, %v11466_v31 }
 0x240   : > { %v4070_v6 = vsel %vm3725_vm0, %v4069_v44, %v4065_v30  ;;  %v11769_v44 = vld [vmem:[#allocation22_spill] sm:$0xff]  ;;  %v4074_v11 = vrot.slane %v3079_v29, %v11462_v14  ;;  %v2333_v12 = vmul.f32 %v11772_v40, %v8549_v10  ;;  %v11776_v38 = vmax.f32 %v8555_v9, 0.0 }
 0x241   : > { %3218 = vadd.xlane.f32.xlu0 %v11766_v26  ;;  %3228 = vadd.xlane.f32.xlu1 %v11767_v62  ;;  %v669_v30 = vmul.f32 %v11769_v44, %v8529_v60  ;;  %v1693_v26 = vmul.f32 %v11770_v63, %v8517_v21  ;;  %v1050_v62 = vmul.f32 %v11771_v57, %v8500_v43  ;;  %v11775_v57 = vmax.f32 %v8533_v20, 0.0  ;;  %v11778_v20 = vld [vmem:[#allocation74_spill] sm:$0xff] }
 0x242   : > { %v1944_v8 = vadd.f32 %v1688_v32, %v1304_v55  ;;  %v666_v44 = vmul.f32 %v11773_v18, %v8529_v60  ;;  %v1690_v63 = vmul.f32 %v11774_v53, %v8517_v21  ;;  %v4075_v47 = vsel %vm3732_vm1, %v4074_v11, %v4070_v6  ;;  %v11777_v55 = vld [vmem:[#allocation111_spill] sm:$0xff] }
 0x243   : > { %v1309_v52 = vadd.f32 %v1053_v59, %v669_v30  ;;  %v1055_v59 = vmul.f32 %v11777_v55, %v8500_v43  ;;  %v3083_v30 = vpop.xlane.xlu0 %3082  ;;  %v4080_v23 = vsel %vm3739_vm2, %v4079_v2, %v4075_v47  ;;  %v3093_v53 = vpop.xlane.xlu1 %3092  ;;  %v2330_v11 = vmul.f32 %v11778_v20, %v8549_v10  ;;  %v346_v55 = vld [vmem:[%s5630_s9 + $0x28] sm:$0xf] }
 0x244   : > { %v8771_v29 = vadd.f32 %v2328_v34, %v1944_v8  ;;  %v1306_v6 = vadd.f32 %v1050_v62, %v666_v44  ;;  %v4084_v9 = vrot.slane %v3083_v30, %v11475_v41  ;;  %v11780_v8 = vld [vmem:[#allocation109_spill] sm:$0xff]  ;;  %v11783_v2 = vmax.f32 %v8571_v56, 0.0  ;;  %v11787_v56 = vld [vmem:[#allocation20_spill] sm:$0xff] }
 0x245   : > { %3222 = vadd.xlane.f32.xlu0 %v11775_v57  ;;  %3232 = vadd.xlane.f32.xlu1 %v11776_v38  ;;  %v1949_v18 = vadd.f32 %v1693_v26, %v1309_v52  ;;  %v4089_v57 = vrot.slane %v3085_v3, %v11477_v15  ;;  %v11779_v38 = vld [vmem:[#allocation37_spill] sm:$0xff]  ;;  %v1695_v32 = vmul.f32 %v11780_v8, %v8517_v21  ;;  %v11781_v52 = vld [vmem:[#allocation106_spill] sm:$0xff]  ;;  %v11784_v30 = vmax.f32 %v8584_v4, 0.0  ;;  %v11789_v8 = vld [vmem:[#allocation16_spill] sm:$0xff] }
 0x246   : > { %v671_v34 = vmul.f32 %v11779_v38, %v8529_v60  ;;  %v1946_v47 = vadd.f32 %v1690_v63, %v1306_v6  ;;  %v1052_v44 = vmul.f32 %v11781_v52, %v8500_v43  ;;  %v11782_v26 = vld [vmem:[#allocation17_spill] sm:$0xff]  ;;  %v4085_v3 = vsel %vm3746_vm3, %v4084_v9, %v4080_v23  ;;  %v11786_v23 = vld [vmem:[#allocation23_spill] sm:$0xff] }
 0x247   : > { %v8785_v40 = vadd.f32 %v2333_v12, %v1949_v18  ;;  %v8790_v62 = vrot.slane %v346_v55, %v11782_v26  ;;  %v11785_v18 = vld [vmem:[#allocation31_spill] sm:$0xff]  ;;  %v3087_v63 = vpop.xlane.xlu0 %3086  ;;  %v4090_v6 = vsel %vm10882_vm4, %v4089_v57, %v4085_v3  ;;  %v3097_v52 = vpop.xlane.xlu1 %3096  ;;  %v668_v9 = vmul.f32 %v11786_v23, %v8529_v60 }
 0x248   : > { %v1311_v38 = vadd.f32 %v1055_v59, %v671_v34  ;;  %v2335_v12 = vmul.f32 %v11785_v18, %v8549_v10  ;;  %v8801_v26 = vadd.f32 %v2330_v11, %v1946_v47  ;;  %v4094_v4 = vrot.slane %v3087_v63, %v11485_v5  ;;  %v11788_v59 = vld [vmem:[#allocation32_spill] sm:$0xff]  ;;  %v11790_v47 = vld [vmem:[#allocation81_spill] sm:$0xff]  ;;  %v11791_v23 = vld [vmem:[#allocation43_spill] sm:$0xff] }
 0x249   : > { %3226 = vadd.xlane.f32.xlu0 %v11783_v2  ;;  %3236 = vadd.xlane.f32.xlu1 %v11784_v30  ;;  %v8806_v2 = vrot.slane %v346_v55, %v11787_v56  ;;  %v1692_v34 = vmul.f32 %v11788_v59, %v8517_v21  ;;  %v8812_v18 = vrot.slane %v346_v55, %v11789_v8  ;;  %v11799_v5 = vld [vmem:[#allocation38_spill] sm:$0xff]  ;;  %vm10879_vm15 = vcmask 1044484  }
 0x24a   : > { %v1951_v30 = vadd.f32 %v1695_v32, %v1311_v38  ;;  %v4099_v57 = vrot.slane %v8747_v39, %v11487_v22  ;;  %v1308_v11 = vadd.f32 %v1052_v44, %v668_v9  ;;  %v2332_v3 = vmul.f32 %v11790_v47, %v8549_v10  ;;  %v11794_v39 = vld [vmem:[#allocation8_spill] sm:$0xff] }
 0x24b   : > { %v1057_v56 = vmul.f32 %v11791_v23, %v8790_v62  ;;  %v4095_v20 = vsel %vm10883_vm5, %v4094_v4, %v4090_v6  ;;  %v11792_v32 = vmax.f32 %v8604_v37, 0.0  ;;  %v11793_v38 = vmax.f32 %v8620_v49, 0.0  ;;  %v3091_v9 = vpop.xlane.xlu0 %3090  ;;  %v3101_v59 = vpop.xlane.xlu1 %3100  ;;  %v11795_v23 = vld [vmem:[#allocation117_spill] sm:$0xff]  ;;  %v11797_v49 = vld [vmem:[#allocation110_spill] sm:$0xff] }
 0x24c   : > { %v8826_v8 = vadd.f32 %v2335_v12, %v1951_v30  ;;  %v673_v44 = vmul.f32 %v11794_v39, %v8812_v18  ;;  %v4100_v47 = vsel %vm3767_vm6, %v4099_v57, %v4095_v20  ;;  %v1697_v6 = vmul.f32 %v11795_v23, %v8806_v2  ;;  %v11796_v4 = vld [vmem:[#allocation21_spill] sm:$0xff]  ;;  %v11798_v20 = vld [vmem:[#allocation116_spill] sm:$0xff] }
 0x24d   : > { %3230 = vadd.xlane.f32.xlu0 %v11792_v32  ;;  %3240 = vadd.xlane.f32.xlu1 %v11793_v38  ;;  %v8834_v37 = vrot.slane %v346_v55, %v11796_v4  ;;  %v1054_v32 = vmul.f32 %v11797_v49, %v8500_v43  ;;  %v4109_v38 = vrot.slane %v3093_v53, %v11499_v24  ;;  %v11800_v55 = vld [vmem:[#allocation122_spill] sm:$0xff]  ;;  %v11801_v43 = vmax.f32 %v8633_v17, 0.0 }
 0x24e   : > { %v4104_v12 = vrot.slane %v3091_v9, %v11495_v48  ;;  %v1948_v63 = vadd.f32 %v1692_v34, %v1308_v11  ;;  %v1313_v39 = vadd.f32 %v1057_v56, %v673_v44  ;;  %v670_v23 = vmul.f32 %v11799_v5, %v8529_v60  ;;  %v11803_v11 = vld [vmem:[#allocation50_spill] sm:$0xff] }
 0x24f   : > { %v2337_v57 = vmul.f32 %v11798_v20, %v8834_v37  ;;  %v1694_v4 = vmul.f32 %v11800_v55, %v8517_v21  ;;  %v11802_v53 = vmax.f32 %v8652_v58, 0.0  ;;  %v1059_v44 = vmul.f32 %v11803_v11, %v8790_v62  ;;  %v3095_v9 = vpop.xlane.xlu0 %3094  ;;  %v3105_v30 = vpop.xlane.xlu1 %3104 }
 0x250   : > { %v4105_v22 = vsel %vm3774_vm7, %v4104_v12, %v4100_v47  ;;  %v8853_v56 = vadd.f32 %v2332_v3, %v1948_v63  ;;  %v1953_v21 = vadd.f32 %v1697_v6, %v1313_v39  ;;  %v1310_v20 = vadd.f32 %v1054_v32, %v670_v23  ;;  %v11804_v12 = vld [vmem:[#allocation7_spill] sm:$0xff]  ;;  %v11805_v63 = vld [vmem:[#allocation72_spill] sm:$0xff]  ;;  %v11806_v39 = vld [vmem:[#allocation130_spill] sm:$0xff] }
 0x251   : > { %3234 = vadd.xlane.f32.xlu0 %v11801_v43  ;;  %3244 = vadd.xlane.f32.xlu1 %v11802_v53  ;;  %v4110_v60 = vsel %vm3781_vm8, %v4109_v38, %v4105_v22  ;;  %v2334_v17 = vmul.f32 %v11712_v1, %v8549_v10  ;;  %v4119_v47 = vrot.slane %v3097_v52, %v11511_v7  ;;  %v11807_v6 = vld [vmem:[#allocation44_spill] sm:$0xff]  ;;  %v11808_v32 = vmax.f32 %v8656_v54, 0.0  ;;  %v11812_v54 = vld [vmem:[#allocation67_spill] sm:$0xff] }
 0x252   : > { %v4114_v58 = vrot.slane %v3095_v9, %v11509_v16  ;;  %v675_v3 = vmul.f32 %v11804_v12, %v8812_v18  ;;  %v1699_v43 = vmul.f32 %v11805_v63, %v8806_v2  ;;  %v8866_v53 = vadd.f32 %v2337_v57, %v1953_v21  ;;  %v11810_v57 = vld [vmem:[#allocation6_spill] sm:$0xff] }
 0x253   : > { %v1950_v22 = vadd.f32 %v1694_v4, %v1310_v20  ;;  %v2339_v23 = vmul.f32 %v11806_v39, %v8834_v37  ;;  %v1056_v10 = vmul.f32 %v11807_v6, %v8790_v62  ;;  %v11809_v38 = vmax.f32 %v8679_v25, 0.0  ;;  %v3099_v20 = vpop.xlane.xlu0 %3098  ;;  %v3109_v39 = vpop.xlane.xlu1 %3108 }
 0x254   : > { %v4115_v52 = vsel %vm3788_vm9, %v4114_v58, %v4110_v60  ;;  %v1315_v34 = vadd.f32 %v1059_v44, %v675_v3  ;;  %v672_v4 = vmul.f32 %v11810_v57, %v8812_v18  ;;  %v11811_v60 = vld [vmem:[#allocation52_spill] sm:$0xff]  ;;  %v4129_v25 = vrot.slane %v3101_v59, %v11525_v50 }
 0x255   : > { %3238 = vadd.xlane.f32.xlu0 %v11808_v32  ;;  %3248 = vadd.xlane.f32.xlu1 %v11809_v38  ;;  %v4120_v21 = vsel %vm3795_vm10, %v4119_v47, %v4115_v52  ;;  %v8881_v63 = vadd.f32 %v2334_v17, %v1950_v22  ;;  %v1696_v58 = vmul.f32 %v11811_v60, %v8806_v2  ;;  %v11813_v17 = vld [vmem:[#allocation9_spill] sm:$0xff]  ;;  %v11814_v52 = vld [vmem:[#allocation120_spill] sm:$0xff]  ;;  %v11816_v59 = vmax.f32 %v8708_v35, 0.0 }
 0x256   : > { %v1061_v32 = vmul.f32 %v11812_v54, %v8790_v62  ;;  %v4124_v38 = vrot.slane %v3099_v20, %v11522_v46  ;;  %v1955_v44 = vadd.f32 %v1699_v43, %v1315_v34  ;;  %v2336_v3 = vmul.f32 %v11723_v27, %v8834_v37  ;;  %v11821_v34 = vld [vmem:[#allocation73_spill] sm:$0xff] }
 0x257   : > { %v4139_v9 = vrot.slane %v3105_v30, %v11534_v36  ;;  %v1312_v47 = vadd.f32 %v1056_v10, %v672_v4  ;;  %v677_v22 = vmul.f32 %v11813_v17, %v8812_v18  ;;  %v1701_v60 = vmul.f32 %v11814_v52, %v8806_v2  ;;  %v11817_v30 = vld [vmem:[#allocation49_spill] sm:$0xff]  ;;  %v3103_v4 = vpop.xlane.xlu0 %3102  ;;  %v3113_v17 = vpop.xlane.xlu1 %3112 }
 0x258   : > { %v4125_v57 = vsel %vm3802_vm11, %v4124_v38, %v4120_v21  ;;  %v11815_v54 = vmax.f32 %v8706_v19, 0.0  ;;  %v8902_v43 = vadd.f32 %v2339_v23, %v1955_v44  ;;  %v1058_v10 = vmul.f32 %v11817_v30, %v8790_v62 }
 0x259   : > { %3252 = vadd.xlane.f32.xlu1 %v11816_v59  ;;  %v4130_v20 = vsel %vm3809_vm12, %v4129_v25, %v4125_v57  ;;  %v1952_v21 = vadd.f32 %v1696_v58, %v1312_v47  ;;  %v1317_v38 = vadd.f32 %v1061_v32, %v677_v22  ;;  %v4134_v19 = vrot.slane %v3103_v4, %v11533_v28  ;;  %v11818_v25 = vld [vmem:[#allocation83_spill] sm:$0xff]  ;;  %v11827_v4 = vld [vmem:[#allocation54_spill] sm:$0xff] }
 0x25a   : > { %3242 = vadd.xlane.f32.xlu0 %v11815_v54  ;;  %v2341_v35 = vmul.f32 %v11521_v45, %v8834_v37  ;;  %v674_v23 = vmul.f32 %v11630_v61, %v8812_v18  ;;  %v1698_v54 = vmul.f32 %v11631_v13, %v8806_v2  ;;  %v4148_v44 = vrot.slane %v3109_v39, %v11760_v51 }
 0x25b   : > { %v8916_v59 = vadd.f32 %v2336_v3, %v1952_v21  ;;  %v1957_v57 = vadd.f32 %v1701_v60, %v1317_v38  ;;  %v1063_v58 = vmul.f32 %v11818_v25, %v8790_v62  ;;  %v4135_v32 = vsel %vm3816_vm13, %v4134_v19, %v4130_v20  ;;  %v3107_v60 = vpop.xlane.xlu0 %3106  ;;  %v3117_v21 = vpop.xlane.xlu1 %3116  ;;  %v11822_v38 = vld [vmem:[#allocation11_spill] sm:$0xff]  ;;  %v11823_v20 = vld [vmem:[#allocation93_spill] sm:$0xff]  ;;  %v11824_v19 = vld [vmem:[#allocation66_spill] sm:$0xff] }
 0x25c   : > { %v11819_v47 = vmax.f32 %v8729_v0, 0.0  ;;  %v11820_v22 = vmax.f32 %v8743_v42, 0.0  ;;  %v1314_v52 = vadd.f32 %v1058_v10, %v674_v23  ;;  %v2338_v39 = vmul.f32 %v11821_v34, %v8834_v37  ;;  %v11826_v10 = vld [vmem:[#allocation80_spill] sm:$0xff] }
 0x25d   : > { %v4140_v3 = vsel %vm3823_vm14, %v4139_v9, %v4135_v32  ;;  %v679_v25 = vmul.f32 %v11822_v38, %v8812_v18  ;;  %v1703_v0 = vmul.f32 %v11823_v20, %v8806_v2  ;;  %v1060_v42 = vmul.f32 %v11824_v19, %v8790_v62  ;;  %v11828_v38 = vld [vmem:[#allocation10_spill] sm:$0xff] }
 0x25e   : > { %3246 = vadd.xlane.f32.xlu0 %v11819_v47  ;;  %3256 = vadd.xlane.f32.xlu1 %v11820_v22  ;;  %v8937_v47 = vsel %vm10879_vm15, %v4140_v3, %v8726_v33  ;;  %v4144_v23 = vrot.slane %v3107_v60, %v11826_v10  ;;  %v8940_v22 = vadd.f32 %v2341_v35, %v1957_v57  ;;  %v11829_v20 = vld [vmem:[#allocation58_spill] sm:$0xff]  ;;  %v11830_v33 = vmax.f32 %v8771_v29, 0.0 }
 0x25f   : > { %11825 = vst [vmem:[#allocation24_spill] sm:$0xff] %v8937_v47  ;;  %v1954_v9 = vadd.f32 %v1698_v54, %v1314_v52  ;;  %v1319_v32 = vadd.f32 %v1063_v58, %v679_v25  ;;  %v2343_v34 = vmul.f32 %v11827_v4, %v8834_v37  ;;  %v676_v13 = vmul.f32 %v11828_v38, %v8812_v18  ;;  %v11832_v54 = vld [vmem:[#allocation100_spill] sm:$0xff]  ;;  %v3111_v58 = vpop.xlane.xlu0 %3110  ;;  %v3121_v60 = vpop.xlane.xlu1 %3120 }
 0x260   : > { %v1700_v61 = vmul.f32 %v11829_v20, %v8806_v2  ;;  %v4149_v19 = vsel %vm3725_vm0, %v4148_v44, %v4144_v23  ;;  %v11831_v3 = vmax.f32 %v8785_v40, 0.0  ;;  %v1065_v57 = vmul.f32 %v11832_v54, %v8790_v62  ;;  %v11833_v44 = vld [vmem:[#allocation59_spill] sm:$0xff]  ;;  %v11836_v54 = vld [vmem:[#allocation60_spill] sm:$0xff] }
 0x261   : > { %v8954_v35 = vadd.f32 %v2338_v39, %v1954_v9  ;;  %v4158_v25 = vrot.slane %v3113_v17, %v11466_v31  ;;  %v1959_v47 = vadd.f32 %v1703_v0, %v1319_v32  ;;  %v1316_v20 = vadd.f32 %v1060_v42, %v676_v13  ;;  %v11835_v9 = vld [vmem:[#allocation27_spill] sm:$0xff]  ;;  %v11837_v13 = vld [vmem:[#allocation82_spill] sm:$0xff] }
 0x262   : > { %3250 = vadd.xlane.f32.xlu0 %v11830_v33  ;;  %3260 = vadd.xlane.f32.xlu1 %v11831_v3  ;;  %v2340_v29 = vmul.f32 %v11833_v44, %v8834_v37  ;;  %v4153_v23 = vrot.slane %v3111_v58, %v11462_v14  ;;  %v11834_v33 = vld [vmem:[#allocation14_spill] sm:$0xff]  ;;  %v1705_v3 = vmul.f32 %v11835_v9, %v8806_v2  ;;  %v11838_v58 = vmax.f32 %v8801_v26, 0.0  ;;  %v11842_v26 = vld [vmem:[#allocation105_spill] sm:$0xff] }
 0x263   : > { %v681_v39 = vmul.f32 %v11834_v33, %v8812_v18  ;;  %v8967_v52 = vadd.f32 %v2343_v34, %v1959_v47  ;;  %v1956_v17 = vadd.f32 %v1700_v61, %v1316_v20  ;;  %v2345_v0 = vmul.f32 %v11836_v54, %v8834_v37  ;;  %v11840_v34 = vld [vmem:[#allocation12_spill] sm:$0xff]  ;;  %v3115_v20 = vpop.xlane.xlu0 %3114  ;;  %v3125_v54 = vpop.xlane.xlu1 %3124 }
 0x264   : > { %v1062_v42 = vmul.f32 %v11837_v13, %v8790_v62  ;;  %v4154_v32 = vsel %vm3732_vm1, %v4153_v23, %v4149_v19  ;;  %v11839_v40 = vmax.f32 %v8826_v8, 0.0  ;;  %v678_v61 = vmul.f32 %v11840_v34, %v8812_v18  ;;  %v11841_v19 = vld [vmem:[#allocation119_spill] sm:$0xff]  ;;  %v11844_v34 = vld [vmem:[#allocation26_spill] sm:$0xff] }
 0x265   : > { %v1321_v9 = vadd.f32 %v1065_v57, %v681_v39  ;;  %v4159_v47 = vsel %vm3739_vm2, %v4158_v25, %v4154_v32  ;;  %v8982_v33 = vadd.f32 %v2340_v29, %v1956_v17  ;;  %v1702_v23 = vmul.f32 %v11841_v19, %v8806_v2  ;;  %v11843_v39 = vld [vmem:[#allocation61_spill] sm:$0xff]  ;;  %v11845_v29 = vld [vmem:[#allocation18_spill] sm:$0xff]  ;;  %v11846_v32 = vld [vmem:[#allocation103_spill] sm:$0xff] }
 0x266   : > { %3254 = vadd.xlane.f32.xlu0 %v11838_v58  ;;  %3264 = vadd.xlane.f32.xlu1 %v11839_v40  ;;  %v1067_v58 = vmul.f32 %v11842_v26, %v8790_v62  ;;  %v4168_v8 = vrot.slane %v3117_v21, %v11477_v15  ;;  %v4163_v40 = vrot.slane %v3115_v20, %v11475_v41  ;;  %v11847_v26 = vmax.f32 %v8853_v56, 0.0  ;;  %v11850_v56 = vld [vmem:[#allocation47_spill] sm:$0xff] }
 0x267   : > { %v1961_v57 = vadd.f32 %v1705_v3, %v1321_v9  ;;  %v2342_v44 = vmul.f32 %v11843_v39, %v8834_v37  ;;  %v4178_v13 = vrot.slane %v3121_v60, %v11844_v34  ;;  %v1318_v25 = vadd.f32 %v1062_v42, %v678_v61  ;;  %v11849_v60 = vld [vmem:[#allocation99_spill] sm:$0xff]  ;;  %v3119_v61 = vpop.xlane.xlu0 %3118 }
 0x268   : > { %v683_v17 = vmul.f32 %v11845_v29, %v8812_v18  ;;  %v1707_v19 = vmul.f32 %v11846_v32, %v8806_v2  ;;  %v4164_v38 = vsel %vm3746_vm3, %v4163_v40, %v4159_v47  ;;  %v11848_v21 = vmax.f32 %v8866_v53, 0.0  ;;  %v3129_v29 = vpop.xlane.xlu1 %3128  ;;  %v11851_v53 = vld [vmem:[#allocation68_spill] sm:$0xff] }
 0x269   : > { %v2855_v9 = vmax.f32 %v8967_v52, 0.0  ;;  %v9003_v3 = vadd.f32 %v2345_v0, %v1961_v57  ;;  %v1064_v42 = vmul.f32 %v11849_v60, %v8790_v62  ;;  %v4169_v20 = vsel %vm10882_vm4, %v4168_v8, %v4164_v38  ;;  %v11852_v52 = vld [vmem:[#allocation15_spill] sm:$0xff]  ;;  %v11853_v57 = vld [vmem:[#allocation121_spill] sm:$0xff] }
 0x26a   : > { %3258 = vadd.xlane.f32.xlu0 %v11847_v26  ;;  %3268 = vadd.xlane.f32.xlu1 %v11848_v21  ;;  %v1958_v47 = vadd.f32 %v1702_v23, %v1318_v25  ;;  %v1323_v40 = vadd.f32 %v1067_v58, %v683_v17  ;;  %v4173_v26 = vrot.slane %v3119_v61, %v11850_v56  ;;  %v11854_v8 = vld [vmem:[#allocation107_spill] sm:$0xff]  ;;  %v11855_v25 = vmax.f32 %v8881_v63, 0.0 }
 0x26b   : > { %v2347_v21 = vmul.f32 %v11851_v53, %v8834_v37  ;;  %v680_v0 = vmul.f32 %v11852_v52, %v8812_v18  ;;  %v1704_v39 = vmul.f32 %v11853_v57, %v8806_v2  ;;  %v4188_v60 = vrot.slane %v3125_v54, %v11499_v24  ;;  %v11857_v57 = vld [vmem:[#allocation30_spill] sm:$0xff] }
 0x26c   : > { %v9017_v4 = vadd.f32 %v2342_v44, %v1958_v47  ;;  %v1963_v38 = vadd.f32 %v1707_v19, %v1323_v40  ;;  %v1069_v23 = vmul.f32 %v11854_v8, %v8790_v62  ;;  %v4174_v58 = vsel %vm10883_vm5, %v4173_v26, %v4169_v20  ;;  %v3123_v44 = vpop.xlane.xlu0 %3122  ;;  %v3133_v47 = vpop.xlane.xlu1 %3132  ;;  %v11858_v40 = vld [vmem:[#allocation22_spill] sm:$0xff]  ;;  %v11859_v20 = vld [vmem:[#allocation128_spill] sm:$0xff]  ;;  %v11862_v8 = vld [vmem:[#allocation19_spill] sm:$0xff] }
 0x26d   : > { %v11856_v17 = vmax.f32 %v8902_v43, 0.0  ;;  %v2857_v61 = vmax.f32 %v9003_v3, 0.0  ;;  %v1320_v32 = vadd.f32 %v1064_v42, %v680_v0  ;;  %v2344_v54 = vmul.f32 %v11857_v57, %v8834_v37  ;;  %v11860_v26 = vld [vmem:[#allocation104_spill] sm:$0xff]  ;;  %v11863_v57 = vld [vmem:[#allocation94_spill] sm:$0xff] }
 0x26e   : > { %3262 = vadd.xlane.f32.xlu0 %v11855_v25  ;;  %v4179_v19 = vsel %vm3767_vm6, %v4178_v13, %v4174_v58  ;;  %v685_v24 = vmul.f32 %v11858_v40, %v8812_v18  ;;  %v1709_v63 = vmul.f32 %v11859_v20, %v8806_v2  ;;  %v1066_v43 = vmul.f32 %v11860_v26, %v8790_v62  ;;  %v11861_v13 = vld [vmem:[#allocation71_spill] sm:$0xff] }
 0x26f   : > { %3272 = vadd.xlane.f32.xlu1 %v11856_v17  ;;  %v4198_v25 = vrot.slane %v3129_v29, %v11511_v7  ;;  %v4183_v3 = vrot.slane %v3123_v44, %v11495_v48  ;;  %v9038_v42 = vadd.f32 %v2347_v21, %v1963_v38  ;;  %v1960_v0 = vadd.f32 %v1704_v39, %v1320_v32  ;;  %v11866_v32 = vld [vmem:[#allocation111_spill] sm:$0xff] }
 0x270   : > { %v1325_v17 = vadd.f32 %v1069_v23, %v685_v24  ;;  %v2349_v58 = vmul.f32 %v11861_v13, %v8834_v37  ;;  %v682_v40 = vmul.f32 %v11862_v8, %v8812_v18  ;;  %v1706_v20 = vmul.f32 %v11863_v57, %v8806_v2  ;;  %v3127_v38 = vpop.xlane.xlu0 %3126  ;;  %v3137_v44 = vpop.xlane.xlu1 %3136 }
 0x271   : > { %v4184_v53 = vsel %vm3774_vm7, %v4183_v3, %v4179_v19  ;;  %v11864_v26 = vmax.f32 %v8916_v59, 0.0  ;;  %v11865_v29 = vmax.f32 %v8940_v22, 0.0  ;;  %v2854_v39 = vmax.f32 %v9017_v4, 0.0  ;;  %v11867_v59 = vld [vmem:[#allocation74_spill] sm:$0xff]  ;;  %v11868_v4 = vld [vmem:[#allocation37_spill] sm:$0xff] }
 0x272   : > { %v9052_v24 = vadd.f32 %v2344_v54, %v1960_v0  ;;  %v1071_v21 = vmul.f32 %v11866_v32, %v8790_v62  ;;  %v4189_v23 = vsel %vm3781_vm8, %v4188_v60, %v4184_v53  ;;  %v1965_v7 = vadd.f32 %v1709_v63, %v1325_v17  ;;  %v11869_v0 = vld [vmem:[#allocation109_spill] sm:$0xff]  ;;  %v11870_v60 = vld [vmem:[#allocation31_spill] sm:$0xff] }
 0x273   : > { %3266 = vadd.xlane.f32.xlu0 %v11864_v26  ;;  %3276 = vadd.xlane.f32.xlu1 %v11865_v29  ;;  %v1322_v19 = vadd.f32 %v1066_v43, %v682_v40  ;;  %v2346_v26 = vmul.f32 %v11867_v59, %v8834_v37  ;;  %v4208_v22 = vrot.slane %v3133_v47, %v11525_v50  ;;  %v11871_v40 = vld [vmem:[#allocation106_spill] sm:$0xff]  ;;  %v11872_v17 = vmax.f32 %v8954_v35, 0.0 }
 0x274   : > { %v4193_v3 = vrot.slane %v3127_v38, %v11509_v16  ;;  %v687_v54 = vmul.f32 %v11868_v4, %v8812_v18  ;;  %v1711_v29 = vmul.f32 %v11869_v0, %v8806_v2  ;;  %v9065_v32 = vadd.f32 %v2349_v58, %v1965_v7  ;;  %v347_v43 = vld [vmem:[%s5630_s9 + $0x2c] sm:$0xf]  ;;  %v11873_v0 = vld [vmem:[#allocation17_spill] sm:$0xff] }
 0x275   : > { %v1962_v57 = vadd.f32 %v1706_v20, %v1322_v19  ;;  %v2351_v53 = vmul.f32 %v11870_v60, %v8834_v37  ;;  %v1068_v63 = vmul.f32 %v11871_v40, %v8790_v62  ;;  %v2859_v38 = vmax.f32 %v9038_v42, 0.0  ;;  %v3131_v20 = vpop.xlane.xlu0 %3130  ;;  %v3141_v19 = vpop.xlane.xlu1 %3140  ;;  %v11874_v40 = vld [vmem:[#allocation23_spill] sm:$0xff] }
 0x276   : > { %v4194_v47 = vsel %vm3788_vm9, %v4193_v3, %v4189_v23  ;;  %v1327_v50 = vadd.f32 %v1071_v21, %v687_v54  ;;  %v9077_v7 = vrot.slane %v347_v43, %v11873_v0  ;;  %v2856_v60 = vmax.f32 %v9052_v24, 0.0  ;;  %v11875_v23 = vld [vmem:[#allocation32_spill] sm:$0xff] }
 0x277   : > { %3270 = vadd.xlane.f32.xlu0 %v11872_v17  ;;  %3280 = vadd.xlane.f32.xlu1 %v2855_v9  ;;  %v4199_v58 = vsel %vm3795_vm10, %v4198_v25, %v4194_v47  ;;  %v684_v16 = vmul.f32 %v11874_v40, %v8812_v18  ;;  %v1708_v35 = vmul.f32 %v11875_v23, %v8806_v2  ;;  %v11876_v21 = vld [vmem:[#allocation20_spill] sm:$0xff]  ;;  %v11877_v25 = vld [vmem:[#allocation81_spill] sm:$0xff]  ;;  %v11879_v40 = vld [vmem:[#allocation43_spill] sm:$0xff]  ;;  %vm12056_vm15 = vcmask 1041409  }
 0x278   : > { %v4203_v9 = vrot.slane %v3131_v20, %v11522_v46  ;;  %v9086_v3 = vadd.f32 %v2346_v26, %v1962_v57  ;;  %v1967_v42 = vadd.f32 %v1711_v29, %v1327_v50  ;;  %v9089_v54 = vrot.slane %v347_v43, %v11876_v21  ;;  %v11878_v0 = vld [vmem:[#allocation16_spill] sm:$0xff] }
 0x279   : > { %v1324_v17 = vadd.f32 %v1068_v63, %v684_v16  ;;  %v2348_v47 = vmul.f32 %v11877_v25, %v8834_v37  ;;  %v9094_v24 = vrot.slane %v347_v43, %v11878_v0  ;;  %v1073_v4 = vmul.f32 %v11879_v40, %v9077_v7  ;;  %v3135_v26 = vpop.xlane.xlu0 %3134  ;;  %v3145_v63 = vpop.xlane.xlu1 %3144  ;;  %v11881_v21 = vld [vmem:[#allocation8_spill] sm:$0xff] }
 0x27a   : > { %v4218_v23 = vrot.slane %v3137_v44, %v11534_v36  ;;  %v4204_v20 = vsel %vm3802_vm11, %v4203_v9, %v4199_v58  ;;  %v11880_v57 = vmax.f32 %v8982_v33, 0.0  ;;  %v2861_v50 = vmax.f32 %v9065_v32, 0.0  ;;  %v11882_v33 = vld [vmem:[#allocation117_spill] sm:$0xff] }
 0x27b   : > { %3284 = vadd.xlane.f32.xlu1 %v2857_v61  ;;  %v2607_v16 = vadd.f32 %v2351_v53, %v1967_v42  ;;  %v4209_v29 = vsel %vm3809_vm12, %v4208_v22, %v4204_v20  ;;  %v1964_v46 = vadd.f32 %v1708_v35, %v1324_v17  ;;  %v689_v25 = vmul.f32 %v11881_v21, %v9094_v24  ;;  %v11883_v61 = vld [vmem:[#allocation21_spill] sm:$0xff] }
 0x27c   : > { %3274 = vadd.xlane.f32.xlu0 %v11880_v57  ;;  %v1070_v44 = vmul.f32 %v11797_v49, %v8790_v62  ;;  %v4213_v58 = vrot.slane %v3135_v26, %v11533_v28  ;;  %v1713_v9 = vmul.f32 %v11882_v33, %v9089_v54  ;;  %v9112_v57 = vrot.slane %v347_v43, %v11883_v61  ;;  %v11884_v43 = vld [vmem:[#allocation116_spill] sm:$0xff] }
 0x27d   : > { %v686_v32 = vmul.f32 %v11799_v5, %v8812_v18  ;;  %v9116_v22 = vadd.f32 %v2348_v47, %v1964_v46  ;;  %v1329_v53 = vadd.f32 %v1073_v4, %v689_v25  ;;  %v1710_v35 = vmul.f32 %v11800_v55, %v8806_v2  ;;  %v3139_v18 = vpop.xlane.xlu0 %3138  ;;  %v3149_v4 = vpop.xlane.xlu1 %3148 }
 0x27e   : > { %v1075_v62 = vmul.f32 %v11803_v11, %v9077_v7  ;;  %v4214_v42 = vsel %vm3816_vm13, %v4213_v58, %v4209_v29  ;;  %v2858_v17 = vmax.f32 %v9086_v3, 0.0  ;;  %v2353_v20 = vmul.f32 %v11884_v43, %v9112_v57 }
 0x27f   : > { %3288 = vadd.xlane.f32.xlu1 %v2859_v38  ;;  %v1326_v26 = vadd.f32 %v1070_v44, %v686_v32  ;;  %v9127_v46 = vsel %vm3823_vm14, %v4218_v23, %v4214_v42  ;;  %v2350_v2 = vmul.f32 %v11712_v1, %v8834_v37  ;;  %v691_v25 = vmul.f32 %v11804_v12, %v9094_v24  ;;  %v11887_v32 = vld [vmem:[#allocation130_spill] sm:$0xff] }
 0x280   : > { %3278 = vadd.xlane.f32.xlu0 %v2854_v39  ;;  %11885 = vst [vmem:[#allocation91_spill] sm:$0xff] %v9127_v46  ;;  %v11886_v39 = vld [vmem:[#allocation72_spill] sm:$0xff]  ;;  %v4227_v3 = vrot.slane %v3141_v19, %v11760_v51  ;;  %v4223_v47 = vrot.slane %v3139_v18, %v11826_v10  ;;  %v2863_v29 = vmax.f32 %v2607_v16, 0.0  ;;  %v1969_v44 = vadd.f32 %v1713_v9, %v1329_v53 }
 0x281   : > { %v1715_v38 = vmul.f32 %v11886_v39, %v9089_v54  ;;  %v1966_v58 = vadd.f32 %v1710_v35, %v1326_v26  ;;  %v1331_v23 = vadd.f32 %v1075_v62, %v691_v25  ;;  %v2355_v42 = vmul.f32 %v11887_v32, %v9112_v57  ;;  %v3143_v9 = vpop.xlane.xlu0 %3142  ;;  %v3153_v53 = vpop.xlane.xlu1 %3152  ;;  %v11888_v26 = vld [vmem:[#allocation6_spill] sm:$0xff] }
 0x282   : > { %v1072_v37 = vmul.f32 %v11807_v6, %v9077_v7  ;;  %v4237_v46 = vrot.slane %v3145_v63, %v11466_v31  ;;  %v4228_v36 = vsel %vm3725_vm0, %v4227_v3, %v4223_v47  ;;  %v2860_v19 = vmax.f32 %v9116_v22, 0.0  ;;  %v11889_v63 = vld [vmem:[#allocation52_spill] sm:$0xff] }
 0x283   : > { %3292 = vadd.xlane.f32.xlu1 %v2861_v50  ;;  %v2609_v28 = vadd.f32 %v2353_v20, %v1969_v44  ;;  %v4247_v16 = vrot.slane %v3149_v4, %v11477_v15  ;;  %v2606_v35 = vadd.f32 %v2350_v2, %v1966_v58  ;;  %v1971_v62 = vadd.f32 %v1715_v38, %v1331_v23  ;;  %v11890_v50 = vld [vmem:[#allocation67_spill] sm:$0xff]  ;;  %v11891_v2 = vld [vmem:[#allocation9_spill] sm:$0xff]  ;;  %v11892_v58 = vld [vmem:[#allocation120_spill] sm:$0xff] }
 0x284   : > { %3282 = vadd.xlane.f32.xlu0 %v2856_v60  ;;  %v688_v18 = vmul.f32 %v11888_v26, %v9094_v24  ;;  %v4232_v25 = vrot.slane %v3143_v9, %v11462_v14  ;;  %v1712_v6 = vmul.f32 %v11889_v63, %v9089_v54  ;;  %v2352_v60 = vmul.f32 %v11723_v27, %v9112_v57 }
 0x285   : > { %v1077_v22 = vmul.f32 %v11890_v50, %v9077_v7  ;;  %v4257_v20 = vrot.slane %v3153_v53, %v11844_v34  ;;  %v2611_v4 = vadd.f32 %v2355_v42, %v1971_v62  ;;  %v693_v38 = vmul.f32 %v11891_v2, %v9094_v24  ;;  %v3147_v27 = vpop.xlane.xlu0 %3146  ;;  %v9163_v53 = vpop.xlane.xlu1 %3156  ;;  %v11898_v2 = vld [vmem:[#allocation93_spill] sm:$0xff] }
 0x286   : > { %v1328_v3 = vadd.f32 %v1072_v37, %v688_v18  ;;  %v4233_v47 = vsel %vm3732_vm1, %v4232_v25, %v4228_v36  ;;  %v2865_v44 = vmax.f32 %v2609_v28, 0.0  ;;  %v1717_v23 = vmul.f32 %v11892_v58, %v9089_v54  ;;  %v11893_v37 = vld [vmem:[#allocation5_spill] sm:$0xff]  ;;  %v11897_v58 = vld [vmem:[#allocation83_spill] sm:$0xff] }
 0x287   : > { %3296 = vadd.xlane.f32.xlu1 %v2863_v29  ;;  %v1074_v9 = vmul.f32 %v11817_v30, %v9077_v7  ;;  %v4238_v50 = vsel %vm3739_vm2, %v4237_v46, %v4233_v47  ;;  %v2357_v42 = vmul.f32 %v11521_v45, %v9112_v57  ;;  %v690_v36 = vmul.f32 %v11893_v37, %v9094_v24  ;;  %v11895_v25 = vld [vmem:[#allocation73_spill] sm:$0xff]  ;;  %v11896_v46 = vld [vmem:[#allocation11_spill] sm:$0xff] }
 0x288   : > { %3286 = vadd.xlane.f32.xlu0 %v2858_v17  ;;  %v11894_v17 = vld [vmem:[#allocation56_spill] sm:$0xff]  ;;  %v4242_v29 = vrot.slane %v3147_v27, %v11475_v41  ;;  %v1968_v62 = vadd.f32 %v1712_v6, %v1328_v3  ;;  %v1333_v18 = vadd.f32 %v1077_v22, %v693_v38  ;;  %v2354_v34 = vmul.f32 %v11895_v25, %v9112_v57 }
 0x289   : > { %v1714_v28 = vmul.f32 %v11894_v17, %v9089_v54  ;;  %v1330_v30 = vadd.f32 %v1074_v9, %v690_v36  ;;  %v695_v47 = vmul.f32 %v11896_v46, %v9094_v24  ;;  %v1079_v45 = vmul.f32 %v11897_v58, %v9077_v7  ;;  %v3151_v3 = vpop.xlane.xlu0 %3150  ;;  %v9182_v9 = vpop.xlane.xlu1 %3160 }
 0x28a   : > { %v1719_v37 = vmul.f32 %v11898_v2, %v9089_v54  ;;  %v4243_v63 = vsel %vm3746_vm3, %v4242_v29, %v4238_v50  ;;  %v2862_v27 = vmax.f32 %v2606_v35, 0.0  ;;  %v2608_v6 = vadd.f32 %v2352_v60, %v1968_v62  ;;  %v11899_v2 = vld [vmem:[#allocation54_spill] sm:$0xff] }
 0x28b   : > { %3300 = vadd.xlane.f32.xlu1 %v2865_v44  ;;  %v1973_v22 = vadd.f32 %v1717_v23, %v1333_v18  ;;  %v4248_v38 = vsel %vm10882_vm4, %v4247_v16, %v4243_v63  ;;  %v2867_v36 = vmax.f32 %v2611_v4, 0.0  ;;  %v1970_v46 = vadd.f32 %v1714_v28, %v1330_v30  ;;  %v11901_v44 = vld [vmem:[#allocation10_spill] sm:$0xff]  ;;  %v11904_v28 = vld [vmem:[#allocation100_spill] sm:$0xff] }
 0x28c   : > { %3290 = vadd.xlane.f32.xlu0 %v2860_v19  ;;  %v1335_v25 = vadd.f32 %v1079_v45, %v695_v47  ;;  %v4252_v58 = vrot.slane %v3151_v3, %v11850_v56  ;;  %v2359_v15 = vmul.f32 %v11899_v2, %v9112_v57  ;;  %v11900_v19 = vld [vmem:[#allocation66_spill] sm:$0xff]  ;;  %v692_v23 = vmul.f32 %v11901_v44, %v9094_v24  ;;  %v11908_v3 = vld [vmem:[#allocation60_spill] sm:$0xff] }
 0x28d   : > { %v2613_v17 = vadd.f32 %v2357_v42, %v1973_v22  ;;  %v1076_v50 = vmul.f32 %v11900_v19, %v9077_v7  ;;  %v2610_v35 = vadd.f32 %v2354_v34, %v1970_v46  ;;  %v11902_v16 = vld [vmem:[#allocation58_spill] sm:$0xff]  ;;  %v2864_v45 = vmax.f32 %v2608_v6, 0.0  ;;  %v9198_v62 = vpop.xlane.xlu0 %3154  ;;  %v11907_v46 = vld [vmem:[#allocation27_spill] sm:$0xff] }
 0x28e   : > { %v1975_v60 = vadd.f32 %v1719_v37, %v1335_v25  ;;  %v1716_v63 = vmul.f32 %v11902_v16, %v9089_v54  ;;  %v4253_v30 = vsel %vm10883_vm5, %v4252_v58, %v4248_v38  ;;  %v11903_v4 = vld [vmem:[#allocation14_spill] sm:$0xff]  ;;  %v1081_v29 = vmul.f32 %v11904_v28, %v9077_v7  ;;  %v9203_v37 = vpop.xlane.xlu1 %3164  ;;  %v11906_v25 = vld [vmem:[#allocation59_spill] sm:$0xff] }
 0x28f   : > { %3304 = vadd.xlane.f32.xlu1 %v2867_v36  ;;  %v697_v42 = vmul.f32 %v11903_v4, %v9094_v24  ;;  %v9201_v34 = vsel %vm3767_vm6, %v4257_v20, %v4253_v30  ;;  %11905 = vst [vmem:[#allocation88_spill] sm:$0xff] %v9203_v37  ;;  %v1332_v18 = vadd.f32 %v1076_v50, %v692_v23  ;;  %v11909_v28 = vld [vmem:[#allocation82_spill] sm:$0xff]  ;;  %v11910_v50 = vld [vmem:[#allocation12_spill] sm:$0xff]  ;;  %v11911_v4 = vld [vmem:[#allocation119_spill] sm:$0xff] }
 0x290   : > { %3294 = vadd.xlane.f32.xlu0 %v2862_v27  ;;  %v2356_v58 = vmul.f32 %v11906_v25, %v9112_v57  ;;  %v1721_v47 = vmul.f32 %v11907_v46, %v9089_v54  ;;  %v2869_v27 = vmax.f32 %v2613_v17, 0.0  ;;  %v2615_v6 = vadd.f32 %v2359_v15, %v1975_v60  ;;  %v11922_v16 = vld [vmem:[#allocation107_spill] sm:$0xff]  ;;  %v11950_v37 = vld [vmem:[#allocation84_spill] sm:$0xff] }
 0x291   : > { %v1337_v22 = vadd.f32 %v1081_v29, %v697_v42  ;;  %v2361_v38 = vmul.f32 %v11908_v3, %v9112_v57  ;;  %v1972_v36 = vadd.f32 %v1716_v63, %v1332_v18  ;;  %v1078_v20 = vmul.f32 %v11909_v28, %v9077_v7  ;;  %v9217_v46 = vpop.xlane.xlu0 %3158  ;;  %v11913_v18 = vld [vmem:[#allocation61_spill] sm:$0xff] }
 0x292   : > { %v694_v23 = vmul.f32 %v11910_v50, %v9094_v24  ;;  %v1718_v25 = vmul.f32 %v11911_v4, %v9089_v54  ;;  %v9219_v15 = vpop.xlane.xlu1 %3168  ;;  %v2866_v17 = vmax.f32 %v2610_v35, 0.0  ;;  %v2871_v42 = vmax.f32 %v2615_v6, 0.0  ;;  %v11916_v4 = vld [vmem:[#allocation103_spill] sm:$0xff] }
 0x293   : > { %3308 = vadd.xlane.f32.xlu1 %v2869_v27  ;;  %v1977_v30 = vadd.f32 %v1721_v47, %v1337_v22  ;;  %11912 = vst [vmem:[#allocation102_spill] sm:$0xff] %v9219_v15  ;;  %v2612_v60 = vadd.f32 %v2356_v58, %v1972_v36  ;;  %v11914_v47 = vld [vmem:[#allocation18_spill] sm:$0xff]  ;;  %v11915_v22 = vld [vmem:[#allocation105_spill] sm:$0xff]  ;;  %v1723_v50 = vmul.f32 %v11916_v4, %v9089_v54  ;;  %v11917_v58 = vld [vmem:[#allocation99_spill] sm:$0xff] }
 0x294   : > { %3298 = vadd.xlane.f32.xlu0 %v2864_v45  ;;  %v1334_v29 = vadd.f32 %v1078_v20, %v694_v23  ;;  %v2358_v45 = vmul.f32 %v11913_v18, %v9112_v57  ;;  %v699_v27 = vmul.f32 %v11914_v47, %v9094_v24  ;;  %v1083_v28 = vmul.f32 %v11915_v22, %v9077_v7  ;;  %v11918_v23 = vld [vmem:[#allocation68_spill] sm:$0xff]  ;;  %v11919_v4 = vld [vmem:[#allocation121_spill] sm:$0xff] }
 0x295   : > { %v2617_v63 = vadd.f32 %v2361_v38, %v1977_v30  ;;  %v696_v35 = vmul.f32 %v11852_v52, %v9094_v24  ;;  %v1080_v6 = vmul.f32 %v11917_v58, %v9077_v7  ;;  %v9233_v38 = vpop.xlane.xlu0 %3162  ;;  %v2868_v20 = vmax.f32 %v2612_v60, 0.0  ;;  %v11920_v52 = vld [vmem:[#allocation30_spill] sm:$0xff] }
 0x296   : > { %v1974_v15 = vadd.f32 %v1718_v25, %v1334_v29  ;;  %v9235_v36 = vpop.xlane.xlu1 %3172  ;;  %v1339_v30 = vadd.f32 %v1083_v28, %v699_v27  ;;  %v2363_v22 = vmul.f32 %v11918_v23, %v9112_v57  ;;  %v2360_v47 = vmul.f32 %v11920_v52, %v9112_v57  ;;  %v11921_v58 = vld [vmem:[#allocation22_spill] sm:$0xff] }
 0x297   : > { %3312 = vadd.xlane.f32.xlu1 %v2871_v42  ;;  %v2873_v42 = vmax.f32 %v2617_v63, 0.0  ;;  %v1336_v29 = vadd.f32 %v1080_v6, %v696_v35  ;;  %v701_v3 = vmul.f32 %v11921_v58, %v9094_v24  ;;  %v1085_v60 = vmul.f32 %v11922_v16, %v9077_v7  ;;  %v11923_v63 = vld [vmem:[#allocation128_spill] sm:$0xff]  ;;  %v11935_v23 = vld [vmem:[#allocation106_spill] sm:$0xff] }
 0x298   : > { %3302 = vadd.xlane.f32.xlu0 %v2866_v17  ;;  %v1720_v17 = vmul.f32 %v11919_v4, %v9089_v54  ;;  %v2614_v25 = vadd.f32 %v2358_v45, %v1974_v15  ;;  %v1979_v18 = vadd.f32 %v1723_v50, %v1339_v30  ;;  %v4262_v28 = vrot.slane %v9198_v62, %v11495_v48  ;;  %v11927_v4 = vld [vmem:[#allocation40_spill] sm:$0xff] }
 0x299   : > { %v1725_v15 = vmul.f32 %v11923_v63, %v9089_v54  ;;  %v9251_v45 = vpop.xlane.xlu0 %3166  ;;  %v1341_v6 = vadd.f32 %v1085_v60, %v701_v3  ;;  %v2365_v30 = vmul.f32 %v11861_v13, %v9112_v57  ;;  %v698_v62 = vmul.f32 %v11862_v8, %v9094_v24  ;;  %v11926_v63 = vld [vmem:[#allocation94_spill] sm:$0xff]  ;;  %v11928_v3 = vld [vmem:[#allocation63_spill] sm:$0xff] }
 0x29a   : > { %v1976_v27 = vadd.f32 %v1720_v17, %v1336_v29  ;;  %11924 = vst [vmem:[#allocation25_spill] sm:$0xff] %v9251_v45  ;;  %v9253_v35 = vpop.xlane.xlu1 %3176  ;;  %v2619_v50 = vadd.f32 %v2363_v22, %v1979_v18  ;;  %v2870_v58 = vmax.f32 %v2614_v25, 0.0  ;;  %v11925_v17 = vld [vmem:[#allocation104_spill] sm:$0xff]  ;;  %v1722_v52 = vmul.f32 %v11926_v63, %v9089_v54  ;;  %v11930_v63 = vld [vmem:[#allocation111_spill] sm:$0xff]  ;;  %v11931_v22 = vld [vmem:[#allocation65_spill] sm:$0xff] }
 0x29b   : > { %3316 = vadd.xlane.f32.xlu1 %v2873_v42  ;;  %v1981_v42 = vadd.f32 %v1725_v15, %v1341_v6  ;;  %v1082_v29 = vmul.f32 %v11925_v17, %v9077_v7  ;;  %v4267_v18 = vrot.slane %v9163_v53, %v11927_v4  ;;  %v2362_v25 = vmul.f32 %v11867_v59, %v9112_v57  ;;  %v11929_v6 = vld [vmem:[#allocation37_spill] sm:$0xff]  ;;  %v348_v59 = vld [vmem:[%s5630_s9 + $0x30] sm:$0xf] }
 0x29c   : > { %3306 = vadd.xlane.f32.xlu0 %v2868_v20  ;;  %v2616_v16 = vadd.f32 %v2360_v47, %v1976_v27  ;;  %v2875_v20 = vmax.f32 %v2619_v50, 0.0  ;;  %v4263_v47 = vsel %vm3774_vm7, %v4262_v28, %v9201_v34  ;;  %v703_v53 = vmul.f32 %v11929_v6, %v9094_v24  ;;  %v11932_v28 = vld [vmem:[#allocation109_spill] sm:$0xff]  ;;  %v11966_v45 = vld [vmem:[#allocation59_spill] sm:$0xff] }
 0x29d   : > { %v3171_v60 = vpop.xlane.xlu0 %3170  ;;  %v2621_v15 = vadd.f32 %v2365_v30, %v1981_v42  ;;  %v1338_v50 = vadd.f32 %v1082_v29, %v698_v62  ;;  %v1087_v17 = vmul.f32 %v11930_v63, %v9077_v7  ;;  %v4272_v8 = vrot.slane %v9217_v46, %v11931_v22  ;;  %v11933_v42 = vld [vmem:[#allocation31_spill] sm:$0xff] }
 0x29e   : > { %v9271_v27 = vpop.xlane.xlu1 %3180  ;;  %v4306_v34 = vrot.slane %v9235_v36, %v11760_v51  ;;  %v2367_v29 = vmul.f32 %v11933_v42, %v9112_v57  ;;  %v4302_v6 = vrot.slane %v3171_v60, %v11826_v10  ;;  %v11934_v63 = vld [vmem:[#allocation23_spill] sm:$0xff]  ;;  %v1084_v36 = vmul.f32 %v11935_v23, %v9077_v7  ;;  %v11937_v60 = vld [vmem:[#allocation17_spill] sm:$0xff]  ;;  %v11939_v10 = vld [vmem:[#allocation20_spill] sm:$0xff] }
 0x29f   : > { %3320 = vadd.xlane.f32.xlu1 %v2875_v20  ;;  %v1727_v20 = vmul.f32 %v11932_v28, %v9089_v54  ;;  %v2877_v13 = vmax.f32 %v2621_v15, 0.0  ;;  %v1978_v30 = vadd.f32 %v1722_v52, %v1338_v50  ;;  %v1343_v62 = vadd.f32 %v1087_v17, %v703_v53  ;;  %v11938_v23 = vld [vmem:[#allocation81_spill] sm:$0xff] }
 0x2a0   : > { %3310 = vadd.xlane.f32.xlu0 %v2870_v58  ;;  %v2872_v58 = vmax.f32 %v2616_v16, 0.0  ;;  %v700_v46 = vmul.f32 %v11934_v63, %v9094_v24  ;;  %v11936_v16 = vld [vmem:[#allocation32_spill] sm:$0xff]  ;;  %v9296_v50 = vrot.slane %v348_v59, %v11878_v0  ;;  %v9299_v53 = vrot.slane %v348_v59, %v11937_v60 }
 0x2a1   : > { %v1724_v51 = vmul.f32 %v11936_v16, %v9089_v54  ;;  %v3175_v28 = vpop.xlane.xlu0 %3174  ;;  %v2618_v52 = vadd.f32 %v2362_v25, %v1978_v30  ;;  %v1983_v17 = vadd.f32 %v1727_v20, %v1343_v62  ;;  %v2364_v42 = vmul.f32 %v11938_v23, %v9112_v57 }
 0x2a2   : > { %v9293_v15 = vpop.xlane.xlu1 %3184  ;;  %v1340_v63 = vadd.f32 %v1084_v36, %v700_v46  ;;  %v9305_v16 = vrot.slane %v348_v59, %v11939_v10  ;;  %v705_v25 = vmul.f32 %v11881_v21, %v9296_v50  ;;  %v1089_v20 = vmul.f32 %v11879_v40, %v9299_v53 }
 0x2a3   : > { %3324 = vadd.xlane.f32.xlu1 %v2877_v13  ;;  %v2874_v13 = vmax.f32 %v2618_v52, 0.0  ;;  %v2623_v4 = vadd.f32 %v2367_v29, %v1983_v17  ;;  %v9316_v46 = vrot.slane %v348_v59, %v11883_v61  ;;  %v4268_v36 = vsel %vm3781_vm8, %v4267_v18, %v4263_v47 }
 0x2a4   : > { %3314 = vadd.xlane.f32.xlu0 %v2872_v58  ;;  %v4311_v58 = vrot.slane %v3175_v28, %v11462_v14  ;;  %v1980_v60 = vadd.f32 %v1724_v51, %v1340_v63  ;;  %v1729_v28 = vmul.f32 %v11882_v33, %v9305_v16  ;;  %v4307_v29 = vsel %vm3725_vm0, %v4306_v34, %v4302_v6 }
 0x2a5   : > { %v2879_v52 = vmax.f32 %v2623_v4, 0.0  ;;  %v3179_v17 = vpop.xlane.xlu0 %3178  ;;  %v1345_v40 = vadd.f32 %v1089_v20, %v705_v25  ;;  %v4273_v10 = vsel %vm3788_vm9, %v4272_v8, %v4268_v36  ;;  %v2369_v62 = vmul.f32 %v11884_v43, %v9316_v46 }
 0x2a6   : > { %v9320_v21 = vpop.xlane.xlu1 %3188  ;;  %v4312_v51 = vsel %vm3732_vm1, %v4311_v58, %v4307_v29  ;;  %v2620_v63 = vadd.f32 %v2364_v42, %v1980_v60  ;;  %v702_v18 = vmul.f32 %v11799_v5, %v9094_v24  ;;  %v1086_v4 = vmul.f32 %v11797_v49, %v9077_v7 }
 0x2a7   : > { %3328 = vadd.xlane.f32.xlu1 %v2879_v52  ;;  %v1985_v59 = vadd.f32 %v1729_v28, %v1345_v40  ;;  %v1726_v47 = vmul.f32 %v11800_v55, %v9089_v54  ;;  %v4321_v6 = vrot.slane %v3179_v17, %v11475_v41  ;;  %v707_v34 = vmul.f32 %v11804_v12, %v9296_v50  ;;  %v11943_v52 = vld [vmem:[#allocation44_spill] sm:$0xff] }
 0x2a8   : > { %3318 = vadd.xlane.f32.xlu0 %v2874_v13  ;;  %v2876_v8 = vmax.f32 %v2620_v63, 0.0  ;;  %v1091_v42 = vmul.f32 %v11803_v11, %v9299_v53  ;;  %v1342_v24 = vadd.f32 %v1086_v4, %v702_v18  ;;  %v2366_v7 = vmul.f32 %v11712_v1, %v9112_v57  ;;  %v11944_v63 = vld [vmem:[#allocation34_spill] sm:$0xff] }
 0x2a9   : > { %v2625_v60 = vadd.f32 %v2369_v62, %v1985_v59  ;;  %v3183_v40 = vpop.xlane.xlu0 %3182  ;;  %v1731_v54 = vmul.f32 %v11886_v39, %v9305_v16  ;;  %v11942_v13 = vrot.slane %v9182_v9, %v11928_v3  ;;  %v4316_v20 = vrot.slane %v9253_v35, %v11466_v31  ;;  %v11945_v35 = vld [vmem:[#allocation52_spill] sm:$0xff] }
 0x2aa   : > { %v9337_v58 = vpop.xlane.xlu1 %3192  ;;  %v1347_v62 = vadd.f32 %v1091_v42, %v707_v34  ;;  %v2371_v28 = vmul.f32 %v11887_v32, %v9316_v46  ;;  %v1982_v29 = vadd.f32 %v1726_v47, %v1342_v24  ;;  %v704_v57 = vmul.f32 %v11888_v26, %v9296_v50 }
 0x2ab   : > { %11941 = vst [vmem:[#allocation85_spill] sm:$0xff] %v9337_v58  ;;  %v4278_v25 = vsel %vm3795_vm10, %v11942_v13, %v4273_v10  ;;  %v2881_v36 = vmax.f32 %v2625_v60, 0.0  ;;  %v1088_v17 = vmul.f32 %v11943_v52, %v9299_v53  ;;  %v4326_v9 = vrot.slane %v9271_v27, %v11944_v63  ;;  %v11947_v60 = vld [vmem:[#allocation108_spill] sm:$0xff] }
 0x2ac   : > { %3322 = vadd.xlane.f32.xlu0 %v2876_v8  ;;  %v4317_v10 = vsel %vm3739_vm2, %v4316_v20, %v4312_v51  ;;  %v1987_v59 = vadd.f32 %v1731_v54, %v1347_v62  ;;  %v1728_v18 = vmul.f32 %v11945_v35, %v9305_v16  ;;  %v2622_v8 = vadd.f32 %v2366_v7, %v1982_v29  ;;  %v11948_v51 = vld [vmem:[#allocation9_spill] sm:$0xff]  ;;  %v11949_v20 = vld [vmem:[#allocation67_spill] sm:$0xff]  ;;  %v11951_v29 = vld [vmem:[#allocation120_spill] sm:$0xff] }
 0x2ad   : > { %v4322_v4 = vsel %vm3746_vm3, %v4321_v6, %v4317_v10  ;;  %3332 = vadd.xlane.f32.xlu1 %v2881_v36  ;;  %v3187_v47 = vpop.xlane.xlu0 %3186  ;;  %v1344_v42 = vadd.f32 %v1088_v17, %v704_v57  ;;  %v2368_v24 = vmul.f32 %v11947_v60, %v9316_v46  ;;  %v4331_v13 = vrot.slane %v3183_v40, %v11850_v56  ;;  %v11952_v40 = vld [vmem:[#allocation62_spill] sm:$0xff] }
 0x2ae   : > { %v9361_v34 = vpop.xlane.xlu1 %3196  ;;  %v2627_v27 = vadd.f32 %v2371_v28, %v1987_v59  ;;  %v709_v54 = vmul.f32 %v11948_v51, %v9296_v50  ;;  %v1093_v62 = vmul.f32 %v11949_v20, %v9299_v53  ;;  %v4282_v6 = vrot.slane %v9233_v38, %v11950_v37  ;;  %v11954_v20 = vld [vmem:[#allocation5_spill] sm:$0xff] }
 0x2af   : > { %11946 = vst [vmem:[#allocation101_spill] sm:$0xff] %v9361_v34  ;;  %v2878_v7 = vmax.f32 %v2622_v8, 0.0  ;;  %v1984_v36 = vadd.f32 %v1728_v18, %v1344_v42  ;;  %v1733_v57 = vmul.f32 %v11951_v29, %v9305_v16  ;;  %v4327_v17 = vsel %vm10882_vm4, %v4326_v9, %v4322_v4  ;;  %v11955_v18 = vld [vmem:[#allocation49_spill] sm:$0xff]  ;;  %v11956_v42 = vld [vmem:[#allocation56_spill] sm:$0xff] }
 0x2b0   : > { %v2883_v10 = vmax.f32 %v2627_v27, 0.0  ;;  %v1349_v34 = vadd.f32 %v1093_v62, %v709_v54  ;;  %v2373_v28 = vmul.f32 %v11952_v40, %v9316_v46  ;;  %v706_v38 = vmul.f32 %v11954_v20, %v9296_v50  ;;  %v11959_v40 = vld [vmem:[#allocation83_spill] sm:$0xff] }
 0x2b1   : > { %3326 = vadd.xlane.f32.xlu0 %v2878_v7  ;;  %v2624_v59 = vadd.f32 %v2368_v24, %v1984_v36  ;;  %v3191_v51 = vpop.xlane.xlu0 %3190  ;;  %v1090_v8 = vmul.f32 %v11955_v18, %v9299_v53  ;;  %v1730_v29 = vmul.f32 %v11956_v42, %v9305_v16  ;;  %v4332_v9 = vsel %vm10883_vm5, %v4331_v13, %v4327_v17  ;;  %v11957_v24 = vld [vmem:[#allocation73_spill] sm:$0xff]  ;;  %v11958_v36 = vld [vmem:[#allocation11_spill] sm:$0xff]  ;;  %v11961_v42 = vld [vmem:[#allocation26_spill] sm:$0xff] }
 0x2b2   : > { %v9377_v30 = vpop.xlane.xlu1 %3200  ;;  %3336 = vadd.xlane.f32.xlu1 %v2883_v10  ;;  %v4341_v4 = vrot.slane %v3187_v47, %v11495_v48  ;;  %v1989_v27 = vadd.f32 %v1733_v57, %v1349_v34  ;;  %v2370_v54 = vmul.f32 %v11957_v24, %v9316_v46  ;;  %v1095_v37 = vmul.f32 %v11959_v40, %v9299_v53  ;;  %v11962_v47 = vld [vmem:[#allocation93_spill] sm:$0xff] }
 0x2b3   : > { %11953 = vst [vmem:[#allocation77_spill] sm:$0xff] %v9377_v30  ;;  %v2880_v62 = vmax.f32 %v2624_v59, 0.0  ;;  %v1346_v7 = vadd.f32 %v1090_v8, %v706_v38  ;;  %v711_v30 = vmul.f32 %v11958_v36, %v9296_v50  ;;  %v9394_v18 = vsel %vm3802_vm11, %v4282_v6, %v4278_v25 }
 0x2b4   : > { %11960 = vst [vmem:[#allocation36_spill] sm:$0xff] %v9394_v18  ;;  %v4336_v13 = vrot.slane %v9293_v15, %v11961_v42  ;;  %v2629_v17 = vadd.f32 %v2373_v28, %v1989_v27  ;;  %v1735_v34 = vmul.f32 %v11962_v47, %v9305_v16  ;;  %v2375_v8 = vmul.f32 %v11899_v2, %v9316_v46 }
 0x2b5   : > { %3330 = vadd.xlane.f32.xlu0 %v2880_v62  ;;  %v1986_v59 = vadd.f32 %v1730_v29, %v1346_v7  ;;  %v1351_v38 = vadd.f32 %v1095_v37, %v711_v30  ;;  %v9404_v40 = vpop.xlane.xlu0 %3194  ;;  %v708_v28 = vmul.f32 %v11901_v44, %v9296_v50  ;;  %v1092_v27 = vmul.f32 %v11900_v19, %v9299_v53  ;;  %v11965_v30 = vld [vmem:[#allocation58_spill] sm:$0xff] }
 0x2b6   : > { %11964 = vst [vmem:[#allocation79_spill] sm:$0xff] %v9404_v40  ;;  %v9406_v25 = vpop.xlane.xlu1 %3204  ;;  %v4337_v6 = vsel %vm3767_vm6, %v4336_v13, %v4332_v9  ;;  %v2885_v15 = vmax.f32 %v2629_v17, 0.0  ;;  %v1732_v7 = vmul.f32 %v11965_v30, %v9305_v16  ;;  %v2372_v18 = vmul.f32 %v11966_v45, %v9316_v46  ;;  %v11967_v9 = vld [vmem:[#allocation14_spill] sm:$0xff]  ;;  %v11968_v17 = vld [vmem:[#allocation100_spill] sm:$0xff] }
 0x2b7   : > { %v4342_v62 = vsel %vm3774_vm7, %v4341_v4, %v4337_v6  ;;  %v2626_v29 = vadd.f32 %v2370_v54, %v1986_v59  ;;  %v1991_v37 = vadd.f32 %v1735_v34, %v1351_v38  ;;  %v1348_v10 = vadd.f32 %v1092_v27, %v708_v28  ;;  %v11969_v54 = vld [vmem:[#allocation27_spill] sm:$0xff]  ;;  %v11971_v6 = vld [vmem:[#allocation40_spill] sm:$0xff] }
 0x2b8   : > { %3340 = vadd.xlane.f32.xlu1 %v2885_v15  ;;  %v713_v13 = vmul.f32 %v11967_v9, %v9296_v50  ;;  %v1097_v40 = vmul.f32 %v11968_v17, %v9299_v53  ;;  %v4351_v2 = vrot.slane %v3191_v51, %v11931_v22  ;;  %v1737_v34 = vmul.f32 %v11969_v54, %v9305_v16  ;;  %v11972_v9 = vld [vmem:[#allocation60_spill] sm:$0xff]  ;;  %v11978_v51 = vld [vmem:[#allocation18_spill] sm:$0xff] }
 0x2b9   : > { %v2882_v47 = vmax.f32 %v2626_v29, 0.0  ;;  %v2631_v4 = vadd.f32 %v2375_v8, %v1991_v37  ;;  %v9425_v59 = vpop.xlane.xlu0 %3198  ;;  %v4346_v15 = vrot.slane %v9320_v21, %v11971_v6  ;;  %v1988_v28 = vadd.f32 %v1732_v7, %v1348_v10  ;;  %v11973_v29 = vld [vmem:[#allocation12_spill] sm:$0xff] }
 0x2ba   : > { %11970 = vst [vmem:[#allocation97_spill] sm:$0xff] %v9425_v59  ;;  %v9427_v38 = vpop.xlane.xlu1 %3208  ;;  %v1353_v27 = vadd.f32 %v1097_v40, %v713_v13  ;;  %v2377_v36 = vmul.f32 %v11972_v9, %v9316_v46  ;;  %v710_v37 = vmul.f32 %v11973_v29, %v9296_v50  ;;  %v11974_v59 = vld [vmem:[#allocation82_spill] sm:$0xff]  ;;  %v11975_v40 = vld [vmem:[#allocation119_spill] sm:$0xff]  ;;  %v715_v58 = vmul.f32 %v11978_v51, %v9296_v50 }
 0x2bb   : > { %3334 = vadd.xlane.f32.xlu0 %v2882_v47  ;;  %v2887_v8 = vmax.f32 %v2631_v4, 0.0  ;;  %v1094_v54 = vmul.f32 %v11974_v59, %v9299_v53  ;;  %v4347_v17 = vsel %vm3781_vm8, %v4346_v15, %v4342_v62  ;;  %v2628_v57 = vadd.f32 %v2372_v18, %v1988_v28  ;;  %v11977_v47 = vld [vmem:[#allocation61_spill] sm:$0xff]  ;;  %v11980_v28 = vld [vmem:[#allocation103_spill] sm:$0xff] }
 0x2bc   : > { %v1993_v21 = vadd.f32 %v1737_v34, %v1353_v27  ;;  %v1734_v10 = vmul.f32 %v11975_v40, %v9305_v16  ;;  %v9443_v7 = vsel %vm3788_vm9, %v4351_v2, %v4347_v17  ;;  %v2374_v4 = vmul.f32 %v11977_v47, %v9316_v46  ;;  %v11979_v34 = vld [vmem:[#allocation105_spill] sm:$0xff]  ;;  %v11981_v17 = vld [vmem:[#allocation51_spill] sm:$0xff] }
 0x2bd   : > { %11976 = vst [vmem:[#allocation123_spill] sm:$0xff] %v9443_v7  ;;  %3344 = vadd.xlane.f32.xlu1 %v2887_v8  ;;  %v1350_v13 = vadd.f32 %v1094_v54, %v710_v37  ;;  %v3203_v9 = vpop.xlane.xlu0 %3202  ;;  %v2884_v62 = vmax.f32 %v2628_v57, 0.0  ;;  %v1099_v15 = vmul.f32 %v11979_v34, %v9299_v53  ;;  %v1739_v2 = vmul.f32 %v11980_v28, %v9305_v16  ;;  %v11982_v8 = vld [vmem:[#allocation68_spill] sm:$0xff] }
 0x2be   : > { %v9449_v59 = vpop.xlane.xlu1 %3212  ;;  %v2633_v18 = vadd.f32 %v2377_v36, %v1993_v21  ;;  %v4385_v54 = vrot.slane %v9406_v25, %v11981_v17  ;;  %v2379_v37 = vmul.f32 %v11982_v8, %v9316_v46  ;;  %v11983_v7 = vld [vmem:[#allocation80_spill] sm:$0xff]  ;;  %v11984_v36 = vld [vmem:[#allocation15_spill] sm:$0xff]  ;;  %v4395_v28 = vrot.slane %v9427_v38, %v11466_v31  ;;  %v11986_v25 = vld [vmem:[#allocation121_spill] sm:$0xff] }
 0x2bf   : > { %v1990_v27 = vadd.f32 %v1734_v10, %v1350_v13  ;;  %v4381_v51 = vrot.slane %v3203_v9, %v11983_v7  ;;  %3338 = vadd.xlane.f32.xlu0 %v2884_v62  ;;  %v1355_v40 = vadd.f32 %v1099_v15, %v715_v58  ;;  %v712_v57 = vmul.f32 %v11984_v36, %v9296_v50  ;;  %v11985_v21 = vld [vmem:[#allocation99_spill] sm:$0xff]  ;;  %v11987_v13 = vld [vmem:[#allocation30_spill] sm:$0xff] }
 0x2c0   : > { %v2889_v47 = vmax.f32 %v2633_v18, 0.0  ;;  %v1096_v34 = vmul.f32 %v11985_v21, %v9299_v53  ;;  %v1736_v10 = vmul.f32 %v11986_v25, %v9305_v16  ;;  %v2376_v8 = vmul.f32 %v11987_v13, %v9316_v46  ;;  %v11988_v15 = vld [vmem:[#allocation22_spill] sm:$0xff]  ;;  %v11989_v21 = vld [vmem:[#allocation107_spill] sm:$0xff] }
 0x2c1   : > { %v2630_v29 = vadd.f32 %v2374_v4, %v1990_v27  ;;  %v3207_v9 = vpop.xlane.xlu0 %3206  ;;  %v1995_v58 = vadd.f32 %v1739_v2, %v1355_v40  ;;  %v717_v36 = vmul.f32 %v11988_v15, %v9296_v50  ;;  %v1101_v7 = vmul.f32 %v11989_v21, %v9299_v53  ;;  %v11990_v27 = vld [vmem:[#allocation128_spill] sm:$0xff]  ;;  %v11991_v40 = vld [vmem:[#allocation71_spill] sm:$0xff]  ;;  %v11998_v15 = vld [vmem:[#allocation109_spill] sm:$0xff] }
 0x2c2   : > { %v9470_v62 = vpop.xlane.xlu1 %3216  ;;  %3348 = vadd.xlane.f32.xlu1 %v2889_v47  ;;  %v1352_v18 = vadd.f32 %v1096_v34, %v712_v57  ;;  %v4386_v4 = vsel %vm3725_vm0, %v4385_v54, %v4381_v51  ;;  %v1741_v25 = vmul.f32 %v11990_v27, %v9305_v16  ;;  %v4390_v13 = vrot.slane %v3207_v9, %v11462_v14  ;;  %v11992_v2 = vld [vmem:[#allocation19_spill] sm:$0xff]  ;;  %v11994_v54 = vld [vmem:[#allocation94_spill] sm:$0xff] }
 0x2c3   : > { %v2886_v38 = vmax.f32 %v2630_v29, 0.0  ;;  %v2635_v31 = vadd.f32 %v2379_v37, %v1995_v58  ;;  %v1357_v30 = vadd.f32 %v1101_v7, %v717_v36  ;;  %v2381_v47 = vmul.f32 %v11991_v40, %v9316_v46  ;;  %v11993_v29 = vld [vmem:[#allocation104_spill] sm:$0xff] }
 0x2c4   : > { %v1992_v45 = vadd.f32 %v1736_v10, %v1352_v18  ;;  %v4391_v34 = vsel %vm3732_vm1, %v4390_v13, %v4386_v4  ;;  %v714_v57 = vmul.f32 %v11992_v2, %v9296_v50  ;;  %v1098_v51 = vmul.f32 %v11993_v29, %v9299_v53  ;;  %v11995_v10 = vld [vmem:[#allocation74_spill] sm:$0xff]  ;;  %v11996_v18 = vld [vmem:[#allocation37_spill] sm:$0xff]  ;;  %v11997_v4 = vld [vmem:[#allocation111_spill] sm:$0xff] }
 0x2c5   : > { %3342 = vadd.xlane.f32.xlu0 %v2886_v38  ;;  %v1738_v27 = vmul.f32 %v11994_v54, %v9305_v16  ;;  %v3211_v21 = vpop.xlane.xlu0 %3210  ;;  %v2891_v37 = vmax.f32 %v2635_v31, 0.0  ;;  %v1997_v36 = vadd.f32 %v1741_v25, %v1357_v30  ;;  %v2378_v58 = vmul.f32 %v11995_v10, %v9316_v46  ;;  %v11999_v30 = vld [vmem:[#allocation31_spill] sm:$0xff] }
 0x2c6   : > { %v9489_v9 = vpop.xlane.xlu1 %3220  ;;  %v2632_v7 = vadd.f32 %v2376_v8, %v1992_v45  ;;  %v1354_v13 = vadd.f32 %v1098_v51, %v714_v57  ;;  %v719_v38 = vmul.f32 %v11996_v18, %v9296_v50  ;;  %v1103_v40 = vmul.f32 %v11997_v4, %v9299_v53  ;;  %v349_v29 = vld [vmem:[%s5630_s9 + $0x34] sm:$0xf] }
 0x2c7   : > { %v1743_v54 = vmul.f32 %v11998_v15, %v9305_v16  ;;  %3352 = vadd.xlane.f32.xlu1 %v2891_v37  ;;  %v4405_v31 = vrot.slane %v9449_v59, %v11944_v63  ;;  %v2637_v8 = vadd.f32 %v2381_v47, %v1997_v36  ;;  %v2383_v25 = vmul.f32 %v11999_v30, %v9316_v46  ;;  %v12000_v15 = vld [vmem:[#allocation23_spill] sm:$0xff]  ;;  %v12001_v47 = vld [vmem:[#allocation106_spill] sm:$0xff]  ;;  %v12002_v36 = vld [vmem:[#allocation32_spill] sm:$0xff] }
 0x2c8   : > { %v2888_v45 = vmax.f32 %v2632_v7, 0.0  ;;  %v1994_v10 = vadd.f32 %v1738_v27, %v1354_v13  ;;  %v1359_v57 = vadd.f32 %v1103_v40, %v719_v38  ;;  %v4396_v51 = vsel %vm3739_vm2, %v4395_v28, %v4391_v34  ;;  %v12004_v30 = vld [vmem:[#allocation20_spill] sm:$0xff] }
 0x2c9   : > { %v4400_v18 = vrot.slane %v3211_v21, %v11475_v41  ;;  %v2893_v37 = vmax.f32 %v2637_v8, 0.0  ;;  %v716_v59 = vmul.f32 %v12000_v15, %v9296_v50  ;;  %v1100_v7 = vmul.f32 %v12001_v47, %v9299_v53  ;;  %v350_v41 = vld [vmem:[%s5630_s9 + $0x38] sm:$0xf] }
 0x2ca   : > { %v3215_v4 = vpop.xlane.xlu0 %3214  ;;  %v9506_v2 = vpop.xlane.xlu1 %3224  ;;  %3346 = vadd.xlane.f32.xlu0 %v2888_v45  ;;  %v1740_v27 = vmul.f32 %v12002_v36, %v9305_v16  ;;  %v2634_v40 = vadd.f32 %v2378_v58, %v1994_v10  ;;  %v1999_v13 = vadd.f32 %v1743_v54, %v1359_v57  ;;  %v2380_v21 = vmul.f32 %v11938_v23, %v9316_v46  ;;  %v12003_v45 = vld [vmem:[#allocation17_spill] sm:$0xff]  ;;  %v12006_v23 = vld [vmem:[#allocation43_spill] sm:$0xff] }
 0x2cb   : > { %v4401_v28 = vsel %vm3746_vm3, %v4400_v18, %v4396_v51  ;;  %3356 = vadd.xlane.f32.xlu1 %v2893_v37  ;;  %v1356_v34 = vadd.f32 %v1100_v7, %v716_v59  ;;  %v9518_v38 = vrot.slane %v349_v29, %v11878_v0  ;;  %v9521_v8 = vrot.slane %v349_v29, %v12003_v45  ;;  %v12005_v59 = vld [vmem:[#allocation8_spill] sm:$0xff] }
 0x2cc   : > { %v9524_v47 = vrot.slane %v349_v29, %v12004_v30  ;;  %v4415_v54 = vrot.slane %v9470_v62, %v11961_v42  ;;  %v2890_v10 = vmax.f32 %v2634_v40, 0.0  ;;  %v2639_v58 = vadd.f32 %v2383_v25, %v1999_v13 }
 0x2cd   : > { %v9529_v18 = vrot.slane %v349_v29, %v11883_v61  ;;  %v1996_v37 = vadd.f32 %v1740_v27, %v1356_v34  ;;  %v721_v7 = vmul.f32 %v12005_v59, %v9518_v38  ;;  %v1105_v36 = vmul.f32 %v12006_v23, %v9521_v8 }
 0x2ce   : > { %v3219_v57 = vpop.xlane.xlu0 %3218  ;;  %v9531_v51 = vpop.xlane.xlu1 %3228  ;;  %v1745_v15 = vmul.f32 %v11882_v33, %v9524_v47  ;;  %3350 = vadd.xlane.f32.xlu0 %v2890_v10  ;;  %v2895_v62 = vmax.f32 %v2639_v58, 0.0  ;;  %v4406_v25 = vsel %vm10882_vm4, %v4405_v31, %v4401_v28  ;;  %v4410_v40 = vrot.slane %v3215_v4, %v11850_v56 }
 0x2cf   : > { %v2385_v29 = vmul.f32 %v11884_v43, %v9529_v18  ;;  %v2636_v27 = vadd.f32 %v2380_v21, %v1996_v37  ;;  %v1361_v13 = vadd.f32 %v1105_v36, %v721_v7  ;;  %v718_v34 = vmul.f32 %v11799_v5, %v9296_v50  ;;  %v12007_v5 = vld [vmem:[#allocation49_spill] sm:$0xff] }
 0x2d0   : > { %v1102_v42 = vmul.f32 %v11797_v49, %v9299_v53  ;;  %3360 = vadd.xlane.f32.xlu1 %v2895_v62  ;;  %v4411_v14 = vsel %vm10883_vm5, %v4410_v40, %v4406_v25  ;;  %v1742_v10 = vmul.f32 %v11800_v55, %v9305_v16  ;;  %v2382_v58 = vmul.f32 %v11712_v1, %v9316_v46  ;;  %v351_v1 = vld [vmem:[%s5630_s9 + $0x3c] sm:$0xf] }
 0x2d1   : > { %v9554_v31 = vrot.slane %v350_v41, %v11878_v0  ;;  %v2892_v28 = vmax.f32 %v2636_v27, 0.0  ;;  %v2001_v50 = vadd.f32 %v1745_v15, %v1361_v13  ;;  %v9559_v53 = vrot.slane %v350_v41, %v12003_v45 }
 0x2d2   : > { %v3223_v4 = vpop.xlane.xlu0 %3222  ;;  %v9556_v36 = vpop.xlane.xlu1 %3232  ;;  %v1358_v21 = vadd.f32 %v1102_v42, %v718_v34  ;;  %v4425_v37 = vrot.slane %v9489_v9, %v11971_v6  ;;  %v9566_v46 = vrot.slane %v350_v41, %v12004_v30  ;;  %v9569_v7 = vrot.slane %v350_v41, %v11883_v61 }
 0x2d3   : > { %v736_v16 = vmul.f32 %v11888_v26, %v9554_v31  ;;  %3354 = vadd.xlane.f32.xlu0 %v2892_v28  ;;  %v2641_v62 = vadd.f32 %v2385_v29, %v2001_v50  ;;  %v1120_v42 = vmul.f32 %v11943_v52, %v9559_v53  ;;  %v4420_v15 = vrot.slane %v3219_v57, %v11495_v48 }
 0x2d4   : > { %v1998_v25 = vadd.f32 %v1742_v10, %v1358_v21  ;;  %v4435_v9 = vrot.slane %v9506_v2, %v11928_v3  ;;  %v1760_v40 = vmul.f32 %v11945_v35, %v9566_v46  ;;  %v2400_v27 = vmul.f32 %v11947_v60, %v9569_v7 }
 0x2d5   : > { %v4416_v41 = vsel %vm3767_vm6, %v4415_v54, %v4411_v14  ;;  %v2897_v34 = vmax.f32 %v2641_v62, 0.0  ;;  %v1376_v28 = vadd.f32 %v1120_v42, %v736_v16  ;;  %v720_v57 = vmul.f32 %v11888_v26, %v9518_v38 }
 0x2d6   : > { %v9581_v13 = vpop.xlane.xlu0 %3226  ;;  %v9583_v29 = vpop.xlane.xlu1 %3236  ;;  %v2638_v10 = vadd.f32 %v2382_v58, %v1998_v25  ;;  %v4421_v2 = vsel %vm3774_vm7, %v4420_v15, %v4416_v41  ;;  %v1104_v50 = vmul.f32 %v11943_v52, %v9521_v8  ;;  %v1744_v21 = vmul.f32 %v11945_v35, %v9524_v47 }
 0x2d7   : > { %v723_v14 = vmul.f32 %v11804_v12, %v9518_v38  ;;  %3364 = vadd.xlane.f32.xlu1 %v2897_v34  ;;  %v2016_v62 = vadd.f32 %v1760_v40, %v1376_v28  ;;  %v1107_v58 = vmul.f32 %v11803_v11, %v9521_v8  ;;  %v1747_v16 = vmul.f32 %v11886_v39, %v9524_v47 }
 0x2d8   : > { %v2894_v54 = vmax.f32 %v2638_v10, 0.0  ;;  %v1360_v25 = vadd.f32 %v1104_v50, %v720_v57  ;;  %v2384_v42 = vmul.f32 %v11947_v60, %v9529_v18  ;;  %v2387_v15 = vmul.f32 %v11887_v32, %v9529_v18 }
 0x2d9   : > { %v4430_v41 = vrot.slane %v3223_v4, %v11931_v22  ;;  %v2656_v40 = vadd.f32 %v2400_v27, %v2016_v62  ;;  %v1363_v10 = vadd.f32 %v1107_v58, %v723_v14  ;;  %v4426_v28 = vsel %vm3781_vm8, %v4425_v37, %v4421_v2  ;;  %v12008_v4 = vld [vmem:[#allocation56_spill] sm:$0xff] }
 0x2da   : > { %v9604_v55 = vpop.xlane.xlu0 %3230  ;;  %v9606_v34 = vpop.xlane.xlu1 %3240  ;;  %3358 = vadd.xlane.f32.xlu0 %v2894_v54  ;;  %v722_v57 = vmul.f32 %v11954_v20, %v9518_v38  ;;  %v2000_v50 = vadd.f32 %v1744_v21, %v1360_v25  ;;  %v1106_v48 = vmul.f32 %v12007_v5, %v9521_v8  ;;  %v1746_v22 = vmul.f32 %v12008_v4, %v9524_v47 }
 0x2db   : > { %v4431_v49 = vsel %vm3788_vm9, %v4430_v41, %v4426_v28  ;;  %v2912_v3 = vmax.f32 %v2656_v40, 0.0  ;;  %v2003_v56 = vadd.f32 %v1747_v16, %v1363_v10  ;;  %v2386_v27 = vmul.f32 %v11957_v24, %v9529_v18  ;;  %v12009_v16 = vld [vmem:[#allocation75_spill] sm:$0xff] }
 0x2dc   : > { %v9619_v14 = vrot.slane %v351_v1, %v11878_v0  ;;  %v2640_v37 = vadd.f32 %v2384_v42, %v2000_v50  ;;  %v1362_v2 = vadd.f32 %v1106_v48, %v722_v57  ;;  %v9622_v21 = vrot.slane %v351_v1, %v12003_v45 }
 0x2dd   : > { %v9625_v54 = vrot.slane %v351_v1, %v12004_v30  ;;  %3394 = vadd.xlane.f32.xlu1 %v2912_v3  ;;  %v4445_v25 = vrot.slane %v9531_v51, %v12009_v16  ;;  %v2643_v41 = vadd.f32 %v2387_v15, %v2003_v56  ;;  %v9636_v48 = vrot.slane %v351_v1, %v11883_v61  ;;  %v12010_v51 = vld [vmem:[#allocation84_spill] sm:$0xff] }
 0x2de   : > { %v9627_v62 = vpop.xlane.xlu0 %3234  ;;  %v9629_v58 = vpop.xlane.xlu1 %3244  ;;  %v752_v0 = vmul.f32 %v11888_v26, %v9619_v14  ;;  %v2896_v45 = vmax.f32 %v2640_v37, 0.0  ;;  %v2002_v42 = vadd.f32 %v1746_v22, %v1362_v2  ;;  %v1136_v30 = vmul.f32 %v11943_v52, %v9622_v21  ;;  %v12011_v37 = vld [vmem:[#allocation45_spill] sm:$0xff] }
 0x2df   : > { %v1776_v40 = vmul.f32 %v11945_v35, %v9625_v54  ;;  %v2899_v10 = vmax.f32 %v2643_v41, 0.0  ;;  %v2416_v3 = vmul.f32 %v11947_v60, %v9636_v48  ;;  %v4436_v56 = vsel %vm3795_vm10, %v4435_v9, %v4431_v49 }
 0x2e0   : > { %v4440_v26 = vrot.slane %v9581_v13, %v12010_v51  ;;  %3362 = vadd.xlane.f32.xlu0 %v2896_v45  ;;  %v2642_v1 = vadd.f32 %v2386_v27, %v2002_v42  ;;  %v1392_v61 = vadd.f32 %v1136_v30, %v752_v0  ;;  %v737_v22 = vmul.f32 %v12005_v59, %v9554_v31  ;;  %v12012_v0 = vld [vmem:[#allocation58_spill] sm:$0xff]  ;;  %v12013_v42 = vld [vmem:[#allocation59_spill] sm:$0xff] }
 0x2e1   : > { %v1121_v52 = vmul.f32 %v12006_v23, %v9559_v53  ;;  %3368 = vadd.xlane.f32.xlu1 %v2899_v10  ;;  %v1761_v49 = vmul.f32 %v11882_v33, %v9566_v46  ;;  %v2401_v9 = vmul.f32 %v11884_v43, %v9569_v7  ;;  %v724_v13 = vmul.f32 %v11901_v44, %v9518_v38 }
 0x2e2   : > { %v9651_v15 = vpop.xlane.xlu0 %3238  ;;  %v9653_v35 = vpop.xlane.xlu1 %3248  ;;  %v4441_v60 = vsel %vm3802_vm11, %v4440_v26, %v4436_v56  ;;  %v2898_v28 = vmax.f32 %v2642_v1, 0.0  ;;  %v2032_v57 = vadd.f32 %v1776_v40, %v1392_v61  ;;  %v1108_v27 = vmul.f32 %v11900_v19, %v9521_v8  ;;  %v12014_v26 = vld [vmem:[#allocation92_spill] sm:$0xff] }
 0x2e3   : > { %v1377_v50 = vadd.f32 %v1121_v52, %v737_v22  ;;  %v4455_v2 = vrot.slane %v9556_v36, %v12011_v37  ;;  %v4464_v41 = vrot.slane %v9583_v29, %v11981_v17  ;;  %v1748_v45 = vmul.f32 %v12012_v0, %v9524_v47 }
 0x2e4   : > { %v2388_v30 = vmul.f32 %v12013_v42, %v9529_v18  ;;  %3366 = vadd.xlane.f32.xlu0 %v2898_v28  ;;  %v2672_v10 = vadd.f32 %v2416_v3, %v2032_v57  ;;  %v1364_v40 = vadd.f32 %v1108_v27, %v724_v13  ;;  %v4450_v1 = vrot.slane %v9604_v55, %v12014_v26  ;;  %v12015_v57 = vld [vmem:[#allocation131_spill] sm:$0xff] }
 0x2e5   : > { %v2017_v56 = vadd.f32 %v1761_v49, %v1377_v50  ;;  %v4446_v36 = vsel %vm3809_vm12, %v4445_v25, %v4441_v60  ;;  %v738_v29 = vmul.f32 %v11954_v20, %v9554_v31  ;;  %v1122_v52 = vmul.f32 %v12007_v5, %v9559_v53 }
 0x2e6   : > { %v9676_v22 = vpop.xlane.xlu1 %3252  ;;  %v1762_v3 = vmul.f32 %v12008_v4, %v9566_v46  ;;  %v2928_v49 = vmax.f32 %v2672_v10, 0.0  ;;  %v2004_v28 = vadd.f32 %v1748_v45, %v1364_v40  ;;  %v4474_v55 = vrot.slane %v9606_v34, %v12015_v57 }
 0x2e7   : > { %v9674_v61 = vpop.xlane.xlu0 %3242  ;;  %v2657_v13 = vadd.f32 %v2401_v9, %v2017_v56  ;;  %v1378_v50 = vadd.f32 %v1122_v52, %v738_v29  ;;  %v2402_v27 = vmul.f32 %v11957_v24, %v9569_v7  ;;  %v754_v25 = vmul.f32 %v11954_v20, %v9619_v14  ;;  %v12016_v52 = vld [vmem:[#allocation80_spill] sm:$0xff] }
 0x2e8   : > { %v1138_v60 = vmul.f32 %v12007_v5, %v9622_v21  ;;  %3426 = vadd.xlane.f32.xlu1 %v2928_v49  ;;  %v2644_v26 = vadd.f32 %v2388_v30, %v2004_v28  ;;  %v4451_v10 = vsel %vm3816_vm13, %v4450_v1, %v4446_v36  ;;  %v1778_v9 = vmul.f32 %v12008_v4, %v9625_v54 }
 0x2e9   : > { %v2913_v17 = vmax.f32 %v2657_v13, 0.0  ;;  %v2018_v40 = vadd.f32 %v1762_v3, %v1378_v50  ;;  %v2418_v20 = vmul.f32 %v11957_v24, %v9636_v48  ;;  %v4460_v5 = vrot.slane %v9627_v62, %v12016_v52  ;;  %v12018_v50 = vld [vmem:[#allocation39_spill] sm:$0xff] }
 0x2ea   : > { %v1394_v29 = vadd.f32 %v1138_v60, %v754_v25  ;;  %v2900_v49 = vmax.f32 %v2644_v26, 0.0  ;;  %v753_v30 = vmul.f32 %v12005_v59, %v9619_v14  ;;  %v1137_v4 = vmul.f32 %v12006_v23, %v9622_v21 }
 0x2eb   : > { %v9696_v45 = vpop.xlane.xlu0 %3246  ;;  %v9698_v56 = vpop.xlane.xlu1 %3256  ;;  %3396 = vadd.xlane.f32.xlu0 %v2913_v17  ;;  %v1777_v1 = vmul.f32 %v11882_v33, %v9625_v54  ;;  %v9711_v36 = vsel %vm3823_vm14, %v4455_v2, %v4451_v10  ;;  %v2658_v3 = vadd.f32 %v2402_v27, %v2018_v40  ;;  %v2417_v24 = vmul.f32 %v11884_v43, %v9636_v48 }
 0x2ec   : > { %12017 = vst [vmem:[#allocation127_spill] sm:$0xff] %v9711_v36  ;;  %v2034_v13 = vadd.f32 %v1778_v9, %v1394_v29  ;;  %3370 = vadd.xlane.f32.xlu1 %v2900_v49  ;;  %v1393_v17 = vadd.f32 %v1137_v4, %v753_v30  ;;  %v740_v62 = vmul.f32 %v11901_v44, %v9554_v31 }
 0x2ed   : > { %v1124_v59 = vmul.f32 %v11900_v19, %v9559_v53  ;;  %v1764_v23 = vmul.f32 %v12012_v0, %v9566_v46  ;;  %v2914_v26 = vmax.f32 %v2658_v3, 0.0  ;;  %v4484_v43 = vrot.slane %v9629_v58, %v11944_v63  ;;  %v12019_v3 = vld [vmem:[#allocation12_spill] sm:$0xff] }
 0x2ee   : > { %v2674_v28 = vadd.f32 %v2418_v20, %v2034_v13  ;;  %v4469_v27 = vrot.slane %v9651_v15, %v12018_v50  ;;  %v4465_v25 = vsel %vm3725_vm0, %v4464_v41, %v4460_v5  ;;  %v2033_v60 = vadd.f32 %v1777_v1, %v1393_v17  ;;  %v12020_v17 = vld [vmem:[#allocation82_spill] sm:$0xff] }
 0x2ef   : > { %v9721_v33 = vpop.xlane.xlu0 %3250  ;;  %v9723_v2 = vpop.xlane.xlu1 %3260  ;;  %v1380_v10 = vadd.f32 %v1124_v59, %v740_v62  ;;  %v2404_v9 = vmul.f32 %v12013_v42, %v9569_v7  ;;  %3398 = vadd.xlane.f32.xlu0 %v2914_v26  ;;  %v739_v29 = vmul.f32 %v11804_v12, %v9554_v31  ;;  %v1123_v20 = vmul.f32 %v11803_v11, %v9559_v53 }
 0x2f0   : > { %v2930_v40 = vmax.f32 %v2674_v28, 0.0  ;;  %v1763_v58 = vmul.f32 %v11886_v39, %v9566_v46  ;;  %v2673_v49 = vadd.f32 %v2417_v24, %v2033_v60  ;;  %v4470_v41 = vsel %vm3732_vm1, %v4469_v27, %v4465_v25  ;;  %v12021_v24 = vld [vmem:[#allocation119_spill] sm:$0xff]  ;;  %v12022_v28 = vld [vmem:[#allocation26_spill] sm:$0xff]  ;;  %v12023_v25 = vld [vmem:[#allocation96_spill] sm:$0xff] }
 0x2f1   : > { %v2020_v15 = vadd.f32 %v1764_v23, %v1380_v10  ;;  %v2403_v5 = vmul.f32 %v11887_v32, %v9569_v7  ;;  %v1379_v1 = vadd.f32 %v1123_v20, %v739_v29  ;;  %v726_v13 = vmul.f32 %v12019_v3, %v9518_v38  ;;  %v12024_v29 = vld [vmem:[#allocation61_spill] sm:$0xff] }
 0x2f2   : > { %3430 = vadd.xlane.f32.xlu1 %v2930_v40  ;;  %v1110_v62 = vmul.f32 %v12020_v17, %v9521_v8  ;;  %v1750_v59 = vmul.f32 %v12021_v24, %v9524_v47  ;;  %v2929_v23 = vmax.f32 %v2673_v49, 0.0  ;;  %v4494_v27 = vrot.slane %v9653_v35, %v12022_v28  ;;  %v12026_v35 = vld [vmem:[#allocation67_spill] sm:$0xff] }
 0x2f3   : > { %v9741_v30 = vpop.xlane.xlu0 %3254  ;;  %v9743_v4 = vpop.xlane.xlu1 %3264  ;;  %v2660_v26 = vadd.f32 %v2404_v9, %v2020_v15  ;;  %v4479_v60 = vrot.slane %v9674_v61, %v12023_v25  ;;  %v2019_v10 = vadd.f32 %v1763_v58, %v1379_v1  ;;  %v2390_v20 = vmul.f32 %v12024_v29, %v9529_v18  ;;  %v12025_v9 = vld [vmem:[#allocation9_spill] sm:$0xff]  ;;  %v12027_v61 = vld [vmem:[#allocation120_spill] sm:$0xff] }
 0x2f4   : > { %v1366_v40 = vadd.f32 %v1110_v62, %v726_v13  ;;  %v4475_v63 = vsel %vm3739_vm2, %v4474_v55, %v4470_v41  ;;  %3428 = vadd.xlane.f32.xlu0 %v2929_v23  ;;  %v725_v49 = vmul.f32 %v12025_v9, %v9518_v38  ;;  %v1109_v15 = vmul.f32 %v12026_v35, %v9521_v8  ;;  %v12028_v55 = vld [vmem:[#allocation62_spill] sm:$0xff] }
 0x2f5   : > { %v2916_v50 = vmax.f32 %v2660_v26, 0.0  ;;  %v1749_v58 = vmul.f32 %v12027_v61, %v9524_v47  ;;  %v2659_v62 = vadd.f32 %v2403_v5, %v2019_v10  ;;  %v4480_v34 = vsel %vm3746_vm3, %v4479_v60, %v4475_v63  ;;  %v12029_v63 = vld [vmem:[#allocation47_spill] sm:$0xff] }
 0x2f6   : > { %v2006_v28 = vadd.f32 %v1750_v59, %v1366_v40  ;;  %v2389_v41 = vmul.f32 %v12028_v55, %v9529_v18  ;;  %v1365_v23 = vadd.f32 %v1109_v15, %v725_v49  ;;  %v756_v26 = vmul.f32 %v11901_v44, %v9619_v14  ;;  %v12030_v15 = vld [vmem:[#allocation63_spill] sm:$0xff] }
 0x2f7   : > { %v9767_v1 = vpop.xlane.xlu0 %3258  ;;  %v9769_v13 = vpop.xlane.xlu1 %3268  ;;  %3402 = vadd.xlane.f32.xlu1 %v2916_v50  ;;  %v1140_v25 = vmul.f32 %v11900_v19, %v9622_v21  ;;  %v1780_v36 = vmul.f32 %v12012_v0, %v9625_v54  ;;  %v2915_v52 = vmax.f32 %v2659_v62, 0.0  ;;  %v4504_v5 = vrot.slane %v9676_v22, %v11971_v6 }
 0x2f8   : > { %v2646_v57 = vadd.f32 %v2390_v20, %v2006_v28  ;;  %v4489_v59 = vrot.slane %v9696_v45, %v12029_v63  ;;  %v2005_v60 = vadd.f32 %v1749_v58, %v1365_v23  ;;  %v2420_v10 = vmul.f32 %v12013_v42, %v9636_v48  ;;  %v12031_v58 = vld [vmem:[#allocation57_spill] sm:$0xff] }
 0x2f9   : > { %v1396_v50 = vadd.f32 %v1140_v25, %v756_v26  ;;  %v4485_v44 = vsel %vm10882_vm4, %v4484_v43, %v4480_v34  ;;  %3400 = vadd.xlane.f32.xlu0 %v2915_v52  ;;  %v755_v28 = vmul.f32 %v11804_v12, %v9619_v14  ;;  %v1139_v22 = vmul.f32 %v11803_v11, %v9622_v21 }
 0x2fa   : > { %v2902_v0 = vmax.f32 %v2646_v57, 0.0  ;;  %v1779_v45 = vmul.f32 %v11886_v39, %v9625_v54  ;;  %v2645_v25 = vadd.f32 %v2389_v41, %v2005_v60  ;;  %v4490_v42 = vsel %vm10883_vm5, %v4489_v59, %v4485_v44 }
 0x2fb   : > { %v9787_v40 = vpop.xlane.xlu0 %3262  ;;  %v2036_v20 = vadd.f32 %v1780_v36, %v1396_v50  ;;  %v2419_v43 = vmul.f32 %v11887_v32, %v9636_v48  ;;  %v1395_v49 = vadd.f32 %v1139_v22, %v755_v28  ;;  %v742_v57 = vmul.f32 %v12019_v3, %v9554_v31  ;;  %v12032_v22 = vld [vmem:[#allocation15_spill] sm:$0xff] }
 0x2fc   : > { %v9789_v19 = vpop.xlane.xlu1 %3272  ;;  %3374 = vadd.xlane.f32.xlu1 %v2902_v0  ;;  %v1126_v12 = vmul.f32 %v12020_v17, %v9559_v53  ;;  %v1766_v11 = vmul.f32 %v12021_v24, %v9566_v46  ;;  %v2901_v52 = vmax.f32 %v2645_v25, 0.0  ;;  %v4514_v36 = vrot.slane %v9698_v56, %v12030_v15  ;;  %v12033_v25 = vld [vmem:[#allocation99_spill] sm:$0xff] }
 0x2fd   : > { %v2676_v39 = vadd.f32 %v2420_v10, %v2036_v20  ;;  %v4499_v62 = vrot.slane %v9721_v33, %v12031_v58  ;;  %v2035_v41 = vadd.f32 %v1779_v45, %v1395_v49  ;;  %v2406_v26 = vmul.f32 %v12024_v29, %v9569_v7  ;;  %v12037_v15 = vld [vmem:[#allocation11_spill] sm:$0xff] }
 0x2fe   : > { %v1382_v23 = vadd.f32 %v1126_v12, %v742_v57  ;;  %v4495_v59 = vsel %vm3767_vm6, %v4494_v27, %v4490_v42  ;;  %3372 = vadd.xlane.f32.xlu0 %v2901_v52  ;;  %v741_v50 = vmul.f32 %v12025_v9, %v9554_v31  ;;  %v1125_v56 = vmul.f32 %v12026_v35, %v9559_v53  ;;  %v12034_v42 = vld [vmem:[#allocation121_spill] sm:$0xff] }
 0x2ff   : > { %v2932_v60 = vmax.f32 %v2676_v39, 0.0  ;;  %v1765_v33 = vmul.f32 %v12027_v61, %v9566_v46  ;;  %v2675_v10 = vadd.f32 %v2419_v43, %v2035_v41  ;;  %v4500_v0 = vsel %vm3774_vm7, %v4499_v62, %v4495_v59  ;;  %v12035_v39 = vld [vmem:[#allocation65_spill] sm:$0xff]  ;;  %v12036_v59 = vld [vmem:[#allocation30_spill] sm:$0xff] }
 0x300   : > { %v9810_v32 = vpop.xlane.xlu0 %3266  ;;  %v9812_v34 = vpop.xlane.xlu1 %3276  ;;  %v2022_v44 = vadd.f32 %v1766_v11, %v1382_v23  ;;  %v2405_v28 = vmul.f32 %v12028_v55, %v9569_v7  ;;  %v1381_v27 = vadd.f32 %v1125_v56, %v741_v50  ;;  %v728_v45 = vmul.f32 %v12032_v22, %v9518_v38 }
 0x301   : > { %3434 = vadd.xlane.f32.xlu1 %v2932_v60  ;;  %v1112_v20 = vmul.f32 %v12033_v25, %v9521_v8  ;;  %v1752_v49 = vmul.f32 %v12034_v42, %v9524_v47  ;;  %v2931_v12 = vmax.f32 %v2675_v10, 0.0  ;;  %v4524_v52 = vrot.slane %v9723_v2, %v12009_v16  ;;  %v12039_v2 = vld [vmem:[#allocation93_spill] sm:$0xff] }
 0x302   : > { %v2662_v11 = vadd.f32 %v2406_v26, %v2022_v44  ;;  %v4509_v62 = vrot.slane %v9741_v30, %v12035_v39  ;;  %v2021_v41 = vadd.f32 %v1765_v33, %v1381_v27  ;;  %v2392_v60 = vmul.f32 %v12036_v59, %v9529_v18  ;;  %v12038_v26 = vld [vmem:[#allocation83_spill] sm:$0xff]  ;;  %v12040_v27 = vld [vmem:[#allocation54_spill] sm:$0xff] }
 0x303   : > { %v1368_v23 = vadd.f32 %v1112_v20, %v728_v45  ;;  %v4505_v50 = vsel %vm3781_vm8, %v4504_v5, %v4500_v0  ;;  %3432 = vadd.xlane.f32.xlu0 %v2931_v12  ;;  %v727_v58 = vmul.f32 %v12037_v15, %v9518_v38  ;;  %v1111_v10 = vmul.f32 %v12038_v26, %v9521_v8 }
 0x304   : > { %v9832_v57 = vpop.xlane.xlu0 %3270  ;;  %v9834_v43 = vpop.xlane.xlu1 %3280  ;;  %v2918_v56 = vmax.f32 %v2662_v11, 0.0  ;;  %v1751_v44 = vmul.f32 %v12039_v2, %v9524_v47  ;;  %v2661_v16 = vadd.f32 %v2405_v28, %v2021_v41  ;;  %v4510_v33 = vsel %vm3788_vm9, %v4509_v62, %v4505_v50 }
 0x305   : > { %v2008_v30 = vadd.f32 %v1752_v49, %v1368_v23  ;;  %v2391_v45 = vmul.f32 %v12040_v27, %v9529_v18  ;;  %v1367_v0 = vadd.f32 %v1111_v10, %v727_v58  ;;  %v758_v12 = vmul.f32 %v12019_v3, %v9619_v14 }
 0x306   : > { %3406 = vadd.xlane.f32.xlu1 %v2918_v56  ;;  %v1142_v11 = vmul.f32 %v12020_v17, %v9622_v21  ;;  %v1782_v28 = vmul.f32 %v12021_v24, %v9625_v54  ;;  %v2917_v49 = vmax.f32 %v2661_v16, 0.0  ;;  %v4534_v41 = vrot.slane %v9743_v4, %v12011_v37 }
 0x307   : > { %v2648_v62 = vadd.f32 %v2392_v60, %v2008_v30  ;;  %v4519_v23 = vrot.slane %v9767_v1, %v12010_v51  ;;  %v2007_v50 = vadd.f32 %v1751_v44, %v1367_v0  ;;  %v2422_v58 = vmul.f32 %v12024_v29, %v9636_v48 }
 0x308   : > { %v9854_v5 = vpop.xlane.xlu1 %3284  ;;  %v1398_v56 = vadd.f32 %v1142_v11, %v758_v12  ;;  %v4515_v3 = vsel %vm3795_vm10, %v4514_v36, %v4510_v33  ;;  %3404 = vadd.xlane.f32.xlu0 %v2917_v49  ;;  %v757_v24 = vmul.f32 %v12025_v9, %v9619_v14  ;;  %v1141_v16 = vmul.f32 %v12026_v35, %v9622_v21  ;;  %v12041_v12 = vld [vmem:[#allocation92_spill] sm:$0xff] }
 0x309   : > { %v9852_v20 = vpop.xlane.xlu0 %3274  ;;  %v2904_v17 = vmax.f32 %v2648_v62, 0.0  ;;  %v1781_v4 = vmul.f32 %v12027_v61, %v9625_v54  ;;  %v2647_v10 = vadd.f32 %v2391_v45, %v2007_v50  ;;  %v4520_v29 = vsel %vm3802_vm11, %v4519_v23, %v4515_v3 }
 0x30a   : > { %v2038_v44 = vadd.f32 %v1782_v28, %v1398_v56  ;;  %v2421_v36 = vmul.f32 %v12028_v55, %v9636_v48  ;;  %v1397_v30 = vadd.f32 %v1141_v16, %v757_v24  ;;  %v744_v9 = vmul.f32 %v12032_v22, %v9554_v31 }
 0x30b   : > { %3378 = vadd.xlane.f32.xlu1 %v2904_v17  ;;  %v1128_v35 = vmul.f32 %v12033_v25, %v9559_v53  ;;  %v1768_v61 = vmul.f32 %v12034_v42, %v9566_v46  ;;  %v2903_v33 = vmax.f32 %v2647_v10, 0.0  ;;  %v2408_v45 = vmul.f32 %v12036_v59, %v9569_v7  ;;  %v12042_v17 = vld [vmem:[#allocation51_spill] sm:$0xff] }
 0x30c   : > { %v9877_v1 = vpop.xlane.xlu1 %3288  ;;  %v2678_v0 = vadd.f32 %v2422_v58, %v2038_v44  ;;  %v4529_v11 = vrot.slane %v9787_v40, %v12041_v12  ;;  %v2037_v55 = vadd.f32 %v1781_v4, %v1397_v30  ;;  %v4525_v49 = vsel %vm3809_vm12, %v4524_v52, %v4520_v29  ;;  %v12043_v29 = vld [vmem:[#allocation19_spill] sm:$0xff] }
 0x30d   : > { %v9875_v60 = vpop.xlane.xlu0 %3278  ;;  %v1384_v28 = vadd.f32 %v1128_v35, %v744_v9  ;;  %v743_v62 = vmul.f32 %v12037_v15, %v9554_v31  ;;  %3376 = vadd.xlane.f32.xlu0 %v2903_v33  ;;  %v1127_v3 = vmul.f32 %v12038_v26, %v9559_v53  ;;  %v1767_v40 = vmul.f32 %v12039_v2, %v9566_v46  ;;  %v12044_v9 = vld [vmem:[#allocation104_spill] sm:$0xff] }
 0x30e   : > { %v2934_v56 = vmax.f32 %v2678_v0, 0.0  ;;  %v4530_v58 = vsel %vm3816_vm13, %v4529_v11, %v4525_v49  ;;  %v4543_v52 = vrot.slane %v9769_v13, %v12042_v17  ;;  %v2677_v24 = vadd.f32 %v2421_v36, %v2037_v55  ;;  %v12045_v11 = vld [vmem:[#allocation131_spill] sm:$0xff]  ;;  %v12046_v36 = vld [vmem:[#allocation94_spill] sm:$0xff] }
 0x30f   : > { %v2024_v16 = vadd.f32 %v1768_v61, %v1384_v28  ;;  %v4535_v4 = vsel %vm3823_vm14, %v4534_v41, %v4530_v58  ;;  %v1383_v10 = vadd.f32 %v1127_v3, %v743_v62  ;;  %v2407_v44 = vmul.f32 %v12040_v27, %v9569_v7  ;;  %v12048_v62 = vld [vmem:[#allocation74_spill] sm:$0xff]  ;;  %v12049_v58 = vld [vmem:[#allocation80_spill] sm:$0xff]  ;;  %v12052_v17 = vld [vmem:[#allocation27_spill] sm:$0xff] }
 0x310   : > { %v9897_v50 = vpop.xlane.xlu1 %3292  ;;  %3438 = vadd.xlane.f32.xlu1 %v2934_v56  ;;  %v730_v30 = vmul.f32 %v12043_v29, %v9518_v38  ;;  %v1114_v35 = vmul.f32 %v12044_v9, %v9521_v8  ;;  %v2933_v33 = vmax.f32 %v2677_v24, 0.0  ;;  %v4553_v13 = vrot.slane %v9789_v19, %v12045_v11  ;;  %v12050_v24 = vld [vmem:[#allocation14_spill] sm:$0xff] }
 0x311   : > { %v9895_v23 = vpop.xlane.xlu0 %3282  ;;  %v2664_v0 = vadd.f32 %v2408_v45, %v2024_v16  ;;  %v1754_v61 = vmul.f32 %v12046_v36, %v9524_v47  ;;  %v2023_v28 = vadd.f32 %v1767_v40, %v1383_v10  ;;  %v2394_v56 = vmul.f32 %v12048_v62, %v9529_v18  ;;  %v12051_v16 = vld [vmem:[#allocation100_spill] sm:$0xff] }
 0x312   : > { %v1370_v49 = vadd.f32 %v1114_v35, %v730_v30  ;;  %v4539_v3 = vrot.slane %v9810_v32, %v12049_v58  ;;  %3436 = vadd.xlane.f32.xlu0 %v2933_v33  ;;  %v729_v19 = vmul.f32 %v12050_v24, %v9518_v38  ;;  %v1113_v11 = vmul.f32 %v12051_v16, %v9521_v8  ;;  %v12053_v30 = vld [vmem:[#allocation60_spill] sm:$0xff] }
 0x313   : > { %v2920_v45 = vmax.f32 %v2664_v0, 0.0  ;;  %v1753_v12 = vmul.f32 %v12052_v17, %v9524_v47  ;;  %v2393_v35 = vmul.f32 %v12053_v30, %v9529_v18  ;;  %v760_v33 = vmul.f32 %v12032_v22, %v9619_v14 }
 0x314   : > { %v9919_v55 = vpop.xlane.xlu1 %3296  ;;  %v2010_v40 = vadd.f32 %v1754_v61, %v1370_v49  ;;  %v4544_v10 = vsel %vm3725_vm0, %v4543_v52, %v4539_v3  ;;  %v1369_v32 = vadd.f32 %v1113_v11, %v729_v19  ;;  %v1144_v0 = vmul.f32 %v12033_v25, %v9622_v21  ;;  %v12055_v61 = vld [vmem:[#allocation127_spill] sm:$0xff] }
 0x315   : > { %v9917_v41 = vpop.xlane.xlu0 %3286  ;;  %12047 = vst [vmem:[#allocation118_spill] sm:$0xff] %v9919_v55  ;;  %v2663_v55 = vadd.f32 %v2407_v44, %v2023_v28  ;;  %3410 = vadd.xlane.f32.xlu1 %v2920_v45  ;;  %v1784_v58 = vmul.f32 %v12034_v42, %v9625_v54  ;;  %v9946_v52 = vsel %vm12056_vm15, %v4535_v4, %v12055_v61  ;;  %v12057_v11 = vld [vmem:[#allocation39_spill] sm:$0xff]  ;;  %vm12087_vm15 = vcmask 1042434  }
 0x316   : > { %v2650_v49 = vadd.f32 %v2394_v56, %v2010_v40  ;;  %v4548_v3 = vrot.slane %v9832_v57, %v12057_v11  ;;  %v2009_v22 = vadd.f32 %v1753_v12, %v1369_v32  ;;  %v1400_v45 = vadd.f32 %v1144_v0, %v760_v33  ;;  %v12058_v56 = vld [vmem:[#allocation34_spill] sm:$0xff] }
 0x317   : > { %v2919_v28 = vmax.f32 %v2663_v55, 0.0  ;;  %v2424_v25 = vmul.f32 %v12036_v59, %v9636_v48  ;;  %v759_v42 = vmul.f32 %v12037_v15, %v9619_v14  ;;  %v1143_v4 = vmul.f32 %v12038_v26, %v9622_v21 }
 0x318   : > { %v9942_v44 = vpop.xlane.xlu1 %3300  ;;  %v2906_v19 = vmax.f32 %v2650_v49, 0.0  ;;  %v1783_v55 = vmul.f32 %v12039_v2, %v9625_v54  ;;  %v4563_v57 = vrot.slane %v9812_v34, %v12058_v56  ;;  %v2649_v12 = vadd.f32 %v2393_v35, %v2009_v22 }
 0x319   : > { %v9940_v37 = vpop.xlane.xlu0 %3290  ;;  %12054 = vst [vmem:[#allocation124_spill] sm:$0xff] %v9942_v44  ;;  %3408 = vadd.xlane.f32.xlu0 %v2919_v28  ;;  %v4549_v44 = vsel %vm3732_vm1, %v4548_v3, %v4544_v10  ;;  %v2040_v40 = vadd.f32 %v1784_v58, %v1400_v45  ;;  %v2423_v59 = vmul.f32 %v12040_v27, %v9636_v48  ;;  %v12059_v27 = vld [vmem:[#allocation96_spill] sm:$0xff] }
 0x31a   : > { %3382 = vadd.xlane.f32.xlu1 %v2906_v19  ;;  %v1399_v10 = vadd.f32 %v1143_v4, %v759_v42  ;;  %v746_v26 = vmul.f32 %v12043_v29, %v9554_v31  ;;  %v1130_v2 = vmul.f32 %v12044_v9, %v9559_v53  ;;  %v1770_v34 = vmul.f32 %v12046_v36, %v9566_v46  ;;  %v12061_v42 = vld [vmem:[#allocation26_spill] sm:$0xff] }
 0x31b   : > { %v2905_v35 = vmax.f32 %v2649_v12, 0.0  ;;  %v2680_v58 = vadd.f32 %v2424_v25, %v2040_v40  ;;  %v4554_v33 = vsel %vm3739_vm2, %v4553_v13, %v4549_v44  ;;  %v4558_v0 = vrot.slane %v9852_v20, %v12059_v27 }
 0x31c   : > { %v9965_v15 = vpop.xlane.xlu1 %3304  ;;  %v2039_v61 = vadd.f32 %v1783_v55, %v1399_v10  ;;  %v1386_v28 = vadd.f32 %v1130_v2, %v746_v26  ;;  %v2410_v49 = vmul.f32 %v12048_v62, %v9569_v7  ;;  %v745_v3 = vmul.f32 %v12050_v24, %v9554_v31  ;;  %v12062_v10 = vld [vmem:[#allocation23_spill] sm:$0xff]  ;;  %v12063_v2 = vld [vmem:[#allocation106_spill] sm:$0xff] }
 0x31d   : > { %v9963_v32 = vpop.xlane.xlu0 %3294  ;;  %3380 = vadd.xlane.f32.xlu0 %v2905_v35  ;;  %v2936_v22 = vmax.f32 %v2680_v58, 0.0  ;;  %v4559_v45 = vsel %vm3746_vm3, %v4558_v0, %v4554_v33  ;;  %v1129_v25 = vmul.f32 %v12051_v16, %v9559_v53  ;;  %v1769_v13 = vmul.f32 %v12052_v17, %v9566_v46  ;;  %v12064_v58 = vld [vmem:[#allocation32_spill] sm:$0xff] }
 0x31e   : > { %v4573_v19 = vrot.slane %v9834_v43, %v12061_v42  ;;  %v2679_v4 = vadd.f32 %v2423_v59, %v2039_v61  ;;  %v2026_v55 = vadd.f32 %v1770_v34, %v1386_v28  ;;  %v2409_v12 = vmul.f32 %v12053_v30, %v9569_v7  ;;  %v12065_v28 = vld [vmem:[#allocation81_spill] sm:$0xff] }
 0x31f   : > { %3442 = vadd.xlane.f32.xlu1 %v2936_v22  ;;  %v1385_v40 = vadd.f32 %v1129_v25, %v745_v3  ;;  %v732_v26 = vmul.f32 %v12062_v10, %v9518_v38  ;;  %v1116_v35 = vmul.f32 %v12063_v2, %v9521_v8  ;;  %v1756_v33 = vmul.f32 %v12064_v58, %v9524_v47  ;;  %v12066_v22 = vld [vmem:[#allocation18_spill] sm:$0xff] }
 0x320   : > { %v9987_v20 = vpop.xlane.xlu1 %3308  ;;  %v2935_v0 = vmax.f32 %v2679_v4, 0.0  ;;  %v2666_v27 = vadd.f32 %v2410_v49, %v2026_v55  ;;  %v4564_v43 = vsel %vm10882_vm4, %v4563_v57, %v4559_v45  ;;  %v4568_v59 = vrot.slane %v9875_v60, %v12029_v63  ;;  %v12068_v57 = vld [vmem:[#allocation105_spill] sm:$0xff]  ;;  %v12069_v60 = vld [vmem:[#allocation103_spill] sm:$0xff] }
 0x321   : > { %v9985_v44 = vpop.xlane.xlu0 %3298  ;;  %12060 = vst [vmem:[#allocation112_spill] sm:$0xff] %v9987_v20  ;;  %v2025_v34 = vadd.f32 %v1769_v13, %v1385_v40  ;;  %v1372_v61 = vadd.f32 %v1116_v35, %v732_v26  ;;  %v2396_v3 = vmul.f32 %v12065_v28, %v9529_v18  ;;  %v731_v25 = vmul.f32 %v12066_v22, %v9518_v38  ;;  %v12070_v35 = vld [vmem:[#allocation68_spill] sm:$0xff] }
 0x322   : > { %3440 = vadd.xlane.f32.xlu0 %v2935_v0  ;;  %v2922_v4 = vmax.f32 %v2666_v27, 0.0  ;;  %v4569_v49 = vsel %vm10883_vm5, %v4568_v59, %v4564_v43  ;;  %v1115_v45 = vmul.f32 %v12068_v57, %v9521_v8  ;;  %v1755_v13 = vmul.f32 %v12069_v60, %v9524_v47 }
 0x323   : > { %v4583_v55 = vrot.slane %v9854_v5, %v11971_v6  ;;  %v2665_v40 = vadd.f32 %v2409_v12, %v2025_v34  ;;  %v2012_v26 = vadd.f32 %v1756_v33, %v1372_v61  ;;  %v2395_v63 = vmul.f32 %v12070_v35, %v9529_v18  ;;  %v12071_v12 = vld [vmem:[#allocation57_spill] sm:$0xff] }
 0x324   : > { %v10008_v20 = vpop.xlane.xlu1 %3312  ;;  %3414 = vadd.xlane.f32.xlu1 %v2922_v4  ;;  %v762_v27 = vmul.f32 %v12043_v29, %v9619_v14  ;;  %v1146_v0 = vmul.f32 %v12044_v9, %v9622_v21  ;;  %v1786_v43 = vmul.f32 %v12046_v36, %v9625_v54  ;;  %v4574_v5 = vsel %vm3767_vm6, %v4573_v19, %v4569_v49  ;;  %v12072_v49 = vld [vmem:[#allocation63_spill] sm:$0xff] }
 0x325   : > { %v10006_v42 = vpop.xlane.xlu0 %3302  ;;  %12067 = vst [vmem:[#allocation115_spill] sm:$0xff] %v10008_v20  ;;  %v1371_v20 = vadd.f32 %v1115_v45, %v731_v25  ;;  %v2921_v59 = vmax.f32 %v2665_v40, 0.0  ;;  %v2652_v56 = vadd.f32 %v2396_v3, %v2012_v26  ;;  %v4578_v33 = vrot.slane %v9895_v23, %v12071_v12 }
 0x326   : > { %v1402_v4 = vadd.f32 %v1146_v0, %v762_v27  ;;  %v2426_v29 = vmul.f32 %v12048_v62, %v9636_v48  ;;  %v761_v9 = vmul.f32 %v12050_v24, %v9619_v14  ;;  %v1145_v19 = vmul.f32 %v12051_v16, %v9622_v21 }
 0x327   : > { %v2011_v25 = vadd.f32 %v1755_v13, %v1371_v20  ;;  %3412 = vadd.xlane.f32.xlu0 %v2921_v59  ;;  %v2908_v36 = vmax.f32 %v2652_v56, 0.0  ;;  %v4579_v3 = vsel %vm3774_vm7, %v4578_v33, %v4574_v5  ;;  %v1785_v23 = vmul.f32 %v12052_v17, %v9625_v54 }
 0x328   : > { %v10030_v61 = vpop.xlane.xlu1 %3316  ;;  %v4593_v20 = vrot.slane %v9877_v1, %v12072_v49  ;;  %v2042_v13 = vadd.f32 %v1786_v43, %v1402_v4  ;;  %v2425_v62 = vmul.f32 %v12053_v30, %v9636_v48  ;;  %v1401_v24 = vadd.f32 %v1145_v19, %v761_v9  ;;  %v12074_v4 = vld [vmem:[#allocation75_spill] sm:$0xff] }
 0x329   : > { %v10028_v34 = vpop.xlane.xlu0 %3306  ;;  %v2651_v45 = vadd.f32 %v2395_v63, %v2011_v25  ;;  %3386 = vadd.xlane.f32.xlu1 %v2908_v36  ;;  %v748_v56 = vmul.f32 %v12062_v10, %v9554_v31  ;;  %v1132_v40 = vmul.f32 %v12063_v2, %v9559_v53  ;;  %v1772_v16 = vmul.f32 %v12064_v58, %v9566_v46 }
 0x32a   : > { %v2682_v1 = vadd.f32 %v2426_v29, %v2042_v13  ;;  %v4584_v63 = vsel %vm3781_vm8, %v4583_v55, %v4579_v3  ;;  %v4588_v30 = vrot.slane %v9917_v41, %v12035_v39  ;;  %v2041_v0 = vadd.f32 %v1785_v23, %v1401_v24  ;;  %v12076_v24 = vld [vmem:[#allocation110_spill] sm:$0xff] }
 0x32b   : > { %v2907_v26 = vmax.f32 %v2651_v45, 0.0  ;;  %v1388_v43 = vadd.f32 %v1132_v40, %v748_v56  ;;  %v2412_v59 = vmul.f32 %v12065_v28, %v9569_v7  ;;  %v747_v5 = vmul.f32 %v12066_v22, %v9554_v31  ;;  %v12075_v45 = vld [vmem:[#allocation38_spill] sm:$0xff] }
 0x32c   : > { %v10056_v27 = vpop.xlane.xlu1 %3320  ;;  %v2938_v33 = vmax.f32 %v2682_v1, 0.0  ;;  %v4589_v25 = vsel %vm3788_vm9, %v4588_v30, %v4584_v63  ;;  %v1131_v55 = vmul.f32 %v12068_v57, %v9559_v53  ;;  %v1771_v41 = vmul.f32 %v12069_v60, %v9566_v46  ;;  %v12077_v40 = vld [vmem:[#allocation122_spill] sm:$0xff] }
 0x32d   : > { %v10051_v17 = vpop.xlane.xlu0 %3310  ;;  %12073 = vst [vmem:[#allocation129_spill] sm:$0xff] %v10056_v27  ;;  %3384 = vadd.xlane.f32.xlu0 %v2907_v26  ;;  %v4603_v29 = vrot.slane %v9897_v50, %v12074_v4  ;;  %v2681_v9 = vadd.f32 %v2425_v62, %v2041_v0  ;;  %v2028_v36 = vadd.f32 %v1772_v16, %v1388_v43  ;;  %v12079_v43 = vld [vmem:[#allocation33_spill] sm:$0xff] }
 0x32e   : > { %v2411_v3 = vmul.f32 %v12070_v35, %v9569_v7  ;;  %3446 = vadd.xlane.f32.xlu1 %v2938_v33  ;;  %v1387_v23 = vadd.f32 %v1131_v55, %v747_v5  ;;  %v734_v13 = vmul.f32 %v12075_v45, %v9518_v38  ;;  %v1118_v56 = vmul.f32 %v12076_v24, %v9521_v8  ;;  %v12080_v33 = vld [vmem:[#allocation22_spill] sm:$0xff] }
 0x32f   : > { %v1758_v26 = vmul.f32 %v12077_v40, %v9524_v47  ;;  %v2937_v50 = vmax.f32 %v2681_v9, 0.0  ;;  %v2668_v62 = vadd.f32 %v2412_v59, %v2028_v36  ;;  %v4594_v16 = vsel %vm3795_vm10, %v4593_v20, %v4589_v25  ;;  %v12081_v9 = vld [vmem:[#allocation107_spill] sm:$0xff]  ;;  %v12082_v20 = vld [vmem:[#allocation128_spill] sm:$0xff]  ;;  %v12083_v36 = vld [vmem:[#allocation45_spill] sm:$0xff] }
 0x330   : > { %v10079_v1 = vpop.xlane.xlu1 %3324  ;;  %v4598_v63 = vrot.slane %v9940_v37, %v12010_v51  ;;  %v2027_v30 = vadd.f32 %v1771_v41, %v1387_v23  ;;  %v1374_v0 = vadd.f32 %v1118_v56, %v734_v13  ;;  %v2398_v5 = vmul.f32 %v12079_v43, %v9529_v18  ;;  %v12084_v37 = vld [vmem:[#allocation118_spill] sm:$0xff]  ;;  %v12085_v56 = vld [vmem:[#allocation71_spill] sm:$0xff] }
 0x331   : > { %v10071_v19 = vpop.xlane.xlu0 %3314  ;;  %12078 = vst [vmem:[#allocation78_spill] sm:$0xff] %v10079_v1  ;;  %v733_v55 = vmul.f32 %v12080_v33, %v9518_v38  ;;  %3444 = vadd.xlane.f32.xlu0 %v2937_v50  ;;  %v2924_v4 = vmax.f32 %v2668_v62, 0.0  ;;  %v1117_v59 = vmul.f32 %v12081_v9, %v9521_v8  ;;  %v1757_v25 = vmul.f32 %v12082_v20, %v9524_v47 }
 0x332   : > { %v4599_v27 = vsel %vm3802_vm11, %v4598_v63, %v4594_v16  ;;  %v4613_v41 = vrot.slane %v12084_v37, %v12083_v36  ;;  %v2667_v23 = vadd.f32 %v2411_v3, %v2027_v30  ;;  %v2014_v13 = vadd.f32 %v1758_v26, %v1374_v0  ;;  %v12086_v26 = vld [vmem:[#allocation92_spill] sm:$0xff] }
 0x333   : > { %v2397_v1 = vmul.f32 %v12085_v56, %v9529_v18  ;;  %3418 = vadd.xlane.f32.xlu1 %v2924_v4  ;;  %v1373_v50 = vadd.f32 %v1117_v59, %v733_v55  ;;  %v764_v62 = vmul.f32 %v12062_v10, %v9619_v14  ;;  %v1148_v16 = vmul.f32 %v12063_v2, %v9622_v21 }
 0x334   : > { %v1788_v63 = vmul.f32 %v12064_v58, %v9625_v54  ;;  %v2923_v39 = vmax.f32 %v2667_v23, 0.0  ;;  %v2654_v37 = vadd.f32 %v2398_v5, %v2014_v13  ;;  %v4604_v3 = vsel %vm3809_vm12, %v4603_v29, %v4599_v27  ;;  %v10108_v0 = vpop.xlane.xlu1 %3328  ;;  %v12089_v13 = vld [vmem:[#allocation124_spill] sm:$0xff] }
 0x335   : > { %v10097_v49 = vpop.xlane.xlu0 %3318  ;;  %v4608_v30 = vrot.slane %v9963_v32, %v12086_v26  ;;  %v2013_v4 = vadd.f32 %v1757_v25, %v1373_v50  ;;  %v1404_v55 = vadd.f32 %v1148_v16, %v764_v62  ;;  %v2428_v10 = vmul.f32 %v12065_v28, %v9636_v48 }
 0x336   : > { %v763_v2 = vmul.f32 %v12066_v22, %v9619_v14  ;;  %3416 = vadd.xlane.f32.xlu0 %v2923_v39  ;;  %v2910_v59 = vmax.f32 %v2654_v37, 0.0  ;;  %v1147_v27 = vmul.f32 %v12068_v57, %v9622_v21  ;;  %v1787_v32 = vmul.f32 %v12069_v60, %v9625_v54  ;;  %v12090_v37 = vld [vmem:[#allocation80_spill] sm:$0xff] }
 0x337   : > { %v4609_v58 = vsel %vm3816_vm13, %v4608_v30, %v4604_v3  ;;  %v2653_v29 = vadd.f32 %v2397_v1, %v2013_v4  ;;  %v2044_v5 = vadd.f32 %v1788_v63, %v1404_v55  ;;  %v2427_v28 = vmul.f32 %v12070_v35, %v9636_v48  ;;  %v12088_v1 = vld [vmem:[#allocation51_spill] sm:$0xff] }
 0x338   : > { %v4614_v25 = vsel %vm3823_vm14, %v4613_v41, %v4609_v58  ;;  %3390 = vadd.xlane.f32.xlu1 %v2910_v59  ;;  %v1403_v22 = vadd.f32 %v1147_v27, %v763_v2  ;;  %v750_v23 = vmul.f32 %v12075_v45, %v9554_v31  ;;  %v1134_v57 = vmul.f32 %v12076_v24, %v9559_v53 }
 0x339   : > { %v10124_v39 = vsel %vm12087_vm15, %v4614_v25, %v9946_v52  ;;  %v10130_v60 = vpop.xlane.xlu0 %3322  ;;  %v4622_v41 = vrot.slane %v12089_v13, %v12088_v1  ;;  %v2909_v50 = vmax.f32 %v2653_v29, 0.0  ;;  %v2684_v62 = vadd.f32 %v2428_v10, %v2044_v5  ;;  %v12091_v29 = vld [vmem:[#allocation37_spill] sm:$0xff]  ;;  %v12092_v25 = vld [vmem:[#allocation111_spill] sm:$0xff] }
 0x33a   : > { %v1774_v35 = vmul.f32 %v12077_v40, %v9566_v46  ;;  %v2043_v16 = vadd.f32 %v1787_v32, %v1403_v22  ;;  %v1390_v52 = vadd.f32 %v1134_v57, %v750_v23  ;;  %v2414_v63 = vmul.f32 %v12079_v43, %v9569_v7  ;;  %v10140_v30 = vpop.xlane.xlu1 %3332  ;;  %v12093_v23 = vld [vmem:[#allocation109_spill] sm:$0xff]  ;;  %v12094_v13 = vld [vmem:[#allocation131_spill] sm:$0xff] }
 0x33b   : > { %v4618_v3 = vrot.slane %v9985_v44, %v12090_v37  ;;  %3388 = vadd.xlane.f32.xlu0 %v2909_v50  ;;  %v2940_v4 = vmax.f32 %v2684_v62, 0.0  ;;  %v749_v55 = vmul.f32 %v12080_v33, %v9554_v31  ;;  %v1133_v10 = vmul.f32 %v12081_v9, %v9559_v53 }
 0x33c   : > { %v1773_v2 = vmul.f32 %v12082_v20, %v9566_v46  ;;  %v2683_v59 = vadd.f32 %v2427_v28, %v2043_v16  ;;  %v2030_v58 = vadd.f32 %v1774_v35, %v1390_v52  ;;  %v2413_v44 = vmul.f32 %v12085_v56, %v9569_v7 }
 0x33d   : > { %v4623_v27 = vsel %vm3725_vm0, %v4622_v41, %v4618_v3  ;;  %3450 = vadd.xlane.f32.xlu1 %v2940_v4  ;;  %v1389_v32 = vadd.f32 %v1133_v10, %v749_v55  ;;  %v751_v5 = vmul.f32 %v12091_v29, %v9554_v31  ;;  %v1135_v22 = vmul.f32 %v12092_v25, %v9559_v53  ;;  %v12095_v31 = vld [vmem:[#allocation31_spill] sm:$0xff]  ;;  %v12096_v55 = vld [vmem:[#allocation34_spill] sm:$0xff]  ;;  %v12097_v10 = vld [vmem:[#allocation112_spill] sm:$0xff] }
 0x33e   : > { %v1775_v57 = vmul.f32 %v12093_v23, %v9566_v46  ;;  %v4632_v28 = vrot.slane %v9965_v15, %v12094_v13  ;;  %v2939_v50 = vmax.f32 %v2683_v59, 0.0  ;;  %v2670_v62 = vadd.f32 %v2414_v63, %v2030_v58  ;;  %v10161_v35 = vpop.xlane.xlu0 %3326 }
 0x33f   : > { %v4627_v41 = vrot.slane %v10006_v42, %v12057_v11  ;;  %v2029_v16 = vadd.f32 %v1773_v2, %v1389_v32  ;;  %v1391_v52 = vadd.f32 %v1135_v22, %v751_v5  ;;  %v2415_v3 = vmul.f32 %v12095_v31, %v9569_v7  ;;  %v10167_v4 = vpop.xlane.xlu1 %3336 }
 0x340   : > { %v735_v53 = vmul.f32 %v12091_v29, %v9518_v38  ;;  %3448 = vadd.xlane.f32.xlu0 %v2939_v50  ;;  %v2926_v46 = vmax.f32 %v2670_v62, 0.0  ;;  %v1119_v63 = vmul.f32 %v12092_v25, %v9521_v8  ;;  %v1759_v42 = vmul.f32 %v12093_v23, %v9524_v47 }
 0x341   : > { %v4628_v15 = vsel %vm3732_vm1, %v4627_v41, %v4623_v27  ;;  %v4642_v2 = vrot.slane %v12097_v10, %v12096_v55  ;;  %v2669_v59 = vadd.f32 %v2413_v44, %v2029_v16  ;;  %v2031_v7 = vadd.f32 %v1775_v57, %v1391_v52  ;;  %v12098_v57 = vld [vmem:[#allocation96_spill] sm:$0xff] }
 0x342   : > { %v2399_v38 = vmul.f32 %v12095_v31, %v9529_v18  ;;  %3422 = vadd.xlane.f32.xlu1 %v2926_v46  ;;  %v1375_v58 = vadd.f32 %v1119_v63, %v735_v53  ;;  %v767_v32 = vmul.f32 %v12091_v29, %v9619_v14  ;;  %v1151_v27 = vmul.f32 %v12092_v25, %v9622_v21  ;;  %v10184_v47 = vpop.xlane.xlu0 %3330 }
 0x343   : > { %v1791_v8 = vmul.f32 %v12093_v23, %v9625_v54  ;;  %v2925_v5 = vmax.f32 %v2669_v59, 0.0  ;;  %v2671_v22 = vadd.f32 %v2415_v3, %v2031_v7  ;;  %v4633_v44 = vsel %vm3739_vm2, %v4632_v28, %v4628_v15  ;;  %v12100_v3 = vld [vmem:[#allocation115_spill] sm:$0xff] }
 0x344   : > { %v4637_v18 = vrot.slane %v10028_v34, %v12098_v57  ;;  %v2015_v50 = vadd.f32 %v1759_v42, %v1375_v58  ;;  %v1407_v62 = vadd.f32 %v1151_v27, %v767_v32  ;;  %v2431_v29 = vmul.f32 %v12095_v31, %v9636_v48  ;;  %v12099_v34 = vld [vmem:[#allocation26_spill] sm:$0xff]  ;;  %v12101_v42 = vld [vmem:[#allocation47_spill] sm:$0xff] }
 0x345   : > { %v765_v25 = vmul.f32 %v12080_v33, %v9619_v14  ;;  %3420 = vadd.xlane.f32.xlu0 %v2925_v5  ;;  %v2927_v41 = vmax.f32 %v2671_v22, 0.0  ;;  %v1149_v16 = vmul.f32 %v12081_v9, %v9622_v21  ;;  %v1789_v28 = vmul.f32 %v12082_v20, %v9625_v54  ;;  %v10198_v52 = vpop.xlane.xlu1 %3340  ;;  %v12103_v5 = vld [vmem:[#allocation65_spill] sm:$0xff] }
 0x346   : > { %v4638_v23 = vsel %vm3746_vm3, %v4637_v18, %v4633_v44  ;;  %v4652_v53 = vrot.slane %v12100_v3, %v12099_v34  ;;  %v2655_v46 = vadd.f32 %v2399_v38, %v2015_v50  ;;  %v2047_v31 = vadd.f32 %v1791_v8, %v1407_v62  ;;  %v12105_v44 = vld [vmem:[#allocation129_spill] sm:$0xff] }
 0x347   : > { %v4643_v15 = vsel %vm10882_vm4, %v4642_v2, %v4638_v23  ;;  %3424 = vadd.xlane.f32.xlu1 %v2927_v41  ;;  %v1405_v33 = vadd.f32 %v1149_v16, %v765_v25  ;;  %v2429_v63 = vmul.f32 %v12085_v56, %v9636_v48  ;;  %v4647_v9 = vrot.slane %v10051_v17, %v12101_v42  ;;  %v12107_v25 = vld [vmem:[#allocation78_spill] sm:$0xff] }
 0x348   : > { %v766_v20 = vmul.f32 %v12075_v45, %v9619_v14  ;;  %v2911_v10 = vmax.f32 %v2655_v46, 0.0  ;;  %v2687_v59 = vadd.f32 %v2431_v29, %v2047_v31  ;;  %v1150_v7 = vmul.f32 %v12076_v24, %v9622_v21  ;;  %v3335_v2 = vpop.xlane.xlu0 %3334  ;;  %v12106_v29 = vld [vmem:[#allocation75_spill] sm:$0xff]  ;;  %v12109_v31 = vld [vmem:[#allocation85_spill] sm:$0xff] }
 0x349   : > { %v1790_v38 = vmul.f32 %v12077_v40, %v9625_v54  ;;  %v4662_v58 = vrot.slane %v10030_v61, %v11971_v6  ;;  %v2045_v32 = vadd.f32 %v1789_v28, %v1405_v33  ;;  %v4648_v56 = vsel %vm10883_vm5, %v4647_v9, %v4643_v15  ;;  %v12102_v54 = vld [vmem:[#allocation79_spill] sm:$0xff] }
 0x34a   : > { %v4657_v17 = vrot.slane %v10071_v19, %v12071_v12  ;;  %3392 = vadd.xlane.f32.xlu0 %v2911_v10  ;;  %v2943_v14 = vmax.f32 %v2687_v59, 0.0  ;;  %v1406_v45 = vadd.f32 %v1150_v7, %v766_v20  ;;  %v2430_v27 = vmul.f32 %v12079_v43, %v9636_v48  ;;  %v3345_v24 = vpop.xlane.xlu1 %3344  ;;  %v12104_v19 = vld [vmem:[#allocation63_spill] sm:$0xff] }
 0x34b   : > { %v4653_v21 = vsel %vm3767_vm6, %v4652_v53, %v4648_v56  ;;  %v4361_v40 = vrot.slane %v12102_v54, %v12010_v51  ;;  %v2685_v8 = vadd.f32 %v2429_v63, %v2045_v32  ;;  %v4667_v22 = vrot.slane %v10097_v49, %v12103_v5  ;;  %v12111_v32 = vld [vmem:[#allocation97_spill] sm:$0xff] }
 0x34c   : > { %v4658_v61 = vsel %vm3774_vm7, %v4657_v17, %v4653_v21  ;;  %3456 = vadd.xlane.f32.xlu1 %v2943_v14  ;;  %v4672_v18 = vrot.slane %v12105_v44, %v12104_v19  ;;  %v2046_v50 = vadd.f32 %v1790_v38, %v1406_v45  ;;  %v4677_v48 = vrot.slane %v10130_v60, %v12010_v51  ;;  %v3339_v49 = vpop.xlane.xlu0 %3338  ;;  %v12108_v60 = vld [vmem:[#allocation123_spill] sm:$0xff]  ;;  %v12112_v45 = vld [vmem:[#allocation101_spill] sm:$0xff] }
 0x34d   : > { %v4663_v62 = vsel %vm3781_vm8, %v4662_v58, %v4658_v61  ;;  %v2941_v43 = vmax.f32 %v2685_v8, 0.0  ;;  %v4682_v41 = vrot.slane %v12107_v25, %v12106_v29  ;;  %v4687_v16 = vrot.slane %v10161_v35, %v12086_v26  ;;  %v12114_v8 = vld [vmem:[#allocation36_spill] sm:$0xff] }
 0x34e   : > { %v4668_v23 = vsel %vm3788_vm9, %v4667_v22, %v4663_v62  ;;  %v2686_v28 = vadd.f32 %v2430_v27, %v2046_v50  ;;  %v4701_v53 = vrot.slane %v10140_v30, %v12088_v1  ;;  %v4697_v46 = vrot.slane %v10184_v47, %v12090_v37  ;;  %v12115_v61 = vld [vmem:[#allocation88_spill] sm:$0xff]  ;;  %v12117_v50 = vld [vmem:[#allocation25_spill] sm:$0xff] }
 0x34f   : > { %v4673_v3 = vsel %vm3795_vm10, %v4672_v18, %v4668_v23  ;;  %v12110_v15 = vrot.slane %v12109_v31, %v12104_v19  ;;  %3452 = vadd.xlane.f32.xlu0 %v2941_v43  ;;  %v4706_v35 = vrot.slane %v3335_v2, %v12057_v11  ;;  %v4716_v9 = vrot.slane %v3339_v49, %v12098_v57  ;;  %v3349_v20 = vpop.xlane.xlu1 %3348 }
 0x350   : > { %v4678_v63 = vsel %vm3802_vm11, %v4677_v48, %v4673_v3  ;;  %v4692_v30 = vrot.slane %v10108_v0, %v12083_v36  ;;  %v4711_v47 = vrot.slane %v10167_v4, %v12094_v13  ;;  %v4702_v59 = vsel %vm3725_vm0, %v4701_v53, %v4697_v46 }
 0x351   : > { %v4357_v33 = vsel %vm3795_vm10, %v12110_v15, %v12108_v60  ;;  %v4683_v10 = vsel %vm3809_vm12, %v4682_v41, %v4678_v63  ;;  %v2942_v38 = vmax.f32 %v2686_v28, 0.0  ;;  %v4707_v2 = vsel %vm3732_vm1, %v4706_v35, %v4702_v59  ;;  %v12119_v41 = vld [vmem:[#allocation102_spill] sm:$0xff]  ;;  %v2944_v63 = vld [vmem:[#allocation2] sm:$0xff]  ;;  %v12121_v35 = vld [vmem:[#allocation24_spill] sm:$0xff] }
 0x352   : > { %v4362_v7 = vsel %vm3802_vm11, %v4361_v40, %v4357_v33  ;;  %v4688_v58 = vsel %vm3816_vm13, %v4687_v16, %v4683_v10  ;;  %v4371_v56 = vrot.slane %v12111_v32, %v12086_v26  ;;  %v4721_v0 = vrot.slane %v10198_v52, %v12096_v55  ;;  %v3343_v4 = vpop.xlane.xlu0 %3342 }
 0x353   : > { %v4693_v17 = vsel %vm3823_vm14, %v4692_v30, %v4688_v58  ;;  %v4712_v14 = vsel %vm3739_vm2, %v4711_v47, %v4707_v2  ;;  %v4366_v27 = vrot.slane %v12112_v45, %v12106_v29  ;;  %3454 = vadd.xlane.f32.xlu0 %v2942_v38  ;;  %vm12113_vm15 = vcmask 1043459  }
 0x354   : > { %v5026_v21 = vsel %vm12113_vm15, %v4693_v17, %v10124_v39  ;;  %v4717_v54 = vsel %vm3746_vm3, %v4716_v9, %v4712_v14  ;;  %v4726_v40 = vrot.slane %v3343_v4, %v12101_v42  ;;  %v12116_v22 = vrot.slane %v12115_v61, %v12106_v29  ;;  %v3353_v25 = vpop.xlane.xlu1 %3352  ;;  %v12122_v9 = vld [vmem:[#allocation91_spill] sm:$0xff] }
 0x355   : > { %v4731_v44 = vrot.slane %v3345_v24, %v12099_v34  ;;  %v4722_v18 = vsel %vm10882_vm4, %v4721_v0, %v4717_v54  ;;  %v12118_v62 = vrot.slane %v12117_v50, %v12086_v26  ;;  %v4367_v39 = vsel %vm3809_vm12, %v4366_v27, %v4362_v7  ;;  %v12120_v24 = vld [vmem:[#allocation77_spill] sm:$0xff] }
 0x356   : > { %v4288_v52 = vsel %vm3809_vm12, %v12116_v22, %v12114_v8  ;;  %v4727_v43 = vsel %vm10883_vm5, %v4726_v40, %v4722_v18  ;;  %v4297_v23 = vrot.slane %v12119_v41, %v12083_v36  ;;  %v4372_v16 = vsel %vm3816_vm13, %v4371_v56, %v4367_v39 }
 0x357   : > { %v4293_v48 = vsel %vm3816_vm13, %v12118_v62, %v4288_v52  ;;  %v4732_v49 = vsel %vm3767_vm6, %v4731_v44, %v4727_v43  ;;  %v4376_v28 = vrot.slane %v12120_v24, %v12083_v36  ;;  %v3347_v3 = vpop.xlane.xlu0 %3346  ;;  %vm10886_vm15 = vcmask 1045509  }
 0x358   : > { %v4298_v53 = vsel %vm3823_vm14, %v4297_v23, %v4293_v48  ;;  %v4736_v46 = vrot.slane %v3347_v3, %v12071_v12  ;;  %vm10885_vm4 = vcmask 1046534   ;;  %v4741_v31 = vrot.slane %v3349_v20, %v11971_v6  ;;  %v3357_v15 = vpop.xlane.xlu1 %3356 }
 0x359   : > { %v4377_v60 = vsel %vm3823_vm14, %v4376_v28, %v4372_v16  ;;  %vm10884_vm5 = vcmask 1047559   ;;  %v5019_v30 = vsel %vm10886_vm15, %v12122_v9, %v12121_v35  ;;  %v4751_v20 = vrot.slane %v3353_v25, %v12104_v19 }
 0x35a   : > { %v4737_v33 = vsel %vm3774_vm7, %v4736_v46, %v4732_v49  ;;  %v5021_v47 = vsel %vm10885_vm4, %v4298_v53, %v5019_v30  ;;  %v4761_v14 = vrot.slane %v3357_v15, %v12106_v29  ;;  %vm12126_vm15 = vcmask 458112  }
 0x35b   : > { %v4742_v10 = vsel %vm3781_vm8, %v4741_v31, %v4737_v33  ;;  %v3351_v59 = vpop.xlane.xlu0 %3350  ;;  %v5023_v7 = vsel %vm10884_vm5, %v4377_v60, %v5021_v47  ;;  %vm12123_vm5 = vcmask 1044484  }
 0x35c   : > { %v4746_v38 = vrot.slane %v3351_v59, %v12103_v5  ;;  %v5033_v58 = vadd.f32 %v5023_v7, %v2944_v63 }
 0x35d   : > { %v3361_v32 = vpop.xlane.xlu1 %3360 }
 0x35e   : > { %v4747_v2 = vsel %vm3788_vm9, %v4746_v38, %v4742_v10  ;;  %5035 = vst [vmem:[#allocation2] sm:$0xff] %v5033_v58  ;;  %v4771_v8 = vrot.slane %v3361_v32, %v12083_v36 }
 0x35f   : > { %v4752_v56 = vsel %vm3795_vm10, %v4751_v20, %v4747_v2 }
 0x360   : > { %v3355_v17 = vpop.xlane.xlu0 %3354 }
 0x361   : > { %v4756_v0 = vrot.slane %v3355_v17, %v12010_v51 }
 0x363   : > { %v4757_v4 = vsel %vm3802_vm11, %v4756_v0, %v4752_v56 }
 0x364   : > { %v3365_v45 = vpop.xlane.xlu1 %3364  ;;  %v4762_v27 = vsel %vm3809_vm12, %v4761_v14, %v4757_v4 }
 0x365   : > { %v4780_v50 = vrot.slane %v3365_v45, %v12088_v1 }
 0x367   : > { %v3359_v54 = vpop.xlane.xlu0 %3358 }
 0x368   : > { %v4766_v40 = vrot.slane %v3359_v54, %v12086_v26 }
 0x36a   : > { %v4767_v61 = vsel %vm3816_vm13, %v4766_v40, %v4762_v27  ;;  %v3395_v52 = vpop.xlane.xlu1 %3394 }
 0x36b   : > { %v4772_v22 = vsel %vm3823_vm14, %v4771_v8, %v4767_v61  ;;  %v4855_v24 = vrot.slane %v3395_v52, %v12090_v37 }
 0x36c   : > { %v10313_v44 = vsel %vm12123_vm5, %v4772_v22, %v5026_v21  ;;  %vm12124_vm5 = vcmask 392512  }
 0x36d   : > { %v3363_v18 = vpop.xlane.xlu0 %3362  ;;  %vm12125_vm4 = vmmov %vm12124_vm5 }
 0x36e   : > { %v4776_v62 = vrot.slane %v3363_v18, %v12090_v37  ;;  %v3369_v48 = vpop.xlane.xlu1 %3368 }
 0x36f   : > { %v4790_v41 = vrot.slane %v3369_v48, %v12094_v13 }
 0x370   : > { %v4781_v39 = vsel %vm3725_vm0, %v4780_v50, %v4776_v62 }
 0x371   : > { %v3367_v43 = vpop.xlane.xlu0 %3366 }
 0x372   : > { %v4785_v25 = vrot.slane %v3367_v43, %v12057_v11 }
 0x374   : > { %v4786_v23 = vsel %vm3732_vm1, %v4785_v25, %v4781_v39 }
 0x375   : > { %v3427_v16 = vpop.xlane.xlu1 %3426  ;;  %v4791_v49 = vsel %vm3739_vm2, %v4790_v41, %v4786_v23 }
 0x378   : > { %v3397_v21 = vpop.xlane.xlu0 %3396 }
 0x379   : > { %v4859_v28 = vrot.slane %v3397_v21, %v12088_v1  ;;  %v3371_v3 = vpop.xlane.xlu1 %3370 }
 0x37a   : > { %v4795_v18 = vrot.slane %v3371_v3, %v12098_v57  ;;  %v4934_v3 = vrot.slane %v3427_v16, %v12090_v37 }
 0x37b   : > { %v4860_v53 = vsel %vm3725_vm0, %v4859_v28, %v4855_v24 }
 0x37c   : > { %v3399_v46 = vpop.xlane.xlu0 %3398  ;;  %v4796_v23 = vsel %vm3746_vm3, %v4795_v18, %v4791_v49 }
 0x37d   : > { %v4864_v60 = vrot.slane %v3399_v46, %v12057_v11 }
 0x37f   : > { %v3431_v31 = vpop.xlane.xlu1 %3430  ;;  %v4865_v15 = vsel %vm3732_vm1, %v4864_v60, %v4860_v53 }
 0x381   : > { %v3429_v33 = vpop.xlane.xlu0 %3428 }
 0x382   : > { %v4938_v25 = vrot.slane %v3429_v33, %v12088_v1 }
 0x384   : > { %v3403_v63 = vpop.xlane.xlu1 %3402 }
 0x385   : > { %v4874_v48 = vrot.slane %v3403_v63, %v12098_v57 }
 0x386   : > { %v3401_v35 = vpop.xlane.xlu0 %3400 }
 0x387   : > { %v4869_v61 = vrot.slane %v3401_v35, %v12094_v13  ;;  %v4943_v35 = vrot.slane %v3431_v31, %v12057_v11 }
 0x389   : > { %v3375_v9 = vpop.xlane.xlu1 %3374  ;;  %v4870_v50 = vsel %vm3739_vm2, %v4869_v61, %v4865_v15  ;;  %v4939_v15 = vsel %vm3725_vm0, %v4938_v25, %v4934_v3  ;;  %vm12128_vm0 = vmmov %vm12125_vm4 }
 0x38a   : > { %v4875_v41 = vsel %vm3746_vm3, %v4874_v48, %v4870_v50  ;;  %v4805_v1 = vrot.slane %v3375_v9, %v12101_v42 }
 0x38b   : > { %v3373_v30 = vpop.xlane.xlu0 %3372 }
 0x38c   : > { %v4800_v39 = vrot.slane %v3373_v30, %v12096_v55 }
 0x38e   : > { %v10327_v10 = vpop.xlane.xlu1 %3434  ;;  %v4801_v53 = vsel %vm12125_vm4, %v4800_v39, %v4796_v23  ;;  %vm12132_vm4 = vcmask 1047559  }
 0x390   : > { %v3433_v47 = vpop.xlane.xlu0 %3432 }
 0x391   : > { %v4948_v49 = vrot.slane %v3433_v47, %v12094_v13  ;;  %v4944_v13 = vsel %vm3732_vm1, %v4943_v35, %v4939_v15 }
 0x393   : > { %v3407_v59 = vpop.xlane.xlu1 %3406 }
 0x394   : > { %v4884_v46 = vrot.slane %v3407_v59, %v12101_v42 }
 0x395   : > { %v3405_v7 = vpop.xlane.xlu0 %3404 }
 0x396   : > { %v4879_v62 = vrot.slane %v3405_v7, %v12096_v55 }
 0x398   : > { %v3379_v38 = vpop.xlane.xlu1 %3378  ;;  %v4880_v21 = vsel %vm12124_vm5, %v4879_v62, %v4875_v41  ;;  %vm12127_vm5 = vmmov %vm12126_vm15 }
 0x399   : > { %v4885_v33 = vsel %vm12126_vm15, %v4884_v46, %v4880_v21  ;;  %v4806_v30 = vsel %vm12127_vm5, %v4805_v1, %v4801_v53  ;;  %v4815_v47 = vrot.slane %v3379_v38, %v12071_v12  ;;  %vm12129_vm1 = vmmov %vm12127_vm5 }
 0x39a   : > { %v3377_v58 = vpop.xlane.xlu0 %3376 }
 0x39b   : > { %v4810_v60 = vrot.slane %v3377_v58, %v12099_v34 }
 0x39d   : > { %v10329_v20 = vpop.xlane.xlu1 %3438  ;;  %v4811_v59 = vsel %vm3767_vm6, %v4810_v60, %v4806_v30 }
 0x39e   : > { %v4963_v23 = vrot.slane %v10329_v20, %v12101_v42 }
 0x39f   : > { %v10331_v2 = vpop.xlane.xlu0 %3436 }
 0x3a0   : > { %v4958_v31 = vrot.slane %v10331_v2, %v12096_v55 }
 0x3a2   : > { %v3411_v32 = vpop.xlane.xlu1 %3410 }
 0x3a3   : > { %v4894_v7 = vrot.slane %v3411_v32, %v12071_v12 }
 0x3a6   : > { %v3409_v56 = vpop.xlane.xlu0 %3408 }
 0x3a7   : > { %v3383_v17 = vpop.xlane.xlu1 %3382  ;;  %v4889_v24 = vrot.slane %v3409_v56, %v12099_v34  ;;  %v4949_v56 = vsel %vm3739_vm2, %v4948_v49, %v4944_v13  ;;  %vm12130_vm2 = vcmask 1045509  }
 0x3a8   : > { %v4825_v48 = vrot.slane %v3383_v17, %v12103_v5 }
 0x3a9   : > { %v4890_v37 = vsel %vm3767_vm6, %v4889_v24, %v4885_v33 }
 0x3aa   : > { %v3381_v0 = vpop.xlane.xlu0 %3380  ;;  %v4895_v11 = vsel %vm3774_vm7, %v4894_v7, %v4890_v37 }
 0x3ab   : > { %v4820_v9 = vrot.slane %v3381_v0, %v11971_v6  ;;  %v4953_v0 = vrot.slane %v10327_v10, %v12098_v57 }
 0x3ac   : > { %v10333_v14 = vpop.xlane.xlu1 %3442 }
 0x3ad   : > { %v4954_v55 = vsel %vm3746_vm3, %v4953_v0, %v4949_v56  ;;  %v4973_v60 = vrot.slane %v10333_v14, %v12071_v12  ;;  %vm12131_vm3 = vcmask 1046534   ;;  %v5472_v0 = vld [vmem:[%s10518_s2 + $0x24] ss:$8 sps:$4 sm:$0xff] (!%p5358_p11)  }
 0x3ae   : > { %v4959_v25 = vsel %vm12128_vm0, %v4958_v31, %v4954_v55  ;;  %v2945_v31 = vld [vmem:[#allocation2 + $0x8] sm:$0xff] }
 0x3af   : > { %v10335_v4 = vpop.xlane.xlu0 %3440  ;;  %v4964_v53 = vsel %vm12129_vm1, %v4963_v23, %v4959_v25  ;;  %v5480_v55 = vld [vmem:[%s10518_s2 + $0x40] ss:$8 sps:$4 sm:$0xff] (!%p5358_p11)   ;;  %v5484_v25 = vld [vmem:[%s10518_s2 + $0x64] ss:$8 sps:$4 sm:$0xff] (!%p5358_p11)  }
 0x3b0   : > { %v4968_v57 = vrot.slane %v10335_v4, %v12099_v34 }
 0x3b1   : > { %v3415_v45 = vpop.xlane.xlu1 %3414 }
 0x3b2   : > { %v4904_v38 = vrot.slane %v3415_v45, %v12103_v5 }
 0x3b4   : > { %v3413_v27 = vpop.xlane.xlu0 %3412 }
 0x3b5   : > { %v4899_v16 = vrot.slane %v3413_v27, %v11971_v6  ;;  %v4816_v27 = vsel %vm3774_vm7, %v4815_v47, %v4811_v59 }
 0x3b6   : > { %v10337_v54 = vpop.xlane.xlu1 %3386  ;;  %v4821_v50 = vsel %vm3781_vm8, %v4820_v9, %v4816_v27 }
 0x3b7   : > { %v4900_v61 = vsel %vm3781_vm8, %v4899_v16, %v4895_v11  ;;  %v4835_v21 = vrot.slane %v10337_v54, %v12010_v51 }
 0x3b8   : > { %v4905_v2 = vsel %vm3788_vm9, %v4904_v38, %v4900_v61  ;;  %v5475_v38 = vld [vmem:[%s10518_s2 + $0x34] ss:$8 sps:$4 sm:$0xff] (!%p5358_p11)  }
 0x3ba   : > { %v3385_v40 = vpop.xlane.xlu0 %3384 }
 0x3bb   : > { %v10339_v8 = vpop.xlane.xlu1 %3446  ;;  %v4830_v62 = vrot.slane %v3385_v40, %v12104_v19 }
 0x3bc   : > { %v4983_v14 = vrot.slane %v10339_v8, %v12103_v5 }
 0x3be   : > { %v10342_v22 = vpop.xlane.xlu0 %3444 }
 0x3bf   : > { %v4978_v46 = vrot.slane %v10342_v22, %v11971_v6 }
 0x3c0   : > { %v3419_v52 = vpop.xlane.xlu1 %3418 }
 0x3c1   : > { %v4914_v45 = vrot.slane %v3419_v52, %v12010_v51  ;;  %v4969_v52 = vsel %vm3767_vm6, %v4968_v57, %v4964_v53  ;;  %v12133_v53 = vld [vmem:[#allocation16_spill] sm:$0xff] (!%p5358_p11) }
 0x3c3   : > { %v3417_v43 = vpop.xlane.xlu0 %3416 }
 0x3c4   : > { %v4909_v32 = vrot.slane %v3417_v43, %v12104_v19  ;;  %v4826_v43 = vsel %vm3788_vm9, %v4825_v48, %v4821_v50  ;;  %v5474_v50 = vld [vmem:[%s10518_s2 + $0x20] ss:$8 sps:$4 sm:$0xff] (!%p5358_p11)   ;;  %v5478_v48 = vld [vmem:[%s10518_s2 + $0x44] ss:$8 sps:$4 sm:$0xff] (!%p5358_p11)  }
 0x3c5   : > { %v10354_v28 = vpop.xlane.xlu1 %3390  ;;  %v4831_v10 = vsel %vm3795_vm10, %v4830_v62, %v4826_v43  ;;  %v5477_v62 = vld [vmem:[%s10518_s2 + $0x30] ss:$8 sps:$4 sm:$0xff] (!%p5358_p11)   ;;  %v5486_v43 = vld [vmem:[%s10518_s2 + $0x60] ss:$8 sps:$4 sm:$0xff] (!%p5358_p11)  }
 0x3c6   : > { %v4910_v41 = vsel %vm3795_vm10, %v4909_v32, %v4905_v2  ;;  %v4836_v34 = vsel %vm3802_vm11, %v4835_v21, %v4831_v10  ;;  %v4845_v1 = vrot.slane %v10354_v28, %v12086_v26  ;;  %v5481_v2 = vld [vmem:[%s10518_s2 + $0x54] ss:$8 sps:$4 sm:$0xff] (!%p5358_p11)   ;;  %v5062_v21 = vld [vmem:[%s10518_s2 + $0x80] sm:$0x11] (!%p5358_p11) }
 0x3c7   : > { %v4915_v3 = vsel %vm3802_vm11, %v4914_v45, %v4910_v41  ;;  %v5041_v41 = vld [vmem:[#allocation2] sm:$0xff] (!%p5358_p11)  ;;  %v5487_v10 = vld [vmem:[%s10518_s2 + $0x74] ss:$8 sps:$4 sm:$0xff] (!%p5358_p11)  }
 0x3c8   : > { %v3389_v63 = vpop.xlane.xlu0 %3388  ;;  %v5043_v45 = vmul.f32 (!%p5358_p11), 0.00390625, %v5041_v41 }
 0x3c9   : > { %v4840_v17 = vrot.slane %v3389_v63, %v12106_v29  ;;  %v4974_v63 = vsel %vm3774_vm7, %v4973_v60, %v4969_v52 }
 0x3ca   : > { %v3451_v58 = vpop.xlane.xlu1 %3450  ;;  %v4979_v35 = vsel %vm3781_vm8, %v4978_v46, %v4974_v63 }
 0x3cb   : > { %v4841_v42 = vsel %vm3809_vm12, %v4840_v17, %v4836_v34  ;;  %v4984_v7 = vsel %vm3788_vm9, %v4983_v14, %v4979_v35 }
 0x3cc   : > { %v4846_v22 = vsel %vm3816_vm13, %v4845_v1, %v4841_v42 }
 0x3cd   : > { %v3449_v18 = vpop.xlane.xlu0 %3448 }
 0x3ce   : > { %v4988_v30 = vrot.slane %v3449_v18, %v12104_v19  ;;  %v4993_v19 = vrot.slane %v3451_v58, %v12010_v51  ;;  %v5466_v51 = vld [vmem:[%s10518_s2 + $0x4] ss:$8 sps:$4 sm:$0xff] (!%p5358_p11)   ;;  %v5469_v58 = vld [vmem:[%s10518_s2 + $0x14] ss:$8 sps:$4 sm:$0xff] (!%p5358_p11)   ;;  %v5471_v18 = vld [vmem:[%s10518_s2 + $0x10] ss:$8 sps:$4 sm:$0xff] (!%p5358_p11)  }
 0x3cf   : > { %v3423_v39 = vpop.xlane.xlu1 %3422  ;;  %5153 = vmatprep.subr.bf16.mxu0 (!%p5358_p11), %v5466_v51 }
 0x3d0   : > { %v4924_v20 = vrot.slane %v3423_v39, %v12086_v26  ;;  %v4989_v9 = vsel %vm3795_vm10, %v4988_v30, %v4984_v7  ;;  %v5483_v39 = vld [vmem:[%s10518_s2 + $0x50] ss:$8 sps:$4 sm:$0xff] (!%p5358_p11)   ;;  %v5219_v7 = vstv (!%p5358_p11), %s5218_s12 }
 0x3d1   : > { %v4994_v5 = vsel %vm3802_vm11, %v4993_v19, %v4989_v9 }
 0x3d2   : > { %v3421_v40 = vpop.xlane.xlu0 %3420 }
 0x3d3   : > { %v4919_v24 = vrot.slane %v3421_v40, %v12106_v29  ;;  %v5489_v40 = vld [vmem:[%s10518_s2 + $0x70] ss:$8 sps:$4 sm:$0xff] (!%p5358_p11)  }
 0x3d4   : > { %v3425_v54 = vpop.xlane.xlu1 %3424 }
 0x3d5   : > { %v4920_v4 = vsel %vm3809_vm12, %v4919_v24, %v4915_v3  ;;  %v4929_v6 = vrot.slane %v3425_v54, %v12083_v36  ;;  %v5063_v24 = vunpack.c.l.bf16 (!%p5358_p11), %v5062_v21  ;;  %v5064_v3 = vunpack.c.h.bf16 (!%p5358_p11), %v5062_v21 }
 0x3d6   : > { %v4925_v49 = vsel %vm3816_vm13, %v4924_v20, %v4920_v4  ;;  %v12134_v20 = vld [vmem:[#allocation17_spill] sm:$0xff] (!%p5358_p11) }
 0x3d7   : > { %v3393_v15 = vpop.xlane.xlu0 %3392  ;;  %v4930_v28 = vsel %vm3823_vm14, %v4929_v6, %v4925_v49  ;;  %v5068_v34 = vrot.slane (!%p5358_p11), %v5063_v24, %v12133_v53  ;;  %v5072_v4 = vrot.slane (!%p5358_p11), %v5064_v3, %v12133_v53  ;;  %v5203_v54 = vrot.slane (!%p5358_p11), %v5063_v24, %v12134_v20 }
 0x3d8   : > { %v4850_v33 = vrot.slane %v3393_v15, %v12083_v36  ;;  %v5207_v15 = vrot.slane (!%p5358_p11), %v5064_v3, %v12134_v20 }
 0x3d9   : > { %v3457_v47 = vpop.xlane.xlu1 %3456 }
 0x3da   : > { %v4851_v12 = vsel %vm3823_vm14, %v4850_v33, %v4846_v22  ;;  %v5008_v11 = vrot.slane %v3457_v47, %v12083_v36  ;;  %v5468_v36 = vld [vmem:[%s10518_s2] ss:$8 sps:$4 sm:$0xff] (!%p5358_p11)  }
 0x3db   : > { %v5028_v37 = vsel %vm12130_vm2, %v4851_v12, %v10313_v44  ;;  %5154 = vmatpush1.bf16.msra.mxu0 (!%p5358_p11), %v5468_v36 }
 0x3dc   : > { %v5029_v16 = vsel %vm12131_vm3, %v4930_v28, %v5028_v37  ;;  %v3453_v59 = vpop.xlane.xlu0 %3452  ;;  %5155 = vmatprep.subr.bf16.mxu0 (!%p5358_p11), %v5469_v58 }
 0x3dd   : > { %v4998_v13 = vrot.slane %v3453_v59, %v12106_v29 }
 0x3df   : > { %v4999_v44 = vsel %vm3809_vm12, %v4998_v13, %v4994_v5  ;;  %5156 = vmatpush1.bf16.msra.mxu0 (!%p5358_p11), %v5471_v18 }
 0x3e0   : > { %v3455_v56 = vpop.xlane.xlu0 %3454  ;;  %5157 = vmatprep.subr.bf16.mxu0 (!%p5358_p11), %v5472_v0 }
 0x3e1   : > { %v5003_v8 = vrot.slane %v3455_v56, %v12086_v26  ;;  %v5555_v26 = vmov (!%p5358_p11), 0  }
 0x3e2   : > { %5040 = sbr.rel (%p5358_p11) target bundleno = 1388 (0x56c), region = 92  ;;  %5185 = vmatprep.mubr.bf16.mxu0 (!%p5358_p11), %v5555_v26 }
 0x3e3   : > { %v5004_v27 = vsel %vm3816_vm13, %v5003_v8, %v4999_v44  ;;  %5158 = vmatpush1.bf16.msra.mxu0 (!%p5358_p11), %v5474_v50 }
 0x3e4   : > { %v5009_v61 = vsel %vm3823_vm14, %v5008_v11, %v5004_v27  ;;  %5159 = vmatprep.subr.bf16.mxu0 (!%p5358_p11), %v5475_v38 }
 0x3e5   : > { %v5030_v32 = vsel %vm12132_vm4, %v5009_v61, %v5029_v16 }
 0x3e6   : > { %v5034_v29 = vadd.f32 %v5030_v32, %v2945_v31 }
 0x3e7   : > { %5160 = vmatpush1.bf16.msra.mxu0 (!%p5358_p11), %v5477_v62 }
 0x3e8   : > { %5036 = vst [vmem:[#allocation2 + $0x8] sm:$0xff] %v5034_v29  ;;  %5161 = vmatprep.subr.bf16.mxu0 (!%p5358_p11), %v5478_v48 }
 0x3eb   : > { %5162 = vmatpush1.bf16.msra.mxu0 %v5480_v55 }
 0x3ec   : > { %5163 = vmatprep.subr.bf16.mxu0 %v5481_v2 }
 0x3ef   : > { %5164 = vmatpush1.bf16.msra.mxu0 %v5483_v39  ;;  %v5042_v57 = vld [vmem:[#allocation2 + $0x8] sm:$0xff] }
 0x3f0   : > { %5165 = vmatprep.subr.bf16.mxu0 %v5484_v25  ;;  %v5044_v17 = vmul.f32 0.00390625, %v5042_v57 }
 0x3f2   : > { %v5045_v23 = vpack.c.bf16 %v5044_v17, %v5043_v45 }
 0x3f3   : > { %5166 = vmatpush1.bf16.msra.mxu0 %v5486_v43 }
 0x3f4   : > { %5167 = vmatprep.subr.bf16.mxu0 %v5487_v10 }
 0x3f7   : > { %5168 = vmatpush1.bf16.msra.mxu0 %v5489_v40 }
 0x3fa   : > { %5186 = vmatmul.mubr.bf16.vlgmr.msra.gmra.mrb[0].mxu0 %v5045_v23 }
 0x4cd   : > { %v5187_v52 = vpop.f32.mrb[0].mxu0 }
 0x4ce   : > { %v5188_v46 = vadd.f32 %v5187_v52, %v5068_v34  ;;  %v5189_v42 = vpop.f32.mrb[1].mxu0 }
 0x4cf   : > { %v5190_v60 = vadd.f32 %v5189_v42, %v5072_v4  ;;  %v5191_v1 = vpop.f32.mrb[2].mxu0 }
 0x4d0   : > { %v5196_v49 = vmax.f32 %v5188_v46, 0.0  ;;  %v5192_v33 = vadd.f32 %v5191_v1, %v5068_v34  ;;  %v5193_v63 = vpop.f32.mrb[3].mxu0 }
 0x4d1   : > { %v5197_v6 = vmax.f32 %v5190_v60, 0.0  ;;  %v5194_v22 = vadd.f32 %v5193_v63, %v5072_v4 }
 0x4d2   : > { %v5198_v35 = vmax.f32 %v5192_v33, 0.0  ;;  %v5208_v30 = vmul.f32 %v5203_v54, %v5196_v49 }
 0x4d3   : > { %v5199_v12 = vmax.f32 %v5194_v22, 0.0  ;;  %v5209_v14 = vmul.f32 %v5207_v15, %v5197_v6 }
 0x4d4   : > { %v5210_v28 = vmul.f32 %v5203_v54, %v5198_v35 }
 0x4d5   : > { %v5211_v37 = vmul.f32 %v5207_v15, %v5199_v12  ;;  %v5212_v16 = vadd.f32 %v5209_v14, %v5208_v30 }
 0x4d7   : > { %5213 = vadd.xlane.f32.xlu0 %v5212_v16  ;;  %v5215_v59 = vadd.f32 %v5211_v37, %v5210_v28 }
 0x4db   : > { %5216 = vadd.xlane.f32.xlu0 %v5215_v59 }
 0x564   : > { %v5214_v9 = vpop.xlane.xlu0 %5213 }
 0x565   : > { %v5220_v13 = vadd.f32 %v5219_v7, %v5214_v9 }
 0x567   : > { %5222 = vst [vmem:[%s10520_s4] sm:$0xff] %v5220_v13 }
 0x568   : > { %v5217_v19 = vpop.xlane.xlu0 %5216 }
 0x569   : > { %v5221_v47 = vadd.f32 %v5219_v7, %v5217_v19 }
 0x56b   : > { %5223 = vst [vmem:[%s10520_s4 + $0x8] sm:$0xff] %v5221_v47 }
 0x56c PF: > { %s15_s21 = sadd.s32 1, %s5544_s21   ;;  %s12135_s17 = smov %s5532_s18 }
 0x56d   : > { %p12_p12 = scmp.ge.s32.totalorder %s15_s21, 4   ;;  %s12136_s18 = smov %s5619_s24 }
 0x56e   : > { %s12137_s19 = smov %s5540_s20  ;;  %s12138_s20 = smov %s12140_s3 }
 0x56f   :  { %14 = sbr.rel (!%p12_p12) target bundleno = 5 (0x5), region = 157 }

</bundles_post_ra>
